<compile_context>
chip_gen: v5e
topology: v5e:2x2
jax: 0.10.0
libtpu: 0.0.40
codegen_flags: <defaults>
</compile_context>

<pallas_src>
import math
import functools

import jax
import jax.numpy as jnp
from jax.experimental import pallas as pl
from jax.experimental.pallas import tpu as pltpu


# ----------------------------- tiling knobs -----------------------------

def _chip_config():
    """Pick tile sizes / VMEM budget from the detected TPU generation."""
    vmem_bytes = 64 * 1024 * 1024
    try:
        info = pltpu.get_tpu_info()
        vmem_bytes = int(getattr(info, "vmem_capacity_bytes", vmem_bytes))
    except Exception:
        pass  # unknown chip -> conservative (v7x-class) config is safe everywhere
    if vmem_bytes >= 100 * 1024 * 1024:
        # v5e / v6e class (128 MiB VMEM): big tiles, ~85% of HBM roofline.
        return dict(tm=512, tn=512, tk=1024, vmem_limit=64 * 1024 * 1024)
    # v7x class (64 MiB VMEM, 32 MiB default scoped limit): stay bounded.
    return dict(tm=256, tn=512, tk=512, vmem_limit=40 * 1024 * 1024)


_CFG = _chip_config()
TILE_M = _CFG["tm"]
TILE_N = _CFG["tn"]        # lane axis: multiples of 128
TILE_K = _CFG["tk"]
VMEM_LIMIT = _CFG["vmem_limit"]


def _tile(d, cap, align=8):
    """Largest multiple-of-`align` divisor of d that is <= cap.

    Falls back to d itself (the full axis extent, which is always a legal
    block per the (8,128) rule) when no aligned divisor exists."""
    if d % align == 0 and d <= cap:
        return d
    t = (min(cap, d) // align) * align
    while t >= align:
        if d % t == 0:
            return t
        t -= align
    return d


# ----------------------------- Pallas kernels -----------------------------

def _patch_embed_kernel(x_ref, w_ref, b_ref, pos_ref, o_ref):
    # x: (ts, patch_dim) bf16, w: (patch_dim, tn) bf16, b: (1, tn) f32,
    # pos: (ts, tn) f32   -> o: (ts, tn) f32
    y = jnp.dot(x_ref[...], w_ref[...], preferred_element_type=jnp.float32)
    o_ref[...] = (y + b_ref[...] + pos_ref[...]).astype(o_ref.dtype)


def patch_embed(x, w, b, pos):
    """Fused patch-embedding matmul + bias + position embedding add.

    x is (B, S, patch_dim) so the S-tile always lines up with the position
    embedding rows (works for any S, including S not a multiple of 8)."""
    B, S, K = x.shape
    N = w.shape[1]
    ts = _tile(S, TILE_M)
    tn = _tile(N, TILE_N, align=128)
    out = pl.pallas_call(
        _patch_embed_kernel,
        out_shape=jax.ShapeDtypeStruct((B, S, N), jnp.float32),
        grid=(B, S // ts, N // tn),
        in_specs=[
            pl.BlockSpec((None, ts, K), lambda b, i, j: (b, i, 0)),
            pl.BlockSpec((K, tn), lambda b, i, j: (0, j)),
            pl.BlockSpec((1, tn), lambda b, i, j: (0, j)),
            pl.BlockSpec((ts, tn), lambda b, i, j: (i, j)),
        ],
        out_specs=pl.BlockSpec((None, ts, tn), lambda b, i, j: (b, i, j)),
        compiler_params=pltpu.CompilerParams(
            dimension_semantics=("parallel", "parallel", "parallel"),
            vmem_limit_bytes=VMEM_LIMIT),
        cost_estimate=pl.CostEstimate(
            flops=2 * B * S * N * K, transcendentals=0,
            bytes_accessed=B * S * K * 2 + K * N * 2 + S * N * 4 + B * S * N * 4),
    )(x, w, b, pos)
    return out.reshape(B * S, N)


def _ln_matmul_kernel(x_ref, g_ref, bt_ref, w_ref, b_ref, o_ref, xn_ref, *,
                      eps, activation):
    # LayerNorm prologue computed ONCE per row tile (at j == 0) into a bf16
    # VMEM scratch, then reused by every output-column tile of the matmul.
    j = pl.program_id(1)

    @pl.when(j == 0)
    def _():
        x = x_ref[...]                                      # (tm, K) f32
        mean = jnp.mean(x, axis=-1, keepdims=True)
        xc = x - mean
        var = jnp.mean(xc * xc, axis=-1, keepdims=True)     # biased var (torch LN)
        xn = xc * jax.lax.rsqrt(var + eps) * g_ref[...] + bt_ref[...]
        xn_ref[...] = xn.astype(xn_ref.dtype)

    y = jnp.dot(xn_ref[...], w_ref[...],
                preferred_element_type=jnp.float32) + b_ref[...]
    if activation == "gelu":
        c = math.sqrt(2.0 / math.pi)                        # tanh-approx GELU
        y = 0.5 * y * (1.0 + jnp.tanh(c * (y + 0.044715 * y * y * y)))
    o_ref[...] = y.astype(o_ref.dtype)


def ln_matmul(x, gamma, beta, w, b, activation="none"):
    """Fused LayerNorm -> Linear(-> GELU).  x is the f32 residual stream."""
    M, K = x.shape
    N = w.shape[1]
    tm = _tile(M, TILE_M)
    tn = _tile(N, TILE_N, align=128)
    return pl.pallas_call(
        functools.partial(_ln_matmul_kernel, eps=1e-5, activation=activation),
        out_shape=jax.ShapeDtypeStruct((M, N), jnp.bfloat16),
        grid=(M // tm, N // tn),
        in_specs=[
            pl.BlockSpec((tm, K), lambda i, j: (i, 0)),
            pl.BlockSpec((1, K), lambda i, j: (0, 0)),
            pl.BlockSpec((1, K), lambda i, j: (0, 0)),
            pl.BlockSpec((K, tn), lambda i, j: (0, j)),
            pl.BlockSpec((1, tn), lambda i, j: (0, j)),
        ],
        out_specs=pl.BlockSpec((tm, tn), lambda i, j: (i, j)),
        scratch_shapes=[pltpu.VMEM((tm, K), jnp.bfloat16)],   # normalized rows
        compiler_params=pltpu.CompilerParams(
            # j must run sequentially per i so the scratch is reused correctly.
            dimension_semantics=("parallel", "arbitrary"),
            vmem_limit_bytes=VMEM_LIMIT),
        cost_estimate=pl.CostEstimate(
            flops=2 * M * N * K,
            transcendentals=(M * N) if activation == "gelu" else 0,
            bytes_accessed=M * K * 4 + K * N * 2 + M * N * 2),
    )(x, gamma, beta, w, b)


def _matmul_resid_kernel(x_ref, w_ref, b_ref, r_ref, o_ref, acc_ref):
    # K-tiled matmul with f32 accumulator; bias + residual add in epilogue.
    k = pl.program_id(2)

    @pl.when(k == 0)
    def _():
        acc_ref[...] = jnp.zeros_like(acc_ref)

    acc_ref[...] += jnp.dot(x_ref[...], w_ref[...],
                            preferred_element_type=jnp.float32)

    @pl.when(k == pl.num_programs(2) - 1)
    def _():
        o_ref[...] = (acc_ref[...] + b_ref[...] + r_ref[...]).astype(o_ref.dtype)


def matmul_resid(x, w, b, residual):
    """Fused Linear + bias + residual add (residual stream stays f32)."""
    M, K = x.shape
    N = w.shape[1]
    tm = _tile(M, TILE_M)
    tn = _tile(N, TILE_N, align=128)
    tk = _tile(K, TILE_K, align=128)
    return pl.pallas_call(
        _matmul_resid_kernel,
        out_shape=jax.ShapeDtypeStruct((M, N), jnp.float32),
        grid=(M // tm, N // tn, K // tk),
        in_specs=[
            pl.BlockSpec((tm, tk), lambda i, j, k: (i, k)),
            pl.BlockSpec((tk, tn), lambda i, j, k: (k, j)),
            pl.BlockSpec((1, tn), lambda i, j, k: (0, j)),
            pl.BlockSpec((tm, tn), lambda i, j, k: (i, j)),
        ],
        out_specs=pl.BlockSpec((tm, tn), lambda i, j, k: (i, j)),
        scratch_shapes=[pltpu.VMEM((tm, tn), jnp.float32)],
        compiler_params=pltpu.CompilerParams(
            dimension_semantics=("parallel", "parallel", "arbitrary"),
            vmem_limit_bytes=VMEM_LIMIT),
        cost_estimate=pl.CostEstimate(
            flops=2 * M * N * K, transcendentals=0,
            bytes_accessed=M * K * 2 + K * N * 2 + 2 * M * N * 4),
    )(x, w, b, residual)


def _attn_single_kv_kernel(q_ref, k_ref, v_ref, o_ref, *, scale, G, Dh):
    # Single KV block: plain single-pass softmax, no recurrence / scratch.
    q = q_ref[...]                                      # (tq, G*Dh) bf16
    k = k_ref[...]                                      # (S , G*Dh) bf16
    v = v_ref[...]
    parts = []
    for g in range(G):
        sl = slice(g * Dh, (g + 1) * Dh)
        s = jax.lax.dot_general(q[:, sl], k[:, sl], (((1,), (1,)), ((), ())),
                                preferred_element_type=jnp.float32) * scale
        s = s - jnp.max(s, axis=-1, keepdims=True)
        p = jnp.exp(s)
        l = jnp.sum(p, axis=-1, keepdims=True)
        o = jnp.dot(p.astype(v.dtype), v[:, sl],
                    preferred_element_type=jnp.float32)
        parts.append(o * pl.reciprocal(l, approx=True))
    out = parts[0] if G == 1 else jnp.concatenate(parts, axis=-1)
    o_ref[...] = out.astype(o_ref.dtype)


def _attn_flash_kernel(q_ref, k_ref, v_ref, o_ref, m_sc, l_sc, acc_sc, *,
                       scale, G, Dh):
    # Flash-style online softmax over the KV grid axis (axis 3); G heads per
    # grid step so the lane block G*Dh is 128-aligned even for Dh=64/96.
    kv = pl.program_id(3)

    @pl.when(kv == 0)
    def _():
        m_sc[...] = jnp.full_like(m_sc, -jnp.inf)
        l_sc[...] = jnp.zeros_like(l_sc)
        acc_sc[...] = jnp.zeros_like(acc_sc)

    q = q_ref[...]                                      # (tq , G*Dh) bf16
    k = k_ref[...]                                      # (tkv, G*Dh) bf16
    v = v_ref[...]
    for g in range(G):
        sl = slice(g * Dh, (g + 1) * Dh)
        s = jax.lax.dot_general(q[:, sl], k[:, sl], (((1,), (1,)), ((), ())),
                                preferred_element_type=jnp.float32) * scale
        m_prev = m_sc[g]                                # (tq, 1)
        m_new = jnp.maximum(m_prev, jnp.max(s, axis=-1, keepdims=True))
        alpha = jnp.exp(m_prev - m_new)
        # TODO(synk): on v6e/v7x the exp could run in bf16 (bf16 EUP) for ~2x
        # throughput; kept in f32 so the identical kernel stays exact on v5e.
        p = jnp.exp(s - m_new)
        l_sc[g] = alpha * l_sc[g] + jnp.sum(p, axis=-1, keepdims=True)
        acc_sc[g] = alpha * acc_sc[g] + jnp.dot(
            p.astype(v.dtype), v[:, sl], preferred_element_type=jnp.float32)
        m_sc[g] = m_new

    @pl.when(kv == pl.num_programs(3) - 1)
    def _():
        parts = [acc_sc[g] * pl.reciprocal(l_sc[g], approx=True)
                 for g in range(G)]
        out = parts[0] if G == 1 else jnp.concatenate(parts, axis=-1)
        o_ref[...] = out.astype(o_ref.dtype)


def attention_fused(qkv, heads):
    """Multi-head self attention straight from the fused (B, S, 3*dim) QKV.

    Head slices are taken out of the fused tensor via BlockSpec lane blocks of
    width G*Dh (G = smallest divisor of H making G*Dh 128-aligned), so there
    are no head split/merge transposes through HBM for any standard ViT config
    (Dh = 64, 96, 128, ...)."""
    B, S, three_d = qkv.shape
    dim = three_d // 3
    H = heads
    Dh = dim // H
    scale = 1.0 / math.sqrt(Dh)

    G = None
    for g in range(1, H + 1):
        if H % g == 0 and (g * Dh) % 128 == 0:
            G = g
            break
    if G is None:
        # TODO(synk): dim not a multiple of 128 — no lane-aligned head grouping
        # exists; fall back to plain-JAX attention for this rare configuration.
        q, k, v = jnp.split(qkv.astype(jnp.float32), 3, axis=-1)
        q = q.reshape(B, S, H, Dh)
        k = k.reshape(B, S, H, Dh)
        v = v.reshape(B, S, H, Dh)
        s = jnp.einsum("bqhd,bkhd->bhqk", q, k) * scale
        p = jax.nn.softmax(s, axis=-1)
        o = jnp.einsum("bhqk,bkhd->bqhd", p, v)
        return o.reshape(B * S, dim).astype(jnp.bfloat16)

    W = G * Dh
    HG = H // G
    tq = _tile(S, 256)          # tiled query axis (review: shrink temporaries)
    tkv = _tile(S, 512)
    nq = S // tq
    nkv = S // tkv

    flops = 4 * B * H * S * S * Dh
    transc = B * H * S * S
    bytes_acc = 3 * B * S * dim * 2 + B * S * dim * 2

    if nkv == 1:
        # Single KV block -> skip the online-softmax recurrence entirely.
        kernel = functools.partial(_attn_single_kv_kernel,
                                   scale=scale, G=G, Dh=Dh)
        out = pl.pallas_call(
            kernel,
            out_shape=jax.ShapeDtypeStruct((B, S, dim), jnp.bfloat16),
            grid=(B, HG, nq),
            in_specs=[
                pl.BlockSpec((None, tq, W), lambda b, hg, qi: (b, qi, hg)),
                pl.BlockSpec((None, S, W), lambda b, hg, qi: (b, 0, HG + hg)),
                pl.BlockSpec((None, S, W), lambda b, hg, qi: (b, 0, 2 * HG + hg)),
            ],
            out_specs=pl.BlockSpec((None, tq, W), lambda b, hg, qi: (b, qi, hg)),
            compiler_params=pltpu.CompilerParams(
                dimension_semantics=("parallel", "parallel", "parallel"),
                vmem_limit_bytes=VMEM_LIMIT),
            cost_estimate=pl.CostEstimate(flops=flops, transcendentals=transc,
                                          bytes_accessed=bytes_acc),
        )(qkv, qkv, qkv)
        return out.reshape(B * S, dim)

    kernel = functools.partial(_attn_flash_kernel, scale=scale, G=G, Dh=Dh)
    out = pl.pallas_call(
        kernel,
        out_shape=jax.ShapeDtypeStruct((B, S, dim), jnp.bfloat16),
        grid=(B, HG, nq, nkv),
        in_specs=[
            pl.BlockSpec((None, tq, W), lambda b, hg, qi, kv: (b, qi, hg)),
            pl.BlockSpec((None, tkv, W), lambda b, hg, qi, kv: (b, kv, HG + hg)),
            pl.BlockSpec((None, tkv, W), lambda b, hg, qi, kv: (b, kv, 2 * HG + hg)),
        ],
        out_specs=pl.BlockSpec((None, tq, W), lambda b, hg, qi, kv: (b, qi, hg)),
        scratch_shapes=[pltpu.VMEM((G, tq, 1), jnp.float32),
                        pltpu.VMEM((G, tq, 1), jnp.float32),
                        pltpu.VMEM((G, tq, Dh), jnp.float32)],
        compiler_params=pltpu.CompilerParams(
            dimension_semantics=("parallel", "parallel", "parallel", "arbitrary"),
            vmem_limit_bytes=VMEM_LIMIT),
        cost_estimate=pl.CostEstimate(flops=flops, transcendentals=transc,
                                      bytes_accessed=bytes_acc),
    )(qkv, qkv, qkv)
    return out.reshape(B * S, dim)


def _ln_mean_kernel(x_ref, g_ref, b_ref, o_ref, acc_ref, *, eps, cnt):
    # Final LayerNorm fused with the mean over the `cnt` axis (grid reduction).
    c = pl.program_id(1)

    @pl.when(c == 0)
    def _():
        acc_ref[...] = jnp.zeros_like(acc_ref)

    x = x_ref[...]                                      # (S, D) f32
    mean = jnp.mean(x, axis=-1, keepdims=True)
    xc = x - mean
    var = jnp.mean(xc * xc, axis=-1, keepdims=True)
    acc_ref[...] += xc * jax.lax.rsqrt(var + eps) * g_ref[...] + b_ref[...]

    @pl.when(c == cnt - 1)
    def _():
        o_ref[...] = (acc_ref[...] * (1.0 / cnt)).astype(o_ref.dtype)


def ln_mean(x, gamma, beta, bs, cnt, S, D):
    x4 = x.reshape(bs, cnt, S, D)
    return pl.pallas_call(
        functools.partial(_ln_mean_kernel, eps=1e-5, cnt=cnt),
        out_shape=jax.ShapeDtypeStruct((bs, S, D), jnp.float32),
        grid=(bs, cnt),
        in_specs=[
            pl.BlockSpec((None, None, S, D), lambda b, c: (b, c, 0, 0)),
            pl.BlockSpec((1, D), lambda b, c: (0, 0)),
            pl.BlockSpec((1, D), lambda b, c: (0, 0)),
        ],
        out_specs=pl.BlockSpec((None, S, D), lambda b, c: (b, 0, 0)),
        scratch_shapes=[pltpu.VMEM((S, D), jnp.float32)],
        compiler_params=pltpu.CompilerParams(
            dimension_semantics=("parallel", "arbitrary"),
            vmem_limit_bytes=VMEM_LIMIT),
        cost_estimate=pl.CostEstimate(
            flops=8 * bs * cnt * S * D, transcendentals=bs * cnt * S,
            bytes_accessed=bs * cnt * S * D * 4 + bs * S * D * 4),
    )(x4, gamma, beta)


# ----------------------------- model glue -----------------------------

def init_params(key, *, image_size, patch_size, dim, depth, heads):
    num_patches = (image_size // patch_size) ** 2
    patch_dim = 3 * patch_size ** 2
    mlp_dim = 4 * dim
    keys = jax.random.split(key, 2 + depth)

    def dense(k, din, dout):
        w = (jax.random.normal(k, (din, dout), jnp.float32)
             * (1.0 / math.sqrt(din))).astype(jnp.bfloat16)
        b = jnp.zeros((1, dout), jnp.float32)
        return w, b

    wpatch, bpatch = dense(keys[0], patch_dim, dim)
    params = {
        "wpatch": wpatch, "bpatch": bpatch,
        "pos": jax.random.normal(keys[1], (num_patches, dim), jnp.float32),
        "norm_g": jnp.ones((1, dim), jnp.float32),
        "norm_b": jnp.zeros((1, dim), jnp.float32),
        "blocks": [],
    }
    for i in range(depth):
        bk = jax.random.split(keys[2 + i], 4)
        wqkv, bqkv = dense(bk[0], dim, 3 * dim)      # fused Q/K/V projection
        wo, bo = dense(bk[1], dim, dim)
        w1, b1 = dense(bk[2], dim, mlp_dim)
        w2, b2 = dense(bk[3], mlp_dim, dim)
        params["blocks"].append({
            "ln1_g": jnp.ones((1, dim), jnp.float32),
            "ln1_b": jnp.zeros((1, dim), jnp.float32),
            "wqkv": wqkv, "bqkv": bqkv, "wo": wo, "bo": bo,
            "ln2_g": jnp.ones((1, dim), jnp.float32),
            "ln2_b": jnp.zeros((1, dim), jnp.float32),
            "w1": w1, "b1": b1, "w2": w2, "b2": b2,
        })
    return params


def transformer_block(x, blk, B, S, heads):
    # x: (B*S, dim) f32 residual stream
    dim = x.shape[1]
    # fused LN1 -> QKV projection
    qkv = ln_matmul(x, blk["ln1_g"], blk["ln1_b"], blk["wqkv"], blk["bqkv"])
    # multi-head attention (head-group slicing via BlockSpec, flash softmax)
    a = attention_fused(qkv.reshape(B, S, 3 * dim), heads)       # (B*S, dim) bf16
    # output projection + residual add
    x = matmul_resid(a, blk["wo"], blk["bo"], x)
    # fused LN2 -> MLP up -> GELU
    h = ln_matmul(x, blk["ln2_g"], blk["ln2_b"], blk["w1"], blk["b1"],
                  activation="gelu")
    # MLP down + residual add
    x = matmul_resid(h, blk["w2"], blk["b2"], x)
    return x


def vit_encoder_forward(params, img, *, patch_size, heads):
    bs, cnt, c, h, w = img.shape
    p = patch_size
    gh, gw = h // p, w // p
    S = gh * gw
    dim = params["wpatch"].shape[1]
    B = bs * cnt

    # rearrange 'b c (h p1) (w p2) -> b (h w) (p1 p2 c)'  (plain-JAX glue)
    x = img.reshape(B, c, gh, p, gw, p)
    x = jnp.transpose(x, (0, 2, 4, 3, 5, 1))
    x = x.reshape(B, S, p * p * c).astype(jnp.bfloat16)

    # fused patch embedding + position embedding  -> (B*S, dim) f32
    x = patch_embed(x, params["wpatch"], params["bpatch"], params["pos"])

    # transformer stack
    for blk in params["blocks"]:
        x = transformer_block(x, blk, B, S, heads)

    # fused final LayerNorm + mean over cnt
    return ln_mean(x, params["norm_g"], params["norm_b"], bs, cnt, S, dim)


# ----------------------------- main -----------------------------

if __name__ == "__main__":
    # small shapes consistent with the module (scaled down from 512/16/768/12/8);
    # dim=256, heads=2 keeps the head dim lane-aligned (Dh=128, G=1).
    image_size, patch_size, dim, depth, heads = 32, 8, 256, 2, 2
    bs, cnt = 2, 2

    key = jax.random.PRNGKey(0)
    k_img, k_par = jax.random.split(key)
    img = jax.random.normal(k_img, (bs, cnt, 3, image_size, image_size), jnp.float32)

    params = init_params(k_par, image_size=image_size, patch_size=patch_size,
                         dim=dim, depth=depth, heads=heads)

    fwd = jax.jit(functools.partial(vit_encoder_forward,
                                    patch_size=patch_size, heads=heads))
    out = jax.block_until_ready(fwd(params, img))

    num_patches = (image_size // patch_size) ** 2
    assert out.shape == (bs, num_patches, dim), out.shape
    assert jnp.isfinite(out).all()
    print("KERNEL_OK")
</pallas_src>

<mosaic_0001>
module attributes {stable_mosaic.version = 11 : i64} {
  func.func @_ln_matmul_kernel(%arg0: i32, %arg1: i32, %arg2: memref<64x256xf32, #tpu.memory_space<vmem>>, %arg3: memref<1x256xf32, #tpu.memory_space<vmem>>, %arg4: memref<1x256xf32, #tpu.memory_space<vmem>>, %arg5: memref<256x384xbf16, #tpu.memory_space<vmem>>, %arg6: memref<1x384xf32, #tpu.memory_space<vmem>>, %arg7: memref<64x384xbf16, #tpu.memory_space<vmem>>, %arg8: memref<64x256xbf16, #tpu.memory_space<vmem>>) attributes {dimension_semantics = [#tpu.dimension_semantics<parallel>, #tpu.dimension_semantics<arbitrary>], iteration_bounds = array<i64: 1, 2>, scalar_prefetch = 0 : i64, scratch_operands = 1 : i64, tpu.core_type = #tpu.core_type<tc>, window_params = [{transform_indices = @transform_0, window_bounds = array<i64: 64, 256>}, {pipeline_mode = #tpu.pipeline_mode<synchronous>, transform_indices = @transform_1, window_bounds = array<i64: 1, 256>}, {pipeline_mode = #tpu.pipeline_mode<synchronous>, transform_indices = @transform_2, window_bounds = array<i64: 1, 256>}, {transform_indices = @transform_3, window_bounds = array<i64: 256, 384>}, {transform_indices = @transform_4, window_bounds = array<i64: 1, 384>}, {transform_indices = @transform_5, window_bounds = array<i64: 64, 384>}]} {
    %c0_i32 = arith.constant 0 : i32
    %0 = arith.cmpi eq, %arg1, %c0_i32 : i32
    %1 = arith.extui %0 : i1 to i32
    %c0_i32_0 = arith.constant 0 : i32
    %2 = arith.cmpi ne, %1, %c0_i32_0 : i32
    scf.if %2 {
      %c0_8 = arith.constant 0 : index
      %c0_9 = arith.constant 0 : index
      %11 = vector.load %arg2[%c0_8, %c0_9] : memref<64x256xf32, #tpu.memory_space<vmem>>, vector<64x256xf32>
      %cst_10 = arith.constant dense<0.000000e+00> : vector<64xf32>
      %12 = vector.multi_reduction <add>, %11, %cst_10 [1] : vector<64x256xf32> to vector<64xf32>
      %13 = vector.shape_cast %12 : vector<64xf32> to vector<64x1xf32>
      %cst_11 = arith.constant 2.560000e+02 : f32
      %14 = vector.broadcast %cst_11 : f32 to vector<64x1xf32>
      %15 = arith.divf %13, %14 : vector<64x1xf32>
      %16 = vector.broadcast %15 : vector<64x1xf32> to vector<64x256xf32>
      %17 = arith.subf %11, %16 : vector<64x256xf32>
      %18 = arith.mulf %17, %17 : vector<64x256xf32>
      %cst_12 = arith.constant dense<0.000000e+00> : vector<64xf32>
      %19 = vector.multi_reduction <add>, %18, %cst_12 [1] : vector<64x256xf32> to vector<64xf32>
      %20 = vector.shape_cast %19 : vector<64xf32> to vector<64x1xf32>
      %cst_13 = arith.constant 2.560000e+02 : f32
      %21 = vector.broadcast %cst_13 : f32 to vector<64x1xf32>
      %22 = arith.divf %20, %21 : vector<64x1xf32>
      %cst_14 = arith.constant 9.99999974E-6 : f32
      %23 = vector.broadcast %cst_14 : f32 to vector<64x1xf32>
      %24 = arith.addf %22, %23 : vector<64x1xf32>
      %25 = math.rsqrt %24 : vector<64x1xf32>
      %26 = vector.broadcast %25 : vector<64x1xf32> to vector<64x256xf32>
      %27 = arith.mulf %17, %26 : vector<64x256xf32>
      %c0_15 = arith.constant 0 : index
      %c0_16 = arith.constant 0 : index
      %28 = vector.load %arg3[%c0_15, %c0_16] : memref<1x256xf32, #tpu.memory_space<vmem>>, vector<1x256xf32>
      %29 = vector.broadcast %28 : vector<1x256xf32> to vector<64x256xf32>
      %30 = arith.mulf %27, %29 : vector<64x256xf32>
      %c0_17 = arith.constant 0 : index
      %c0_18 = arith.constant 0 : index
      %31 = vector.load %arg4[%c0_17, %c0_18] : memref<1x256xf32, #tpu.memory_space<vmem>>, vector<1x256xf32>
      %32 = vector.broadcast %31 : vector<1x256xf32> to vector<64x256xf32>
      %33 = arith.addf %30, %32 : vector<64x256xf32>
      %34 = arith.truncf %33 : vector<64x256xf32> to vector<64x256xbf16>
      %c0_19 = arith.constant 0 : index
      %c0_20 = arith.constant 0 : index
      %35 = vector.load %arg8[%c0_19, %c0_20] : memref<64x256xbf16, #tpu.memory_space<vmem>>, vector<64x256xbf16>
      tpu.vector_store %arg8[%c0_19, %c0_20], %34 {strides = array<i32>} : memref<64x256xbf16, #tpu.memory_space<vmem>>, vector<64x256xbf16>,
    } else {
    }
    %c0 = arith.constant 0 : index
    %c0_1 = arith.constant 0 : index
    %3 = vector.load %arg8[%c0, %c0_1] : memref<64x256xbf16, #tpu.memory_space<vmem>>, vector<64x256xbf16>
    %c0_2 = arith.constant 0 : index
    %c0_3 = arith.constant 0 : index
    %4 = vector.load %arg5[%c0_2, %c0_3] : memref<256x384xbf16, #tpu.memory_space<vmem>>, vector<256x384xbf16>
    %cst = arith.constant dense<0.000000e+00> : vector<64x384xf32>
    %5 = tpu.matmul %3, %4, %cst {dimension_numbers = #tpu.dot_dimension_numbers<[1], [0], [0], [1], [0, 0, 1, 1], [], []>} : vector<64x256xbf16>, vector<256x384xbf16>, vector<64x384xf32> -> vector<64x384xf32>
    %c0_4 = arith.constant 0 : index
    %c0_5 = arith.constant 0 : index
    %6 = vector.load %arg6[%c0_4, %c0_5] : memref<1x384xf32, #tpu.memory_space<vmem>>, vector<1x384xf32>
    %7 = vector.broadcast %6 : vector<1x384xf32> to vector<64x384xf32>
    %8 = arith.addf %5, %7 : vector<64x384xf32>
    %9 = arith.truncf %8 : vector<64x384xf32> to vector<64x384xbf16>
    %c0_6 = arith.constant 0 : index
    %c0_7 = arith.constant 0 : index
    %10 = vector.load %arg7[%c0_6, %c0_7] : memref<64x384xbf16, #tpu.memory_space<vmem>>, vector<64x384xbf16>
    tpu.vector_store %arg7[%c0_6, %c0_7], %9 {strides = array<i32>} : memref<64x384xbf16, #tpu.memory_space<vmem>>, vector<64x384xbf16>,
    return
  }
  func.func @transform_0(%arg0: i32, %arg1: i32) -> (i32, i32) {
    %c0_i32 = arith.constant 0 : i32
    %c0_i32_0 = arith.constant 0 : i32
    return %arg0, %c0_i32 : i32, i32
  }
  func.func @transform_1(%arg0: i32, %arg1: i32) -> (i32, i32) {
    %c0_i32 = arith.constant 0 : i32
    %c0_i32_0 = arith.constant 0 : i32
    %c0_i32_1 = arith.constant 0 : i32
    return %c0_i32, %c0_i32_0 : i32, i32
  }
  func.func @transform_2(%arg0: i32, %arg1: i32) -> (i32, i32) {
    %c0_i32 = arith.constant 0 : i32
    %c0_i32_0 = arith.constant 0 : i32
    %c0_i32_1 = arith.constant 0 : i32
    return %c0_i32, %c0_i32_0 : i32, i32
  }
  func.func @transform_3(%arg0: i32, %arg1: i32) -> (i32, i32) {
    %c0_i32 = arith.constant 0 : i32
    %c0_i32_0 = arith.constant 0 : i32
    return %c0_i32, %arg1 : i32, i32
  }
  func.func @transform_4(%arg0: i32, %arg1: i32) -> (i32, i32) {
    %c0_i32 = arith.constant 0 : i32
    %c0_i32_0 = arith.constant 0 : i32
    return %c0_i32, %arg1 : i32, i32
  }
  func.func @transform_5(%arg0: i32, %arg1: i32) -> (i32, i32) {
    %c0_i32 = arith.constant 0 : i32
    return %arg0, %arg1 : i32, i32
  }
}

module attributes {stable_mosaic.version = 11 : i64} {
  func.func @_patch_embed_kernel(%arg0: i32, %arg1: i32, %arg2: i32, %arg3: memref<1x16x192xbf16, #tpu.memory_space<vmem>>, %arg4: memref<192x256xbf16, #tpu.memory_space<vmem>>, %arg5: memref<1x256xf32, #tpu.memory_space<vmem>>, %arg6: memref<16x256xf32, #tpu.memory_space<vmem>>, %arg7: memref<1x16x256xf32, #tpu.memory_space<vmem>>) attributes {dimension_semantics = [#tpu.dimension_semantics<parallel>, #tpu.dimension_semantics<parallel>, #tpu.dimension_semantics<parallel>], iteration_bounds = array<i64: 4, 1, 1>, scalar_prefetch = 0 : i64, scratch_operands = 0 : i64, tpu.core_type = #tpu.core_type<tc>, window_params = [{transform_indices = @transform_0, window_bounds = array<i64: 1, 16, 192>}, {transform_indices = @transform_1, window_bounds = array<i64: 192, 256>}, {transform_indices = @transform_2, window_bounds = array<i64: 1, 256>}, {transform_indices = @transform_3, window_bounds = array<i64: 16, 256>}, {transform_indices = @transform_4, window_bounds = array<i64: 1, 16, 256>}]} {
    %c0 = arith.constant 0 : index
    %c0_0 = arith.constant 0 : index
    %c0_1 = arith.constant 0 : index
    %0 = vector.load %arg3[%c0, %c0_0, %c0_1] : memref<1x16x192xbf16, #tpu.memory_space<vmem>>, vector<1x16x192xbf16>
    %1 = vector.shape_cast %0 : vector<1x16x192xbf16> to vector<16x192xbf16>
    %c0_2 = arith.constant 0 : index
    %c0_3 = arith.constant 0 : index
    %2 = vector.load %arg4[%c0_2, %c0_3] : memref<192x256xbf16, #tpu.memory_space<vmem>>, vector<192x256xbf16>
    %cst = arith.constant dense<0.000000e+00> : vector<16x256xf32>
    %3 = tpu.matmul %1, %2, %cst {dimension_numbers = #tpu.dot_dimension_numbers<[1], [0], [0], [1], [0, 0, 1, 1], [], []>} : vector<16x192xbf16>, vector<192x256xbf16>, vector<16x256xf32> -> vector<16x256xf32>
    %c0_4 = arith.constant 0 : index
    %c0_5 = arith.constant 0 : index
    %4 = vector.load %arg5[%c0_4, %c0_5] : memref<1x256xf32, #tpu.memory_space<vmem>>, vector<1x256xf32>
    %5 = vector.broadcast %4 : vector<1x256xf32> to vector<16x256xf32>
    %6 = arith.addf %3, %5 : vector<16x256xf32>
    %c0_6 = arith.constant 0 : index
    %c0_7 = arith.constant 0 : index
    %7 = vector.load %arg6[%c0_6, %c0_7] : memref<16x256xf32, #tpu.memory_space<vmem>>, vector<16x256xf32>
    %8 = arith.addf %6, %7 : vector<16x256xf32>
    %c0_8 = arith.constant 0 : index
    %c0_9 = arith.constant 0 : index
    %c0_10 = arith.constant 0 : index
    %9 = vector.load %arg7[%c0_8, %c0_9, %c0_10] : memref<1x16x256xf32, #tpu.memory_space<vmem>>, vector<1x16x256xf32>
    %10 = vector.shape_cast %9 : vector<1x16x256xf32> to vector<16x256xf32>
    %11 = vector.shape_cast %8 : vector<16x256xf32> to vector<1x16x256xf32>
    tpu.vector_store %arg7[%c0_8, %c0_9, %c0_10], %11 {strides = array<i32>} : memref<1x16x256xf32, #tpu.memory_space<vmem>>, vector<1x16x256xf32>,
    return
  }
  func.func @transform_0(%arg0: i32, %arg1: i32, %arg2: i32) -> (i32, i32, i32) {
    %c0_i32 = arith.constant 0 : i32
    %c0_i32_0 = arith.constant 0 : i32
    return %arg0, %arg1, %c0_i32 : i32, i32, i32
  }
  func.func @transform_1(%arg0: i32, %arg1: i32, %arg2: i32) -> (i32, i32) {
    %c0_i32 = arith.constant 0 : i32
    %c0_i32_0 = arith.constant 0 : i32
    return %c0_i32, %arg2 : i32, i32
  }
  func.func @transform_2(%arg0: i32, %arg1: i32, %arg2: i32) -> (i32, i32) {
    %c0_i32 = arith.constant 0 : i32
    %c0_i32_0 = arith.constant 0 : i32
    return %c0_i32, %arg2 : i32, i32
  }
  func.func @transform_3(%arg0: i32, %arg1: i32, %arg2: i32) -> (i32, i32) {
    %c0_i32 = arith.constant 0 : i32
    return %arg1, %arg2 : i32, i32
  }
  func.func @transform_4(%arg0: i32, %arg1: i32, %arg2: i32) -> (i32, i32, i32) {
    %c0_i32 = arith.constant 0 : i32
    return %arg0, %arg1, %arg2 : i32, i32, i32
  }
}

module attributes {stable_mosaic.version = 11 : i64} {
  func.func @_matmul_resid_kernel(%arg0: i32, %arg1: i32, %arg2: i32, %arg3: memref<64x256xbf16, #tpu.memory_space<vmem>>, %arg4: memref<256x256xbf16, #tpu.memory_space<vmem>>, %arg5: memref<1x256xf32, #tpu.memory_space<vmem>>, %arg6: memref<64x256xf32, #tpu.memory_space<vmem>>, %arg7: memref<64x256xf32, #tpu.memory_space<vmem>>, %arg8: memref<64x256xf32, #tpu.memory_space<vmem>>) attributes {dimension_semantics = [#tpu.dimension_semantics<parallel>, #tpu.dimension_semantics<parallel>, #tpu.dimension_semantics<arbitrary>], iteration_bounds = array<i64: 1, 1, 1>, scalar_prefetch = 0 : i64, scratch_operands = 1 : i64, tpu.core_type = #tpu.core_type<tc>, window_params = [{transform_indices = @transform_0, window_bounds = array<i64: 64, 256>}, {transform_indices = @transform_1, window_bounds = array<i64: 256, 256>}, {transform_indices = @transform_2, window_bounds = array<i64: 1, 256>}, {transform_indices = @transform_3, window_bounds = array<i64: 64, 256>}, {transform_indices = @transform_4, window_bounds = array<i64: 64, 256>}]} {
    %c0_i32 = arith.constant 0 : i32
    %0 = arith.cmpi eq, %arg2, %c0_i32 : i32
    %1 = arith.extui %0 : i1 to i32
    %c0_i32_0 = arith.constant 0 : i32
    %2 = arith.cmpi ne, %1, %c0_i32_0 : i32
    scf.if %2 {
      %cst_10 = arith.constant 0.000000e+00 : f32
      %12 = vector.broadcast %cst_10 : f32 to vector<64x256xf32>
      %c0_11 = arith.constant 0 : index
      %c0_12 = arith.constant 0 : index
      %13 = vector.load %arg8[%c0_11, %c0_12] : memref<64x256xf32, #tpu.memory_space<vmem>>, vector<64x256xf32>
      tpu.vector_store %arg8[%c0_11, %c0_12], %12 {strides = array<i32>} : memref<64x256xf32, #tpu.memory_space<vmem>>, vector<64x256xf32>,
    } else {
    }
    %c0 = arith.constant 0 : index
    %c0_1 = arith.constant 0 : index
    %3 = vector.load %arg8[%c0, %c0_1] : memref<64x256xf32, #tpu.memory_space<vmem>>, vector<64x256xf32>
    %c0_2 = arith.constant 0 : index
    %c0_3 = arith.constant 0 : index
    %4 = vector.load %arg3[%c0_2, %c0_3] : memref<64x256xbf16, #tpu.memory_space<vmem>>, vector<64x256xbf16>
    %c0_4 = arith.constant 0 : index
    %c0_5 = arith.constant 0 : index
    %5 = vector.load %arg4[%c0_4, %c0_5] : memref<256x256xbf16, #tpu.memory_space<vmem>>, vector<256x256xbf16>
    %cst = arith.constant dense<0.000000e+00> : vector<64x256xf32>
    %6 = tpu.matmul %4, %5, %cst {dimension_numbers = #tpu.dot_dimension_numbers<[1], [0], [0], [1], [0, 0, 1, 1], [], []>} : vector<64x256xbf16>, vector<256x256xbf16>, vector<64x256xf32> -> vector<64x256xf32>
    %7 = arith.addf %3, %6 : vector<64x256xf32>
    %c0_6 = arith.constant 0 : index
    %c0_7 = arith.constant 0 : index
    %8 = vector.load %arg8[%c0_6, %c0_7] : memref<64x256xf32, #tpu.memory_space<vmem>>, vector<64x256xf32>
    tpu.vector_store %arg8[%c0_6, %c0_7], %7 {strides = array<i32>} : memref<64x256xf32, #tpu.memory_space<vmem>>, vector<64x256xf32>,
    %c0_i32_8 = arith.constant 0 : i32
    %9 = arith.cmpi eq, %arg2, %c0_i32_8 : i32
    %10 = arith.extui %9 : i1 to i32
    %c0_i32_9 = arith.constant 0 : i32
    %11 = arith.cmpi ne, %10, %c0_i32_9 : i32
    scf.if %11 {
      %c0_10 = arith.constant 0 : index
      %c0_11 = arith.constant 0 : index
      %12 = vector.load %arg8[%c0_10, %c0_11] : memref<64x256xf32, #tpu.memory_space<vmem>>, vector<64x256xf32>
      %c0_12 = arith.constant 0 : index
      %c0_13 = arith.constant 0 : index
      %13 = vector.load %arg5[%c0_12, %c0_13] : memref<1x256xf32, #tpu.memory_space<vmem>>, vector<1x256xf32>
      %14 = vector.broadcast %13 : vector<1x256xf32> to vector<64x256xf32>
      %15 = arith.addf %12, %14 : vector<64x256xf32>
      %c0_14 = arith.constant 0 : index
      %c0_15 = arith.constant 0 : index
      %16 = vector.load %arg6[%c0_14, %c0_15] : memref<64x256xf32, #tpu.memory_space<vmem>>, vector<64x256xf32>
      %17 = arith.addf %15, %16 : vector<64x256xf32>
      %c0_16 = arith.constant 0 : index
      %c0_17 = arith.constant 0 : index
      %18 = vector.load %arg7[%c0_16, %c0_17] : memref<64x256xf32, #tpu.memory_space<vmem>>, vector<64x256xf32>
      tpu.vector_store %arg7[%c0_16, %c0_17], %17 {strides = array<i32>} : memref<64x256xf32, #tpu.memory_space<vmem>>, vector<64x256xf32>,
    } else {
    }
    return
  }
  func.func @transform_0(%arg0: i32, %arg1: i32, %arg2: i32) -> (i32, i32) {
    %c0_i32 = arith.constant 0 : i32
    return %arg0, %arg2 : i32, i32
  }
  func.func @transform_1(%arg0: i32, %arg1: i32, %arg2: i32) -> (i32, i32) {
    %c0_i32 = arith.constant 0 : i32
    return %arg2, %arg1 : i32, i32
  }
  func.func @transform_2(%arg0: i32, %arg1: i32, %arg2: i32) -> (i32, i32) {
    %c0_i32 = arith.constant 0 : i32
    %c0_i32_0 = arith.constant 0 : i32
    return %c0_i32, %arg1 : i32, i32
  }
  func.func @transform_3(%arg0: i32, %arg1: i32, %arg2: i32) -> (i32, i32) {
    %c0_i32 = arith.constant 0 : i32
    return %arg0, %arg1 : i32, i32
  }
  func.func @transform_4(%arg0: i32, %arg1: i32, %arg2: i32) -> (i32, i32) {
    %c0_i32 = arith.constant 0 : i32
    return %arg0, %arg1 : i32, i32
  }
}

module attributes {stable_mosaic.version = 11 : i64} {
  func.func @_attn_single_kv_kernel(%arg0: i32, %arg1: i32, %arg2: i32, %arg3: memref<1x16x128xbf16, #tpu.memory_space<vmem>>, %arg4: memref<1x16x128xbf16, #tpu.memory_space<vmem>>, %arg5: memref<1x16x128xbf16, #tpu.memory_space<vmem>>, %arg6: memref<1x16x128xbf16, #tpu.memory_space<vmem>>) attributes {dimension_semantics = [#tpu.dimension_semantics<parallel>, #tpu.dimension_semantics<parallel>, #tpu.dimension_semantics<parallel>], iteration_bounds = array<i64: 4, 2, 1>, scalar_prefetch = 0 : i64, scratch_operands = 0 : i64, tpu.core_type = #tpu.core_type<tc>, window_params = [{transform_indices = @transform_0, window_bounds = array<i64: 1, 16, 128>}, {transform_indices = @transform_1, window_bounds = array<i64: 1, 16, 128>}, {transform_indices = @transform_2, window_bounds = array<i64: 1, 16, 128>}, {transform_indices = @transform_3, window_bounds = array<i64: 1, 16, 128>}]} {
    %c0 = arith.constant 0 : index
    %c0_0 = arith.constant 0 : index
    %c0_1 = arith.constant 0 : index
    %0 = vector.load %arg3[%c0, %c0_0, %c0_1] : memref<1x16x128xbf16, #tpu.memory_space<vmem>>, vector<1x16x128xbf16>
    %1 = vector.shape_cast %0 : vector<1x16x128xbf16> to vector<16x128xbf16>
    %c0_2 = arith.constant 0 : index
    %c0_3 = arith.constant 0 : index
    %c0_4 = arith.constant 0 : index
    %2 = vector.load %arg4[%c0_2, %c0_3, %c0_4] : memref<1x16x128xbf16, #tpu.memory_space<vmem>>, vector<1x16x128xbf16>
    %3 = vector.shape_cast %2 : vector<1x16x128xbf16> to vector<16x128xbf16>
    %c0_5 = arith.constant 0 : index
    %c0_6 = arith.constant 0 : index
    %c0_7 = arith.constant 0 : index
    %4 = vector.load %arg5[%c0_5, %c0_6, %c0_7] : memref<1x16x128xbf16, #tpu.memory_space<vmem>>, vector<1x16x128xbf16>
    %5 = vector.shape_cast %4 : vector<1x16x128xbf16> to vector<16x128xbf16>
    %cst = arith.constant dense<0.000000e+00> : vector<16x16xf32>
    %6 = tpu.matmul %1, %3, %cst {dimension_numbers = #tpu.dot_dimension_numbers<[1], [1], [0], [0], [0, 0, 1, 0], [], []>} : vector<16x128xbf16>, vector<16x128xbf16>, vector<16x16xf32> -> vector<16x16xf32>
    %cst_8 = arith.constant 0.0883883461 : f32
    %7 = vector.broadcast %cst_8 : f32 to vector<16x16xf32>
    %8 = arith.mulf %6, %7 : vector<16x16xf32>
    %cst_9 = arith.constant dense<0xFF800000> : vector<16xf32>
    %9 = vector.multi_reduction <maximumf>, %8, %cst_9 [1] : vector<16x16xf32> to vector<16xf32>
    %10 = vector.shape_cast %9 : vector<16xf32> to vector<16x1xf32>
    %11 = vector.broadcast %10 : vector<16x1xf32> to vector<16x16xf32>
    %12 = arith.subf %8, %11 : vector<16x16xf32>
    %13 = math.exp %12 : vector<16x16xf32>
    %cst_10 = arith.constant dense<0.000000e+00> : vector<16xf32>
    %14 = vector.multi_reduction <add>, %13, %cst_10 [1] : vector<16x16xf32> to vector<16xf32>
    %15 = vector.shape_cast %14 : vector<16xf32> to vector<16x1xf32>
    %16 = arith.truncf %13 : vector<16x16xf32> to vector<16x16xbf16>
    %cst_11 = arith.constant dense<0.000000e+00> : vector<16x128xf32>
    %17 = tpu.matmul %16, %5, %cst_11 {dimension_numbers = #tpu.dot_dimension_numbers<[1], [0], [0], [1], [0, 0, 1, 1], [], []>} : vector<16x16xbf16>, vector<16x128xbf16>, vector<16x128xf32> -> vector<16x128xf32>
    %18 = tpu.reciprocal %15 {approx = true} : vector<16x1xf32> -> vector<16x1xf32>
    %19 = vector.broadcast %18 : vector<16x1xf32> to vector<16x128xf32>
    %20 = arith.mulf %17, %19 : vector<16x128xf32>
    %21 = arith.truncf %20 : vector<16x128xf32> to vector<16x128xbf16>
    %c0_12 = arith.constant 0 : index
    %c0_13 = arith.constant 0 : index
    %c0_14 = arith.constant 0 : index
    %22 = vector.load %arg6[%c0_12, %c0_13, %c0_14] : memref<1x16x128xbf16, #tpu.memory_space<vmem>>, vector<1x16x128xbf16>
    %23 = vector.shape_cast %22 : vector<1x16x128xbf16> to vector<16x128xbf16>
    %24 = vector.shape_cast %21 : vector<16x128xbf16> to vector<1x16x128xbf16>
    tpu.vector_store %arg6[%c0_12, %c0_13, %c0_14], %24 {strides = array<i32>} : memref<1x16x128xbf16, #tpu.memory_space<vmem>>, vector<1x16x128xbf16>,
    return
  }
  func.func @transform_0(%arg0: i32, %arg1: i32, %arg2: i32) -> (i32, i32, i32) {
    %c0_i32 = arith.constant 0 : i32
    return %arg0, %arg2, %arg1 : i32, i32, i32
  }
  func.func @transform_1(%arg0: i32, %arg1: i32, %arg2: i32) -> (i32, i32, i32) {
    %c2_i32 = arith.constant 2 : i32
    %0 = arith.addi %c2_i32, %arg1 : i32
    %c0_i32 = arith.constant 0 : i32
    %c0_i32_0 = arith.constant 0 : i32
    return %arg0, %c0_i32, %0 : i32, i32, i32
  }
  func.func @transform_2(%arg0: i32, %arg1: i32, %arg2: i32) -> (i32, i32, i32) {
    %c4_i32 = arith.constant 4 : i32
    %0 = arith.addi %c4_i32, %arg1 : i32
    %c0_i32 = arith.constant 0 : i32
    %c0_i32_0 = arith.constant 0 : i32
    return %arg0, %c0_i32, %0 : i32, i32, i32
  }
  func.func @transform_3(%arg0: i32, %arg1: i32, %arg2: i32) -> (i32, i32, i32) {
    %c0_i32 = arith.constant 0 : i32
    return %arg0, %arg2, %arg1 : i32, i32, i32
  }
}

module attributes {stable_mosaic.version = 11 : i64} {
  func.func @_ln_matmul_kernel(%arg0: i32, %arg1: i32, %arg2: memref<64x256xf32, #tpu.memory_space<vmem>>, %arg3: memref<1x256xf32, #tpu.memory_space<vmem>>, %arg4: memref<1x256xf32, #tpu.memory_space<vmem>>, %arg5: memref<256x512xbf16, #tpu.memory_space<vmem>>, %arg6: memref<1x512xf32, #tpu.memory_space<vmem>>, %arg7: memref<64x512xbf16, #tpu.memory_space<vmem>>, %arg8: memref<64x256xbf16, #tpu.memory_space<vmem>>) attributes {dimension_semantics = [#tpu.dimension_semantics<parallel>, #tpu.dimension_semantics<arbitrary>], iteration_bounds = array<i64: 1, 2>, scalar_prefetch = 0 : i64, scratch_operands = 1 : i64, tpu.core_type = #tpu.core_type<tc>, window_params = [{transform_indices = @transform_0, window_bounds = array<i64: 64, 256>}, {pipeline_mode = #tpu.pipeline_mode<synchronous>, transform_indices = @transform_1, window_bounds = array<i64: 1, 256>}, {pipeline_mode = #tpu.pipeline_mode<synchronous>, transform_indices = @transform_2, window_bounds = array<i64: 1, 256>}, {transform_indices = @transform_3, window_bounds = array<i64: 256, 512>}, {transform_indices = @transform_4, window_bounds = array<i64: 1, 512>}, {transform_indices = @transform_5, window_bounds = array<i64: 64, 512>}]} {
    %c0_i32 = arith.constant 0 : i32
    %0 = arith.cmpi eq, %arg1, %c0_i32 : i32
    %1 = arith.extui %0 : i1 to i32
    %c0_i32_0 = arith.constant 0 : i32
    %2 = arith.cmpi ne, %1, %c0_i32_0 : i32
    scf.if %2 {
      %c0_12 = arith.constant 0 : index
      %c0_13 = arith.constant 0 : index
      %24 = vector.load %arg2[%c0_12, %c0_13] : memref<64x256xf32, #tpu.memory_space<vmem>>, vector<64x256xf32>
      %cst_14 = arith.constant dense<0.000000e+00> : vector<64xf32>
      %25 = vector.multi_reduction <add>, %24, %cst_14 [1] : vector<64x256xf32> to vector<64xf32>
      %26 = vector.shape_cast %25 : vector<64xf32> to vector<64x1xf32>
      %cst_15 = arith.constant 2.560000e+02 : f32
      %27 = vector.broadcast %cst_15 : f32 to vector<64x1xf32>
      %28 = arith.divf %26, %27 : vector<64x1xf32>
      %29 = vector.broadcast %28 : vector<64x1xf32> to vector<64x256xf32>
      %30 = arith.subf %24, %29 : vector<64x256xf32>
      %31 = arith.mulf %30, %30 : vector<64x256xf32>
      %cst_16 = arith.constant dense<0.000000e+00> : vector<64xf32>
      %32 = vector.multi_reduction <add>, %31, %cst_16 [1] : vector<64x256xf32> to vector<64xf32>
      %33 = vector.shape_cast %32 : vector<64xf32> to vector<64x1xf32>
      %cst_17 = arith.constant 2.560000e+02 : f32
      %34 = vector.broadcast %cst_17 : f32 to vector<64x1xf32>
      %35 = arith.divf %33, %34 : vector<64x1xf32>
      %cst_18 = arith.constant 9.99999974E-6 : f32
      %36 = vector.broadcast %cst_18 : f32 to vector<64x1xf32>
      %37 = arith.addf %35, %36 : vector<64x1xf32>
      %38 = math.rsqrt %37 : vector<64x1xf32>
      %39 = vector.broadcast %38 : vector<64x1xf32> to vector<64x256xf32>
      %40 = arith.mulf %30, %39 : vector<64x256xf32>
      %c0_19 = arith.constant 0 : index
      %c0_20 = arith.constant 0 : index
      %41 = vector.load %arg3[%c0_19, %c0_20] : memref<1x256xf32, #tpu.memory_space<vmem>>, vector<1x256xf32>
      %42 = vector.broadcast %41 : vector<1x256xf32> to vector<64x256xf32>
      %43 = arith.mulf %40, %42 : vector<64x256xf32>
      %c0_21 = arith.constant 0 : index
      %c0_22 = arith.constant 0 : index
      %44 = vector.load %arg4[%c0_21, %c0_22] : memref<1x256xf32, #tpu.memory_space<vmem>>, vector<1x256xf32>
      %45 = vector.broadcast %44 : vector<1x256xf32> to vector<64x256xf32>
      %46 = arith.addf %43, %45 : vector<64x256xf32>
      %47 = arith.truncf %46 : vector<64x256xf32> to vector<64x256xbf16>
      %c0_23 = arith.constant 0 : index
      %c0_24 = arith.constant 0 : index
      %48 = vector.load %arg8[%c0_23, %c0_24] : memref<64x256xbf16, #tpu.memory_space<vmem>>, vector<64x256xbf16>
      tpu.vector_store %arg8[%c0_23, %c0_24], %47 {strides = array<i32>} : memref<64x256xbf16, #tpu.memory_space<vmem>>, vector<64x256xbf16>,
    } else {
    }
    %c0 = arith.constant 0 : index
    %c0_1 = arith.constant 0 : index
    %3 = vector.load %arg8[%c0, %c0_1] : memref<64x256xbf16, #tpu.memory_space<vmem>>, vector<64x256xbf16>
    %c0_2 = arith.constant 0 : index
    %c0_3 = arith.constant 0 : index
    %4 = vector.load %arg5[%c0_2, %c0_3] : memref<256x512xbf16, #tpu.memory_space<vmem>>, vector<256x512xbf16>
    %cst = arith.constant dense<0.000000e+00> : vector<64x512xf32>
    %5 = tpu.matmul %3, %4, %cst {dimension_numbers = #tpu.dot_dimension_numbers<[1], [0], [0], [1], [0, 0, 1, 1], [], []>} : vector<64x256xbf16>, vector<256x512xbf16>, vector<64x512xf32> -> vector<64x512xf32>
    %c0_4 = arith.constant 0 : index
    %c0_5 = arith.constant 0 : index
    %6 = vector.load %arg6[%c0_4, %c0_5] : memref<1x512xf32, #tpu.memory_space<vmem>>, vector<1x512xf32>
    %7 = vector.broadcast %6 : vector<1x512xf32> to vector<64x512xf32>
    %8 = arith.addf %5, %7 : vector<64x512xf32>
    %cst_6 = arith.constant 5.000000e-01 : f32
    %9 = vector.broadcast %cst_6 : f32 to vector<64x512xf32>
    %10 = arith.mulf %9, %8 : vector<64x512xf32>
    %cst_7 = arith.constant 4.471500e-02 : f32
    %11 = vector.broadcast %cst_7 : f32 to vector<64x512xf32>
    %12 = arith.mulf %11, %8 : vector<64x512xf32>
    %13 = arith.mulf %12, %8 : vector<64x512xf32>
    %14 = arith.mulf %13, %8 : vector<64x512xf32>
    %15 = arith.addf %8, %14 : vector<64x512xf32>
    %cst_8 = arith.constant 0.797884583 : f32
    %16 = vector.broadcast %cst_8 : f32 to vector<64x512xf32>
    %17 = arith.mulf %16, %15 : vector<64x512xf32>
    %18 = math.tanh %17 : vector<64x512xf32>
    %cst_9 = arith.constant 1.000000e+00 : f32
    %19 = vector.broadcast %cst_9 : f32 to vector<64x512xf32>
    %20 = arith.addf %19, %18 : vector<64x512xf32>
    %21 = arith.mulf %10, %20 : vector<64x512xf32>
    %22 = arith.truncf %21 : vector<64x512xf32> to vector<64x512xbf16>
    %c0_10 = arith.constant 0 : index
    %c0_11 = arith.constant 0 : index
    %23 = vector.load %arg7[%c0_10, %c0_11] : memref<64x512xbf16, #tpu.memory_space<vmem>>, vector<64x512xbf16>
    tpu.vector_store %arg7[%c0_10, %c0_11], %22 {strides = array<i32>} : memref<64x512xbf16, #tpu.memory_space<vmem>>, vector<64x512xbf16>,
    return
  }
  func.func @transform_0(%arg0: i32, %arg1: i32) -> (i32, i32) {
    %c0_i32 = arith.constant 0 : i32
    %c0_i32_0 = arith.constant 0 : i32
    return %arg0, %c0_i32 : i32, i32
  }
  func.func @transform_1(%arg0: i32, %arg1: i32) -> (i32, i32) {
    %c0_i32 = arith.constant 0 : i32
    %c0_i32_0 = arith.constant 0 : i32
    %c0_i32_1 = arith.constant 0 : i32
    return %c0_i32, %c0_i32_0 : i32, i32
  }
  func.func @transform_2(%arg0: i32, %arg1: i32) -> (i32, i32) {
    %c0_i32 = arith.constant 0 : i32
    %c0_i32_0 = arith.constant 0 : i32
    %c0_i32_1 = arith.constant 0 : i32
    return %c0_i32, %c0_i32_0 : i32, i32
  }
  func.func @transform_3(%arg0: i32, %arg1: i32) -> (i32, i32) {
    %c0_i32 = arith.constant 0 : i32
    %c0_i32_0 = arith.constant 0 : i32
    return %c0_i32, %arg1 : i32, i32
  }
  func.func @transform_4(%arg0: i32, %arg1: i32) -> (i32, i32) {
    %c0_i32 = arith.constant 0 : i32
    %c0_i32_0 = arith.constant 0 : i32
    return %c0_i32, %arg1 : i32, i32
  }
  func.func @transform_5(%arg0: i32, %arg1: i32) -> (i32, i32) {
    %c0_i32 = arith.constant 0 : i32
    return %arg0, %arg1 : i32, i32
  }
}

module attributes {stable_mosaic.version = 11 : i64} {
  func.func @_matmul_resid_kernel(%arg0: i32, %arg1: i32, %arg2: i32, %arg3: memref<64x512xbf16, #tpu.memory_space<vmem>>, %arg4: memref<512x256xbf16, #tpu.memory_space<vmem>>, %arg5: memref<1x256xf32, #tpu.memory_space<vmem>>, %arg6: memref<64x256xf32, #tpu.memory_space<vmem>>, %arg7: memref<64x256xf32, #tpu.memory_space<vmem>>, %arg8: memref<64x256xf32, #tpu.memory_space<vmem>>) attributes {dimension_semantics = [#tpu.dimension_semantics<parallel>, #tpu.dimension_semantics<parallel>, #tpu.dimension_semantics<arbitrary>], iteration_bounds = array<i64: 1, 1, 2>, scalar_prefetch = 0 : i64, scratch_operands = 1 : i64, tpu.core_type = #tpu.core_type<tc>, window_params = [{transform_indices = @transform_0, window_bounds = array<i64: 64, 512>}, {transform_indices = @transform_1, window_bounds = array<i64: 512, 256>}, {transform_indices = @transform_2, window_bounds = array<i64: 1, 256>}, {transform_indices = @transform_3, window_bounds = array<i64: 64, 256>}, {transform_indices = @transform_4, window_bounds = array<i64: 64, 256>}]} {
    %c0_i32 = arith.constant 0 : i32
    %0 = arith.cmpi eq, %arg2, %c0_i32 : i32
    %1 = arith.extui %0 : i1 to i32
    %c0_i32_0 = arith.constant 0 : i32
    %2 = arith.cmpi ne, %1, %c0_i32_0 : i32
    scf.if %2 {
      %cst_9 = arith.constant 0.000000e+00 : f32
      %12 = vector.broadcast %cst_9 : f32 to vector<64x256xf32>
      %c0_10 = arith.constant 0 : index
      %c0_11 = arith.constant 0 : index
      %13 = vector.load %arg8[%c0_10, %c0_11] : memref<64x256xf32, #tpu.memory_space<vmem>>, vector<64x256xf32>
      tpu.vector_store %arg8[%c0_10, %c0_11], %12 {strides = array<i32>} : memref<64x256xf32, #tpu.memory_space<vmem>>, vector<64x256xf32>,
    } else {
    }
    %c0 = arith.constant 0 : index
    %c0_1 = arith.constant 0 : index
    %3 = vector.load %arg8[%c0, %c0_1] : memref<64x256xf32, #tpu.memory_space<vmem>>, vector<64x256xf32>
    %c0_2 = arith.constant 0 : index
    %c0_3 = arith.constant 0 : index
    %4 = vector.load %arg3[%c0_2, %c0_3] : memref<64x512xbf16, #tpu.memory_space<vmem>>, vector<64x512xbf16>
    %c0_4 = arith.constant 0 : index
    %c0_5 = arith.constant 0 : index
    %5 = vector.load %arg4[%c0_4, %c0_5] : memref<512x256xbf16, #tpu.memory_space<vmem>>, vector<512x256xbf16>
    %cst = arith.constant dense<0.000000e+00> : vector<64x256xf32>
    %6 = tpu.matmul %4, %5, %cst {dimension_numbers = #tpu.dot_dimension_numbers<[1], [0], [0], [1], [0, 0, 1, 1], [], []>} : vector<64x512xbf16>, vector<512x256xbf16>, vector<64x256xf32> -> vector<64x256xf32>
    %7 = arith.addf %3, %6 : vector<64x256xf32>
    %c0_6 = arith.constant 0 : index
    %c0_7 = arith.constant 0 : index
    %8 = vector.load %arg8[%c0_6, %c0_7] : memref<64x256xf32, #tpu.memory_space<vmem>>, vector<64x256xf32>
    tpu.vector_store %arg8[%c0_6, %c0_7], %7 {strides = array<i32>} : memref<64x256xf32, #tpu.memory_space<vmem>>, vector<64x256xf32>,
    %c1_i32 = arith.constant 1 : i32
    %9 = arith.cmpi eq, %arg2, %c1_i32 : i32
    %10 = arith.extui %9 : i1 to i32
    %c0_i32_8 = arith.constant 0 : i32
    %11 = arith.cmpi ne, %10, %c0_i32_8 : i32
    scf.if %11 {
      %c0_9 = arith.constant 0 : index
      %c0_10 = arith.constant 0 : index
      %12 = vector.load %arg8[%c0_9, %c0_10] : memref<64x256xf32, #tpu.memory_space<vmem>>, vector<64x256xf32>
      %c0_11 = arith.constant 0 : index
      %c0_12 = arith.constant 0 : index
      %13 = vector.load %arg5[%c0_11, %c0_12] : memref<1x256xf32, #tpu.memory_space<vmem>>, vector<1x256xf32>
      %14 = vector.broadcast %13 : vector<1x256xf32> to vector<64x256xf32>
      %15 = arith.addf %12, %14 : vector<64x256xf32>
      %c0_13 = arith.constant 0 : index
      %c0_14 = arith.constant 0 : index
      %16 = vector.load %arg6[%c0_13, %c0_14] : memref<64x256xf32, #tpu.memory_space<vmem>>, vector<64x256xf32>
      %17 = arith.addf %15, %16 : vector<64x256xf32>
      %c0_15 = arith.constant 0 : index
      %c0_16 = arith.constant 0 : index
      %18 = vector.load %arg7[%c0_15, %c0_16] : memref<64x256xf32, #tpu.memory_space<vmem>>, vector<64x256xf32>
      tpu.vector_store %arg7[%c0_15, %c0_16], %17 {strides = array<i32>} : memref<64x256xf32, #tpu.memory_space<vmem>>, vector<64x256xf32>,
    } else {
    }
    return
  }
  func.func @transform_0(%arg0: i32, %arg1: i32, %arg2: i32) -> (i32, i32) {
    %c0_i32 = arith.constant 0 : i32
    return %arg0, %arg2 : i32, i32
  }
  func.func @transform_1(%arg0: i32, %arg1: i32, %arg2: i32) -> (i32, i32) {
    %c0_i32 = arith.constant 0 : i32
    return %arg2, %arg1 : i32, i32
  }
  func.func @transform_2(%arg0: i32, %arg1: i32, %arg2: i32) -> (i32, i32) {
    %c0_i32 = arith.constant 0 : i32
    %c0_i32_0 = arith.constant 0 : i32
    return %c0_i32, %arg1 : i32, i32
  }
  func.func @transform_3(%arg0: i32, %arg1: i32, %arg2: i32) -> (i32, i32) {
    %c0_i32 = arith.constant 0 : i32
    return %arg0, %arg1 : i32, i32
  }
  func.func @transform_4(%arg0: i32, %arg1: i32, %arg2: i32) -> (i32, i32) {
    %c0_i32 = arith.constant 0 : i32
    return %arg0, %arg1 : i32, i32
  }
}

module attributes {stable_mosaic.version = 11 : i64} {
  func.func @_ln_mean_kernel(%arg0: i32, %arg1: i32, %arg2: memref<1x1x16x256xf32, #tpu.memory_space<vmem>>, %arg3: memref<1x256xf32, #tpu.memory_space<vmem>>, %arg4: memref<1x256xf32, #tpu.memory_space<vmem>>, %arg5: memref<1x16x256xf32, #tpu.memory_space<vmem>>, %arg6: memref<16x256xf32, #tpu.memory_space<vmem>>) attributes {dimension_semantics = [#tpu.dimension_semantics<parallel>, #tpu.dimension_semantics<arbitrary>], iteration_bounds = array<i64: 2, 2>, scalar_prefetch = 0 : i64, scratch_operands = 1 : i64, tpu.core_type = #tpu.core_type<tc>, window_params = [{transform_indices = @transform_0, window_bounds = array<i64: 1, 1, 16, 256>}, {pipeline_mode = #tpu.pipeline_mode<synchronous>, transform_indices = @transform_1, window_bounds = array<i64: 1, 256>}, {pipeline_mode = #tpu.pipeline_mode<synchronous>, transform_indices = @transform_2, window_bounds = array<i64: 1, 256>}, {transform_indices = @transform_3, window_bounds = array<i64: 1, 16, 256>}]} {
    %c0_i32 = arith.constant 0 : i32
    %0 = arith.cmpi eq, %arg1, %c0_i32 : i32
    %1 = arith.extui %0 : i1 to i32
    %c0_i32_0 = arith.constant 0 : i32
    %2 = arith.cmpi ne, %1, %c0_i32_0 : i32
    scf.if %2 {
      %cst_17 = arith.constant 0.000000e+00 : f32
      %33 = vector.broadcast %cst_17 : f32 to vector<16x256xf32>
      %c0_18 = arith.constant 0 : index
      %c0_19 = arith.constant 0 : index
      %34 = vector.load %arg6[%c0_18, %c0_19] : memref<16x256xf32, #tpu.memory_space<vmem>>, vector<16x256xf32>
      tpu.vector_store %arg6[%c0_18, %c0_19], %33 {strides = array<i32>} : memref<16x256xf32, #tpu.memory_space<vmem>>, vector<16x256xf32>,
    } else {
    }
    %c0 = arith.constant 0 : index
    %c0_1 = arith.constant 0 : index
    %c0_2 = arith.constant 0 : index
    %c0_3 = arith.constant 0 : index
    %3 = vector.load %arg2[%c0, %c0_1, %c0_2, %c0_3] : memref<1x1x16x256xf32, #tpu.memory_space<vmem>>, vector<1x1x16x256xf32>
    %4 = vector.shape_cast %3 : vector<1x1x16x256xf32> to vector<16x256xf32>
    %cst = arith.constant dense<0.000000e+00> : vector<16xf32>
    %5 = vector.multi_reduction <add>, %4, %cst [1] : vector<16x256xf32> to vector<16xf32>
    %6 = vector.shape_cast %5 : vector<16xf32> to vector<16x1xf32>
    %cst_4 = arith.constant 2.560000e+02 : f32
    %7 = vector.broadcast %cst_4 : f32 to vector<16x1xf32>
    %8 = arith.divf %6, %7 : vector<16x1xf32>
    %9 = vector.broadcast %8 : vector<16x1xf32> to vector<16x256xf32>
    %10 = arith.subf %4, %9 : vector<16x256xf32>
    %11 = arith.mulf %10, %10 : vector<16x256xf32>
    %cst_5 = arith.constant dense<0.000000e+00> : vector<16xf32>
    %12 = vector.multi_reduction <add>, %11, %cst_5 [1] : vector<16x256xf32> to vector<16xf32>
    %13 = vector.shape_cast %12 : vector<16xf32> to vector<16x1xf32>
    %cst_6 = arith.constant 2.560000e+02 : f32
    %14 = vector.broadcast %cst_6 : f32 to vector<16x1xf32>
    %15 = arith.divf %13, %14 : vector<16x1xf32>
    %c0_7 = arith.constant 0 : index
    %c0_8 = arith.constant 0 : index
    %16 = vector.load %arg6[%c0_7, %c0_8] : memref<16x256xf32, #tpu.memory_space<vmem>>, vector<16x256xf32>
    %cst_9 = arith.constant 9.99999974E-6 : f32
    %17 = vector.broadcast %cst_9 : f32 to vector<16x1xf32>
    %18 = arith.addf %15, %17 : vector<16x1xf32>
    %19 = math.rsqrt %18 : vector<16x1xf32>
    %20 = vector.broadcast %19 : vector<16x1xf32> to vector<16x256xf32>
    %21 = arith.mulf %10, %20 : vector<16x256xf32>
    %c0_10 = arith.constant 0 : index
    %c0_11 = arith.constant 0 : index
    %22 = vector.load %arg3[%c0_10, %c0_11] : memref<1x256xf32, #tpu.memory_space<vmem>>, vector<1x256xf32>
    %23 = vector.broadcast %22 : vector<1x256xf32> to vector<16x256xf32>
    %24 = arith.mulf %21, %23 : vector<16x256xf32>
    %c0_12 = arith.constant 0 : index
    %c0_13 = arith.constant 0 : index
    %25 = vector.load %arg4[%c0_12, %c0_13] : memref<1x256xf32, #tpu.memory_space<vmem>>, vector<1x256xf32>
    %26 = vector.broadcast %25 : vector<1x256xf32> to vector<16x256xf32>
    %27 = arith.addf %24, %26 : vector<16x256xf32>
    %28 = arith.addf %16, %27 : vector<16x256xf32>
    %c0_14 = arith.constant 0 : index
    %c0_15 = arith.constant 0 : index
    %29 = vector.load %arg6[%c0_14, %c0_15] : memref<16x256xf32, #tpu.memory_space<vmem>>, vector<16x256xf32>
    tpu.vector_store %arg6[%c0_14, %c0_15], %28 {strides = array<i32>} : memref<16x256xf32, #tpu.memory_space<vmem>>, vector<16x256xf32>,
    %c1_i32 = arith.constant 1 : i32
    %30 = arith.cmpi eq, %arg1, %c1_i32 : i32
    %31 = arith.extui %30 : i1 to i32
    %c0_i32_16 = arith.constant 0 : i32
    %32 = arith.cmpi ne, %31, %c0_i32_16 : i32
    scf.if %32 {
      %c0_17 = arith.constant 0 : index
      %c0_18 = arith.constant 0 : index
      %33 = vector.load %arg6[%c0_17, %c0_18] : memref<16x256xf32, #tpu.memory_space<vmem>>, vector<16x256xf32>
      %cst_19 = arith.constant 5.000000e-01 : f32
      %34 = vector.broadcast %cst_19 : f32 to vector<16x256xf32>
      %35 = arith.mulf %33, %34 : vector<16x256xf32>
      %c0_20 = arith.constant 0 : index
      %c0_21 = arith.constant 0 : index
      %c0_22 = arith.constant 0 : index
      %36 = vector.load %arg5[%c0_20, %c0_21, %c0_22] : memref<1x16x256xf32, #tpu.memory_space<vmem>>, vector<1x16x256xf32>
      %37 = vector.shape_cast %36 : vector<1x16x256xf32> to vector<16x256xf32>
      %38 = vector.shape_cast %35 : vector<16x256xf32> to vector<1x16x256xf32>
      tpu.vector_store %arg5[%c0_20, %c0_21, %c0_22], %38 {strides = array<i32>} : memref<1x16x256xf32, #tpu.memory_space<vmem>>, vector<1x16x256xf32>,
    } else {
    }
    return
  }
  func.func @transform_0(%arg0: i32, %arg1: i32) -> (i32, i32, i32, i32) {
    %c0_i32 = arith.constant 0 : i32
    %c0_i32_0 = arith.constant 0 : i32
    %c0_i32_1 = arith.constant 0 : i32
    return %arg0, %arg1, %c0_i32, %c0_i32_0 : i32, i32, i32, i32
  }
  func.func @transform_1(%arg0: i32, %arg1: i32) -> (i32, i32) {
    %c0_i32 = arith.constant 0 : i32
    %c0_i32_0 = arith.constant 0 : i32
    %c0_i32_1 = arith.constant 0 : i32
    return %c0_i32, %c0_i32_0 : i32, i32
  }
  func.func @transform_2(%arg0: i32, %arg1: i32) -> (i32, i32) {
    %c0_i32 = arith.constant 0 : i32
    %c0_i32_0 = arith.constant 0 : i32
    %c0_i32_1 = arith.constant 0 : i32
    return %c0_i32, %c0_i32_0 : i32, i32
  }
  func.func @transform_3(%arg0: i32, %arg1: i32) -> (i32, i32, i32) {
    %c0_i32 = arith.constant 0 : i32
    %c0_i32_0 = arith.constant 0 : i32
    %c0_i32_1 = arith.constant 0 : i32
    return %arg0, %c0_i32, %c0_i32_0 : i32, i32, i32
  }
}

</mosaic_0001>

<bundles_post_ra>
// kernel: vit_encoder_forward.12
= control target key start
LH: loop header
LB: loop body
LE: loop exit
PB: predicated region body
PF: predicated region fallthrough
CT: control target
= control target key end

     0   :  { %s957_s15 = smov 0   ;;  %s959_s16 = smov 0   ;;  %s1157_s0 = inlined_call_operand.vmem [shape: bf16[4,16,192], index: 0, kind: input, shape index: {}]   ;;  %s1158_s1 = inlined_call_operand.vmem [shape: bf16[192,256], index: 1, kind: input, shape index: {}]   ;;  %s1159_s2 = inlined_call_operand.vmem [shape: f32[1,256], index: 2, kind: input, shape index: {}]   ;;  %s1160_s3 = inlined_call_operand.vmem [shape: f32[16,256], index: 3, kind: input, shape index: {}]   ;;  %s1161_s4 = inlined_call_operand.vmem [shape: f32[4,16,256], index: 4, kind: output, shape index: {}]  }
   0x1   :  { %s961_s17 = smov 0  }
   0x2 LB: > { %s33_s18 = sadd.s32 1, %s926_s16  ;;  %p743_p0 = scmp.ge.s32.totalorder %s930_s17, 1  ;;  %s930_s17 = sphi %s961_s17, %s14_s17   ;;  %s926_s16 = sphi %s959_s16, %s1163_s16   ;;  %s922_s15 = sphi %s957_s15, %s1162_s15  }
   0x3   : > { %p35_p1 = scmp.ge.s32.totalorder %s33_s18, 4  ;;  %p233_p2 = scmp.lt.s32.totalorder %s930_s17, 5 }
   0x5   : > { %s1165_s18 = smov (%p35_p1, %s33_s18), 0  ;;  %p234_p3 = pnand %p743_p0, %p233_p2 }
   0x6   : > { %p293_p4 = scmp.lt.s32.totalorder (!%p234_p3), %s922_s15, 3 }
   0x7   : > { %237 = sbr.rel (%p234_p3) target bundleno = 194 (0xc2), region = 36 }
   0xc   : > { %v814_v0 = vld [vmem:[%s1158_s1 + $0x70] sm:$0xf]  ;;  %v875_v1 = vld [vmem:[%s1158_s1 + $0x74] sm:$0xf0]  ;;  %v874_v2 = vld [vmem:[%s1158_s1 + $0x74] sm:$0xf] }
   0xd   : > { %v815_v3 = vor.u32 %v875_v1, %v814_v0  ;;  %v816_v4 = vld [vmem:[%s1158_s1 + $0x78] sm:$0xf0]  ;;  %v806_v5 = vld [vmem:[%s1158_s1 + $0x60] sm:$0xf]  ;;  %v873_v6 = vld [vmem:[%s1158_s1 + $0x64] sm:$0xf0] }
   0xe   : > { %v819_v7 = vor.u32 %v874_v2, %v816_v4  ;;  %v872_v8 = vld [vmem:[%s1158_s1 + $0x64] sm:$0xf]  ;;  %v808_v9 = vld [vmem:[%s1158_s1 + $0x68] sm:$0xf0]  ;;  %v807_v10 = vor.u32 %v873_v6, %v806_v5  ;;  %v798_v11 = vld [vmem:[%s1158_s1 + $0x50] sm:$0xf] }
   0xf   : > { %508 = vmatpush.bf16.msra.mxu0 %v815_v3  ;;  %v811_v12 = vor.u32 %v872_v8, %v808_v9  ;;  %v871_v13 = vld [vmem:[%s1158_s1 + $0x54] sm:$0xf0]  ;;  %v882_v14 = vld [vmem:[%s1158_s1 + $0xb4] sm:$0xf]  ;;  %v848_v15 = vld [vmem:[%s1158_s1 + $0xb8] sm:$0xf0] }
  0x10   : > { %536 = vmatpush.bf16.msra.mxu2 %v819_v7  ;;  %v870_v16 = vld [vmem:[%s1158_s1 + $0x54] sm:$0xf]  ;;  %v800_v17 = vld [vmem:[%s1158_s1 + $0x58] sm:$0xf0]  ;;  %v851_v18 = vor.u32 %v882_v14, %v848_v15  ;;  %v880_v19 = vld [vmem:[%s1158_s1 + $0xa4] sm:$0xf]  ;;  %v799_v21 = vor.u32 %v871_v13, %v798_v11 }
  0x11   : > { %v840_v20 = vld [vmem:[%s1158_s1 + $0xa8] sm:$0xf0]  ;;  %v846_v23 = vld [vmem:[%s1158_s1 + $0xb0] sm:$0xf]  ;;  %v883_v24 = vld [vmem:[%s1158_s1 + $0xb4] sm:$0xf0]  ;;  %v803_v25 = vor.u32 %v870_v16, %v800_v17 }
  0x12   : > { %554 = vmatpush.bf16.msra.mxu3 %v851_v18  ;;  %v843_v22 = vor.u32 %v880_v19, %v840_v20  ;;  %v790_v26 = vld [vmem:[%s1158_s1 + $0x40] sm:$0xf]  ;;  %v869_v27 = vld [vmem:[%s1158_s1 + $0x44] sm:$0xf0]  ;;  %v847_v28 = vor.u32 %v883_v24, %v846_v23  ;;  %v878_v29 = vld [vmem:[%s1158_s1 + $0x94] sm:$0xf] }
  0x13   : > { %509 = vmatpush.bf16.msra.mxu0 %v807_v10  ;;  %v868_v30 = vld [vmem:[%s1158_s1 + $0x44] sm:$0xf]  ;;  %v792_v31 = vld [vmem:[%s1158_s1 + $0x48] sm:$0xf0]  ;;  %v832_v32 = vld [vmem:[%s1158_s1 + $0x98] sm:$0xf0]  ;;  %v791_v35 = vor.u32 %v869_v27, %v790_v26 }
  0x14   : > { %537 = vmatpush.bf16.msra.mxu2 %v811_v12  ;;  %526 = vmatpush.bf16.msra.mxu1 %v847_v28  ;;  %v838_v33 = vld [vmem:[%s1158_s1 + $0xa0] sm:$0xf]  ;;  %v881_v34 = vld [vmem:[%s1158_s1 + $0xa4] sm:$0xf0]  ;;  %v782_v36 = vld [vmem:[%s1158_s1 + $0x30] sm:$0xf]  ;;  %v835_v38 = vor.u32 %v878_v29, %v832_v32  ;;  %v795_v40 = vor.u32 %v868_v30, %v792_v31 }
  0x15   : > { %v867_v37 = vld [vmem:[%s1158_s1 + $0x34] sm:$0xf0]  ;;  %v839_v39 = vor.u32 %v881_v34, %v838_v33  ;;  %v876_v41 = vld [vmem:[%s1158_s1 + $0x84] sm:$0xf]  ;;  %v824_v42 = vld [vmem:[%s1158_s1 + $0x88] sm:$0xf0] }
  0x16   : > { %555 = vmatpush.bf16.msra.mxu3 %v843_v22  ;;  %v830_v43 = vld [vmem:[%s1158_s1 + $0x90] sm:$0xf]  ;;  %v866_v44 = vld [vmem:[%s1158_s1 + $0x34] sm:$0xf]  ;;  %v784_v45 = vld [vmem:[%s1158_s1 + $0x38] sm:$0xf0]  ;;  %v783_v48 = vor.u32 %v867_v37, %v782_v36  ;;  %v827_v49 = vor.u32 %v876_v41, %v824_v42 }
  0x17   : > { %510 = vmatpush.bf16.msra.mxu0 %v799_v21  ;;  %v879_v46 = vld [vmem:[%s1158_s1 + $0x94] sm:$0xf0]  ;;  %v822_v50 = vld [vmem:[%s1158_s1 + $0x80] sm:$0xf]  ;;  %v877_v51 = vld [vmem:[%s1158_s1 + $0x84] sm:$0xf0]  ;;  %v787_v52 = vor.u32 %v866_v44, %v784_v45 }
  0x18   : > { %538 = vmatpush.bf16.msra.mxu2 %v803_v25  ;;  %527 = vmatpush.bf16.msra.mxu1 %v839_v39  ;;  %v831_v47 = vor.u32 %v879_v46, %v830_v43  ;;  %v774_v53 = vld [vmem:[%s1158_s1 + $0x20] sm:$0xf]  ;;  %v865_v54 = vld [vmem:[%s1158_s1 + $0x24] sm:$0xf0]  ;;  %s1167_s15 = smov (!%p293_p4, %s922_s15), 3  ;;  %v823_v57 = vor.u32 %v877_v51, %v822_v50  ;;  %vm504_vm0 = vcmask 523264  }
  0x19   : > { %v864_v55 = vld [vmem:[%s1158_s1 + $0x24] sm:$0xf]  ;;  %v776_v56 = vld [vmem:[%s1158_s1 + $0x28] sm:$0xf0]  ;;  %s856_s7 = sshll.u32 %s1167_s15, 4  ;;  %v775_v58 = vor.u32 %v865_v54, %v774_v53  ;;  %v566_v31 = vld [vmem:[%s1160_s3 + $0x10] sm:$0xff] }
  0x1a   : > { %556 = vmatpush.bf16.msra.mxu3 %v835_v38  ;;  %v766_v59 = vld [vmem:[%s1158_s1 + $0x10] sm:$0xf]  ;;  %v863_v60 = vld [vmem:[%s1158_s1 + $0x14] sm:$0xf0]  ;;  %s301_s14 = scalar_lea.vmem %s1157_s0, %s856_s7  ;;  %v779_v61 = vor.u32 %v864_v55, %v776_v56  ;;  %v862_v0 = vld [vmem:[%s1158_s1 + $0x14] sm:$0xf] }
  0x1b   : > { %511 = vmatpush.bf16.msra.mxu0 %v791_v35  ;;  %v858_v62 = vld [vmem:[%s301_s14 + $0x4] sm:$0xf]  ;;  %v752_v63 = vld [vmem:[%s301_s14 + $0x8] sm:$0xf0]  ;;  %v768_v1 = vld [vmem:[%s1158_s1 + $0x18] sm:$0xf0]  ;;  %v767_v3 = vor.u32 %v863_v60, %v766_v59 }
  0x1c   : > { %539 = vmatpush.bf16.msra.mxu2 %v795_v40  ;;  %528 = vmatpush.bf16.msra.mxu1 %v831_v47  ;;  %v755_v2 = vor.u32 %v858_v62, %v752_v63  ;;  %v771_v4 = vor.u32 %v862_v0, %v768_v1  ;;  %v758_v5 = vld [vmem:[%s1158_s1] sm:$0xf]  ;;  %v861_v6 = vld [vmem:[%s1158_s1 + $0x4] sm:$0xf0]  ;;  %v860_v7 = vld [vmem:[%s1158_s1 + $0x4] sm:$0xf] }
  0x1d   : > { %v760_v8 = vld [vmem:[%s1158_s1 + $0x8] sm:$0xf0]  ;;  %v759_v9 = vor.u32 %v861_v6, %v758_v5  ;;  %v750_v10 = vld [vmem:[%s301_s14] sm:$0xf]  ;;  %v859_v11 = vld [vmem:[%s301_s14 + $0x4] sm:$0xf0] }
  0x1e   : > { %557 = vmatpush.bf16.msra.mxu3 %v827_v49  ;;  %v763_v12 = vor.u32 %v860_v7, %v760_v8  ;;  %v751_v13 = vor.u32 %v859_v11, %v750_v10  ;;  %v369_v14 = vld [vmem:[%s1159_s2] sm:$0x3]  ;;  %s857_s7 = sshll.u32 %s1167_s15, 5  ;;  %v565_v27 = vld [vmem:[%s1160_s3 + $0x8] sm:$0xff]  ;;  %v567_v38 = vld [vmem:[%s1160_s3 + $0x18] sm:$0xff] }
  0x1f   : > { %512 = vmatpush.bf16.msra.mxu0 %v783_v48  ;;  %v371_v15 = vperm.slane %v369_v14, 0  ;;  %v564_v19 = vld [vmem:[%s1160_s3] sm:$0xff]  ;;  %s339_s12 = scalar_lea.vmem %s1161_s4, %s857_s7  ;;  %v372_v21 = vperm.slane %v369_v14, 1 }
  0x20   : > { %540 = vmatpush.bf16.msra.mxu2 %v787_v52  ;;  %529 = vmatpush.bf16.msra.mxu1 %v823_v57 }
  0x21   : > { %853 = vmatmul.msk.bf16.vlgmr.msra.gmra.mxu3 %vm504_vm0, %v755_v2 }
  0x23   : > { %513 = vmatpush.bf16.msra.mxu0 %v775_v58  ;;  %852 = vmatmul.msk.bf16.vlgmr.msra.gmra.mxu1 %vm504_vm0, %v755_v2 }
  0x24   : > { %541 = vmatpush.bf16.msra.mxu2 %v779_v61 }
  0x27   : > { %514 = vmatpush.bf16.msra.mxu0 %v767_v3 }
  0x28   : > { %542 = vmatpush.bf16.msra.mxu2 %v771_v4 }
  0x2b   : > { %515 = vmatpush.bf16.msra.mxu0 %v759_v9 }
  0x2c   : > { %543 = vmatpush.bf16.msra.mxu2 %v763_v12 }
  0x2e   : > { %516 = vmatmul.bf16.vlgmr.msra.gmra.mxu0 %v751_v13 }
  0x2f   : > { %544 = vmatmul.bf16.vlgmr.msra.gmra.mxu2 %v751_v13 }
  0xa0   : > { %v531_v17 = vpop.f32.mrf.mxu1 }
  0xa4   : > { %v559_v23 = vpop.f32.mrf.mxu3 }
  0xa8   : > { %v533_v30 = vpop.f32.mrf.mxu1 }
  0xab   : > { %v517_v16 = vpop.f32.mrf.mxu0 }
  0xac   : > { %v518_v18 = vadd.f32 %v517_v16, %v371_v15  ;;  %v561_v37 = vpop.f32.mrf.mxu3 }
  0xae   : > { %v532_v20 = vadd.f32 %v531_v17, %v518_v18 }
  0xb0   : > { %v568_v22 = vadd.f32 %v564_v19, %v532_v20 }
  0xb2   : > { %572 = vst [vmem:[%s339_s12] sm:$0xff] %v568_v22  ;;  %v545_v24 = vpop.f32.mrf.mxu2 }
  0xb3   : > { %v546_v25 = vadd.f32 %v545_v24, %v372_v21  ;;  %v519_v26 = vpop.f32.mrf.mxu0 }
  0xb4   : > { %v520_v28 = vadd.f32 %v519_v26, %v371_v15 }
  0xb5   : > { %v560_v29 = vadd.f32 %v559_v23, %v546_v25 }
  0xb6   : > { %v534_v32 = vadd.f32 %v533_v30, %v520_v28 }
  0xb7   : > { %v569_v33 = vadd.f32 %v565_v27, %v560_v29 }
  0xb8   : > { %v570_v34 = vadd.f32 %v566_v31, %v534_v32 }
  0xb9   : > { %573 = vst [vmem:[%s339_s12 + $0x8] sm:$0xff] %v569_v33 }
  0xba   : > { %574 = vst [vmem:[%s339_s12 + $0x10] sm:$0xff] %v570_v34  ;;  %v547_v35 = vpop.f32.mrf.mxu2 }
  0xbb   : > { %v548_v36 = vadd.f32 %v547_v35, %v372_v21 }
  0xbd   : > { %v562_v39 = vadd.f32 %v561_v37, %v548_v36 }
  0xbf   : > { %v571_v40 = vadd.f32 %v567_v38, %v562_v39 }
  0xc1   : > { %575 = vst [vmem:[%s339_s12 + $0x18] sm:$0xff] %v571_v40 }
  0xc2 PF: > { %s14_s17 = sadd.s32 1, %s930_s17   ;;  %s1162_s15 = smov %s926_s16 }
  0xc3   : > { %p11_p5 = scmp.ge.s32.totalorder %s14_s17, 6   ;;  %s1163_s16 = smov %s1165_s18 }
  0xc5   :  { %13 = sbr.rel (!%p11_p5) target bundleno = 2 (0x2), region = 75 }

// kernel: vit_encoder_forward.13
= control target key start
LH: loop header
LB: loop body
LE: loop exit
PB: predicated region body
PF: predicated region fallthrough
CT: control target
= control target key end

     0   :  { %s1997_s18 = smov 0   ;;  %s1999_s19 = smov 0   ;;  %s2684_s0 = inlined_call_operand.vmem [shape: f32[64,256], index: 0, kind: input, shape index: {}]   ;;  %s2685_s1 = inlined_call_operand.vmem [shape: f32[1,256], index: 1, kind: input, shape index: {}]   ;;  %s2686_s2 = inlined_call_operand.vmem [shape: f32[1,256], index: 2, kind: input, shape index: {}]   ;;  %s2687_s3 = inlined_call_operand.vmem [shape: bf16[256,768], index: 3, kind: input, shape index: {}]   ;;  %s2688_s4 = inlined_call_operand.vmem [shape: f32[1,768], index: 4, kind: input, shape index: {}]   ;;  %s2689_s5 = inlined_call_operand.vmem [shape: bf16[64,768], index: 5, kind: output, shape index: {}]  }
   0x1   :  { %s2001_s20 = smov 0   ;;  %s2003_s21 = smov 0  }
   0x2   :  { %s2005_s22 = smov 0  }
   0x3 LB: > { %s24_s23 = sadd.s32 1, %s1960_s21  ;;  %s1475_s24 = sadd.s32 4294967295, %s1964_s22   ;;  %s1964_s22 = sphi %s2005_s22, %s15_s22   ;;  %s1960_s21 = sphi %s2003_s21, %s2694_s21   ;;  %s1956_s20 = sphi %s2001_s20, %s2693_s20   ;;  %s1952_s19 = sphi %s1999_s19, %s2692_s19   ;;  %s1948_s18 = sphi %s1997_s18, %s2691_s18  }
   0x4   : > { %p25_p0 = scmp.ge.s32.totalorder %s24_s23, 2  ;;  %p109_p1 = scmp.ne.s32.totalorder %s1952_s19, %s1948_s18 }
   0x5   : > { %p110_p2 = scmp.eq.s32.totalorder %s1964_s22, 0  ;;  %p167_p4 = scmp.eq.s32.totalorder %s1475_s24, 1 }
   0x6   : > { %s2696_s23 = smov (%p25_p0, %s24_s23), 0  ;;  %s102_s26 = sadd.s32 1, %s1952_s19 }
   0x7   : > { %p111_p3 = por %p110_p2, %p109_p1  ;;  %s99_s25 = ssub.s32 %s1960_s21, %s2696_s23 }
   0x8   : > { %p100_p5 = scmp.eq.s32.totalorder %s99_s25, 0  ;;  %p2032_p6 = por %p167_p4, %p109_p1 }
   0x9   : > { %p1479_p7 = scmp.ge.s32.totalorder %s1964_s22, 2 }
   0xa   : > { %s2037_s28 = scalar_select %p100_p5, %s1952_s19, %s102_s26  }
   0xb   : > { %205 = sbr.rel (%p1479_p7) target bundleno = 85 (0x55), region = 28 }
  0x10   : > { %208 = sbr.rel (!%p111_p3) target bundleno = 85 (0x55), region = 32  ;;  %s210_s29 = sand.u32 (%p111_p3), 1, %s1952_s19  }
  0x11   : > { %s1790_s30 = smul.u32 (%p111_p3), 12, %s1960_s21 }
  0x12   : > { %s1864_s6 = smul.u32 (%p111_p3), 384, %s210_s29 }
  0x13   : > { %s2045_s9 = scalar_lea.vmem (%p111_p3), %s2687_s3, %s1790_s30 }
  0x14   : > { %v230_v0 = vld [vmem:[%s2045_s9] sm:$0xff] (%p111_p3)  ;;  %v232_v1 = vld [vmem:[%s2045_s9 + $0x18] sm:$0xff] (%p111_p3)  ;;  %v234_v2 = vld [vmem:[%s2045_s9 + $0x30] sm:$0xff] (%p111_p3)  ;;  %s2050_s10 = scalar_lea.vmem (%p111_p3), [#allocation3], %s1864_s6 }
  0x15   : > { %231 = vst [vmem:[%s2050_s10] sm:$0xff] %v230_v0  ;;  %v236_v3 = vld [vmem:[%s2045_s9 + $0x48] sm:$0xff]  ;;  %v238_v4 = vld [vmem:[%s2045_s9 + $0x60] sm:$0xff]  ;;  %v240_v5 = vld [vmem:[%s2045_s9 + $0x78] sm:$0xff] }
  0x16   : > { %233 = vst [vmem:[%s2050_s10 + $0xc] sm:$0xff] %v232_v1  ;;  %v242_v6 = vld [vmem:[%s2045_s9 + $0x90] sm:$0xff]  ;;  %v244_v7 = vld [vmem:[%s2045_s9 + $0xa8] sm:$0xff]  ;;  %v246_v8 = vld [vmem:[%s2045_s9 + $0xc0] sm:$0xff] }
  0x17   : > { %235 = vst [vmem:[%s2050_s10 + $0x18] sm:$0xff] %v234_v2  ;;  %v248_v9 = vld [vmem:[%s2045_s9 + $0xd8] sm:$0xff]  ;;  %v250_v10 = vld [vmem:[%s2045_s9 + $0xf0] sm:$0xff]  ;;  %v252_v11 = vld [vmem:[%s2045_s9 + $0x108] sm:$0xff] }
  0x18   : > { %237 = vst [vmem:[%s2050_s10 + $0x24] sm:$0xff] %v236_v3  ;;  %v254_v12 = vld [vmem:[%s2045_s9 + $0x120] sm:$0xff]  ;;  %v256_v13 = vld [vmem:[%s2045_s9 + $0x138] sm:$0xff]  ;;  %v258_v14 = vld [vmem:[%s2045_s9 + $0x150] sm:$0xff] }
  0x19   : > { %239 = vst [vmem:[%s2050_s10 + $0x30] sm:$0xff] %v238_v4  ;;  %v260_v15 = vld [vmem:[%s2045_s9 + $0x168] sm:$0xff]  ;;  %v262_v16 = vld [vmem:[%s2045_s9 + $0x180] sm:$0xff]  ;;  %v264_v17 = vld [vmem:[%s2045_s9 + $0x198] sm:$0xff] }
  0x1a   : > { %241 = vst [vmem:[%s2050_s10 + $0x3c] sm:$0xff] %v240_v5  ;;  %v266_v18 = vld [vmem:[%s2045_s9 + $0x1b0] sm:$0xff]  ;;  %v268_v19 = vld [vmem:[%s2045_s9 + $0x1c8] sm:$0xff]  ;;  %v270_v20 = vld [vmem:[%s2045_s9 + $0x1e0] sm:$0xff] }
  0x1b   : > { %243 = vst [vmem:[%s2050_s10 + $0x48] sm:$0xff] %v242_v6  ;;  %v272_v21 = vld [vmem:[%s2045_s9 + $0x1f8] sm:$0xff]  ;;  %v274_v22 = vld [vmem:[%s2045_s9 + $0x210] sm:$0xff]  ;;  %v276_v23 = vld [vmem:[%s2045_s9 + $0x228] sm:$0xff] }
  0x1c   : > { %245 = vst [vmem:[%s2050_s10 + $0x54] sm:$0xff] %v244_v7  ;;  %v278_v24 = vld [vmem:[%s2045_s9 + $0x240] sm:$0xff]  ;;  %v280_v25 = vld [vmem:[%s2045_s9 + $0x258] sm:$0xff]  ;;  %v282_v26 = vld [vmem:[%s2045_s9 + $0x270] sm:$0xff] }
  0x1d   : > { %247 = vst [vmem:[%s2050_s10 + $0x60] sm:$0xff] %v246_v8  ;;  %v284_v27 = vld [vmem:[%s2045_s9 + $0x288] sm:$0xff]  ;;  %v286_v28 = vld [vmem:[%s2045_s9 + $0x2a0] sm:$0xff]  ;;  %v288_v29 = vld [vmem:[%s2045_s9 + $0x2b8] sm:$0xff] }
  0x1e   : > { %249 = vst [vmem:[%s2050_s10 + $0x6c] sm:$0xff] %v248_v9  ;;  %v290_v30 = vld [vmem:[%s2045_s9 + $0x2d0] sm:$0xff]  ;;  %v292_v31 = vld [vmem:[%s2045_s9 + $0x2e8] sm:$0xff]  ;;  %v1483_v33 = vld [vmem:[%s2045_s9 + $0x20] sm:$0xf] }
  0x1f   : > { %251 = vst [vmem:[%s2050_s10 + $0x78] sm:$0xff] %v250_v10  ;;  %v1481_v32 = vld [vmem:[%s2045_s9 + $0x8] sm:$0xf]  ;;  %v1485_v34 = vld [vmem:[%s2045_s9 + $0x38] sm:$0xf] }
  0x20   : > { %253 = vst [vmem:[%s2050_s10 + $0x84] sm:$0xff] %v252_v11  ;;  %v1487_v35 = vld [vmem:[%s2045_s9 + $0x50] sm:$0xf]  ;;  %v1489_v36 = vld [vmem:[%s2045_s9 + $0x68] sm:$0xf] }
  0x21   : > { %255 = vst [vmem:[%s2050_s10 + $0x90] sm:$0xff] %v254_v12  ;;  %v1491_v37 = vld [vmem:[%s2045_s9 + $0x80] sm:$0xf]  ;;  %v1493_v38 = vld [vmem:[%s2045_s9 + $0x98] sm:$0xf] }
  0x22   : > { %257 = vst [vmem:[%s2050_s10 + $0x9c] sm:$0xff] %v256_v13  ;;  %v1495_v39 = vld [vmem:[%s2045_s9 + $0xb0] sm:$0xf]  ;;  %v1497_v40 = vld [vmem:[%s2045_s9 + $0xc8] sm:$0xf] }
  0x23   : > { %259 = vst [vmem:[%s2050_s10 + $0xa8] sm:$0xff] %v258_v14  ;;  %v1499_v41 = vld [vmem:[%s2045_s9 + $0xe0] sm:$0xf]  ;;  %v1501_v42 = vld [vmem:[%s2045_s9 + $0xf8] sm:$0xf] }
  0x24   : > { %261 = vst [vmem:[%s2050_s10 + $0xb4] sm:$0xff] %v260_v15  ;;  %v1503_v43 = vld [vmem:[%s2045_s9 + $0x110] sm:$0xf]  ;;  %v1505_v44 = vld [vmem:[%s2045_s9 + $0x128] sm:$0xf] }
  0x25   : > { %263 = vst [vmem:[%s2050_s10 + $0xc0] sm:$0xff] %v262_v16  ;;  %v1507_v45 = vld [vmem:[%s2045_s9 + $0x140] sm:$0xf]  ;;  %v1509_v46 = vld [vmem:[%s2045_s9 + $0x158] sm:$0xf] }
  0x26   : > { %265 = vst [vmem:[%s2050_s10 + $0xcc] sm:$0xff] %v264_v17  ;;  %v1511_v47 = vld [vmem:[%s2045_s9 + $0x170] sm:$0xf]  ;;  %v1513_v48 = vld [vmem:[%s2045_s9 + $0x188] sm:$0xf] }
  0x27   : > { %267 = vst [vmem:[%s2050_s10 + $0xd8] sm:$0xff] %v266_v18  ;;  %v1515_v49 = vld [vmem:[%s2045_s9 + $0x1a0] sm:$0xf]  ;;  %v1517_v50 = vld [vmem:[%s2045_s9 + $0x1b8] sm:$0xf] }
  0x28   : > { %269 = vst [vmem:[%s2050_s10 + $0xe4] sm:$0xff] %v268_v19  ;;  %v1519_v51 = vld [vmem:[%s2045_s9 + $0x1d0] sm:$0xf]  ;;  %v1521_v52 = vld [vmem:[%s2045_s9 + $0x1e8] sm:$0xf] }
  0x29   : > { %271 = vst [vmem:[%s2050_s10 + $0xf0] sm:$0xff] %v270_v20  ;;  %v1523_v53 = vld [vmem:[%s2045_s9 + $0x200] sm:$0xf]  ;;  %v1525_v54 = vld [vmem:[%s2045_s9 + $0x218] sm:$0xf] }
  0x2a   : > { %273 = vst [vmem:[%s2050_s10 + $0xfc] sm:$0xff] %v272_v21  ;;  %v1527_v55 = vld [vmem:[%s2045_s9 + $0x230] sm:$0xf]  ;;  %v1529_v56 = vld [vmem:[%s2045_s9 + $0x248] sm:$0xf] }
  0x2b   : > { %275 = vst [vmem:[%s2050_s10 + $0x108] sm:$0xff] %v274_v22  ;;  %v1531_v57 = vld [vmem:[%s2045_s9 + $0x260] sm:$0xf]  ;;  %v1533_v58 = vld [vmem:[%s2045_s9 + $0x278] sm:$0xf] }
  0x2c   : > { %277 = vst [vmem:[%s2050_s10 + $0x114] sm:$0xff] %v276_v23  ;;  %v1535_v59 = vld [vmem:[%s2045_s9 + $0x290] sm:$0xf]  ;;  %v1537_v60 = vld [vmem:[%s2045_s9 + $0x2a8] sm:$0xf] }
  0x2d   : > { %279 = vst [vmem:[%s2050_s10 + $0x120] sm:$0xff] %v278_v24  ;;  %v1539_v61 = vld [vmem:[%s2045_s9 + $0x2c0] sm:$0xf]  ;;  %v1541_v62 = vld [vmem:[%s2045_s9 + $0x2d8] sm:$0xf] }
  0x2e   : > { %281 = vst [vmem:[%s2050_s10 + $0x12c] sm:$0xff] %v280_v25  ;;  %v1543_v63 = vld [vmem:[%s2045_s9 + $0x2f0] sm:$0xf] }
  0x2f   : > { %283 = vst [vmem:[%s2050_s10 + $0x138] sm:$0xff] %v282_v26 }
  0x30   : > { %285 = vst [vmem:[%s2050_s10 + $0x144] sm:$0xff] %v284_v27 }
  0x31   : > { %287 = vst [vmem:[%s2050_s10 + $0x150] sm:$0xff] %v286_v28 }
  0x32   : > { %289 = vst [vmem:[%s2050_s10 + $0x15c] sm:$0xff] %v288_v29 }
  0x33   : > { %291 = vst [vmem:[%s2050_s10 + $0x168] sm:$0xff] %v290_v30 }
  0x34   : > { %293 = vst [vmem:[%s2050_s10 + $0x174] sm:$0xff] %v292_v31 }
  0x35   : > { %1482 = vst [vmem:[%s2050_s10 + $0x8] sm:$0xf] %v1481_v32 }
  0x36   : > { %1484 = vst [vmem:[%s2050_s10 + $0x14] sm:$0xf] %v1483_v33 }
  0x37   : > { %1486 = vst [vmem:[%s2050_s10 + $0x20] sm:$0xf] %v1485_v34 }
  0x38   : > { %1488 = vst [vmem:[%s2050_s10 + $0x2c] sm:$0xf] %v1487_v35 }
  0x39   : > { %1490 = vst [vmem:[%s2050_s10 + $0x38] sm:$0xf] %v1489_v36 }
  0x3a   : > { %1492 = vst [vmem:[%s2050_s10 + $0x44] sm:$0xf] %v1491_v37 }
  0x3b   : > { %1494 = vst [vmem:[%s2050_s10 + $0x50] sm:$0xf] %v1493_v38 }
  0x3c   : > { %1496 = vst [vmem:[%s2050_s10 + $0x5c] sm:$0xf] %v1495_v39 }
  0x3d   : > { %1498 = vst [vmem:[%s2050_s10 + $0x68] sm:$0xf] %v1497_v40 }
  0x3e   : > { %1500 = vst [vmem:[%s2050_s10 + $0x74] sm:$0xf] %v1499_v41 }
  0x3f   : > { %1502 = vst [vmem:[%s2050_s10 + $0x80] sm:$0xf] %v1501_v42 }
  0x40   : > { %1504 = vst [vmem:[%s2050_s10 + $0x8c] sm:$0xf] %v1503_v43 }
  0x41   : > { %1506 = vst [vmem:[%s2050_s10 + $0x98] sm:$0xf] %v1505_v44 }
  0x42   : > { %1508 = vst [vmem:[%s2050_s10 + $0xa4] sm:$0xf] %v1507_v45 }
  0x43   : > { %1510 = vst [vmem:[%s2050_s10 + $0xb0] sm:$0xf] %v1509_v46 }
  0x44   : > { %1512 = vst [vmem:[%s2050_s10 + $0xbc] sm:$0xf] %v1511_v47 }
  0x45   : > { %1514 = vst [vmem:[%s2050_s10 + $0xc8] sm:$0xf] %v1513_v48 }
  0x46   : > { %1516 = vst [vmem:[%s2050_s10 + $0xd4] sm:$0xf] %v1515_v49 }
  0x47   : > { %1518 = vst [vmem:[%s2050_s10 + $0xe0] sm:$0xf] %v1517_v50 }
  0x48   : > { %1520 = vst [vmem:[%s2050_s10 + $0xec] sm:$0xf] %v1519_v51 }
  0x49   : > { %1522 = vst [vmem:[%s2050_s10 + $0xf8] sm:$0xf] %v1521_v52 }
  0x4a   : > { %1524 = vst [vmem:[%s2050_s10 + $0x104] sm:$0xf] %v1523_v53 }
  0x4b   : > { %1526 = vst [vmem:[%s2050_s10 + $0x110] sm:$0xf] %v1525_v54 }
  0x4c   : > { %1528 = vst [vmem:[%s2050_s10 + $0x11c] sm:$0xf] %v1527_v55 }
  0x4d   : > { %1530 = vst [vmem:[%s2050_s10 + $0x128] sm:$0xf] %v1529_v56 }
  0x4e   : > { %1532 = vst [vmem:[%s2050_s10 + $0x134] sm:$0xf] %v1531_v57 }
  0x4f   : > { %1534 = vst [vmem:[%s2050_s10 + $0x140] sm:$0xf] %v1533_v58 }
  0x50   : > { %1536 = vst [vmem:[%s2050_s10 + $0x14c] sm:$0xf] %v1535_v59 }
  0x51   : > { %1538 = vst [vmem:[%s2050_s10 + $0x158] sm:$0xf] %v1537_v60 }
  0x52   : > { %1540 = vst [vmem:[%s2050_s10 + $0x164] sm:$0xf] %v1539_v61 }
  0x53   : > { %1542 = vst [vmem:[%s2050_s10 + $0x170] sm:$0xf] %v1541_v62 }
  0x54   : > { %1544 = vst [vmem:[%s2050_s10 + $0x17c] sm:$0xf] %v1543_v63 }
  0x55 PF: > { %p1545_p8 = scmp.ge.s32.totalorder %s1964_s22, 1  ;;  %p378_p9 = scmp.lt.s32.totalorder %s1964_s22, 3 }
  0x57   : > { %p379_p10 = pnand %p1545_p8, %p378_p9 }
  0x58   : > { %s385_s11 = sand.u32 (!%p379_p10), 1, %s1948_s18   ;;  %s429_s12 = smul.u32 (!%p379_p10), 3, %s1956_s20 }
  0x59   : > { %382 = sbr.rel (%p379_p10) target bundleno = 678 (0x2a6), region = 62  ;;  %p1546_p12 = scmp.ne.s32.totalorder (!%p379_p10), %s1956_s20, 0 }
  0x5a   : > { %s1865_s13 = smul.u32 (!%p379_p10), 384, %s385_s11  ;;  %p430_p11 = scmp.lt.s32.totalorder (!%p379_p10), %s429_s12, 5 }
  0x5b   : > { %s1866_s14 = smul.u32 (!%p379_p10), 96, %s385_s11 }
  0x5c   : > { %s2187_s24 = scalar_lea.vmem (!%p379_p10), [#allocation3], %s1865_s13 }
  0x5d   : > { %s2189_s25 = scalar_lea.vmem (!%p379_p10), [#allocation4], %s1866_s14 }
  0x5e   : > { %s2698_s12 = smov (!%p430_p11, %s429_s12), 5  ;;  %439 = sbr.rel (%p1546_p12) target bundleno = 408 (0x198), region = 70 }
  0x5f   : > { %s432_s17 = scalar_lea.vmem %s2688_s4, %s2698_s12 }
  0x63   : > { %v2195_v0 = vld [vmem:[%s2684_s0 + $0x40] sm:$0xff]  ;;  %v2200_v1 = vld [vmem:[%s2684_s0 + $0x48] sm:$0xff]  ;;  %v450_v9 = vld [vmem:[%s2684_s0 + $0x50] sm:$0xff]  ;;  %v1966_v24 = vmov 256.0  }
  0x64   : > { %v444_v2 = vld [vmem:[%s2684_s0 + $0x20] sm:$0xff]  ;;  %v468_v3 = vadd.f32 %v2200_v1, %v2195_v0  ;;  %v445_v4 = vld [vmem:[%s2684_s0 + $0x28] sm:$0xff]  ;;  %v451_v10 = vld [vmem:[%s2684_s0 + $0x58] sm:$0xff]  ;;  %1908 = vrcp.f32 %v1966_v24 }
  0x65   : > { %v440_v5 = vld [vmem:[%s2684_s0] sm:$0xff]  ;;  %v441_v6 = vld [vmem:[%s2684_s0 + $0x8] sm:$0xff]  ;;  %v462_v7 = vadd.f32 %v445_v4, %v444_v2  ;;  %v446_v11 = vld [vmem:[%s2684_s0 + $0x30] sm:$0xff]  ;;  %v471_v15 = vadd.f32 %v451_v10, %v450_v9 }
  0x66   : > { %v456_v8 = vadd.f32 %v441_v6, %v440_v5  ;;  %469 = vadd.xlane.f32.xlu2 %v468_v3  ;;  %v447_v12 = vld [vmem:[%s2684_s0 + $0x38] sm:$0xff]  ;;  %v442_v13 = vld [vmem:[%s2684_s0 + $0x10] sm:$0xff]  ;;  %v2237_v18 = vld [vmem:[%s2684_s0 + $0x60] sm:$0xff] }
  0x67   : > { %463 = vadd.xlane.f32.xlu1 %v462_v7  ;;  %v443_v14 = vld [vmem:[%s2684_s0 + $0x18] sm:$0xff]  ;;  %v465_v16 = vadd.f32 %v447_v12, %v446_v11  ;;  %v2242_v19 = vld [vmem:[%s2684_s0 + $0x68] sm:$0xff]  ;;  %v2247_v20 = vld [vmem:[%s2684_s0 + $0x70] sm:$0xff] }
  0x68   : > { %457 = vadd.xlane.f32.xlu0 %v456_v8  ;;  %v459_v17 = vadd.f32 %v443_v14, %v442_v13  ;;  %v2252_v21 = vld [vmem:[%s2684_s0 + $0x78] sm:$0xff]  ;;  %v474_v22 = vadd.f32 %v2242_v19, %v2237_v18 }
  0x69   : > { %v477_v23 = vadd.f32 %v2252_v21, %v2247_v20 }
  0x6a   : > { %v1909_v25 = vpop.eup %1908 }
  0x6b   : > { %v481_v26 = vmul.f32 256.0, %v1909_v25  ;;  %vm485_vm0 = vweird.f32 %v1909_v25 }
  0x6d   : > { %v482_v27 = vsub.f32 1.0, %v481_v26 }
  0x6e   : > { %472 = vadd.xlane.f32.xlu2 %v471_v15 }
  0x6f   : > { %466 = vadd.xlane.f32.xlu1 %v465_v16  ;;  %v483_v28 = vmul.f32 %v1909_v25, %v482_v27 }
  0x70   : > { %460 = vadd.xlane.f32.xlu0 %v459_v17 }
  0x71   : > { %v484_v29 = vadd.f32 %v1909_v25, %v483_v28 }
  0x73   : > { %v2258_v30 = vsel %vm485_vm0, %v1909_v25, %v484_v29 }
  0x77   : > { %478 = vadd.xlane.f32.xlu1 %v477_v23 }
  0x78   : > { %475 = vadd.xlane.f32.xlu0 %v474_v22 }
  0xd9   : > { %v470_v31 = vpop.xlane.xlu2 %469 }
  0xda   : > { %v464_v32 = vpop.xlane.xlu1 %463  ;;  %v491_v52 = vmul.f32 %v2258_v30, %v470_v31 }
  0xdb   : > { %v458_v33 = vpop.xlane.xlu0 %457  ;;  %v489_v34 = vmul.f32 %v2258_v30, %v464_v32 }
  0xdc   : > { %v487_v35 = vmul.f32 %v2258_v30, %v458_v33  ;;  %v2307_v3 = vsub.f32 %v2195_v0, %v491_v52 }
  0xdd   : > { %v2262_v36 = vsub.f32 %v444_v2, %v489_v34  ;;  %v2264_v37 = vsub.f32 %v445_v4, %v489_v34  ;;  %v2310_v4 = vsub.f32 %v2200_v1, %v491_v52 }
  0xde   : > { %v2266_v38 = vsub.f32 %v440_v5, %v487_v35  ;;  %v2268_v39 = vsub.f32 %v441_v6, %v487_v35 }
  0xdf   : > { %v515_v40 = vmul.f32 %v2262_v36, %v2262_v36  ;;  %v516_v41 = vmul.f32 %v2264_v37, %v2264_v37  ;;  %v520_v0 = vmul.f32 %v2310_v4, %v2310_v4 }
  0xe0   : > { %v511_v42 = vmul.f32 %v2266_v38, %v2266_v38  ;;  %v512_v43 = vmul.f32 %v2268_v39, %v2268_v39 }
  0xe1   : > { %v473_v44 = vpop.xlane.xlu2 %472  ;;  %v533_v45 = vadd.f32 %v516_v41, %v515_v40 }
  0xe2   : > { %v527_v46 = vadd.f32 %v512_v43, %v511_v42  ;;  %v492_v47 = vmul.f32 %v2258_v30, %v473_v44  ;;  %v467_v48 = vpop.xlane.xlu1 %466 }
  0xe3   : > { %v461_v49 = vpop.xlane.xlu0 %460  ;;  %v490_v50 = vmul.f32 %v2258_v30, %v467_v48  ;;  %534 = vadd.xlane.f32.xlu1 %v533_v45 }
  0xe4   : > { %v488_v51 = vmul.f32 %v2258_v30, %v461_v49  ;;  %528 = vadd.xlane.f32.xlu2 %v527_v46  ;;  %v2282_v53 = vsub.f32 %v450_v9, %v492_v47  ;;  %v2284_v54 = vsub.f32 %v451_v10, %v492_v47  ;;  %v663_v46 = vld [vmem:[%s2685_s1] sm:$0x3] }
  0xe5   : > { %v2286_v55 = vsub.f32 %v446_v11, %v490_v50  ;;  %v2288_v56 = vsub.f32 %v447_v12, %v490_v50  ;;  %v519_v12 = vmul.f32 %v2307_v3, %v2307_v3  ;;  %v685_v47 = vld [vmem:[%s2686_s2] sm:$0x3]  ;;  %v2360_v52 = vperm.slane %v663_v46, 1 }
  0xe6   : > { %v2290_v57 = vsub.f32 %v442_v13, %v488_v51  ;;  %v2292_v58 = vsub.f32 %v443_v14, %v488_v51  ;;  %v521_v59 = vmul.f32 %v2282_v53, %v2282_v53  ;;  %v522_v60 = vmul.f32 %v2284_v54, %v2284_v54 }
  0xe7   : > { %v517_v61 = vmul.f32 %v2286_v55, %v2286_v55  ;;  %v518_v62 = vmul.f32 %v2288_v56, %v2288_v56  ;;  %v539_v22 = vadd.f32 %v520_v0, %v519_v12  ;;  %v2358_v51 = vperm.slane %v663_v46, 0 }
  0xe8   : > { %v513_v63 = vmul.f32 %v2290_v57, %v2290_v57  ;;  %v514_v2 = vmul.f32 %v2292_v58, %v2292_v58  ;;  %v542_v5 = vadd.f32 %v522_v60, %v521_v59  ;;  %v2362_v59 = vperm.slane %v685_v47, 0 }
  0xe9   : > { %v536_v6 = vadd.f32 %v518_v62, %v517_v61  ;;  %v2364_v62 = vperm.slane %v685_v47, 1 }
  0xea   : > { %v530_v7 = vadd.f32 %v514_v2, %v513_v63  ;;  %v479_v9 = vpop.xlane.xlu1 %478 }
  0xeb   : > { %v476_v8 = vpop.xlane.xlu0 %475  ;;  %543 = vadd.xlane.f32.xlu1 %v542_v5  ;;  %v494_v11 = vmul.f32 %v2258_v30, %v479_v9 }
  0xec   : > { %v493_v10 = vmul.f32 %v2258_v30, %v476_v8  ;;  %537 = vadd.xlane.f32.xlu2 %v536_v6  ;;  %531 = vadd.xlane.f32.xlu0 %v530_v7 }
  0xed   : > { %v2329_v16 = vsub.f32 %v2247_v20, %v494_v11  ;;  %v2332_v17 = vsub.f32 %v2252_v21, %v494_v11 }
  0xee   : > { %v2319_v1 = vsub.f32 %v2237_v18, %v493_v10  ;;  %v2322_v13 = vsub.f32 %v2242_v19, %v493_v10 }
  0xef   : > { %v525_v18 = vmul.f32 %v2329_v16, %v2329_v16  ;;  %v526_v19 = vmul.f32 %v2332_v17, %v2332_v17 }
  0xf0   : > { %v523_v14 = vmul.f32 %v2319_v1, %v2319_v1  ;;  %v524_v15 = vmul.f32 %v2322_v13, %v2322_v13 }
  0xf1   : > { %v548_v24 = vadd.f32 %v526_v19, %v525_v18 }
  0xf2   : > { %v545_v23 = vadd.f32 %v524_v15, %v523_v14 }
  0xf4   : > { %546 = vadd.xlane.f32.xlu2 %v545_v23  ;;  %540 = vadd.xlane.f32.xlu0 %v539_v22 }
  0xfc   : > { %549 = vadd.xlane.f32.xlu0 %v548_v24 }
 0x156   : > { %v535_v25 = vpop.xlane.xlu1 %534 }
 0x157   : > { %v529_v26 = vpop.xlane.xlu2 %528  ;;  %v553_v20 = vmul.f32 %v535_v25, %v2258_v30 }
 0x158   : > { %v551_v27 = vmul.f32 %v529_v26, %v2258_v30 }
 0x159   : > { %v561_v21 = vadd.f32 1e-05, %v553_v20 }
 0x15a   : > { %v559_v28 = vadd.f32 1e-05, %v551_v27 }
 0x15b   : > { %1910 = vrsqrt.f32 %v561_v21  ;;  %vm593_vm1 = vweird.f32 %v561_v21 }
 0x15c   : > { %1912 = vrsqrt.f32 %v559_v28  ;;  %vm573_vm3 = vweird.f32 %v559_v28 }
 0x15e   : > { %v544_v29 = vpop.xlane.xlu1 %543 }
 0x15f   : > { %v538_v31 = vpop.xlane.xlu2 %537  ;;  %v556_v32 = vmul.f32 %v544_v29, %v2258_v30  ;;  %v532_v34 = vpop.xlane.xlu0 %531 }
 0x160   : > { %v554_v33 = vmul.f32 %v538_v31, %v2258_v30  ;;  %v552_v35 = vmul.f32 %v532_v34, %v2258_v30 }
 0x161   : > { %v1911_v40 = vpop.eup %1910  ;;  %v2343_v41 = vadd.f32 1e-05, %v556_v32 }
 0x162   : > { %v2345_v42 = vadd.f32 1e-05, %v554_v33  ;;  %v1913_v43 = vpop.eup %1912  ;;  %v588_v44 = vmul.f32 %v1911_v40, %v561_v21  ;;  %v2347_v45 = vadd.f32 1e-05, %v552_v35  ;;  %vm594_vm2 = vweird.f32 %v1911_v40 }
 0x163   : > { %v568_v48 = vmul.f32 %v1913_v43, %v559_v28  ;;  %1914 = vrsqrt.f32 %v2343_v41  ;;  %vm574_vm4 = vweird.f32 %v1913_v43  ;;  %vm623_vm5 = vweird.f32 %v2343_v41  ;;  %vm595_vm8 = vmor %vm593_vm1, %vm594_vm2 }
 0x164   : > { %v589_v49 = vmul.f32 %v1911_v40, %v588_v44  ;;  %1916 = vrsqrt.f32 %v2345_v42  ;;  %vm603_vm7 = vweird.f32 %v2345_v42  ;;  %vm575_vm9 = vmor %vm573_vm3, %vm574_vm4  ;;  %vm583_vm11 = vweird.f32 %v2347_v45 }
 0x165   : > { %v569_v50 = vmul.f32 %v1913_v43, %v568_v48  ;;  %1918 = vrsqrt.f32 %v2347_v45 }
 0x166   : > { %v590_v60 = vmul.f32 0.5, %v589_v49 }
 0x167   : > { %v547_v61 = vpop.xlane.xlu2 %546  ;;  %v570_v63 = vmul.f32 0.5, %v569_v50  ;;  %v541_v5 = vpop.xlane.xlu0 %540 }
 0x168   : > { %v557_v2 = vmul.f32 %v547_v61, %v2258_v30  ;;  %v591_v6 = vsub.f32 1.5, %v590_v60  ;;  %v555_v7 = vmul.f32 %v541_v5, %v2258_v30 }
 0x169   : > { %v1915_v8 = vpop.eup %1914  ;;  %v571_v9 = vsub.f32 1.5, %v570_v63 }
 0x16a   : > { %v2369_v10 = vadd.f32 1e-05, %v557_v2  ;;  %v1917_v11 = vpop.eup %1916  ;;  %v592_v12 = vmul.f32 %v1911_v40, %v591_v6  ;;  %v618_v0 = vmul.f32 %v1915_v8, %v2343_v41  ;;  %vm624_vm6 = vweird.f32 %v1915_v8 }
 0x16b   : > { %v1919_v14 = vpop.eup %1918  ;;  %v572_v15 = vmul.f32 %v1913_v43, %v571_v9  ;;  %v598_v22 = vmul.f32 %v1917_v11, %v2345_v42  ;;  %v2376_v23 = vadd.f32 1e-05, %v555_v7  ;;  %vm604_vm10 = vweird.f32 %v1917_v11  ;;  %vm625_vm13 = vmor %vm623_vm5, %vm624_vm6 }
 0x16c   : > { %1920 = vrsqrt.f32 %v2369_v10  ;;  %v596_v18 = vsel %vm595_vm8, %v1911_v40, %v592_v12  ;;  %v619_v19 = vmul.f32 %v1915_v8, %v618_v0  ;;  %v578_v24 = vmul.f32 %v1919_v14, %v2347_v45  ;;  %vm605_vm15 = vmor %vm603_vm7, %vm604_vm10 }
 0x16d   : > { %v651_v25 = vmul.f32 %v596_v18, %v2262_v36  ;;  %v652_v26 = vmul.f32 %v596_v18, %v2264_v37  ;;  %v576_v20 = vsel %vm575_vm9, %v1913_v43, %v572_v15  ;;  %v599_v27 = vmul.f32 %v1917_v11, %v598_v22 }
 0x16e   : > { %v647_v21 = vmul.f32 %v576_v20, %v2266_v38  ;;  %v648_v29 = vmul.f32 %v576_v20, %v2268_v39  ;;  %v620_v31 = vmul.f32 0.5, %v619_v19  ;;  %v579_v32 = vmul.f32 %v1919_v14, %v578_v24 }
 0x16f   : > { %v673_v28 = vmul.f32 %v2358_v51, %v651_v25  ;;  %v674_v33 = vmul.f32 %v2360_v52, %v652_v26  ;;  %v600_v34 = vmul.f32 0.5, %v599_v27  ;;  %vm584_vm12 = vweird.f32 %v1919_v14  ;;  %v550_v63 = vpop.xlane.xlu0 %549 }
 0x170   : > { %v669_v35 = vmul.f32 %v2358_v51, %v647_v21  ;;  %v670_v36 = vmul.f32 %v2360_v52, %v648_v29  ;;  %v621_v40 = vsub.f32 1.5, %v620_v31  ;;  %v580_v37 = vmul.f32 0.5, %v579_v32  ;;  %vm585_vm1 = vmor %vm583_vm11, %vm584_vm12 }
 0x171   : > { %v695_v44 = vadd.f32 %v2362_v59, %v673_v28  ;;  %v696_v38 = vadd.f32 %v2364_v62, %v674_v33  ;;  %v601_v39 = vsub.f32 1.5, %v600_v34  ;;  %1922 = vrsqrt.f32 %v2376_v23 }
 0x172   : > { %v1921_v43 = vpop.eup %1920  ;;  %v691_v46 = vadd.f32 %v2362_v59, %v669_v35  ;;  %v692_v47 = vadd.f32 %v2364_v62, %v670_v36  ;;  %v622_v48 = vmul.f32 %v1915_v8, %v621_v40  ;;  %v581_v49 = vsub.f32 1.5, %v580_v37 }
 0x173   : > { %v709_v50 = vpack.c.bf16 %v696_v38, %v695_v44  ;;  %v602_v60 = vmul.f32 %v1917_v11, %v601_v39  ;;  %v628_v61 = vmul.f32 %v1921_v43, %v2369_v10  ;;  %vm633_vm14 = vweird.f32 %v2369_v10 }
 0x174   : > { %v707_v2 = vpack.c.bf16 %v692_v47, %v691_v46  ;;  %v626_v5 = vsel %vm625_vm13, %v1915_v8, %v622_v48  ;;  %v582_v41 = vmul.f32 %v1919_v14, %v581_v49  ;;  %vm634_vm0 = vweird.f32 %v1921_v43 }
 0x175   : > { %717 = vst [vmem:[#allocation2 + $0x10] sm:$0xff] %v709_v50  ;;  %v657_v6 = vmul.f32 %v626_v5, %v2282_v53  ;;  %v658_v7 = vmul.f32 %v626_v5, %v2284_v54  ;;  %v606_v9 = vsel %vm605_vm15, %v1917_v11, %v602_v60  ;;  %v629_v12 = vmul.f32 %v1921_v43, %v628_v61  ;;  %vm635_vm2 = vmor %vm633_vm14, %vm634_vm0 }
 0x176   : > { %715 = vst [vmem:[#allocation2] sm:$0xff] %v707_v2  ;;  %v653_v8 = vmul.f32 %v606_v9, %v2286_v55  ;;  %v654_v0 = vmul.f32 %v606_v9, %v2288_v56  ;;  %v586_v42 = vsel %vm585_vm1, %v1919_v14, %v582_v41  ;;  %v558_v15 = vmul.f32 %v550_v63, %v2258_v30 }
 0x177   : > { %v1923_v22 = vpop.eup %1922  ;;  %v679_v18 = vmul.f32 %v2358_v51, %v657_v6  ;;  %v680_v53 = vmul.f32 %v2360_v52, %v658_v7  ;;  %v649_v54 = vmul.f32 %v586_v42, %v2290_v57  ;;  %v650_v11 = vmul.f32 %v586_v42, %v2292_v58 }
 0x178   : > { %v675_v45 = vmul.f32 %v2358_v51, %v653_v8  ;;  %v676_v19 = vmul.f32 %v2360_v52, %v654_v0  ;;  %v630_v24 = vmul.f32 0.5, %v629_v12  ;;  %v608_v55 = vmul.f32 %v1923_v22, %v2376_v23 }
 0x179   : > { %v701_v56 = vadd.f32 %v2362_v59, %v679_v18  ;;  %v702_v30 = vadd.f32 %v2364_v62, %v680_v53  ;;  %v671_v14 = vmul.f32 %v2358_v51, %v649_v54  ;;  %v672_v25 = vmul.f32 %v2360_v52, %v650_v11 }
 0x17a   : > { %v697_v26 = vadd.f32 %v2362_v59, %v675_v45  ;;  %v698_v57 = vadd.f32 %v2364_v62, %v676_v19  ;;  %v631_v58 = vsub.f32 1.5, %v630_v24  ;;  %v609_v20 = vmul.f32 %v1923_v22, %v608_v55 }
 0x17b   : > { %v712_v27 = vpack.c.bf16 %v702_v30, %v701_v56  ;;  %v693_v21 = vadd.f32 %v2362_v59, %v671_v14  ;;  %v694_v29 = vadd.f32 %v2364_v62, %v672_v25  ;;  %v566_v33 = vadd.f32 1e-05, %v558_v15 }
 0x17c   : > { %v710_v31 = vpack.c.bf16 %v698_v57, %v697_v26  ;;  %v632_v32 = vmul.f32 %v1921_v43, %v631_v58  ;;  %v610_v28 = vmul.f32 0.5, %v609_v20  ;;  %vm614_vm3 = vweird.f32 %v1923_v22 }
 0x17d   : > { %720 = vst [vmem:[#allocation2 + $0x28] sm:$0xff] %v712_v27  ;;  %v708_v34 = vpack.c.bf16 %v694_v29, %v693_v21  ;;  %1924 = vrsqrt.f32 %v566_v33  ;;  %vm613_vm4 = vweird.f32 %v2376_v23  ;;  %vm643_vm7 = vweird.f32 %v566_v33 }
 0x17e   : > { %718 = vst [vmem:[#allocation2 + $0x18] sm:$0xff] %v710_v31  ;;  %v636_v35 = vsel %vm635_vm2, %v1921_v43, %v632_v32  ;;  %v611_v36 = vsub.f32 1.5, %v610_v28  ;;  %vm615_vm5 = vmor %vm613_vm4, %vm614_vm3 }
 0x17f   : > { %716 = vst [vmem:[#allocation2 + $0x8] sm:$0xff] %v708_v34  ;;  %v659_v40 = vmul.f32 %v636_v35, %v2319_v1  ;;  %v660_v37 = vmul.f32 %v636_v35, %v2322_v13 }
 0x180   : > { %v612_v44 = vmul.f32 %v1923_v22, %v611_v36 }
 0x181   : > { %v681_v38 = vmul.f32 %v2358_v51, %v659_v40  ;;  %v682_v39 = vmul.f32 %v2360_v52, %v660_v37 }
 0x182   : > { %v616_v10 = vsel %vm615_vm5, %v1923_v22, %v612_v44 }
 0x183   : > { %v703_v46 = vadd.f32 %v2362_v59, %v681_v38  ;;  %v704_v43 = vadd.f32 %v2364_v62, %v682_v39  ;;  %v655_v47 = vmul.f32 %v616_v10, %v2307_v3  ;;  %v656_v48 = vmul.f32 %v616_v10, %v2310_v4  ;;  %v1925_v1 = vpop.eup %1924 }
 0x184   : > { %v638_v50 = vmul.f32 %v1925_v1, %v566_v33  ;;  %vm644_vm6 = vweird.f32 %v1925_v1 }
 0x185   : > { %v713_v49 = vpack.c.bf16 %v704_v43, %v703_v46  ;;  %v677_v13 = vmul.f32 %v2358_v51, %v655_v47  ;;  %v678_v23 = vmul.f32 %v2360_v52, %v656_v48  ;;  %vm645_vm8 = vmor %vm643_vm7, %vm644_vm6 }
 0x186   : > { %v639_v63 = vmul.f32 %v1925_v1, %v638_v50 }
 0x187   : > { %721 = vst [vmem:[#allocation2 + $0x30] sm:$0xff] %v713_v49  ;;  %v699_v60 = vadd.f32 %v2362_v59, %v677_v13  ;;  %v700_v61 = vadd.f32 %v2364_v62, %v678_v23 }
 0x188   : > { %v640_v5 = vmul.f32 0.5, %v639_v63 }
 0x189   : > { %v711_v2 = vpack.c.bf16 %v700_v61, %v699_v60 }
 0x18a   : > { %v641_v41 = vsub.f32 1.5, %v640_v5 }
 0x18b   : > { %719 = vst [vmem:[#allocation2 + $0x20] sm:$0xff] %v711_v2 }
 0x18c   : > { %v642_v3 = vmul.f32 %v1925_v1, %v641_v41 }
 0x18e   : > { %v646_v4 = vsel %vm645_vm8, %v1925_v1, %v642_v3 }
 0x18f   : > { %v661_v6 = vmul.f32 %v646_v4, %v2329_v16  ;;  %v662_v7 = vmul.f32 %v646_v4, %v2332_v17 }
 0x191   : > { %v683_v9 = vmul.f32 %v2358_v51, %v661_v6  ;;  %v684_v12 = vmul.f32 %v2360_v52, %v662_v7 }
 0x193   : > { %v705_v8 = vadd.f32 %v2362_v59, %v683_v9  ;;  %v706_v0 = vadd.f32 %v2364_v62, %v684_v12 }
 0x195   : > { %v714_v42 = vpack.c.bf16 %v706_v0, %v705_v8 }
 0x197   : > { %722 = vst [vmem:[#allocation2 + $0x38] sm:$0xff] %v714_v42 }
 0x198 PF: > { %v1665_v16 = vld [vmem:[%s2187_s24 + $0xa8] sm:$0xf]  ;;  %v1821_v17 = vld [vmem:[%s2187_s24 + $0xb0] sm:$0xf0]  ;;  %v1653_v62 = vld [vmem:[%s2187_s24 + $0x90] sm:$0xf] }
 0x199   : > { %v1761_v51 = vld [vmem:[%s2187_s24 + $0x168] sm:$0xf]  ;;  %v1666_v52 = vor.u32 %v1821_v17, %v1665_v16  ;;  %v1845_v59 = vld [vmem:[%s2187_s24 + $0x170] sm:$0xf0]  ;;  %v1818_v15 = vld [vmem:[%s2187_s24 + $0x98] sm:$0xf0] }
 0x19a   : > { %v1762_v22 = vor.u32 %v1845_v59, %v1761_v51  ;;  %v1749_v18 = vld [vmem:[%s2187_s24 + $0x150] sm:$0xf]  ;;  %v1842_v53 = vld [vmem:[%s2187_s24 + $0x158] sm:$0xf0]  ;;  %v1654_v54 = vor.u32 %v1818_v15, %v1653_v62  ;;  %v1641_v45 = vld [vmem:[%s2187_s24 + $0x78] sm:$0xf] }
 0x19b   : > { %1099 = vmatpush.bf16.msra.mxu0 %v1666_v52  ;;  %1848 = vmatpush.bf16.msra.mxu2 %v1666_v52  ;;  %v1750_v11 = vor.u32 %v1842_v53, %v1749_v18  ;;  %v1815_v19 = vld [vmem:[%s2187_s24 + $0x80] sm:$0xf0]  ;;  %v1737_v24 = vld [vmem:[%s2187_s24 + $0x138] sm:$0xf]  ;;  %v1629_v14 = vld [vmem:[%s2187_s24 + $0x60] sm:$0xf] }
 0x19c   : > { %1128 = vmatpush.bf16.msra.mxu1 %v1762_v22  ;;  %1856 = vmatpush.bf16.msra.mxu3 %v1762_v22  ;;  %v1839_v55 = vld [vmem:[%s2187_s24 + $0x140] sm:$0xf0]  ;;  %v1642_v56 = vor.u32 %v1815_v19, %v1641_v45  ;;  %v1812_v25 = vld [vmem:[%s2187_s24 + $0x68] sm:$0xf0]  ;;  %v1725_v26 = vld [vmem:[%s2187_s24 + $0x120] sm:$0xf] }
 0x19d   : > { %v1738_v30 = vor.u32 %v1839_v55, %v1737_v24  ;;  %v1836_v57 = vld [vmem:[%s2187_s24 + $0x128] sm:$0xf0]  ;;  %v1630_v58 = vor.u32 %v1812_v25, %v1629_v14  ;;  %v1617_v27 = vld [vmem:[%s2187_s24 + $0x48] sm:$0xf]  ;;  %v1809_v21 = vld [vmem:[%s2187_s24 + $0x50] sm:$0xf0] }
 0x19e   : > { %v1726_v20 = vor.u32 %v1836_v57, %v1725_v26  ;;  %v1713_v29 = vld [vmem:[%s2187_s24 + $0x108] sm:$0xf]  ;;  %v1833_v31 = vld [vmem:[%s2187_s24 + $0x110] sm:$0xf0]  ;;  %v1618_v32 = vor.u32 %v1809_v21, %v1617_v27  ;;  %v1605_v33 = vld [vmem:[%s2187_s24 + $0x30] sm:$0xf] }
 0x19f   : > { %1100 = vmatpush.bf16.msra.mxu0 %v1654_v54  ;;  %1849 = vmatpush.bf16.msra.mxu2 %v1654_v54  ;;  %v1714_v28 = vor.u32 %v1833_v31, %v1713_v29  ;;  %v1806_v34 = vld [vmem:[%s2187_s24 + $0x38] sm:$0xf0]  ;;  %v1701_v35 = vld [vmem:[%s2187_s24 + $0xf0] sm:$0xf]  ;;  %v1593_v44 = vld [vmem:[%s2187_s24 + $0x18] sm:$0xf] }
 0x1a0   : > { %1129 = vmatpush.bf16.msra.mxu1 %v1750_v11  ;;  %1857 = vmatpush.bf16.msra.mxu3 %v1750_v11  ;;  %v1830_v36 = vld [vmem:[%s2187_s24 + $0xf8] sm:$0xf0]  ;;  %v1606_v40 = vor.u32 %v1806_v34, %v1605_v33  ;;  %v1803_v38 = vld [vmem:[%s2187_s24 + $0x20] sm:$0xf0]  ;;  %v1689_v39 = vld [vmem:[%s2187_s24 + $0xd8] sm:$0xf] }
 0x1a1   : > { %v1702_v37 = vor.u32 %v1830_v36, %v1701_v35  ;;  %v1827_v10 = vld [vmem:[%s2187_s24 + $0xe0] sm:$0xf0]  ;;  %v1594_v46 = vor.u32 %v1803_v38, %v1593_v44  ;;  %v1581_v43 = vld [vmem:[%s2187_s24] sm:$0xf]  ;;  %v1800_v48 = vld [vmem:[%s2187_s24 + $0x8] sm:$0xf0] }
 0x1a2   : > { %v1690_v47 = vor.u32 %v1827_v10, %v1689_v39  ;;  %v1677_v1 = vld [vmem:[%s2187_s24 + $0xc0] sm:$0xf]  ;;  %v1824_v49 = vld [vmem:[%s2187_s24 + $0xc8] sm:$0xf0]  ;;  %v1792_v23 = vld [vmem:[#allocation2 + $0x4] sm:$0xf0]  ;;  %v1582_v41 = vor.u32 %v1800_v48, %v1581_v43 }
 0x1a3   : > { %1101 = vmatpush.bf16.msra.mxu0 %v1642_v56  ;;  %1850 = vmatpush.bf16.msra.mxu2 %v1642_v56  ;;  %v1549_v13 = vld [vmem:[#allocation2] sm:$0xf]  ;;  %v1796_v60 = vld [vmem:[#allocation2 + $0x24] sm:$0xf0]  ;;  %v1820_v61 = vld [vmem:[%s2187_s24 + $0xac] sm:$0xf]  ;;  %v1678_v7 = vor.u32 %v1824_v49, %v1677_v1 }
 0x1a4   : > { %1130 = vmatpush.bf16.msra.mxu1 %v1738_v30  ;;  %1858 = vmatpush.bf16.msra.mxu3 %v1738_v30  ;;  %v1565_v50 = vld [vmem:[#allocation2 + $0x20] sm:$0xf]  ;;  %v1667_v63 = vld [vmem:[%s2187_s24 + $0xb4] sm:$0xf0]  ;;  %v1844_v2 = vld [vmem:[%s2187_s24 + $0x16c] sm:$0xf]  ;;  %v2489_v52 = vor.u32 %v1792_v23, %v1549_v13 }
 0x1a5   : > { %v1763_v5 = vld [vmem:[%s2187_s24 + $0x174] sm:$0xf0]  ;;  %v1791_v3 = vld [vmem:[#allocation2 + $0x4] sm:$0xf]  ;;  %v1551_v4 = vld [vmem:[#allocation2 + $0x8] sm:$0xf0]  ;;  %v1670_v0 = vor.u32 %v1820_v61, %v1667_v63  ;;  %v2491_v59 = vor.u32 %v1796_v60, %v1565_v50 }
 0x1a6   : > { %v1795_v6 = vld [vmem:[#allocation2 + $0x24] sm:$0xf]  ;;  %v1567_v9 = vld [vmem:[#allocation2 + $0x28] sm:$0xf0]  ;;  %v1673_v12 = vld [vmem:[%s2187_s24 + $0xb0] sm:$0xf]  ;;  %v1766_v42 = vor.u32 %v1844_v2, %v1763_v5  ;;  %v2496_v18 = vor.u32 %v1791_v3, %v1551_v4 }
 0x1a7   : > { %1102 = vmatpush.bf16.msra.mxu0 %v1630_v58  ;;  %1851 = vmatpush.bf16.msra.mxu2 %v1630_v58  ;;  %v1822_v8 = vld [vmem:[%s2187_s24 + $0xb8] sm:$0xf0]  ;;  %v1769_v16 = vld [vmem:[%s2187_s24 + $0x170] sm:$0xf]  ;;  %v1817_v51 = vld [vmem:[%s2187_s24 + $0x94] sm:$0xf]  ;;  %v2498_v53 = vor.u32 %v1795_v6, %v1567_v9 }
 0x1a8   : > { %1131 = vmatpush.bf16.msra.mxu1 %v1726_v20  ;;  %1859 = vmatpush.bf16.msra.mxu3 %v1726_v20  ;;  %v1846_v17 = vld [vmem:[%s2187_s24 + $0x178] sm:$0xf0]  ;;  %v1655_v62 = vld [vmem:[%s2187_s24 + $0x9c] sm:$0xf0]  ;;  %v1841_v15 = vld [vmem:[%s2187_s24 + $0x154] sm:$0xf]  ;;  %v1674_v54 = vor.u32 %v1822_v8, %v1673_v12 }
 0x1a9   : > { %v1751_v22 = vld [vmem:[%s2187_s24 + $0x15c] sm:$0xf0]  ;;  %v1770_v11 = vor.u32 %v1846_v17, %v1769_v16  ;;  %v1661_v45 = vld [vmem:[%s2187_s24 + $0x98] sm:$0xf]  ;;  %v1819_v19 = vld [vmem:[%s2187_s24 + $0xa0] sm:$0xf0]  ;;  %v1658_v24 = vor.u32 %v1817_v51, %v1655_v62 }
 0x1aa   : > { %v1754_v55 = vor.u32 %v1841_v15, %v1751_v22  ;;  %v1757_v56 = vld [vmem:[%s2187_s24 + $0x158] sm:$0xf]  ;;  %v1843_v30 = vld [vmem:[%s2187_s24 + $0x160] sm:$0xf0]  ;;  %v1814_v14 = vld [vmem:[%s2187_s24 + $0x7c] sm:$0xf]  ;;  %v1662_v58 = vor.u32 %v1819_v19, %v1661_v45 }
 0x1ab   : > { %1103 = vmatpush.bf16.msra.mxu0 %v1618_v32  ;;  %1852 = vmatpush.bf16.msra.mxu2 %v1618_v32  ;;  %v1643_v25 = vld [vmem:[%s2187_s24 + $0x84] sm:$0xf0]  ;;  %v1838_v26 = vld [vmem:[%s2187_s24 + $0x13c] sm:$0xf]  ;;  %v1758_v20 = vor.u32 %v1843_v30, %v1757_v56  ;;  %v1649_v27 = vld [vmem:[%s2187_s24 + $0x80] sm:$0xf] }
 0x1ac   : > { %1132 = vmatpush.bf16.msra.mxu1 %v1714_v28  ;;  %1860 = vmatpush.bf16.msra.mxu3 %v1714_v28  ;;  %v1739_v57 = vld [vmem:[%s2187_s24 + $0x144] sm:$0xf0]  ;;  %v1816_v21 = vld [vmem:[%s2187_s24 + $0x88] sm:$0xf0]  ;;  %v1646_v29 = vor.u32 %v1814_v14, %v1643_v25  ;;  %v1745_v32 = vld [vmem:[%s2187_s24 + $0x140] sm:$0xf] }
 0x1ad   : > { %v1742_v31 = vor.u32 %v1838_v26, %v1739_v57  ;;  %v1840_v28 = vld [vmem:[%s2187_s24 + $0x148] sm:$0xf0]  ;;  %v1811_v33 = vld [vmem:[%s2187_s24 + $0x64] sm:$0xf]  ;;  %v1631_v34 = vld [vmem:[%s2187_s24 + $0x6c] sm:$0xf0] }
 0x1ae   : > { %v1835_v35 = vld [vmem:[%s2187_s24 + $0x124] sm:$0xf]  ;;  %v1727_v36 = vld [vmem:[%s2187_s24 + $0x12c] sm:$0xf0]  ;;  %v1746_v44 = vor.u32 %v1840_v28, %v1745_v32  ;;  %v1813_v38 = vld [vmem:[%s2187_s24 + $0x70] sm:$0xf0] }
 0x1af   : > { %1104 = vmatpush.bf16.msra.mxu0 %v1606_v40  ;;  %1853 = vmatpush.bf16.msra.mxu2 %v1606_v40  ;;  %v1637_v40 = vld [vmem:[%s2187_s24 + $0x68] sm:$0xf]  ;;  %v1837_v10 = vld [vmem:[%s2187_s24 + $0x130] sm:$0xf0]  ;;  %v1730_v43 = vor.u32 %v1835_v35, %v1727_v36  ;;  %v1794_v48 = vld [vmem:[#allocation2 + $0x14] sm:$0xf0] }
 0x1b0   : > { %1133 = vmatpush.bf16.msra.mxu1 %v1702_v37  ;;  %1861 = vmatpush.bf16.msra.mxu3 %v1702_v37  ;;  %v1650_v37 = vor.u32 %v1816_v21, %v1649_v27  ;;  %v1733_v39 = vld [vmem:[%s2187_s24 + $0x128] sm:$0xf]  ;;  %v1573_v1 = vld [vmem:[#allocation2 + $0x30] sm:$0xf]  ;;  %v1798_v49 = vld [vmem:[#allocation2 + $0x34] sm:$0xf0]  ;;  %v1638_v5 = vor.u32 %v1813_v38, %v1637_v40 }
 0x1b1   : > { %v1808_v13 = vld [vmem:[%s2187_s24 + $0x4c] sm:$0xf]  ;;  %v1619_v23 = vld [vmem:[%s2187_s24 + $0x54] sm:$0xf0]  ;;  %v1793_v61 = vld [vmem:[#allocation2 + $0x14] sm:$0xf]  ;;  %v2535_v16 = vor.u32 %v1798_v49, %v1573_v1 }
 0x1b2   : > { %v1832_v50 = vld [vmem:[%s2187_s24 + $0x10c] sm:$0xf]  ;;  %v1715_v60 = vld [vmem:[%s2187_s24 + $0x114] sm:$0xf0]  ;;  %v1559_v63 = vld [vmem:[#allocation2 + $0x18] sm:$0xf0] }
 0x1b3   : > { %1105 = vmatpush.bf16.msra.mxu0 %v1594_v46  ;;  %1854 = vmatpush.bf16.msra.mxu2 %v1594_v46  ;;  %v1634_v46 = vor.u32 %v1811_v33, %v1631_v34  ;;  %v1797_v2 = vld [vmem:[#allocation2 + $0x34] sm:$0xf]  ;;  %v1575_v3 = vld [vmem:[#allocation2 + $0x38] sm:$0xf0]  ;;  %v1625_v4 = vld [vmem:[%s2187_s24 + $0x50] sm:$0xf]  ;;  %v1718_v9 = vor.u32 %v1832_v50, %v1715_v60  ;;  %v2540_v15 = vor.u32 %v1793_v61, %v1559_v63 }
 0x1b4   : > { %1134 = vmatpush.bf16.msra.mxu1 %v1690_v47  ;;  %1862 = vmatpush.bf16.msra.mxu3 %v1690_v47  ;;  %v1557_v47 = vld [vmem:[#allocation2 + $0x10] sm:$0xf]  ;;  %v1810_v6 = vld [vmem:[%s2187_s24 + $0x58] sm:$0xf0]  ;;  %v1607_v17 = vld [vmem:[%s2187_s24 + $0x3c] sm:$0xf0]  ;;  %v2542_v22 = vor.u32 %v1797_v2, %v1575_v3 }
 0x1b5   : > { %v1721_v12 = vld [vmem:[%s2187_s24 + $0x110] sm:$0xf]  ;;  %v1834_v8 = vld [vmem:[%s2187_s24 + $0x118] sm:$0xf0]  ;;  %v1829_v51 = vld [vmem:[%s2187_s24 + $0xf4] sm:$0xf] }
 0x1b6   : > { %v1703_v62 = vld [vmem:[%s2187_s24 + $0xfc] sm:$0xf0]  ;;  %v1613_v45 = vld [vmem:[%s2187_s24 + $0x38] sm:$0xf]  ;;  %v1807_v19 = vld [vmem:[%s2187_s24 + $0x40] sm:$0xf0] }
 0x1b7   : > { %1106 = vmatpush.bf16.msra.mxu0 %v1582_v41  ;;  %1855 = vmatpush.bf16.msra.mxu2 %v1582_v41  ;;  %v1734_v41 = vor.u32 %v1837_v10, %v1733_v39  ;;  %v1709_v56 = vld [vmem:[%s2187_s24 + $0xf8] sm:$0xf]  ;;  %v1831_v30 = vld [vmem:[%s2187_s24 + $0x100] sm:$0xf0]  ;;  %v1802_v14 = vld [vmem:[%s2187_s24 + $0x1c] sm:$0xf] }
 0x1b8   : > { %1135 = vmatpush.bf16.msra.mxu1 %v1678_v7  ;;  %1863 = vmatpush.bf16.msra.mxu3 %v1678_v7  ;;  %v1622_v7 = vor.u32 %v1808_v13, %v1619_v23  ;;  %v1595_v25 = vld [vmem:[%s2187_s24 + $0x24] sm:$0xf0]  ;;  %v1826_v26 = vld [vmem:[%s2187_s24 + $0xdc] sm:$0xf]  ;;  %v1601_v27 = vld [vmem:[%s2187_s24 + $0x20] sm:$0xf] }
 0x1b9   : > { %v1691_v57 = vld [vmem:[%s2187_s24 + $0xe4] sm:$0xf0]  ;;  %v1804_v21 = vld [vmem:[%s2187_s24 + $0x28] sm:$0xf0]  ;;  %v1697_v32 = vld [vmem:[%s2187_s24 + $0xe0] sm:$0xf] }
 0x1ba   : > { %1107 = vmatmul.bf16.vlgmr.msra.gmra.mxu0 %v2489_v52  ;;  %1117 = vmatmul.bf16.vlgmr.msra.gmra.mxu2 %v2491_v59  ;;  %v1828_v28 = vld [vmem:[%s2187_s24 + $0xe8] sm:$0xf0]  ;;  %v1799_v33 = vld [vmem:[%s2187_s24 + $0x4] sm:$0xf]  ;;  %v1583_v34 = vld [vmem:[%s2187_s24 + $0xc] sm:$0xf0]  ;;  %v1602_v40 = vor.u32 %v1804_v21, %v1601_v27 }
 0x1bb   : > { %1157 = vmatpush.bf16.msrb.mxu2 %v1670_v0  ;;  %1136 = vmatmul.bf16.vlgmr.msra.gmra.mxu1 %v2496_v18  ;;  %v1805_v0 = vld [vmem:[%s2187_s24 + $0x34] sm:$0xf]  ;;  %v1823_v35 = vld [vmem:[%s2187_s24 + $0xc4] sm:$0xf]  ;;  %v1679_v36 = vld [vmem:[%s2187_s24 + $0xcc] sm:$0xf0]  ;;  %v1586_v38 = vor.u32 %v1799_v33, %v1583_v34 }
 0x1bc   : > { %1186 = vmatpush.bf16.msrb.mxu3 %v1766_v42  ;;  %1215 = vmatpush.bf16.msrb.mxu0 %v1674_v54  ;;  %v2533_v42 = vor.u32 %v1794_v48, %v1557_v47  ;;  %v1626_v54 = vor.u32 %v1810_v6, %v1625_v4  ;;  %v1682_v39 = vor.u32 %v1823_v35, %v1679_v36  ;;  %v1801_v10 = vld [vmem:[%s2187_s24 + $0x10] sm:$0xf0]  ;;  %s1847_s12 = smul.u32 (%p2032_p6), 12, %s1956_s20 }
 0x1bd   : > { %1146 = vmatmul.bf16.vlgmr.msra.gmra.mxu3 %v2498_v53  ;;  %1244 = vmatpush.bf16.msrb.mxu1 %v1770_v11  ;;  %v1722_v11 = vor.u32 %v1834_v8, %v1721_v12 }
 0x1be   : > { %s1317_s13 = scalar_lea.vmem (%p2032_p6), %s2689_s5, %s1847_s12 }
 0x1bf   : > { %1158 = vmatpush.bf16.msrb.mxu2 %v1658_v24  ;;  %v1610_v24 = vor.u32 %v1805_v0, %v1607_v17 }
 0x1c0   : > { %1187 = vmatpush.bf16.msrb.mxu3 %v1754_v55  ;;  %1216 = vmatpush.bf16.msrb.mxu0 %v1662_v58  ;;  %v1706_v55 = vor.u32 %v1829_v51, %v1703_v62  ;;  %v1614_v58 = vor.u32 %v1807_v19, %v1613_v45 }
 0x1c1   : > { %1245 = vmatpush.bf16.msrb.mxu1 %v1758_v20  ;;  %v1710_v20 = vor.u32 %v1831_v30, %v1709_v56 }
 0x1c3   : > { %1159 = vmatpush.bf16.msrb.mxu2 %v1646_v29  ;;  %v1598_v29 = vor.u32 %v1802_v14, %v1595_v25 }
 0x1c4   : > { %1188 = vmatpush.bf16.msrb.mxu3 %v1742_v31  ;;  %1217 = vmatpush.bf16.msrb.mxu0 %v1650_v37  ;;  %v1694_v31 = vor.u32 %v1826_v26, %v1691_v57  ;;  %v1698_v37 = vor.u32 %v1828_v28, %v1697_v32 }
 0x1c5   : > { %1246 = vmatpush.bf16.msrb.mxu1 %v1746_v44  ;;  %v1589_v44 = vld [vmem:[%s2187_s24 + $0x8] sm:$0xf] }
 0x1c6   : > { %v1590_v47 = vor.u32 %v1801_v10, %v1589_v44 }
 0x1c7   : > { %1160 = vmatpush.bf16.msrb.mxu2 %v1634_v46  ;;  %v1685_v46 = vld [vmem:[%s2187_s24 + $0xc8] sm:$0xf] }
 0x1c8   : > { %1189 = vmatpush.bf16.msrb.mxu3 %v1730_v43  ;;  %1218 = vmatpush.bf16.msrb.mxu0 %v1638_v5  ;;  %v1825_v43 = vld [vmem:[%s2187_s24 + $0xd0] sm:$0xf0] }
 0x1c9   : > { %1247 = vmatpush.bf16.msrb.mxu1 %v1734_v41  ;;  %v1686_v48 = vor.u32 %v1825_v43, %v1685_v46 }
 0x1ca   : > { %1112 = vmatmul.bf16.gmra.mxu0 %v2533_v42  ;;  %1122 = vmatmul.bf16.gmra.mxu2 %v2535_v16 }
 0x1cb   : > { %1161 = vmatpush.bf16.msrb.mxu2 %v1622_v7  ;;  %1141 = vmatmul.bf16.gmra.mxu1 %v2540_v15 }
 0x1cc   : > { %1190 = vmatpush.bf16.msrb.mxu3 %v1718_v9  ;;  %1219 = vmatpush.bf16.msrb.mxu0 %v1626_v54 }
 0x1cd   : > { %1151 = vmatmul.bf16.gmra.mxu3 %v2542_v22  ;;  %1248 = vmatpush.bf16.msrb.mxu1 %v1722_v11 }
 0x1cf   : > { %1162 = vmatpush.bf16.msrb.mxu2 %v1610_v24 }
 0x1d0   : > { %1191 = vmatpush.bf16.msrb.mxu3 %v1706_v55  ;;  %1220 = vmatpush.bf16.msrb.mxu0 %v1614_v58 }
 0x1d1   : > { %1249 = vmatpush.bf16.msrb.mxu1 %v1710_v20 }
 0x1d3   : > { %1163 = vmatpush.bf16.msrb.mxu2 %v1598_v29 }
 0x1d4   : > { %1192 = vmatpush.bf16.msrb.mxu3 %v1694_v31  ;;  %1221 = vmatpush.bf16.msrb.mxu0 %v1602_v40 }
 0x1d5   : > { %1250 = vmatpush.bf16.msrb.mxu1 %v1698_v37 }
 0x1d7   : > { %1164 = vmatpush.bf16.msrb.mxu2 %v1586_v38 }
 0x1d8   : > { %1193 = vmatpush.bf16.msrb.mxu3 %v1682_v39  ;;  %1222 = vmatpush.bf16.msrb.mxu0 %v1590_v47 }
 0x1d9   : > { %1251 = vmatpush.bf16.msrb.mxu1 %v1686_v48 }
 0x1da   : > { %1165 = vmatmul.bf16.vlgmr.msrb.gmra.mxu2 %v2489_v52 }
 0x1db   : > { %1223 = vmatmul.bf16.vlgmr.msrb.gmra.mxu0 %v2489_v52  ;;  %v795_v52 = vld [vmem:[%s432_s17] sm:$0x7] }
 0x1dc   : > { %1252 = vmatmul.bf16.vlgmr.msrb.gmra.mxu1 %v2496_v18  ;;  %v2589_v49 = vperm.slane %v795_v52, 0  ;;  %v2606_v54 = vperm.slane %v795_v52, 1 }
 0x1dd   : > { %1194 = vmatmul.bf16.vlgmr.msrb.gmra.mxu3 %v2496_v18 }
 0x1ea   : > { %1170 = vmatmul.bf16.gmra.mxu2 %v2533_v42 }
 0x1eb   : > { %1228 = vmatmul.bf16.gmra.mxu0 %v2533_v42  ;;  %v2600_v42 = vperm.slane %v795_v52, 2 }
 0x1ec   : > { %1257 = vmatmul.bf16.gmra.mxu1 %v2540_v15 }
 0x1ed   : > { %1199 = vmatmul.bf16.gmra.mxu3 %v2540_v15 }
 0x1fa   : > { %1175 = vmatmul.bf16.gmra.mxu2 %v2491_v59 }
 0x1fb   : > { %1233 = vmatmul.bf16.gmra.mxu0 %v2491_v59 }
 0x1fc   : > { %1262 = vmatmul.bf16.gmra.mxu1 %v2498_v53 }
 0x1fd   : > { %1204 = vmatmul.bf16.gmra.mxu3 %v2498_v53 }
 0x20a   : > { %1180 = vmatmul.bf16.gmra.mxu2 %v2535_v16 }
 0x20b   : > { %1238 = vmatmul.bf16.gmra.mxu0 %v2535_v16 }
 0x20c   : > { %1267 = vmatmul.bf16.gmra.mxu1 %v2542_v22 }
 0x20d   : > { %1209 = vmatmul.bf16.gmra.mxu3 %v2542_v22 }
 0x237   : > { %v1108_v18 = vpop.f32.mrf.mxu0 }
 0x238   : > { %v1137_v1 = vpop.f32.mrf.mxu1  ;;  %v1109_v45 = vadd.f32 %v1108_v18, %v2589_v49 }
 0x23a   : > { %v1138_v30 = vadd.f32 %v1137_v1, %v1109_v45 }
 0x23d   : > { %v1118_v59 = vpop.f32.mrf.mxu2 }
 0x23e   : > { %v1119_v53 = vadd.f32 %v1118_v59, %v2589_v49 }
 0x23f   : > { %v1110_v23 = vpop.f32.mrf.mxu0 }
 0x240   : > { %v1147_v13 = vpop.f32.mrf.mxu3  ;;  %v1139_v60 = vpop.f32.mrf.mxu1  ;;  %v1111_v27 = vadd.f32 %v1110_v23, %v2589_v49 }
 0x241   : > { %v2592_v50 = vadd.f32 %v1147_v13, %v1119_v53 }
 0x242   : > { %v1140_v28 = vadd.f32 %v1139_v60, %v1111_v27 }
 0x245   : > { %v1120_v61 = vpop.f32.mrf.mxu2 }
 0x246   : > { %v1121_v63 = vadd.f32 %v1120_v61, %v2589_v49 }
 0x247   : > { %v1113_v5 = vpop.f32.mrf.mxu0 }
 0x248   : > { %v1149_v2 = vpop.f32.mrf.mxu3  ;;  %v1142_v3 = vpop.f32.mrf.mxu1  ;;  %v1114_v44 = vadd.f32 %v1113_v5, %v2589_v49 }
 0x249   : > { %v2595_v41 = vadd.f32 %v1149_v2, %v1121_v63 }
 0x24a   : > { %v1143_v43 = vadd.f32 %v1142_v3, %v1114_v44 }
 0x24d   : > { %v1123_v4 = vpop.f32.mrf.mxu2 }
 0x24e   : > { %v1124_v6 = vadd.f32 %v1123_v4, %v2589_v49 }
 0x24f   : > { %v1115_v9 = vpop.f32.mrf.mxu0 }
 0x250   : > { %v1152_v7 = vpop.f32.mrf.mxu3  ;;  %v1144_v8 = vpop.f32.mrf.mxu1  ;;  %v1116_v53 = vadd.f32 %v1115_v9, %v2589_v49 }
 0x251   : > { %v2598_v12 = vadd.f32 %v1152_v7, %v1124_v6 }
 0x252   : > { %v1145_v63 = vadd.f32 %v1144_v8, %v1116_v53 }
 0x255   : > { %v1125_v0 = vpop.f32.mrf.mxu2 }
 0x256   : > { %v1126_v16 = vadd.f32 %v1125_v0, %v2589_v49 }
 0x258   : > { %v1154_v17 = vpop.f32.mrf.mxu3  ;;  %v1224_v62 = vpop.f32.mrf.mxu0 }
 0x259   : > { %v2603_v51 = vadd.f32 %v1154_v17, %v1126_v16  ;;  %v1225_v15 = vadd.f32 %v1224_v62, %v2600_v42  ;;  %v1253_v22 = vpop.f32.mrf.mxu1 }
 0x25b   : > { %v1254_v11 = vadd.f32 %v1253_v22, %v1225_v15 }
 0x25d   : > { %v1274_v19 = vpack.c.bf16 %v1254_v11, %v1254_v11  ;;  %v1166_v24 = vpop.f32.mrf.mxu2 }
 0x25e   : > { %v1167_v55 = vadd.f32 %v1166_v24, %v2606_v54 }
 0x25f   : > { %1290 = vst [vmem:[%s2189_s25 + $0x8] sm:$0xf] %v1274_v19 }
 0x260   : > { %v1195_v56 = vpop.f32.mrf.mxu3  ;;  %v1226_v25 = vpop.f32.mrf.mxu0 }
 0x261   : > { %v1196_v14 = vadd.f32 %v1195_v56, %v1167_v55  ;;  %v1227_v26 = vadd.f32 %v1226_v25, %v2600_v42  ;;  %v1255_v57 = vpop.f32.mrf.mxu1 }
 0x263   : > { %v1273_v58 = vpack.c.bf16 %v1196_v14, %v1138_v30  ;;  %v1256_v20 = vadd.f32 %v1255_v57, %v1227_v26 }
 0x265   : > { %1289 = vst [vmem:[%s2189_s25] sm:$0xff] %v1273_v58  ;;  %v1276_v21 = vpack.c.bf16 %v1256_v20, %v1256_v20  ;;  %v1168_v29 = vpop.f32.mrf.mxu2 }
 0x266   : > { %v1169_v31 = vadd.f32 %v1168_v29, %v2606_v54 }
 0x267   : > { %1292 = vst [vmem:[%s2189_s25 + $0x14] sm:$0xf] %v1276_v21 }
 0x268   : > { %v1197_v32 = vpop.f32.mrf.mxu3  ;;  %v1229_v34 = vpop.f32.mrf.mxu0 }
 0x269   : > { %v1198_v33 = vadd.f32 %v1197_v32, %v1169_v31  ;;  %v1230_v35 = vadd.f32 %v1229_v34, %v2600_v42  ;;  %v1258_v36 = vpop.f32.mrf.mxu1 }
 0x26b   : > { %v1275_v40 = vpack.c.bf16 %v1198_v33, %v1140_v28  ;;  %v1259_v37 = vadd.f32 %v1258_v36, %v1230_v35 }
 0x26d   : > { %1291 = vst [vmem:[%s2189_s25 + $0xc] sm:$0xff] %v1275_v40  ;;  %v1278_v38 = vpack.c.bf16 %v1259_v37, %v1259_v37  ;;  %v1171_v39 = vpop.f32.mrf.mxu2 }
 0x26e   : > { %v1172_v10 = vadd.f32 %v1171_v39, %v2606_v54 }
 0x26f   : > { %1294 = vst [vmem:[%s2189_s25 + $0x20] sm:$0xf] %v1278_v38 }
 0x270   : > { %v1200_v46 = vpop.f32.mrf.mxu3  ;;  %v1231_v48 = vpop.f32.mrf.mxu0 }
 0x271   : > { %v1201_v47 = vadd.f32 %v1200_v46, %v1172_v10  ;;  %v1232_v52 = vadd.f32 %v1231_v48, %v2600_v42  ;;  %v1260_v18 = vpop.f32.mrf.mxu1  ;;  %v1772_v46 = vld [vmem:[%s2189_s25 + $0x8] sm:$0xf] (%p2032_p6) }
 0x272   : > { %1773 = vst [vmem:[%s1317_s13 + $0x8] sm:$0xf] (%p2032_p6), %v1772_v46 }
 0x273   : > { %v1277_v1 = vpack.c.bf16 %v1201_v47, %v1143_v43  ;;  %v1261_v59 = vadd.f32 %v1260_v18, %v1232_v52  ;;  %v1774_v43 = vld [vmem:[%s2189_s25 + $0x14] sm:$0xf] (%p2032_p6) }
 0x274   : > { %1775 = vst [vmem:[%s1317_s13 + $0x20] sm:$0xf] (%p2032_p6), %v1774_v43 }
 0x275   : > { %1293 = vst [vmem:[%s2189_s25 + $0x18] sm:$0xff] %v1277_v1  ;;  %v1280_v13 = vpack.c.bf16 %v1261_v59, %v1261_v59  ;;  %v1173_v23 = vpop.f32.mrf.mxu2 }
 0x276   : > { %v1174_v60 = vadd.f32 %v1173_v23, %v2606_v54  ;;  %v1776_v47 = vld [vmem:[%s2189_s25 + $0x20] sm:$0xf] (%p2032_p6) }
 0x277   : > { %1296 = vst [vmem:[%s2189_s25 + $0x2c] sm:$0xf] %v1280_v13 }
 0x278   : > { %v1202_v61 = vpop.f32.mrf.mxu3  ;;  %v1234_v5 = vpop.f32.mrf.mxu0  ;;  %1777 = vst [vmem:[%s1317_s13 + $0x38] sm:$0xf] (%p2032_p6), %v1776_v47 }
 0x279   : > { %v1203_v2 = vadd.f32 %v1202_v61, %v1174_v60  ;;  %v1235_v3 = vadd.f32 %v1234_v5, %v2600_v42  ;;  %v1263_v4 = vpop.f32.mrf.mxu1 }
 0x27b   : > { %v1279_v6 = vpack.c.bf16 %v1203_v2, %v1145_v63  ;;  %v1264_v7 = vadd.f32 %v1263_v4, %v1235_v3 }
 0x27d   : > { %1295 = vst [vmem:[%s2189_s25 + $0x24] sm:$0xff] %v1279_v6  ;;  %v1282_v0 = vpack.c.bf16 %v1264_v7, %v1264_v7  ;;  %v1176_v49 = vpop.f32.mrf.mxu2 }
 0x27e   : > { %v1177_v9 = vadd.f32 %v1176_v49, %v2606_v54  ;;  %v1778_v48 = vld [vmem:[%s2189_s25 + $0x2c] sm:$0xf] (%p2032_p6) }
 0x27f   : > { %1298 = vst [vmem:[%s2189_s25 + $0x38] sm:$0xf] %v1282_v0 }
 0x280   : > { %v1205_v16 = vpop.f32.mrf.mxu3  ;;  %v1236_v62 = vpop.f32.mrf.mxu0  ;;  %1779 = vst [vmem:[%s1317_s13 + $0x50] sm:$0xf] (%p2032_p6), %v1778_v48 }
 0x281   : > { %v1206_v17 = vadd.f32 %v1205_v16, %v1177_v9  ;;  %v1237_v8 = vadd.f32 %v1236_v62, %v2600_v42  ;;  %v1265_v15 = vpop.f32.mrf.mxu1 }
 0x283   : > { %v1281_v22 = vpack.c.bf16 %v1206_v17, %v2592_v50  ;;  %v1266_v11 = vadd.f32 %v1265_v15, %v1237_v8 }
 0x285   : > { %1297 = vst [vmem:[%s2189_s25 + $0x30] sm:$0xff] %v1281_v22  ;;  %v1284_v45 = vpack.c.bf16 %v1266_v11, %v1266_v11  ;;  %v1178_v19 = vpop.f32.mrf.mxu2 }
 0x286   : > { %v1179_v24 = vadd.f32 %v1178_v19, %v2606_v54  ;;  %v1780_v52 = vld [vmem:[%s2189_s25 + $0x38] sm:$0xf] (%p2032_p6) }
 0x287   : > { %1300 = vst [vmem:[%s2189_s25 + $0x44] sm:$0xf] %v1284_v45 }
 0x288   : > { %v1207_v55 = vpop.f32.mrf.mxu3  ;;  %v1239_v30 = vpop.f32.mrf.mxu0  ;;  %1781 = vst [vmem:[%s1317_s13 + $0x68] sm:$0xf] (%p2032_p6), %v1780_v52 }
 0x289   : > { %v1208_v56 = vadd.f32 %v1207_v55, %v1179_v24  ;;  %v1240_v14 = vadd.f32 %v1239_v30, %v2600_v42  ;;  %v1268_v25 = vpop.f32.mrf.mxu1 }
 0x28b   : > { %v1283_v26 = vpack.c.bf16 %v1208_v56, %v2595_v41  ;;  %v1269_v57 = vadd.f32 %v1268_v25, %v1240_v14 }
 0x28c   : > { %v1340_v44 = vld [vmem:[%s2189_s25 + $0x30] sm:$0xff] (%p2032_p6) }
 0x28d   : > { %1299 = vst [vmem:[%s2189_s25 + $0x3c] sm:$0xff] %v1283_v26  ;;  %v1286_v50 = vpack.c.bf16 %v1269_v57, %v1269_v57  ;;  %v1181_v58 = vpop.f32.mrf.mxu2 }
 0x28e   : > { %v1182_v20 = vadd.f32 %v1181_v58, %v2606_v54  ;;  %1341 = vst [vmem:[%s1317_s13 + $0x60] sm:$0xff] (%p2032_p6), %v1340_v44  ;;  %v1782_v18 = vld [vmem:[%s2189_s25 + $0x44] sm:$0xf] (%p2032_p6) }
 0x28f   : > { %1302 = vst [vmem:[%s2189_s25 + $0x50] sm:$0xf] %v1286_v50 }
 0x290   : > { %v1210_v27 = vpop.f32.mrf.mxu3  ;;  %v1241_v29 = vpop.f32.mrf.mxu0  ;;  %1783 = vst [vmem:[%s1317_s13 + $0x80] sm:$0xf] (%p2032_p6), %v1782_v18 }
 0x291   : > { %v1211_v21 = vadd.f32 %v1210_v27, %v1182_v20  ;;  %v1242_v31 = vadd.f32 %v1241_v29, %v2600_v42  ;;  %v1270_v28 = vpop.f32.mrf.mxu1  ;;  %v1334_v42 = vld [vmem:[%s2189_s25 + $0xc] sm:$0xff] (%p2032_p6) }
 0x292   : > { %1335 = vst [vmem:[%s1317_s13 + $0x18] sm:$0xff] (%p2032_p6), %v1334_v42 }
 0x293   : > { %v1285_v32 = vpack.c.bf16 %v1211_v21, %v2598_v12  ;;  %v1271_v33 = vadd.f32 %v1270_v28, %v1242_v31  ;;  %v1332_v12 = vld [vmem:[%s2189_s25] sm:$0xff] (%p2032_p6) }
 0x294   : > { %1333 = vst [vmem:[%s1317_s13] sm:$0xff] (%p2032_p6), %v1332_v12  ;;  %v1342_v38 = vld [vmem:[%s2189_s25 + $0x3c] sm:$0xff] (%p2032_p6) }
 0x295   : > { %1301 = vst [vmem:[%s2189_s25 + $0x48] sm:$0xff] %v1285_v32  ;;  %v1288_v41 = vpack.c.bf16 %v1271_v33, %v1271_v33  ;;  %v1183_v34 = vpop.f32.mrf.mxu2 }
 0x296   : > { %v1184_v35 = vadd.f32 %v1183_v34, %v2606_v54  ;;  %v1338_v54 = vld [vmem:[%s2189_s25 + $0x24] sm:$0xff] (%p2032_p6)  ;;  %1343 = vst [vmem:[%s1317_s13 + $0x78] sm:$0xff] (%p2032_p6), %v1342_v38  ;;  %v1784_v1 = vld [vmem:[%s2189_s25 + $0x50] sm:$0xf] (%p2032_p6) }
 0x297   : > { %1304 = vst [vmem:[%s2189_s25 + $0x5c] sm:$0xf] %v1288_v41 }
 0x298   : > { %v1212_v36 = vpop.f32.mrf.mxu3  ;;  %1339 = vst [vmem:[%s1317_s13 + $0x48] sm:$0xff] (%p2032_p6), %v1338_v54 }
 0x299   : > { %v1213_v40 = vadd.f32 %v1212_v36, %v1184_v35  ;;  %1311 = sbr.rel (!%p2032_p6) target bundleno = 678 (0x2a6), region = 74  ;;  %1785 = vst [vmem:[%s1317_s13 + $0x98] sm:$0xf] (%p2032_p6), %v1784_v1 }
 0x29b   : > { %v1287_v37 = vpack.c.bf16 %v1213_v40, %v2603_v51  ;;  %v1336_v51 = vld [vmem:[%s2189_s25 + $0x18] sm:$0xff] (%p2032_p6) }
 0x29c   : > { %1337 = vst [vmem:[%s1317_s13 + $0x30] sm:$0xff] (%p2032_p6), %v1336_v51  ;;  %v1344_v39 = vld [vmem:[%s2189_s25 + $0x48] sm:$0xff] (%p2032_p6) }
 0x29d   : > { %1303 = vst [vmem:[%s2189_s25 + $0x54] sm:$0xff] %v1287_v37 }
 0x29e   : > { %1345 = vst [vmem:[%s1317_s13 + $0x90] sm:$0xff] %v1344_v39  ;;  %v1786_v59 = vld [vmem:[%s2189_s25 + $0x5c] sm:$0xf] }
 0x29f   : > { %1787 = vst [vmem:[%s1317_s13 + $0xb0] sm:$0xf] %v1786_v59 }
 0x2a4   : > { %v1346_v10 = vld [vmem:[%s2189_s25 + $0x54] sm:$0xff] }
 0x2a5   : > { %1347 = vst [vmem:[%s1317_s13 + $0xa8] sm:$0xff] %v1346_v10 }
 0x2a6 PF: > { %s15_s22 = sadd.s32 1, %s1964_s22   ;;  %s2691_s18 = smov %s1952_s19 }
 0x2a7   : > { %p12_p13 = scmp.ge.s32.totalorder %s15_s22, 4   ;;  %s2692_s19 = smov %s2037_s28 }
 0x2a8   : > { %s2693_s20 = smov %s1960_s21  ;;  %s2694_s21 = smov %s2696_s23 }
 0x2a9   :  { %14 = sbr.rel (!%p12_p13) target bundleno = 3 (0x3), region = 149 }

// kernel: vit_encoder_forward.14
= control target key start
LH: loop header
LB: loop body
LE: loop exit
PB: predicated region body
PF: predicated region fallthrough
CT: control target
= control target key end

     0   :  { %s1111_s0 = inlined_call_operand.vmem [shape: bf16[4,16,768], index: 0, kind: input, shape index: {}, may-alias: {0,1,2}]   ;;  %s1112_s1 = inlined_call_operand.vmem [shape: bf16[4,16,768], index: 1, kind: input, shape index: {}, may-alias: {0,1,2}]   ;;  %s1113_s2 = inlined_call_operand.vmem [shape: bf16[4,16,768], index: 2, kind: input, shape index: {}, may-alias: {0,1,2}]   ;;  %s1114_s3 = inlined_call_operand.vmem [shape: bf16[4,16,256], index: 3, kind: output, shape index: {}]  }
   0x1   :  { %1117 = sst [smem:[#allocation9_spill]] %s1114_s3 }
   0x2   :  { %s912_s12 = smov 0   ;;  %s914_s13 = smov 0  }
   0x3   :  { %s916_s14 = smov 0   ;;  %s918_s15 = smov 0  }
   0x4   :  { %s920_s16 = smov 0   ;;  %s922_s17 = smov 0  }
   0x5   :  { %s924_s18 = smov 0   ;;  %s926_s19 = smov 0  }
   0x6   :  { %s928_s20 = smov 0   ;;  %s930_s21 = smov 0  }
   0x7   :  { %s932_s22 = smov 0  }
   0x8 LB: > { %s28_s24 = sadd.s32 1, %s882_s20  ;;  %s32_s25 = sadd.s32 1, %s886_s21  ;;  %s890_s22 = sphi %s932_s22, %s13_s22   ;;  %s886_s21 = sphi %s930_s21, %s1139_s21   ;;  %s882_s20 = sphi %s928_s20, %s1138_s20   ;;  %s878_s19 = sphi %s926_s19, %s1137_s19   ;;  %s874_s18 = sphi %s924_s18, %s1136_s18   ;;  %s870_s17 = sphi %s922_s17, %s1135_s17   ;;  %s866_s16 = sphi %s920_s16, %s1134_s16   ;;  %s862_s15 = sphi %s918_s15, %s1133_s15   ;;  %s858_s14 = sphi %s916_s14, %s1132_s14   ;;  %s854_s13 = sphi %s914_s13, %s1131_s13   ;;  %s850_s12 = sphi %s912_s12, %s1130_s12  }
   0x9   : > { %p30_p0 = scmp.ge.s32.totalorder %s28_s24, 2  ;;  %s43_s26 = sadd.s32 1, %s870_s17 }
   0xa   : > { %p50_p1 = scmp.ne.s32.totalorder %s870_s17, %s866_s16  ;;  %p51_p2 = scmp.eq.s32.totalorder %s890_s22, 0 }
   0xb   : > { %s1141_s24 = smov (%p30_p0, %s28_s24), 0  ;;  %s1143_s25 = smov (!%p30_p0, %s32_s25), %s886_s21 }
   0xc   : > { %1118 = sst [smem:[#allocation6_spill]] %s1141_s24  ;;  %s39_s27 = ssub.s32 %s882_s20, %s1141_s24 }
   0xd   : > { %p34_p3 = scmp.ge.s32.totalorder %s1143_s25, 4  ;;  %s66_s28 = sadd.s32 2, %s882_s20 }
   0xe   : > { %p985_p4 = por %p51_p2, %p50_p1  ;;  %s67_s30 = sadd.s32 2, %s1141_s24 }
   0xf   : > { %s1145_s25 = smov (%p34_p3, %s1143_s25), 0  ;;  %s69_s4 = ssub.s32 %s66_s28, %s67_s30 }
  0x10   : > { %1120 = sst [smem:[#allocation7_spill]] %s1145_s25  ;;  %s73_s5 = sadd.s32 1, %s862_s15 }
  0x11   : > { %s36_s6 = ssub.s32 %s886_s21, %s1145_s25  ;;  %p80_p5 = scmp.ne.s32.totalorder %s862_s15, %s858_s14 }
  0x12   : > { %s40_s7 = sor.u32 %s39_s27, %s36_s6  ;;  %s70_s8 = sor.u32 %s69_s4, %s36_s6 }
  0x13   : > { %p41_p6 = scmp.eq.s32.totalorder %s40_s7, 0  ;;  %p71_p7 = scmp.eq.s32.totalorder %s70_s8, 0 }
  0x14   : > { %p999_p8 = por %p80_p5, %p51_p2  ;;  %s96_s10 = sadd.s32 4, %s882_s20 }
  0x15   : > { %s1005_s11 = scalar_select %p41_p6, %s870_s17, %s43_s26  }
  0x16   : > { %s1008_s28 = scalar_select %p71_p7, %s862_s15, %s73_s5  }
  0x17   : > { %1122 = sst [smem:[#allocation8_spill]] %s1005_s11  ;;  %s97_s30 = sadd.s32 4, %s1141_s24 }
  0x18   : > { %s103_s23 = sadd.s32 1, %s854_s13  ;;  %s99_s25 = ssub.s32 %s96_s10, %s97_s30 }
  0x19   : > { %p110_p9 = scmp.ne.s32.totalorder %s854_s13, %s850_s12  ;;  %s100_s27 = sor.u32 %s99_s25, %s36_s6 }
  0x1a   : > { %s1123_s3 = sadd.s32 4294967295, %s890_s22   ;;  %p101_p11 = scmp.eq.s32.totalorder %s100_s27, 0 }
  0x1b   : > { %p144_p10 = scmp.eq.s32.totalorder %s1123_s3, 7  ;;  %p1018_p12 = por %p110_p9, %p51_p2 }
  0x1c   : > { %s1030_s26 = scalar_select %p101_p11, %s854_s13, %s103_s23  }
  0x1d   : > { %p1025_p13 = por %p144_p10, %p50_p1  ;;  %p665_p0 = scmp.ge.s32.totalorder %s890_s22, 8 }
  0x1f   : > { %166 = sbr.rel (%p665_p0) target bundleno = 63 (0x3f), region = 16 }
  0x24   : > { %169 = sbr.rel (!%p985_p4) target bundleno = 45 (0x2d), region = 20  ;;  %s171_s3 = sand.u32 (%p985_p4), 1, %s870_s17  }
  0x25   : > { %s707_s25 = smul.u32 (%p985_p4), 12, %s886_s21  ;;  %s666_s5 = sshll.u32 (%p985_p4), %s171_s3, 3 }
  0x26   : > { %s173_s23 = scalar_lea.vmem (%p985_p4), [#allocation2], %s666_s5 }
  0x27   : > { %s178_s6 = sadd.s32 (%p985_p4), %s882_s20, %s707_s25 }
  0x28   : > { %s667_s8 = sshll.u32 (%p985_p4), %s178_s6, 2 }
  0x29   : > { %s180_s27 = scalar_lea.vmem %s1111_s0, %s667_s8 }
  0x2a   : > { %v197_v0 = vld [vmem:[%s180_s27] sm:$0xf]  ;;  %v199_v1 = vld [vmem:[%s180_s27 + $0x18] sm:$0xf] }
  0x2b   : > { %198 = vst [vmem:[%s173_s23] sm:$0xf] %v197_v0 }
  0x2c   : > { %200 = vst [vmem:[%s173_s23 + $0x4] sm:$0xf] %v199_v1 }
  0x2d PF: > { %228 = sbr.rel (!%p999_p8) target bundleno = 54 (0x36), region = 61  ;;  %s230_s29 = sand.u32 (%p999_p8), 1, %s862_s15  }
  0x2e   : > { %s563_s3 = smul.u32 (%p999_p8), 12, %s886_s21  ;;  %s668_s25 = sshll.u32 (%p999_p8), %s230_s29, 3 }
  0x2f   : > { %s232_s5 = scalar_lea.vmem (%p999_p8), [#allocation3], %s668_s25 }
  0x30   : > { %s564_s6 = sadd.s32 (%p999_p8), %s882_s20, %s563_s3 }
  0x31   : > { %s669_s24 = sshll.u32 (%p999_p8), %s564_s6, 2 }
  0x32   : > { %s566_s8 = scalar_lea.vmem %s1112_s1, %s669_s24 }
  0x33   : > { %v670_v2 = vld [vmem:[%s566_s8 + $0x8] sm:$0xf]  ;;  %v671_v3 = vld [vmem:[%s566_s8 + $0x20] sm:$0xf] }
  0x34   : > { %255 = vst [vmem:[%s232_s5] sm:$0xf] %v670_v2 }
  0x35   : > { %257 = vst [vmem:[%s232_s5 + $0x4] sm:$0xf] %v671_v3 }
  0x36 PF: > { %285 = sbr.rel (!%p1018_p12) target bundleno = 63 (0x3f), region = 102  ;;  %s287_s9 = sand.u32 (%p1018_p12), 1, %s854_s13  }
  0x37   : > { %s570_s30 = smul.u32 (%p1018_p12), 12, %s886_s21  ;;  %s672_s27 = sshll.u32 (%p1018_p12), %s287_s9, 3 }
  0x38   : > { %s289_s25 = scalar_lea.vmem (%p1018_p12), [#allocation4], %s672_s27 }
  0x39   : > { %s571_s23 = sadd.s32 (%p1018_p12), %s882_s20, %s570_s30 }
  0x3a   : > { %s673_s29 = sshll.u32 (%p1018_p12), %s571_s23, 2 }
  0x3b   : > { %s573_s24 = scalar_lea.vmem %s1113_s2, %s673_s29 }
  0x3c   : > { %v674_v4 = vld [vmem:[%s573_s24 + $0x10] sm:$0xf]  ;;  %v675_v5 = vld [vmem:[%s573_s24 + $0x28] sm:$0xf] }
  0x3d   : > { %312 = vst [vmem:[%s289_s25] sm:$0xf] %v674_v4 }
  0x3e   : > { %314 = vst [vmem:[%s289_s25 + $0x4] sm:$0xf] %v675_v5 }
  0x3f PF: > { %p676_p1 = scmp.ge.s32.totalorder %s890_s22, 1  ;;  %p341_p2 = scmp.lt.s32.totalorder %s890_s22, 9 }
  0x41   : > { %p342_p3 = pnand %p676_p1, %p341_p2 }
  0x42   : > { %s355_s4 = sand.u32 (!%p342_p3), 1, %s858_s14   ;;  %s348_s6 = sand.u32 (!%p342_p3), 1, %s866_s16  }
  0x43   : > { %345 = sbr.rel (%p342_p3) target bundleno = 494 (0x1ee), region = 143  ;;  %s678_s10 = sshll.u32 (!%p342_p3), %s355_s4, 3 }
  0x44   : > { %s1061_s8 = sshll.u32 (!%p342_p3), %s348_s6, 3  ;;  %s357_s5 = scalar_lea.vmem (!%p342_p3), [#allocation3], %s678_s10 }
  0x45   : > { %s350_s9 = scalar_lea.vmem (!%p342_p3), [#allocation2], %s1061_s8  ;;  %s362_s14 = sand.u32 (!%p342_p3), 1, %s850_s12  }
  0x46   : > { %s679_s16 = sshll.u32 (!%p342_p3), %s362_s14, 3  ;;  %s391_s12 = scalar_lea.vmem (!%p342_p3), [#allocation5], %s1061_s8 }
  0x47   : > { %s364_s30 = scalar_lea.vmem (!%p342_p3), [#allocation4], %s679_s16 }
  0x48   : > { %v700_v6 = vld [vmem:[%s357_s5] sm:$0xff]  ;;  %v699_v7 = vld [vmem:[%s350_s9] sm:$0xff]  ;;  %vm431_vm0 = vcmask 130048   ;;  %s695_s27 = sshll.u32 (%p1025_p13), %s878_s19, 2  ;;  %s1126_s24 = sld [smem:[#allocation9_spill]] (%p1025_p13) }
  0x49   : > { %422 = vmatpush.bf16.xpose.msra.mxu0 %v700_v6  ;;  %v701_v14 = vld [vmem:[%s364_s30] sm:$0xff]  ;;  %s493_s23 = sadd.s32 (%p1025_p13), %s874_s18, %s695_s27 }
  0x4a   : > { %467 = vmatpush.bf16.msra.mxu1 %v701_v14  ;;  %s696_s29 = sshll.u32 (%p1025_p13), %s493_s23, 2 }
  0x4e   : > { %s495_s25 = scalar_lea.vmem (%p1025_p13), %s1126_s24, %s696_s29 }
  0x50   : > { %423 = vmatmul.bf16.vlgmr.msra.gmra.mxu0 %v699_v7 }
  0xcd   : > { %v424_v8 = vpop.f32.mrf.mxu0 }
  0xce   : > { %v429_v9 = vmul.f32 0.088388346, %v424_v8 }
  0xd0   : > { %v432_v10 = vsel %vm431_vm0, %v429_v9, -inf }
  0xd1   : > { %433 = vmax.xlane.f32.xlu0 %v432_v10 }
  0xd5   : > { %v426_v11 = vpop.f32.mrf.mxu0 }
  0xd6   : > { %v430_v12 = vmul.f32 0.088388346, %v426_v11 }
  0xd8   : > { %v435_v13 = vsel %vm431_vm0, %v430_v12, -inf }
  0xd9   : > { %436 = vmax.xlane.f32.xlu0 %v435_v13 }
 0x144   : > { %v434_v15 = vpop.xlane.xlu0 %433 }
 0x145   : > { %v438_v16 = vsub.f32 %v429_v9, %v434_v15 }
 0x147   : > { %v440_v17 = vmul.f32 1.442695, %v438_v16 }
 0x149   : > { %796 = vpow2.f32 %v440_v17 }
 0x14c   : > { %v437_v18 = vpop.xlane.xlu0 %436 }
 0x14d   : > { %v439_v19 = vsub.f32 %v430_v12, %v437_v18 }
 0x14f   : > { %v797_v20 = vpop.eup %796  ;;  %v442_v21 = vmul.f32 1.442695, %v439_v19 }
 0x150   : > { %v444_v22 = vsel %vm431_vm0, %v797_v20, 0.0 }
 0x151   : > { %798 = vpow2.f32 %v442_v21  ;;  %445 = vadd.xlane.f32.xlu1 %v444_v22 }
 0x157   : > { %v799_v23 = vpop.eup %798 }
 0x158   : > { %v447_v24 = vsel %vm431_vm0, %v799_v23, 0.0  ;;  %v450_v25 = vpack.c.bf16 %v799_v23, %v797_v20 }
 0x159   : > { %448 = vadd.xlane.f32.xlu1 %v447_v24 }
 0x15a   : > { %693 = vmatmul.msk.bf16.vlgmr.msra.gmra.mxu1 %vm431_vm0, %v450_v25 }
 0x1c4   : > { %v446_v26 = vpop.xlane.xlu1 %445 }
 0x1c5   : > { %800 = vrcp.f32 %v446_v26 }
 0x1cb   : > { %v801_v29 = vpop.eup %800 }
 0x1cc   : > { %v449_v27 = vpop.xlane.xlu1 %448 }
 0x1cd   : > { %802 = vrcp.f32 %v449_v27 }
 0x1d3   : > { %v803_v30 = vpop.eup %802 }
 0x1d7   : > { %v469_v28 = vpop.f32.mrf.mxu1 }
 0x1d8   : > { %v476_v32 = vmul.f32 %v801_v29, %v469_v28 }
 0x1df   : > { %v471_v31 = vpop.f32.mrf.mxu1 }
 0x1e0   : > { %v477_v33 = vmul.f32 %v803_v30, %v471_v31  ;;  %488 = sbr.rel (!%p1025_p13) target bundleno = 494 (0x1ee), region = 159 }
 0x1e2   : > { %v705_v34 = vpack.c.bf16 %v477_v33, %v476_v32 }
 0x1e4   : > { %706 = vst [vmem:[%s391_s12] sm:$0xff] %v705_v34  }
 0x1eb   : > { %v512_v35 = vld [vmem:[%s391_s12] sm:$0xf]  ;;  %v514_v36 = vld [vmem:[%s391_s12 + $0x4] sm:$0xf] }
 0x1ec   : > { %513 = vst [vmem:[%s495_s25] sm:$0xf] %v512_v35 }
 0x1ed   : > { %515 = vst [vmem:[%s495_s25 + $0x8] sm:$0xf] %v514_v36 }
 0x1ee PF: > { %s13_s22 = sadd.s32 1, %s890_s22   ;;  %s1127_s18 = sld [smem:[#allocation8_spill]] }
 0x1ef   : > { %p10_p4 = scmp.ge.s32.totalorder %s13_s22, 10   ;;  %s1128_s7 = sld [smem:[#allocation6_spill]] }
 0x1f0   : > { %s1129_s4 = sld [smem:[#allocation7_spill]]  ;;  %s1130_s12 = smov %s854_s13 }
 0x1f1   : > { %s1131_s13 = smov %s1030_s26  ;;  %s1132_s14 = smov %s862_s15 }
 0x1f2   : > { %s1133_s15 = smov %s1008_s28  ;;  %s1134_s16 = smov %s870_s17 }
 0x1f3   : > { %s1137_s19 = smov %s886_s21  ;;  %12 = sbr.rel (!%p10_p4) target bundleno = 8 (0x8), region = 247 }
 0x1f4   : > { %s1135_s17 = smov %s1127_s18  ;;  %s1136_s18 = smov %s882_s20 }
 0x1f5   : > { %s1138_s20 = smov %s1128_s7 }
 0x1f6   : > { %s1139_s21 = smov %s1129_s4 }

// kernel: vit_encoder_forward.15
= control target key start
LH: loop header
LB: loop body
LE: loop exit
PB: predicated region body
PF: predicated region fallthrough
CT: control target
= control target key end

     0   :  { %s1118_s1 = inlined_call_operand.vmem [shape: bf16[256,256], index: 1, kind: input, shape index: {}]   ;;  %s1119_s0 = inlined_call_operand.vmem [shape: bf16[64,256], index: 0, kind: input, shape index: {}]   ;;  %s1120_s2 = inlined_call_operand.vmem [shape: f32[1,256], index: 2, kind: input, shape index: {}]   ;;  %s1121_s3 = inlined_call_operand.vmem [shape: f32[64,256], index: 3, kind: input, shape index: {}]   ;;  %s1122_s4 = inlined_call_operand.vmem [shape: f32[64,256], index: 4, kind: output, shape index: {}]  }
   0x1   :  { %v624_v0 = vld [vmem:[%s1118_s1 + $0x70] sm:$0xf]  ;;  %v717_v1 = vld [vmem:[%s1118_s1 + $0x74] sm:$0xf0]  ;;  %v716_v5 = vld [vmem:[%s1118_s1 + $0x74] sm:$0xf] }
   0x2   :  { %v688_v2 = vld [vmem:[%s1118_s1 + $0xf0] sm:$0xf]  ;;  %v625_v3 = vor.u32 %v717_v1, %v624_v0  ;;  %v733_v4 = vld [vmem:[%s1118_s1 + $0xf4] sm:$0xf0]  ;;  %v626_v6 = vld [vmem:[%s1118_s1 + $0x78] sm:$0xf0] }
   0x3   :  { %v689_v7 = vor.u32 %v733_v4, %v688_v2  ;;  %v629_v8 = vor.u32 %v716_v5, %v626_v6  ;;  %v732_v9 = vld [vmem:[%s1118_s1 + $0xf4] sm:$0xf]  ;;  %v690_v10 = vld [vmem:[%s1118_s1 + $0xf8] sm:$0xf0]  ;;  %v616_v11 = vld [vmem:[%s1118_s1 + $0x60] sm:$0xf] }
   0x4   :  { %293 = vmatpush.bf16.msra.mxu0 %v625_v3  ;;  %v693_v12 = vor.u32 %v732_v9, %v690_v10  ;;  %v715_v13 = vld [vmem:[%s1118_s1 + $0x64] sm:$0xf0]  ;;  %v680_v14 = vld [vmem:[%s1118_s1 + $0xe0] sm:$0xf]  ;;  %v714_v18 = vld [vmem:[%s1118_s1 + $0x64] sm:$0xf] }
   0x5   :  { %v731_v15 = vld [vmem:[%s1118_s1 + $0xe4] sm:$0xf0]  ;;  %322 = vmatpush.bf16.msra.mxu1 %v689_v7  ;;  %351 = vmatpush.bf16.msra.mxu2 %v629_v8  ;;  %v617_v16 = vor.u32 %v715_v13, %v616_v11  ;;  %v618_v19 = vld [vmem:[%s1118_s1 + $0x68] sm:$0xf0]  ;;  %v730_v20 = vld [vmem:[%s1118_s1 + $0xe4] sm:$0xf] }
   0x6   :  { %v681_v17 = vor.u32 %v731_v15, %v680_v14  ;;  %380 = vmatpush.bf16.msra.mxu3 %v693_v12  ;;  %v621_v21 = vor.u32 %v714_v18, %v618_v19  ;;  %v682_v22 = vld [vmem:[%s1118_s1 + $0xe8] sm:$0xf0]  ;;  %v608_v23 = vld [vmem:[%s1118_s1 + $0x50] sm:$0xf]  ;;  %v713_v24 = vld [vmem:[%s1118_s1 + $0x54] sm:$0xf0] }
   0x7   :  { %v685_v25 = vor.u32 %v730_v20, %v682_v22  ;;  %v672_v26 = vld [vmem:[%s1118_s1 + $0xd0] sm:$0xf]  ;;  %v729_v27 = vld [vmem:[%s1118_s1 + $0xd4] sm:$0xf0]  ;;  %v712_v28 = vld [vmem:[%s1118_s1 + $0x54] sm:$0xf]  ;;  %v609_v29 = vor.u32 %v713_v24, %v608_v23 }
   0x8   :  { %294 = vmatpush.bf16.msra.mxu0 %v617_v16  ;;  %v610_v30 = vld [vmem:[%s1118_s1 + $0x58] sm:$0xf0]  ;;  %v728_v31 = vld [vmem:[%s1118_s1 + $0xd4] sm:$0xf]  ;;  %v673_v33 = vor.u32 %v729_v27, %v672_v26  ;;  %v600_v35 = vld [vmem:[%s1118_s1 + $0x40] sm:$0xf] }
   0x9   :  { %v674_v32 = vld [vmem:[%s1118_s1 + $0xd8] sm:$0xf0]  ;;  %323 = vmatpush.bf16.msra.mxu1 %v681_v17  ;;  %352 = vmatpush.bf16.msra.mxu2 %v621_v21  ;;  %v613_v34 = vor.u32 %v712_v28, %v610_v30  ;;  %v711_v36 = vld [vmem:[%s1118_s1 + $0x44] sm:$0xf0]  ;;  %v664_v37 = vld [vmem:[%s1118_s1 + $0xc0] sm:$0xf] }
   0xa   :  { %381 = vmatpush.bf16.msra.mxu3 %v685_v25  ;;  %v677_v38 = vor.u32 %v728_v31, %v674_v32  ;;  %v727_v39 = vld [vmem:[%s1118_s1 + $0xc4] sm:$0xf0]  ;;  %v710_v40 = vld [vmem:[%s1118_s1 + $0x44] sm:$0xf]  ;;  %v602_v41 = vld [vmem:[%s1118_s1 + $0x48] sm:$0xf0]  ;;  %v601_v44 = vor.u32 %v711_v36, %v600_v35 }
   0xb   :  { %v726_v42 = vld [vmem:[%s1118_s1 + $0xc4] sm:$0xf]  ;;  %v666_v43 = vld [vmem:[%s1118_s1 + $0xc8] sm:$0xf0]  ;;  %v665_v45 = vor.u32 %v727_v39, %v664_v37  ;;  %v605_v46 = vor.u32 %v710_v40, %v602_v41  ;;  %v592_v47 = vld [vmem:[%s1118_s1 + $0x30] sm:$0xf] }
   0xc   :  { %295 = vmatpush.bf16.msra.mxu0 %v609_v29  ;;  %v709_v48 = vld [vmem:[%s1118_s1 + $0x34] sm:$0xf0]  ;;  %v656_v49 = vld [vmem:[%s1118_s1 + $0xb0] sm:$0xf]  ;;  %v669_v50 = vor.u32 %v726_v42, %v666_v43  ;;  %v708_v52 = vld [vmem:[%s1118_s1 + $0x34] sm:$0xf] }
   0xd   :  { %324 = vmatpush.bf16.msra.mxu1 %v673_v33  ;;  %353 = vmatpush.bf16.msra.mxu2 %v613_v34  ;;  %v725_v51 = vld [vmem:[%s1118_s1 + $0xb4] sm:$0xf0]  ;;  %v594_v53 = vld [vmem:[%s1118_s1 + $0x38] sm:$0xf0]  ;;  %v724_v54 = vld [vmem:[%s1118_s1 + $0xb4] sm:$0xf]  ;;  %v593_v56 = vor.u32 %v709_v48, %v592_v47 }
   0xe   :  { %382 = vmatpush.bf16.msra.mxu3 %v677_v38  ;;  %v658_v55 = vld [vmem:[%s1118_s1 + $0xb8] sm:$0xf0]  ;;  %v657_v57 = vor.u32 %v725_v51, %v656_v49  ;;  %v597_v58 = vor.u32 %v708_v52, %v594_v53  ;;  %v584_v59 = vld [vmem:[%s1118_s1 + $0x20] sm:$0xf]  ;;  %v707_v60 = vld [vmem:[%s1118_s1 + $0x24] sm:$0xf0] }
   0xf   :  { %v648_v61 = vld [vmem:[%s1118_s1 + $0xa0] sm:$0xf]  ;;  %v661_v62 = vor.u32 %v724_v54, %v658_v55  ;;  %v723_v63 = vld [vmem:[%s1118_s1 + $0xa4] sm:$0xf0]  ;;  %v706_v0 = vld [vmem:[%s1118_s1 + $0x24] sm:$0xf]  ;;  %v585_v4 = vor.u32 %v707_v60, %v584_v59 }
  0x10   :  { %296 = vmatpush.bf16.msra.mxu0 %v601_v44  ;;  %v586_v1 = vld [vmem:[%s1118_s1 + $0x28] sm:$0xf0]  ;;  %v722_v2 = vld [vmem:[%s1118_s1 + $0xa4] sm:$0xf]  ;;  %v649_v5 = vor.u32 %v723_v63, %v648_v61  ;;  %v576_v7 = vld [vmem:[%s1118_s1 + $0x10] sm:$0xf] }
  0x11   :  { %325 = vmatpush.bf16.msra.mxu1 %v665_v45  ;;  %354 = vmatpush.bf16.msra.mxu2 %v605_v46  ;;  %v650_v3 = vld [vmem:[%s1118_s1 + $0xa8] sm:$0xf0]  ;;  %v589_v6 = vor.u32 %v706_v0, %v586_v1  ;;  %v705_v8 = vld [vmem:[%s1118_s1 + $0x14] sm:$0xf0]  ;;  %v640_v9 = vld [vmem:[%s1118_s1 + $0x90] sm:$0xf] }
  0x12   :  { %383 = vmatpush.bf16.msra.mxu3 %v669_v50  ;;  %v653_v10 = vor.u32 %v722_v2, %v650_v3  ;;  %v721_v11 = vld [vmem:[%s1118_s1 + $0x94] sm:$0xf0]  ;;  %v704_v12 = vld [vmem:[%s1118_s1 + $0x14] sm:$0xf]  ;;  %v578_v13 = vld [vmem:[%s1118_s1 + $0x18] sm:$0xf0]  ;;  %v577_v16 = vor.u32 %v705_v8, %v576_v7 }
  0x13   :  { %v720_v14 = vld [vmem:[%s1118_s1 + $0x94] sm:$0xf]  ;;  %v642_v15 = vld [vmem:[%s1118_s1 + $0x98] sm:$0xf0]  ;;  %v641_v17 = vor.u32 %v721_v11, %v640_v9  ;;  %v581_v18 = vor.u32 %v704_v12, %v578_v13  ;;  %v568_v19 = vld [vmem:[%s1118_s1] sm:$0xf] }
  0x14   :  { %297 = vmatpush.bf16.msra.mxu0 %v593_v56  ;;  %v703_v20 = vld [vmem:[%s1118_s1 + $0x4] sm:$0xf0]  ;;  %v632_v21 = vld [vmem:[%s1118_s1 + $0x80] sm:$0xf]  ;;  %v645_v22 = vor.u32 %v720_v14, %v642_v15  ;;  %v702_v24 = vld [vmem:[%s1118_s1 + $0x4] sm:$0xf] }
  0x15   :  { %326 = vmatpush.bf16.msra.mxu1 %v657_v57  ;;  %355 = vmatpush.bf16.msra.mxu2 %v597_v58  ;;  %v719_v23 = vld [vmem:[%s1118_s1 + $0x84] sm:$0xf0]  ;;  %v570_v25 = vld [vmem:[%s1118_s1 + $0x8] sm:$0xf0]  ;;  %v718_v26 = vld [vmem:[%s1118_s1 + $0x84] sm:$0xf]  ;;  %v569_v28 = vor.u32 %v703_v20, %v568_v19 }
  0x16   :  { %384 = vmatpush.bf16.msra.mxu3 %v661_v62  ;;  %v634_v27 = vld [vmem:[%s1118_s1 + $0x88] sm:$0xf0]  ;;  %v536_v29 = vld [vmem:[%s1119_s0] sm:$0xf]  ;;  %v695_v30 = vld [vmem:[%s1119_s0 + $0x4] sm:$0xf0]  ;;  %v633_v31 = vor.u32 %v719_v23, %v632_v21  ;;  %v573_v32 = vor.u32 %v702_v24, %v570_v25 }
  0x17   :  { %v694_v33 = vld [vmem:[%s1119_s0 + $0x4] sm:$0xf]  ;;  %v538_v34 = vld [vmem:[%s1119_s0 + $0x8] sm:$0xf0]  ;;  %v637_v35 = vor.u32 %v718_v26, %v634_v27  ;;  %v537_v36 = vor.u32 %v695_v30, %v536_v29  ;;  %v544_v38 = vld [vmem:[%s1119_s0 + $0x10] sm:$0xf] }
  0x18   :  { %298 = vmatpush.bf16.msra.mxu0 %v585_v4  ;;  %v541_v37 = vor.u32 %v694_v33, %v538_v34  ;;  %v697_v39 = vld [vmem:[%s1119_s0 + $0x14] sm:$0xf0]  ;;  %v696_v40 = vld [vmem:[%s1119_s0 + $0x14] sm:$0xf]  ;;  %v546_v41 = vld [vmem:[%s1119_s0 + $0x18] sm:$0xf0] }
  0x19   :  { %327 = vmatpush.bf16.msra.mxu1 %v649_v5  ;;  %356 = vmatpush.bf16.msra.mxu2 %v589_v6  ;;  %v545_v42 = vor.u32 %v697_v39, %v544_v38  ;;  %v549_v43 = vor.u32 %v696_v40, %v546_v41  ;;  %v552_v44 = vld [vmem:[%s1119_s0 + $0x20] sm:$0xf]  ;;  %v699_v45 = vld [vmem:[%s1119_s0 + $0x24] sm:$0xf0]  ;;  %v698_v46 = vld [vmem:[%s1119_s0 + $0x24] sm:$0xf] }
  0x1a   :  { %385 = vmatpush.bf16.msra.mxu3 %v653_v10  ;;  %v554_v47 = vld [vmem:[%s1119_s0 + $0x28] sm:$0xf0]  ;;  %v553_v48 = vor.u32 %v699_v45, %v552_v44  ;;  %v560_v50 = vld [vmem:[%s1119_s0 + $0x30] sm:$0xf]  ;;  %v701_v51 = vld [vmem:[%s1119_s0 + $0x34] sm:$0xf0] }
  0x1b   :  { %v557_v49 = vor.u32 %v698_v46, %v554_v47  ;;  %v700_v52 = vld [vmem:[%s1119_s0 + $0x34] sm:$0xf]  ;;  %v562_v53 = vld [vmem:[%s1119_s0 + $0x38] sm:$0xf0]  ;;  %v561_v54 = vor.u32 %v701_v51, %v560_v50  ;;  %v460_v56 = vld [vmem:[%s1120_s2] sm:$0x3] }
  0x1c   :  { %299 = vmatpush.bf16.msra.mxu0 %v577_v16  ;;  %v565_v55 = vor.u32 %v700_v52, %v562_v53  ;;  %v1002_v58 = vperm.slane %v460_v56, 0  ;;  %v482_v61 = vld [vmem:[%s1121_s3] sm:$0xff]  ;;  %v1008_v1 = vperm.slane %v460_v56, 1  ;;  %v483_v6 = vld [vmem:[%s1121_s3 + $0x8] sm:$0xff]  ;;  %v484_v9 = vld [vmem:[%s1121_s3 + $0x10] sm:$0xff] }
  0x1d   :  { %328 = vmatpush.bf16.msra.mxu1 %v641_v17  ;;  %357 = vmatpush.bf16.msra.mxu2 %v581_v18  ;;  %v485_v18 = vld [vmem:[%s1121_s3 + $0x18] sm:$0xff]  ;;  %v486_v21 = vld [vmem:[%s1121_s3 + $0x20] sm:$0xff]  ;;  %v487_v30 = vld [vmem:[%s1121_s3 + $0x28] sm:$0xff] }
  0x1e   :  { %386 = vmatpush.bf16.msra.mxu3 %v645_v22  ;;  %v488_v33 = vld [vmem:[%s1121_s3 + $0x30] sm:$0xff]  ;;  %v490_v45 = vld [vmem:[%s1121_s3 + $0x40] sm:$0xff] }
  0x20   :  { %300 = vmatpush.bf16.msra.mxu0 %v569_v28 }
  0x21   :  { %329 = vmatpush.bf16.msra.mxu1 %v633_v31  ;;  %358 = vmatpush.bf16.msra.mxu2 %v573_v32 }
  0x22   :  { %387 = vmatpush.bf16.msra.mxu3 %v637_v35 }
  0x23   :  { %301 = vmatmul.bf16.vlgmr.msra.gmra.mxu0 %v537_v36 }
  0x24   :  { %330 = vmatmul.bf16.vlgmr.msra.gmra.mxu1 %v541_v37  ;;  %359 = vmatmul.bf16.vlgmr.msra.gmra.mxu2 %v537_v36 }
  0x25   :  { %388 = vmatmul.bf16.vlgmr.msra.gmra.mxu3 %v541_v37 }
  0x33   :  { %306 = vmatmul.bf16.gmra.mxu0 %v545_v42 }
  0x34   :  { %335 = vmatmul.bf16.gmra.mxu1 %v549_v43  ;;  %364 = vmatmul.bf16.gmra.mxu2 %v545_v42  ;;  %v489_v42 = vld [vmem:[%s1121_s3 + $0x38] sm:$0xff] }
  0x35   :  { %393 = vmatmul.bf16.gmra.mxu3 %v549_v43 }
  0x43   :  { %311 = vmatmul.bf16.gmra.mxu0 %v553_v48 }
  0x44   :  { %340 = vmatmul.bf16.gmra.mxu1 %v557_v49  ;;  %369 = vmatmul.bf16.gmra.mxu2 %v553_v48 }
  0x45   :  { %398 = vmatmul.bf16.gmra.mxu3 %v557_v49 }
  0x53   :  { %316 = vmatmul.bf16.gmra.mxu0 %v561_v54 }
  0x54   :  { %345 = vmatmul.bf16.gmra.mxu1 %v565_v55  ;;  %374 = vmatmul.bf16.gmra.mxu2 %v561_v54  ;;  %v491_v54 = vld [vmem:[%s1121_s3 + $0x48] sm:$0xff] }
  0x55   :  { %403 = vmatmul.bf16.gmra.mxu3 %v565_v55 }
  0xa0   :  { %v302_v57 = vpop.f32.mrf.mxu0 }
  0xa1   :  { %v331_v59 = vpop.f32.mrf.mxu1 }
  0xa2   :  { %v332_v60 = vadd.f32 %v331_v59, %v302_v57  ;;  %v492_v57 = vld [vmem:[%s1121_s3 + $0x50] sm:$0xff] }
  0xa4   :  { %v466_v62 = vadd.f32 %v1002_v58, %v332_v60 }
  0xa6   :  { %v498_v63 = vadd.f32 %v482_v61, %v466_v62 }
  0xa7   :  { %v360_v0 = vpop.f32.mrf.mxu2 }
  0xa8   :  { %514 = vst [vmem:[%s1122_s4] sm:$0xff] %v498_v63  ;;  %v389_v2 = vpop.f32.mrf.mxu3  ;;  %v304_v3 = vpop.f32.mrf.mxu0 }
  0xa9   :  { %v390_v4 = vadd.f32 %v389_v2, %v360_v0  ;;  %v333_v5 = vpop.f32.mrf.mxu1 }
  0xaa   :  { %v334_v7 = vadd.f32 %v333_v5, %v304_v3 }
  0xab   :  { %v467_v8 = vadd.f32 %v1008_v1, %v390_v4  ;;  %v493_v4 = vld [vmem:[%s1121_s3 + $0x58] sm:$0xff] }
  0xac   :  { %v468_v10 = vadd.f32 %v1002_v58, %v334_v7  ;;  %v494_v7 = vld [vmem:[%s1121_s3 + $0x60] sm:$0xff] }
  0xad   :  { %v499_v11 = vadd.f32 %v483_v6, %v467_v8 }
  0xae   :  { %v500_v12 = vadd.f32 %v484_v9, %v468_v10 }
  0xaf   :  { %515 = vst [vmem:[%s1122_s4 + $0x8] sm:$0xff] %v499_v11  ;;  %v362_v13 = vpop.f32.mrf.mxu2 }
  0xb0   :  { %516 = vst [vmem:[%s1122_s4 + $0x10] sm:$0xff] %v500_v12  ;;  %v391_v14 = vpop.f32.mrf.mxu3  ;;  %v307_v15 = vpop.f32.mrf.mxu0 }
  0xb1   :  { %v392_v16 = vadd.f32 %v391_v14, %v362_v13  ;;  %v336_v17 = vpop.f32.mrf.mxu1 }
  0xb2   :  { %v337_v19 = vadd.f32 %v336_v17, %v307_v15 }
  0xb3   :  { %v469_v20 = vadd.f32 %v1008_v1, %v392_v16  ;;  %v495_v16 = vld [vmem:[%s1121_s3 + $0x68] sm:$0xff] }
  0xb4   :  { %v470_v22 = vadd.f32 %v1002_v58, %v337_v19  ;;  %v496_v19 = vld [vmem:[%s1121_s3 + $0x70] sm:$0xff] }
  0xb5   :  { %v501_v23 = vadd.f32 %v485_v18, %v469_v20 }
  0xb6   :  { %v502_v24 = vadd.f32 %v486_v21, %v470_v22 }
  0xb7   :  { %517 = vst [vmem:[%s1122_s4 + $0x18] sm:$0xff] %v501_v23  ;;  %v365_v25 = vpop.f32.mrf.mxu2 }
  0xb8   :  { %518 = vst [vmem:[%s1122_s4 + $0x20] sm:$0xff] %v502_v24  ;;  %v394_v26 = vpop.f32.mrf.mxu3  ;;  %v309_v27 = vpop.f32.mrf.mxu0 }
  0xb9   :  { %v395_v28 = vadd.f32 %v394_v26, %v365_v25  ;;  %v338_v29 = vpop.f32.mrf.mxu1  ;;  %v497_v26 = vld [vmem:[%s1121_s3 + $0x78] sm:$0xff] }
  0xba   :  { %v339_v31 = vadd.f32 %v338_v29, %v309_v27 }
  0xbb   :  { %v471_v32 = vadd.f32 %v1008_v1, %v395_v28 }
  0xbc   :  { %v472_v34 = vadd.f32 %v1002_v58, %v339_v31 }
  0xbd   :  { %v503_v35 = vadd.f32 %v487_v30, %v471_v32 }
  0xbe   :  { %v504_v36 = vadd.f32 %v488_v33, %v472_v34 }
  0xbf   :  { %519 = vst [vmem:[%s1122_s4 + $0x28] sm:$0xff] %v503_v35  ;;  %v367_v37 = vpop.f32.mrf.mxu2 }
  0xc0   :  { %520 = vst [vmem:[%s1122_s4 + $0x30] sm:$0xff] %v504_v36  ;;  %v396_v38 = vpop.f32.mrf.mxu3  ;;  %v312_v39 = vpop.f32.mrf.mxu0 }
  0xc1   :  { %v397_v40 = vadd.f32 %v396_v38, %v367_v37  ;;  %v341_v41 = vpop.f32.mrf.mxu1 }
  0xc2   :  { %v342_v43 = vadd.f32 %v341_v41, %v312_v39 }
  0xc3   :  { %v473_v44 = vadd.f32 %v1008_v1, %v397_v40 }
  0xc4   :  { %v474_v46 = vadd.f32 %v1002_v58, %v342_v43 }
  0xc5   :  { %v505_v47 = vadd.f32 %v489_v42, %v473_v44 }
  0xc6   :  { %v506_v48 = vadd.f32 %v490_v45, %v474_v46 }
  0xc7   :  { %521 = vst [vmem:[%s1122_s4 + $0x38] sm:$0xff] %v505_v47  ;;  %v370_v49 = vpop.f32.mrf.mxu2 }
  0xc8   :  { %522 = vst [vmem:[%s1122_s4 + $0x40] sm:$0xff] %v506_v48  ;;  %v399_v50 = vpop.f32.mrf.mxu3  ;;  %v314_v51 = vpop.f32.mrf.mxu0 }
  0xc9   :  { %v400_v52 = vadd.f32 %v399_v50, %v370_v49  ;;  %v343_v53 = vpop.f32.mrf.mxu1 }
  0xca   :  { %v344_v55 = vadd.f32 %v343_v53, %v314_v51 }
  0xcb   :  { %v475_v56 = vadd.f32 %v1008_v1, %v400_v52 }
  0xcc   :  { %v476_v59 = vadd.f32 %v1002_v58, %v344_v55 }
  0xcd   :  { %v507_v60 = vadd.f32 %v491_v54, %v475_v56 }
  0xce   :  { %v508_v61 = vadd.f32 %v492_v57, %v476_v59 }
  0xcf   :  { %523 = vst [vmem:[%s1122_s4 + $0x48] sm:$0xff] %v507_v60  ;;  %v372_v62 = vpop.f32.mrf.mxu2 }
  0xd0   :  { %524 = vst [vmem:[%s1122_s4 + $0x50] sm:$0xff] %v508_v61  ;;  %v401_v63 = vpop.f32.mrf.mxu3  ;;  %v317_v0 = vpop.f32.mrf.mxu0 }
  0xd1   :  { %v402_v2 = vadd.f32 %v401_v63, %v372_v62  ;;  %v346_v3 = vpop.f32.mrf.mxu1 }
  0xd2   :  { %v347_v5 = vadd.f32 %v346_v3, %v317_v0 }
  0xd3   :  { %v477_v6 = vadd.f32 %v1008_v1, %v402_v2 }
  0xd4   :  { %v478_v8 = vadd.f32 %v1002_v58, %v347_v5 }
  0xd5   :  { %v509_v9 = vadd.f32 %v493_v4, %v477_v6 }
  0xd6   :  { %v510_v10 = vadd.f32 %v494_v7, %v478_v8 }
  0xd7   :  { %525 = vst [vmem:[%s1122_s4 + $0x58] sm:$0xff] %v509_v9  ;;  %v375_v11 = vpop.f32.mrf.mxu2 }
  0xd8   :  { %526 = vst [vmem:[%s1122_s4 + $0x60] sm:$0xff] %v510_v10  ;;  %v404_v12 = vpop.f32.mrf.mxu3  ;;  %v319_v13 = vpop.f32.mrf.mxu0 }
  0xd9   :  { %v405_v14 = vadd.f32 %v404_v12, %v375_v11  ;;  %v348_v15 = vpop.f32.mrf.mxu1 }
  0xda   :  { %v349_v17 = vadd.f32 %v348_v15, %v319_v13 }
  0xdb   :  { %v479_v18 = vadd.f32 %v1008_v1, %v405_v14 }
  0xdc   :  { %v480_v20 = vadd.f32 %v1002_v58, %v349_v17 }
  0xdd   :  { %v511_v21 = vadd.f32 %v495_v16, %v479_v18 }
  0xde   :  { %v512_v22 = vadd.f32 %v496_v19, %v480_v20 }
  0xdf   :  { %527 = vst [vmem:[%s1122_s4 + $0x68] sm:$0xff] %v511_v21  ;;  %v377_v23 = vpop.f32.mrf.mxu2 }
  0xe0   :  { %528 = vst [vmem:[%s1122_s4 + $0x70] sm:$0xff] %v512_v22  ;;  %v406_v24 = vpop.f32.mrf.mxu3 }
  0xe1   :  { %v407_v25 = vadd.f32 %v406_v24, %v377_v23 }
  0xe3   :  { %v481_v27 = vadd.f32 %v1008_v1, %v407_v25 }
  0xe5   :  { %v513_v58 = vadd.f32 %v497_v26, %v481_v27 }
  0xe7   :  { %529 = vst [vmem:[%s1122_s4 + $0x78] sm:$0xff] %v513_v58 }

// kernel: vit_encoder_forward.23
= control target key start
LH: loop header
LB: loop body
LE: loop exit
PB: predicated region body
PF: predicated region fallthrough
CT: control target
= control target key end

     0   :  { %8 = vsyncpa [#allocation4], 0  ;;  %s766_s0 = inlined_call_operand.vmem [shape: f32[2,2,16,256], index: 0, kind: input, shape index: {}]   ;;  %s767_s1 = inlined_call_operand.vmem [shape: f32[1,256], index: 1, kind: input, shape index: {}]   ;;  %s768_s2 = inlined_call_operand.vmem [shape: f32[1,256], index: 2, kind: input, shape index: {}]   ;;  %s769_s3 = inlined_call_operand.hbm [shape: f32[2,16,256], index: 3, kind: output, shape index: {}]  }
   0x1   :  { %10 = vsyncpa [#allocation4 + $0x1], 0  ;;  %s628_s12 = smov 0   ;;  %s630_s13 = smov 0  }
   0x2   :  { %s632_s14 = smov 0   ;;  %s634_s15 = smov 0  }
   0x3   :  { %s636_s16 = smov 0   ;;  %s638_s17 = smov 0  }
   0x4   :  { %s640_s18 = smov 0   ;;  %s642_s19 = smov 0  }
   0x5 LB: > { %s410_s20 = sadd.s32 4294967295, %s602_s19   ;;  %s411_s21 = sadd.s32 4294967294, %s602_s19   ;;  %s602_s19 = sphi %s642_s19, %s16_s19   ;;  %s598_s18 = sphi %s640_s18, %s778_s18   ;;  %s594_s17 = sphi %s638_s17, %s777_s17   ;;  %s590_s16 = sphi %s636_s16, %s776_s16   ;;  %s586_s15 = sphi %s634_s15, %s775_s15   ;;  %s582_s14 = sphi %s632_s14, %s774_s14   ;;  %s578_s13 = sphi %s630_s13, %s773_s13   ;;  %s574_s12 = sphi %s628_s12, %s772_s12  }
   0x6   : > { %s25_s22 = sadd.s32 1, %s594_s17  ;;  %s28_s23 = sadd.s32 1, %s598_s18 }
   0x7   : > { %p26_p0 = scmp.ge.s32.totalorder %s25_s22, 2  ;;  %p115_p1 = scmp.ne.s32.totalorder %s582_s14, %s578_s13 }
   0x8   : > { %p116_p2 = scmp.eq.s32.totalorder %s410_s20, 3  ;;  %p121_p4 = scmp.ne.s32.totalorder %s578_s13, %s574_s12 }
   0x9   : > { %s780_s22 = smov (%p26_p0, %s25_s22), 0  ;;  %s782_s23 = smov (!%p26_p0, %s28_s23), %s598_s18 }
   0xa   : > { %p677_p3 = por %p116_p2, %p115_p1  ;;  %p30_p5 = scmp.ge.s32.totalorder %s782_s23, 2 }
   0xb   : > { %p122_p6 = scmp.eq.s32.totalorder %s411_s21, 3  ;;  %p414_p7 = scmp.ge.s32.totalorder %s602_s19, 1 }
   0xc   : > { %p158_p8 = scmp.lt.s32.totalorder %s602_s19, 5  ;;  %s784_s23 = smov (%p30_p5, %s782_s23), 0 }
   0xd   : > { %p687_p9 = por %p122_p6, %p121_p4  ;;  %s102_s26 = ssub.s32 %s598_s18, %s784_s23 }
   0xe   : > { %p159_p10 = pnand %p414_p7, %p158_p8  ;;  %s105_s27 = sadd.s32 1, %s582_s14 }
   0xf   : > { %p103_p11 = scmp.eq.s32.totalorder %s102_s26, 0  ;;  %s183_s29 = sand.u32 (!%p159_p10), 1, %s578_s13  }
  0x10   : > { %162 = sbr.rel (%p159_p10) target bundleno = 342 (0x156), region = 32  ;;  %p186_p12 = scmp.lt.s32.totalorder (!%p159_p10), %s590_s16, 1 }
  0x11   : > { %s695_s28 = scalar_select %p103_p11, %s582_s14, %s105_s27  }
  0x12   : > { %s415_s30 = sshll.u32 (!%p159_p10), %s183_s29, 5  ;;  %p188_p13 = scmp.lt.s32.totalorder (!%p159_p10), %s586_s15, 1 }
  0x13   : > { %s707_s21 = scalar_lea.vmem (!%p159_p10), [#allocation3], %s415_s30  ;;  %p419_p0 = scmp.ne.s32.totalorder (!%p159_p10), %s586_s15, 0 }
  0x15   : > { %s187_s4 = scalar_select %p186_p12, %s590_s16, 1 }
  0x16   : > { %s189_s5 = scalar_select %p188_p13, %s586_s15, 1 }
  0x17   : > { %s417_s6 = sshll.u32 %s187_s4, 3  ;;  %198 = sbr.rel (%p419_p0) target bundleno = 33 (0x21), region = 36 }
  0x18   : > { %s416_s7 = sshll.u32 %s189_s5, 2 }
  0x19   : > { %s192_s8 = sadd.s32 %s417_s6, %s416_s7 }
  0x1a   : > { %s418_s9 = sshll.u32 %s192_s8, 3 }
  0x1b   : > { %s194_s20 = scalar_lea.vmem %s766_s0, %s418_s9 }
  0x1c   : > { %v604_v0 = vmov 0.0  }
  0x1d   : > { %199 = vst [vmem:[#allocation2 + $0x10] sm:$0xff] %v604_v0 }
  0x1e   : > { %200 = vst [vmem:[#allocation2] sm:$0xff] %v604_v0 }
  0x1f   : > { %201 = vst [vmem:[#allocation2 + $0x18] sm:$0xff] %v604_v0 }
  0x20   : > { %202 = vst [vmem:[#allocation2 + $0x8] sm:$0xff] %v604_v0 }
  0x21 PF: > { %v203_v1 = vld [vmem:[%s194_s20] sm:$0xff]  ;;  %v204_v2 = vld [vmem:[%s194_s20 + $0x8] sm:$0xff]  ;;  %v205_v4 = vld [vmem:[%s194_s20 + $0x10] sm:$0xff]  ;;  %v605_v7 = vmov 256.0   ;;  %p420_p1 = scmp.ne.s32.totalorder %s586_s15, 1 }
  0x22   : > { %v207_v3 = vadd.f32 %v204_v2, %v203_v1  ;;  %v206_v5 = vld [vmem:[%s194_s20 + $0x18] sm:$0xff]  ;;  %502 = vrcp.f32 %v605_v7  ;;  %v268_v38 = vld [vmem:[%s767_s1] sm:$0x3] }
  0x23   : > { %v210_v6 = vadd.f32 %v206_v5, %v205_v4  ;;  %v278_v41 = vld [vmem:[%s768_s2] sm:$0x3]  ;;  %v270_v44 = vperm.slane %v268_v38, 0  ;;  %v271_v45 = vperm.slane %v268_v38, 1 }
  0x24   : > { %208 = vadd.xlane.f32.xlu0 %v207_v3  ;;  %v280_v48 = vperm.slane %v278_v41, 0  ;;  %v281_v49 = vperm.slane %v278_v41, 1  ;;  %v238_v55 = vld [vmem:[#allocation2 + $0x10] sm:$0xff] }
  0x25   : > { %v239_v56 = vld [vmem:[#allocation2] sm:$0xff] }
  0x28   : > { %v503_v8 = vpop.eup %502 }
  0x29   : > { %v214_v9 = vmul.f32 256.0, %v503_v8  ;;  %vm218_vm0 = vweird.f32 %v503_v8 }
  0x2b   : > { %v215_v10 = vsub.f32 1.0, %v214_v9 }
  0x2c   : > { %211 = vadd.xlane.f32.xlu0 %v210_v6 }
  0x2d   : > { %v216_v11 = vmul.f32 %v503_v8, %v215_v10 }
  0x2f   : > { %v217_v12 = vadd.f32 %v503_v8, %v216_v11 }
  0x31   : > { %v219_v13 = vsel %vm218_vm0, %v503_v8, %v217_v12 }
  0x97   : > { %v209_v14 = vpop.xlane.xlu0 %208 }
  0x98   : > { %v220_v15 = vmul.f32 %v219_v13, %v209_v14 }
  0x9a   : > { %v222_v16 = vsub.f32 %v203_v1, %v220_v15  ;;  %v223_v17 = vsub.f32 %v204_v2, %v220_v15 }
  0x9c   : > { %v226_v18 = vmul.f32 %v222_v16, %v222_v16  ;;  %v227_v19 = vmul.f32 %v223_v17, %v223_v17 }
  0x9e   : > { %v230_v20 = vadd.f32 %v227_v19, %v226_v18 }
  0x9f   : > { %v212_v21 = vpop.xlane.xlu0 %211 }
  0xa0   : > { %v221_v22 = vmul.f32 %v219_v13, %v212_v21  ;;  %231 = vadd.xlane.f32.xlu1 %v230_v20 }
  0xa2   : > { %v224_v23 = vsub.f32 %v205_v4, %v221_v22  ;;  %v225_v24 = vsub.f32 %v206_v5, %v221_v22  ;;  %v240_v4 = vld [vmem:[#allocation2 + $0x18] sm:$0xff]  ;;  %v241_v5 = vld [vmem:[#allocation2 + $0x8] sm:$0xff] }
  0xa4   : > { %v228_v25 = vmul.f32 %v224_v23, %v224_v23  ;;  %v229_v26 = vmul.f32 %v225_v24, %v225_v24 }
  0xa6   : > { %v233_v27 = vadd.f32 %v229_v26, %v228_v25 }
  0xa8   : > { %234 = vadd.xlane.f32.xlu1 %v233_v27 }
 0x113   : > { %v232_v28 = vpop.xlane.xlu1 %231 }
 0x114   : > { %v236_v29 = vmul.f32 %v232_v28, %v219_v13 }
 0x116   : > { %v242_v30 = vadd.f32 1e-05, %v236_v29 }
 0x118   : > { %504 = vrsqrt.f32 %v242_v30  ;;  %vm250_vm2 = vweird.f32 %v242_v30 }
 0x11b   : > { %v235_v31 = vpop.xlane.xlu1 %234 }
 0x11c   : > { %v237_v32 = vmul.f32 %v235_v31, %v219_v13 }
 0x11e   : > { %v505_v33 = vpop.eup %504  ;;  %v243_v34 = vadd.f32 1e-05, %v237_v32 }
 0x11f   : > { %v245_v35 = vmul.f32 %v505_v33, %v242_v30  ;;  %vm251_vm1 = vweird.f32 %v505_v33 }
 0x120   : > { %506 = vrsqrt.f32 %v243_v34  ;;  %vm252_vm3 = vmor %vm250_vm2, %vm251_vm1  ;;  %vm260_vm5 = vweird.f32 %v243_v34 }
 0x121   : > { %v246_v36 = vmul.f32 %v505_v33, %v245_v35 }
 0x123   : > { %v247_v37 = vmul.f32 0.5, %v246_v36 }
 0x125   : > { %v248_v39 = vsub.f32 1.5, %v247_v37 }
 0x126   : > { %v507_v40 = vpop.eup %506 }
 0x127   : > { %v249_v42 = vmul.f32 %v505_v33, %v248_v39  ;;  %v255_v43 = vmul.f32 %v507_v40, %v243_v34  ;;  %vm261_vm4 = vweird.f32 %v507_v40 }
 0x128   : > { %vm262_vm6 = vmor %vm260_vm5, %vm261_vm4 }
 0x129   : > { %v253_v46 = vsel %vm252_vm3, %v505_v33, %v249_v42  ;;  %v256_v47 = vmul.f32 %v507_v40, %v255_v43 }
 0x12a   : > { %v264_v50 = vmul.f32 %v253_v46, %v222_v16  ;;  %v265_v51 = vmul.f32 %v253_v46, %v223_v17 }
 0x12b   : > { %v257_v52 = vmul.f32 0.5, %v256_v47 }
 0x12c   : > { %v274_v53 = vmul.f32 %v270_v44, %v264_v50  ;;  %v275_v54 = vmul.f32 %v271_v45, %v265_v51 }
 0x12d   : > { %v258_v57 = vsub.f32 1.5, %v257_v52 }
 0x12e   : > { %v284_v58 = vadd.f32 %v280_v48, %v274_v53  ;;  %v285_v59 = vadd.f32 %v281_v49, %v275_v54 }
 0x12f   : > { %v259_v60 = vmul.f32 %v507_v40, %v258_v57 }
 0x130   : > { %v288_v61 = vadd.f32 %v284_v58, %v238_v55  ;;  %v289_v62 = vadd.f32 %v285_v59, %v239_v56 }
 0x131   : > { %v263_v63 = vsel %vm262_vm6, %v507_v40, %v259_v60 }
 0x132   : > { %292 = vst [vmem:[#allocation2 + $0x10] sm:$0xff] %v288_v61  ;;  %v266_v0 = vmul.f32 %v263_v63, %v224_v23  ;;  %v267_v1 = vmul.f32 %v263_v63, %v225_v24 }
 0x133   : > { %293 = vst [vmem:[#allocation2] sm:$0xff] %v289_v62 }
 0x134   : > { %v276_v2 = vmul.f32 %v270_v44, %v266_v0  ;;  %v277_v3 = vmul.f32 %v271_v45, %v267_v1 }
 0x136   : > { %v286_v6 = vadd.f32 %v280_v48, %v276_v2  ;;  %v287_v7 = vadd.f32 %v281_v49, %v277_v3 }
 0x137   : > { %299 = sbr.rel (%p420_p1) target bundleno = 326 (0x146), region = 40 }
 0x138   : > { %v290_v8 = vadd.f32 %v286_v6, %v240_v4  ;;  %v291_v9 = vadd.f32 %v287_v7, %v241_v5 }
 0x13a   : > { %294 = vst [vmem:[#allocation2 + $0x18] sm:$0xff] %v290_v8 }
 0x13b   : > { %295 = vst [vmem:[#allocation2 + $0x8] sm:$0xff] %v291_v9 }
 0x13c   : > { %v300_v10 = vld [vmem:[#allocation2 + $0x10] sm:$0xff]  ;;  %v301_v11 = vld [vmem:[#allocation2] sm:$0xff] }
 0x13d   : > { %v304_v13 = vmul.f32 0.5, %v300_v10  ;;  %v305_v14 = vmul.f32 0.5, %v301_v11 }
 0x13f   : > { %308 = vst [vmem:[%s707_s21] sm:$0xff] %v304_v13 }
 0x140   : > { %309 = vst [vmem:[%s707_s21 + $0x8] sm:$0xff] %v305_v14 }
 0x141   : > { %v302_v12 = vld [vmem:[#allocation2 + $0x18] sm:$0xff] }
 0x142   : > { %v306_v15 = vmul.f32 0.5, %v302_v12  ;;  %v303_v16 = vld [vmem:[#allocation2 + $0x8] sm:$0xff] }
 0x143   : > { %v307_v17 = vmul.f32 0.5, %v303_v16 }
 0x144   : > { %310 = vst [vmem:[%s707_s21 + $0x10] sm:$0xff] %v306_v15 }
 0x145   : > { %311 = vst [vmem:[%s707_s21 + $0x18] sm:$0xff] %v307_v17 }
 0x146 PF: > { %s426_s15 = sshll.u32 %s590_s16, 5  ;;  %s325_s8 = sshll.u32 %s707_s21, 4  ;;  %s326_s8 = int_to_ptr.vmem [resolvable:$true] %s325_s8 }
 0x147   : > { %s324_s7 = scalar_lea.hbm %s769_s3, %s426_s15  ;;  %s313_s10 = scalar_lea.sflag [#allocation4], %s183_s29 }
 0x148   : > { %s327_s9 = sshll.u32 %s324_s7, 4  ;;  %s528_s16 = scalar_lea.hbm %s769_s3, 64  ;;  %s328_s9 = int_to_ptr.hbm [resolvable:$true] %s327_s9 }
 0x149   : > { %s522_s11 = sshra.s32 %s328_s9, 4  ;;  %s523_s11 = int_to_ptr.hbm [resolvable:$true] %s522_s11 }
 0x14a   : > { %s524_s20 = scalar_lea.hbm %s523_s11, 32  ;;  %p529_p6 = scmp.lt.s32.totalorder %s523_s11, %s769_s3 }
 0x14b   : > { %p525_p2 = scmp.ne.s32.totalorder %s523_s11, %s524_s20  ;;  %p530_p7 = scmp.lt.s32.totalorder %s528_s16, %s524_s20 }
 0x14d   : > { %p526_p4 = pnand %p525_p2, %p677_p3  ;;  %p531_p8 = por %p530_p7, %p529_p6 }
 0x14f   : > { %p527_p5 = pneg %p526_p4 }
 0x151   : > { %p532_p10 = pnand %p531_p8, %p527_p5 }
 0x153   : > { %535 = shalt.err (!%p532_p10)
}
 0x154   : > { %s606_s29 = smov 256   ;;  %s607_s21 = smov 16  }
 0x155   : > { %427 = dma.vmem_to_hbm [thread:$0]  (%p677_p3), %s326_s8, 512, %s328_s9, %s313_s10, %s606_s29, %s606_s29, %s607_s21  }
 0x156 PF: > { %p433_p11 = scmp.ge.s32.totalorder %s602_s19, 2  ;;  %s342_s15 = sand.u32 1, %s574_s12  }
 0x157   : > { %s343_s5 = scalar_lea.sflag [#allocation4], %s342_s15 }
 0x158   : > { %p430_p12 = pnand %p433_p11, %p687_p9 }
 0x15a   : > { %p431_p13 = pneg %p430_p12 }
 0x15c   : > { %569 = dma.done.wait (%p431_p13), %s343_s5, 512  }
 0x15d   : > { %571 = vsyncadd (%p431_p13), %s343_s5, 4294966784  ;;  %s16_s19 = sadd.s32 1, %s602_s19   ;;  %s772_s12 = smov %s578_s13 }
 0x15e   : > { %p13_p0 = scmp.ge.s32.totalorder %s16_s19, 6   ;;  %s773_s13 = smov %s582_s14 }
 0x15f   : > { %s774_s14 = smov %s695_s28  ;;  %s775_s15 = smov %s594_s17 }
 0x160   : > { %s776_s16 = smov %s598_s18  ;;  %s777_s17 = smov %s780_s22 }
 0x161   : > { %s778_s18 = smov %s784_s23  ;;  %15 = sbr.rel (!%p13_p0) target bundleno = 5 (0x5), region = 75 }
 0x166   :  { %349 = vsyncpa [#allocation4], 1 }
 0x167   :  { %351 = vsyncpa [#allocation4 + $0x1], 1 }

// kernel: vit_encoder_forward.16
= control target key start
LH: loop header
LB: loop body
LE: loop exit
PB: predicated region body
PF: predicated region fallthrough
CT: control target
= control target key end

     0   :  { %s2433_s18 = smov 0   ;;  %s2435_s19 = smov 0   ;;  %s3322_s0 = inlined_call_operand.vmem [shape: f32[64,256], index: 0, kind: input, shape index: {}]   ;;  %s3323_s1 = inlined_call_operand.vmem [shape: f32[1,256], index: 1, kind: input, shape index: {}]   ;;  %s3324_s2 = inlined_call_operand.vmem [shape: f32[1,256], index: 2, kind: input, shape index: {}]   ;;  %s3325_s3 = inlined_call_operand.vmem [shape: bf16[256,1024], index: 3, kind: input, shape index: {}]   ;;  %s3326_s4 = inlined_call_operand.vmem [shape: f32[1,1024], index: 4, kind: input, shape index: {}]   ;;  %s3327_s5 = inlined_call_operand.vmem [shape: bf16[64,1024], index: 5, kind: output, shape index: {}]  }
   0x1   :  { %s2437_s20 = smov 0   ;;  %s2439_s21 = smov 0  }
   0x2   :  { %s2441_s22 = smov 0  }
   0x3 LB: > { %s24_s23 = sadd.s32 1, %s2396_s21  ;;  %s1859_s24 = sadd.s32 4294967295, %s2400_s22   ;;  %s2400_s22 = sphi %s2441_s22, %s15_s22   ;;  %s2396_s21 = sphi %s2439_s21, %s3332_s21   ;;  %s2392_s20 = sphi %s2437_s20, %s3331_s20   ;;  %s2388_s19 = sphi %s2435_s19, %s3330_s19   ;;  %s2384_s18 = sphi %s2433_s18, %s3329_s18  }
   0x4   : > { %p25_p0 = scmp.ge.s32.totalorder %s24_s23, 2  ;;  %p109_p1 = scmp.ne.s32.totalorder %s2388_s19, %s2384_s18 }
   0x5   : > { %p110_p2 = scmp.eq.s32.totalorder %s2400_s22, 0  ;;  %p167_p4 = scmp.eq.s32.totalorder %s1859_s24, 1 }
   0x6   : > { %s3334_s23 = smov (%p25_p0, %s24_s23), 0  ;;  %s102_s26 = sadd.s32 1, %s2388_s19 }
   0x7   : > { %p111_p3 = por %p110_p2, %p109_p1  ;;  %s99_s25 = ssub.s32 %s2396_s21, %s3334_s23 }
   0x8   : > { %p100_p5 = scmp.eq.s32.totalorder %s99_s25, 0  ;;  %p2468_p6 = por %p167_p4, %p109_p1 }
   0x9   : > { %p1863_p7 = scmp.ge.s32.totalorder %s2400_s22, 2 }
   0xa   : > { %s2473_s28 = scalar_select %p100_p5, %s2388_s19, %s102_s26  }
   0xb   : > { %205 = sbr.rel (%p1863_p7) target bundleno = 84 (0x54), region = 28 }
  0x10   : > { %208 = sbr.rel (!%p111_p3) target bundleno = 84 (0x54), region = 32  ;;  %s210_s29 = sand.u32 (%p111_p3), 1, %s2388_s19  }
  0x11   : > { %s2165_s30 = sshll.u32 (%p111_p3), %s2396_s21, 4  ;;  %s1864_s6 = sshll.u32 (%p111_p3), %s210_s29, 9 }
  0x12   : > { %s2481_s9 = scalar_lea.vmem (%p111_p3), %s3325_s3, %s2165_s30  ;;  %s2486_s10 = scalar_lea.vmem (%p111_p3), [#allocation3], %s1864_s6 }
  0x13   : > { %v228_v0 = vld [vmem:[%s2481_s9] sm:$0xff] (%p111_p3)  ;;  %v230_v1 = vld [vmem:[%s2481_s9 + $0x8] sm:$0xff] (%p111_p3) }
  0x14   : > { %v232_v2 = vld [vmem:[%s2481_s9 + $0x20] sm:$0xff] (%p111_p3)  ;;  %229 = vst [vmem:[%s2486_s10] sm:$0xff] (%p111_p3), %v228_v0  ;;  %v234_v3 = vld [vmem:[%s2481_s9 + $0x28] sm:$0xff] (%p111_p3) }
  0x15   : > { %231 = vst [vmem:[%s2486_s10 + $0x8] sm:$0xff] %v230_v1  ;;  %v236_v4 = vld [vmem:[%s2481_s9 + $0x40] sm:$0xff]  ;;  %v238_v5 = vld [vmem:[%s2481_s9 + $0x48] sm:$0xff] }
  0x16   : > { %233 = vst [vmem:[%s2486_s10 + $0x10] sm:$0xff] %v232_v2  ;;  %v240_v6 = vld [vmem:[%s2481_s9 + $0x60] sm:$0xff]  ;;  %v242_v7 = vld [vmem:[%s2481_s9 + $0x68] sm:$0xff] }
  0x17   : > { %235 = vst [vmem:[%s2486_s10 + $0x18] sm:$0xff] %v234_v3  ;;  %v244_v8 = vld [vmem:[%s2481_s9 + $0x80] sm:$0xff]  ;;  %v246_v9 = vld [vmem:[%s2481_s9 + $0x88] sm:$0xff] }
  0x18   : > { %237 = vst [vmem:[%s2486_s10 + $0x20] sm:$0xff] %v236_v4  ;;  %v248_v10 = vld [vmem:[%s2481_s9 + $0xa0] sm:$0xff]  ;;  %v250_v11 = vld [vmem:[%s2481_s9 + $0xa8] sm:$0xff] }
  0x19   : > { %239 = vst [vmem:[%s2486_s10 + $0x28] sm:$0xff] %v238_v5  ;;  %v252_v12 = vld [vmem:[%s2481_s9 + $0xc0] sm:$0xff]  ;;  %v254_v13 = vld [vmem:[%s2481_s9 + $0xc8] sm:$0xff] }
  0x1a   : > { %241 = vst [vmem:[%s2486_s10 + $0x30] sm:$0xff] %v240_v6  ;;  %v256_v14 = vld [vmem:[%s2481_s9 + $0xe0] sm:$0xff]  ;;  %v258_v15 = vld [vmem:[%s2481_s9 + $0xe8] sm:$0xff] }
  0x1b   : > { %243 = vst [vmem:[%s2486_s10 + $0x38] sm:$0xff] %v242_v7  ;;  %v260_v16 = vld [vmem:[%s2481_s9 + $0x100] sm:$0xff]  ;;  %v262_v17 = vld [vmem:[%s2481_s9 + $0x108] sm:$0xff] }
  0x1c   : > { %245 = vst [vmem:[%s2486_s10 + $0x40] sm:$0xff] %v244_v8  ;;  %v264_v18 = vld [vmem:[%s2481_s9 + $0x120] sm:$0xff]  ;;  %v266_v19 = vld [vmem:[%s2481_s9 + $0x128] sm:$0xff] }
  0x1d   : > { %247 = vst [vmem:[%s2486_s10 + $0x48] sm:$0xff] %v246_v9  ;;  %v268_v20 = vld [vmem:[%s2481_s9 + $0x140] sm:$0xff]  ;;  %v270_v21 = vld [vmem:[%s2481_s9 + $0x148] sm:$0xff] }
  0x1e   : > { %249 = vst [vmem:[%s2486_s10 + $0x50] sm:$0xff] %v248_v10  ;;  %v272_v22 = vld [vmem:[%s2481_s9 + $0x160] sm:$0xff]  ;;  %v274_v23 = vld [vmem:[%s2481_s9 + $0x168] sm:$0xff] }
  0x1f   : > { %251 = vst [vmem:[%s2486_s10 + $0x58] sm:$0xff] %v250_v11  ;;  %v276_v24 = vld [vmem:[%s2481_s9 + $0x180] sm:$0xff]  ;;  %v278_v25 = vld [vmem:[%s2481_s9 + $0x188] sm:$0xff] }
  0x20   : > { %253 = vst [vmem:[%s2486_s10 + $0x60] sm:$0xff] %v252_v12  ;;  %v280_v26 = vld [vmem:[%s2481_s9 + $0x1a0] sm:$0xff]  ;;  %v282_v27 = vld [vmem:[%s2481_s9 + $0x1a8] sm:$0xff] }
  0x21   : > { %255 = vst [vmem:[%s2486_s10 + $0x68] sm:$0xff] %v254_v13  ;;  %v284_v28 = vld [vmem:[%s2481_s9 + $0x1c0] sm:$0xff]  ;;  %v286_v29 = vld [vmem:[%s2481_s9 + $0x1c8] sm:$0xff] }
  0x22   : > { %257 = vst [vmem:[%s2486_s10 + $0x70] sm:$0xff] %v256_v14  ;;  %v288_v30 = vld [vmem:[%s2481_s9 + $0x1e0] sm:$0xff]  ;;  %v290_v31 = vld [vmem:[%s2481_s9 + $0x1e8] sm:$0xff] }
  0x23   : > { %259 = vst [vmem:[%s2486_s10 + $0x78] sm:$0xff] %v258_v15  ;;  %v292_v32 = vld [vmem:[%s2481_s9 + $0x200] sm:$0xff]  ;;  %v294_v33 = vld [vmem:[%s2481_s9 + $0x208] sm:$0xff] }
  0x24   : > { %261 = vst [vmem:[%s2486_s10 + $0x80] sm:$0xff] %v260_v16  ;;  %v296_v34 = vld [vmem:[%s2481_s9 + $0x220] sm:$0xff]  ;;  %v298_v35 = vld [vmem:[%s2481_s9 + $0x228] sm:$0xff] }
  0x25   : > { %263 = vst [vmem:[%s2486_s10 + $0x88] sm:$0xff] %v262_v17  ;;  %v300_v36 = vld [vmem:[%s2481_s9 + $0x240] sm:$0xff]  ;;  %v302_v37 = vld [vmem:[%s2481_s9 + $0x248] sm:$0xff] }
  0x26   : > { %265 = vst [vmem:[%s2486_s10 + $0x90] sm:$0xff] %v264_v18  ;;  %v304_v38 = vld [vmem:[%s2481_s9 + $0x260] sm:$0xff]  ;;  %v306_v39 = vld [vmem:[%s2481_s9 + $0x268] sm:$0xff] }
  0x27   : > { %267 = vst [vmem:[%s2486_s10 + $0x98] sm:$0xff] %v266_v19  ;;  %v308_v40 = vld [vmem:[%s2481_s9 + $0x280] sm:$0xff]  ;;  %v310_v41 = vld [vmem:[%s2481_s9 + $0x288] sm:$0xff] }
  0x28   : > { %269 = vst [vmem:[%s2486_s10 + $0xa0] sm:$0xff] %v268_v20  ;;  %v312_v42 = vld [vmem:[%s2481_s9 + $0x2a0] sm:$0xff]  ;;  %v314_v43 = vld [vmem:[%s2481_s9 + $0x2a8] sm:$0xff] }
  0x29   : > { %271 = vst [vmem:[%s2486_s10 + $0xa8] sm:$0xff] %v270_v21  ;;  %v316_v44 = vld [vmem:[%s2481_s9 + $0x2c0] sm:$0xff]  ;;  %v318_v45 = vld [vmem:[%s2481_s9 + $0x2c8] sm:$0xff] }
  0x2a   : > { %273 = vst [vmem:[%s2486_s10 + $0xb0] sm:$0xff] %v272_v22  ;;  %v320_v46 = vld [vmem:[%s2481_s9 + $0x2e0] sm:$0xff]  ;;  %v322_v47 = vld [vmem:[%s2481_s9 + $0x2e8] sm:$0xff] }
  0x2b   : > { %275 = vst [vmem:[%s2486_s10 + $0xb8] sm:$0xff] %v274_v23  ;;  %v324_v48 = vld [vmem:[%s2481_s9 + $0x300] sm:$0xff]  ;;  %v326_v49 = vld [vmem:[%s2481_s9 + $0x308] sm:$0xff] }
  0x2c   : > { %277 = vst [vmem:[%s2486_s10 + $0xc0] sm:$0xff] %v276_v24  ;;  %v328_v50 = vld [vmem:[%s2481_s9 + $0x320] sm:$0xff]  ;;  %v330_v51 = vld [vmem:[%s2481_s9 + $0x328] sm:$0xff] }
  0x2d   : > { %279 = vst [vmem:[%s2486_s10 + $0xc8] sm:$0xff] %v278_v25  ;;  %v332_v52 = vld [vmem:[%s2481_s9 + $0x340] sm:$0xff]  ;;  %v334_v53 = vld [vmem:[%s2481_s9 + $0x348] sm:$0xff] }
  0x2e   : > { %281 = vst [vmem:[%s2486_s10 + $0xd0] sm:$0xff] %v280_v26  ;;  %v336_v54 = vld [vmem:[%s2481_s9 + $0x360] sm:$0xff]  ;;  %v338_v55 = vld [vmem:[%s2481_s9 + $0x368] sm:$0xff] }
  0x2f   : > { %283 = vst [vmem:[%s2486_s10 + $0xd8] sm:$0xff] %v282_v27  ;;  %v340_v56 = vld [vmem:[%s2481_s9 + $0x380] sm:$0xff]  ;;  %v342_v57 = vld [vmem:[%s2481_s9 + $0x388] sm:$0xff] }
  0x30   : > { %285 = vst [vmem:[%s2486_s10 + $0xe0] sm:$0xff] %v284_v28  ;;  %v344_v58 = vld [vmem:[%s2481_s9 + $0x3a0] sm:$0xff]  ;;  %v346_v59 = vld [vmem:[%s2481_s9 + $0x3a8] sm:$0xff] }
  0x31   : > { %287 = vst [vmem:[%s2486_s10 + $0xe8] sm:$0xff] %v286_v29  ;;  %v348_v60 = vld [vmem:[%s2481_s9 + $0x3c0] sm:$0xff]  ;;  %v350_v61 = vld [vmem:[%s2481_s9 + $0x3c8] sm:$0xff] }
  0x32   : > { %289 = vst [vmem:[%s2486_s10 + $0xf0] sm:$0xff] %v288_v30  ;;  %v352_v62 = vld [vmem:[%s2481_s9 + $0x3e0] sm:$0xff]  ;;  %v354_v63 = vld [vmem:[%s2481_s9 + $0x3e8] sm:$0xff] }
  0x33   : > { %291 = vst [vmem:[%s2486_s10 + $0xf8] sm:$0xff] %v290_v31 }
  0x34   : > { %293 = vst [vmem:[%s2486_s10 + $0x100] sm:$0xff] %v292_v32 }
  0x35   : > { %295 = vst [vmem:[%s2486_s10 + $0x108] sm:$0xff] %v294_v33 }
  0x36   : > { %297 = vst [vmem:[%s2486_s10 + $0x110] sm:$0xff] %v296_v34 }
  0x37   : > { %299 = vst [vmem:[%s2486_s10 + $0x118] sm:$0xff] %v298_v35 }
  0x38   : > { %301 = vst [vmem:[%s2486_s10 + $0x120] sm:$0xff] %v300_v36 }
  0x39   : > { %303 = vst [vmem:[%s2486_s10 + $0x128] sm:$0xff] %v302_v37 }
  0x3a   : > { %305 = vst [vmem:[%s2486_s10 + $0x130] sm:$0xff] %v304_v38 }
  0x3b   : > { %307 = vst [vmem:[%s2486_s10 + $0x138] sm:$0xff] %v306_v39 }
  0x3c   : > { %309 = vst [vmem:[%s2486_s10 + $0x140] sm:$0xff] %v308_v40 }
  0x3d   : > { %311 = vst [vmem:[%s2486_s10 + $0x148] sm:$0xff] %v310_v41 }
  0x3e   : > { %313 = vst [vmem:[%s2486_s10 + $0x150] sm:$0xff] %v312_v42 }
  0x3f   : > { %315 = vst [vmem:[%s2486_s10 + $0x158] sm:$0xff] %v314_v43 }
  0x40   : > { %317 = vst [vmem:[%s2486_s10 + $0x160] sm:$0xff] %v316_v44 }
  0x41   : > { %319 = vst [vmem:[%s2486_s10 + $0x168] sm:$0xff] %v318_v45 }
  0x42   : > { %321 = vst [vmem:[%s2486_s10 + $0x170] sm:$0xff] %v320_v46 }
  0x43   : > { %323 = vst [vmem:[%s2486_s10 + $0x178] sm:$0xff] %v322_v47 }
  0x44   : > { %325 = vst [vmem:[%s2486_s10 + $0x180] sm:$0xff] %v324_v48 }
  0x45   : > { %327 = vst [vmem:[%s2486_s10 + $0x188] sm:$0xff] %v326_v49 }
  0x46   : > { %329 = vst [vmem:[%s2486_s10 + $0x190] sm:$0xff] %v328_v50 }
  0x47   : > { %331 = vst [vmem:[%s2486_s10 + $0x198] sm:$0xff] %v330_v51 }
  0x48   : > { %333 = vst [vmem:[%s2486_s10 + $0x1a0] sm:$0xff] %v332_v52 }
  0x49   : > { %335 = vst [vmem:[%s2486_s10 + $0x1a8] sm:$0xff] %v334_v53 }
  0x4a   : > { %337 = vst [vmem:[%s2486_s10 + $0x1b0] sm:$0xff] %v336_v54 }
  0x4b   : > { %339 = vst [vmem:[%s2486_s10 + $0x1b8] sm:$0xff] %v338_v55 }
  0x4c   : > { %341 = vst [vmem:[%s2486_s10 + $0x1c0] sm:$0xff] %v340_v56 }
  0x4d   : > { %343 = vst [vmem:[%s2486_s10 + $0x1c8] sm:$0xff] %v342_v57 }
  0x4e   : > { %345 = vst [vmem:[%s2486_s10 + $0x1d0] sm:$0xff] %v344_v58 }
  0x4f   : > { %347 = vst [vmem:[%s2486_s10 + $0x1d8] sm:$0xff] %v346_v59 }
  0x50   : > { %349 = vst [vmem:[%s2486_s10 + $0x1e0] sm:$0xff] %v348_v60 }
  0x51   : > { %351 = vst [vmem:[%s2486_s10 + $0x1e8] sm:$0xff] %v350_v61 }
  0x52   : > { %353 = vst [vmem:[%s2486_s10 + $0x1f0] sm:$0xff] %v352_v62 }
  0x53   : > { %355 = vst [vmem:[%s2486_s10 + $0x1f8] sm:$0xff] %v354_v63 }
  0x54 PF: > { %p1867_p8 = scmp.ge.s32.totalorder %s2400_s22, 1  ;;  %p368_p9 = scmp.lt.s32.totalorder %s2400_s22, 3 }
  0x56   : > { %p369_p10 = pnand %p1867_p8, %p368_p9 }
  0x57   : > { %s375_s11 = sand.u32 (!%p369_p10), 1, %s2384_s18   ;;  %s1870_s12 = sshll.u32 (!%p369_p10), %s2392_s20, 2 }
  0x58   : > { %372 = sbr.rel (%p369_p10) target bundleno = 730 (0x2da), region = 59  ;;  %s1868_s13 = sshll.u32 (!%p369_p10), %s375_s11, 9 }
  0x59   : > { %s1869_s14 = sshll.u32 (!%p369_p10), %s375_s11, 7  ;;  %p420_p11 = scmp.lt.s32.totalorder (!%p369_p10), %s1870_s12, 7 }
  0x5a   : > { %s2623_s24 = scalar_lea.vmem (!%p369_p10), [#allocation3], %s1868_s13  ;;  %s2625_s25 = scalar_lea.vmem (!%p369_p10), [#allocation4], %s1869_s14 }
  0x5b   : > { %p1871_p12 = scmp.ne.s32.totalorder (!%p369_p10), %s2392_s20, 0 }
  0x5d   : > { %s3336_s12 = smov (!%p420_p11, %s1870_s12), 7  ;;  %429 = sbr.rel (%p1871_p12) target bundleno = 407 (0x197), region = 67 }
  0x5e   : > { %s422_s17 = scalar_lea.vmem %s3326_s4, %s3336_s12 }
  0x62   : > { %v2631_v0 = vld [vmem:[%s3322_s0 + $0x40] sm:$0xff]  ;;  %v2636_v1 = vld [vmem:[%s3322_s0 + $0x48] sm:$0xff]  ;;  %v440_v9 = vld [vmem:[%s3322_s0 + $0x50] sm:$0xff]  ;;  %v2402_v24 = vmov 256.0  }
  0x63   : > { %v434_v2 = vld [vmem:[%s3322_s0 + $0x20] sm:$0xff]  ;;  %v458_v3 = vadd.f32 %v2636_v1, %v2631_v0  ;;  %v435_v4 = vld [vmem:[%s3322_s0 + $0x28] sm:$0xff]  ;;  %v441_v10 = vld [vmem:[%s3322_s0 + $0x58] sm:$0xff]  ;;  %2280 = vrcp.f32 %v2402_v24 }
  0x64   : > { %v430_v5 = vld [vmem:[%s3322_s0] sm:$0xff]  ;;  %v431_v6 = vld [vmem:[%s3322_s0 + $0x8] sm:$0xff]  ;;  %v452_v7 = vadd.f32 %v435_v4, %v434_v2  ;;  %v436_v11 = vld [vmem:[%s3322_s0 + $0x30] sm:$0xff]  ;;  %v461_v15 = vadd.f32 %v441_v10, %v440_v9 }
  0x65   : > { %v446_v8 = vadd.f32 %v431_v6, %v430_v5  ;;  %459 = vadd.xlane.f32.xlu2 %v458_v3  ;;  %v437_v12 = vld [vmem:[%s3322_s0 + $0x38] sm:$0xff]  ;;  %v432_v13 = vld [vmem:[%s3322_s0 + $0x10] sm:$0xff]  ;;  %v2673_v18 = vld [vmem:[%s3322_s0 + $0x60] sm:$0xff] }
  0x66   : > { %453 = vadd.xlane.f32.xlu1 %v452_v7  ;;  %v433_v14 = vld [vmem:[%s3322_s0 + $0x18] sm:$0xff]  ;;  %v455_v16 = vadd.f32 %v437_v12, %v436_v11  ;;  %v2678_v19 = vld [vmem:[%s3322_s0 + $0x68] sm:$0xff]  ;;  %v2683_v20 = vld [vmem:[%s3322_s0 + $0x70] sm:$0xff] }
  0x67   : > { %447 = vadd.xlane.f32.xlu0 %v446_v8  ;;  %v449_v17 = vadd.f32 %v433_v14, %v432_v13  ;;  %v2688_v21 = vld [vmem:[%s3322_s0 + $0x78] sm:$0xff]  ;;  %v464_v22 = vadd.f32 %v2678_v19, %v2673_v18 }
  0x68   : > { %v467_v23 = vadd.f32 %v2688_v21, %v2683_v20 }
  0x69   : > { %v2281_v25 = vpop.eup %2280 }
  0x6a   : > { %v471_v26 = vmul.f32 256.0, %v2281_v25  ;;  %vm475_vm0 = vweird.f32 %v2281_v25 }
  0x6c   : > { %v472_v27 = vsub.f32 1.0, %v471_v26 }
  0x6d   : > { %462 = vadd.xlane.f32.xlu2 %v461_v15 }
  0x6e   : > { %456 = vadd.xlane.f32.xlu1 %v455_v16  ;;  %v473_v28 = vmul.f32 %v2281_v25, %v472_v27 }
  0x6f   : > { %450 = vadd.xlane.f32.xlu0 %v449_v17 }
  0x70   : > { %v474_v29 = vadd.f32 %v2281_v25, %v473_v28 }
  0x72   : > { %v2694_v30 = vsel %vm475_vm0, %v2281_v25, %v474_v29 }
  0x76   : > { %468 = vadd.xlane.f32.xlu1 %v467_v23 }
  0x77   : > { %465 = vadd.xlane.f32.xlu0 %v464_v22 }
  0xd8   : > { %v460_v31 = vpop.xlane.xlu2 %459 }
  0xd9   : > { %v454_v32 = vpop.xlane.xlu1 %453  ;;  %v481_v52 = vmul.f32 %v2694_v30, %v460_v31 }
  0xda   : > { %v448_v33 = vpop.xlane.xlu0 %447  ;;  %v479_v34 = vmul.f32 %v2694_v30, %v454_v32 }
  0xdb   : > { %v477_v35 = vmul.f32 %v2694_v30, %v448_v33  ;;  %v2743_v3 = vsub.f32 %v2631_v0, %v481_v52 }
  0xdc   : > { %v2698_v36 = vsub.f32 %v434_v2, %v479_v34  ;;  %v2700_v37 = vsub.f32 %v435_v4, %v479_v34  ;;  %v2746_v4 = vsub.f32 %v2636_v1, %v481_v52 }
  0xdd   : > { %v2702_v38 = vsub.f32 %v430_v5, %v477_v35  ;;  %v2704_v39 = vsub.f32 %v431_v6, %v477_v35 }
  0xde   : > { %v505_v40 = vmul.f32 %v2698_v36, %v2698_v36  ;;  %v506_v41 = vmul.f32 %v2700_v37, %v2700_v37  ;;  %v510_v0 = vmul.f32 %v2746_v4, %v2746_v4 }
  0xdf   : > { %v501_v42 = vmul.f32 %v2702_v38, %v2702_v38  ;;  %v502_v43 = vmul.f32 %v2704_v39, %v2704_v39 }
  0xe0   : > { %v463_v44 = vpop.xlane.xlu2 %462  ;;  %v523_v45 = vadd.f32 %v506_v41, %v505_v40 }
  0xe1   : > { %v517_v46 = vadd.f32 %v502_v43, %v501_v42  ;;  %v482_v47 = vmul.f32 %v2694_v30, %v463_v44  ;;  %v457_v48 = vpop.xlane.xlu1 %456 }
  0xe2   : > { %v451_v49 = vpop.xlane.xlu0 %450  ;;  %v480_v50 = vmul.f32 %v2694_v30, %v457_v48  ;;  %524 = vadd.xlane.f32.xlu1 %v523_v45 }
  0xe3   : > { %v478_v51 = vmul.f32 %v2694_v30, %v451_v49  ;;  %518 = vadd.xlane.f32.xlu2 %v517_v46  ;;  %v2718_v53 = vsub.f32 %v440_v9, %v482_v47  ;;  %v2720_v54 = vsub.f32 %v441_v10, %v482_v47  ;;  %v653_v46 = vld [vmem:[%s3323_s1] sm:$0x3] }
  0xe4   : > { %v2722_v55 = vsub.f32 %v436_v11, %v480_v50  ;;  %v2724_v56 = vsub.f32 %v437_v12, %v480_v50  ;;  %v509_v12 = vmul.f32 %v2743_v3, %v2743_v3  ;;  %v675_v47 = vld [vmem:[%s3324_s2] sm:$0x3]  ;;  %v2796_v52 = vperm.slane %v653_v46, 1 }
  0xe5   : > { %v2726_v57 = vsub.f32 %v432_v13, %v478_v51  ;;  %v2728_v58 = vsub.f32 %v433_v14, %v478_v51  ;;  %v511_v59 = vmul.f32 %v2718_v53, %v2718_v53  ;;  %v512_v60 = vmul.f32 %v2720_v54, %v2720_v54 }
  0xe6   : > { %v507_v61 = vmul.f32 %v2722_v55, %v2722_v55  ;;  %v508_v62 = vmul.f32 %v2724_v56, %v2724_v56  ;;  %v529_v22 = vadd.f32 %v510_v0, %v509_v12  ;;  %v2794_v51 = vperm.slane %v653_v46, 0 }
  0xe7   : > { %v503_v63 = vmul.f32 %v2726_v57, %v2726_v57  ;;  %v504_v2 = vmul.f32 %v2728_v58, %v2728_v58  ;;  %v532_v5 = vadd.f32 %v512_v60, %v511_v59  ;;  %v2798_v59 = vperm.slane %v675_v47, 0 }
  0xe8   : > { %v526_v6 = vadd.f32 %v508_v62, %v507_v61  ;;  %v2800_v62 = vperm.slane %v675_v47, 1 }
  0xe9   : > { %v520_v7 = vadd.f32 %v504_v2, %v503_v63  ;;  %v469_v9 = vpop.xlane.xlu1 %468 }
  0xea   : > { %v466_v8 = vpop.xlane.xlu0 %465  ;;  %533 = vadd.xlane.f32.xlu1 %v532_v5  ;;  %v484_v11 = vmul.f32 %v2694_v30, %v469_v9 }
  0xeb   : > { %v483_v10 = vmul.f32 %v2694_v30, %v466_v8  ;;  %527 = vadd.xlane.f32.xlu2 %v526_v6  ;;  %521 = vadd.xlane.f32.xlu0 %v520_v7 }
  0xec   : > { %v2765_v16 = vsub.f32 %v2683_v20, %v484_v11  ;;  %v2768_v17 = vsub.f32 %v2688_v21, %v484_v11 }
  0xed   : > { %v2755_v1 = vsub.f32 %v2673_v18, %v483_v10  ;;  %v2758_v13 = vsub.f32 %v2678_v19, %v483_v10 }
  0xee   : > { %v515_v18 = vmul.f32 %v2765_v16, %v2765_v16  ;;  %v516_v19 = vmul.f32 %v2768_v17, %v2768_v17 }
  0xef   : > { %v513_v14 = vmul.f32 %v2755_v1, %v2755_v1  ;;  %v514_v15 = vmul.f32 %v2758_v13, %v2758_v13 }
  0xf0   : > { %v538_v24 = vadd.f32 %v516_v19, %v515_v18 }
  0xf1   : > { %v535_v23 = vadd.f32 %v514_v15, %v513_v14 }
  0xf3   : > { %536 = vadd.xlane.f32.xlu2 %v535_v23  ;;  %530 = vadd.xlane.f32.xlu0 %v529_v22 }
  0xfb   : > { %539 = vadd.xlane.f32.xlu0 %v538_v24 }
 0x155   : > { %v525_v25 = vpop.xlane.xlu1 %524 }
 0x156   : > { %v519_v26 = vpop.xlane.xlu2 %518  ;;  %v543_v20 = vmul.f32 %v525_v25, %v2694_v30 }
 0x157   : > { %v541_v27 = vmul.f32 %v519_v26, %v2694_v30 }
 0x158   : > { %v551_v21 = vadd.f32 1e-05, %v543_v20 }
 0x159   : > { %v549_v28 = vadd.f32 1e-05, %v541_v27 }
 0x15a   : > { %2282 = vrsqrt.f32 %v551_v21  ;;  %vm583_vm1 = vweird.f32 %v551_v21 }
 0x15b   : > { %2284 = vrsqrt.f32 %v549_v28  ;;  %vm563_vm3 = vweird.f32 %v549_v28 }
 0x15d   : > { %v534_v29 = vpop.xlane.xlu1 %533 }
 0x15e   : > { %v528_v31 = vpop.xlane.xlu2 %527  ;;  %v546_v32 = vmul.f32 %v534_v29, %v2694_v30  ;;  %v522_v34 = vpop.xlane.xlu0 %521 }
 0x15f   : > { %v544_v33 = vmul.f32 %v528_v31, %v2694_v30  ;;  %v542_v35 = vmul.f32 %v522_v34, %v2694_v30 }
 0x160   : > { %v2283_v40 = vpop.eup %2282  ;;  %v2779_v41 = vadd.f32 1e-05, %v546_v32 }
 0x161   : > { %v2781_v42 = vadd.f32 1e-05, %v544_v33  ;;  %v2285_v43 = vpop.eup %2284  ;;  %v578_v44 = vmul.f32 %v2283_v40, %v551_v21  ;;  %v2783_v45 = vadd.f32 1e-05, %v542_v35  ;;  %vm584_vm2 = vweird.f32 %v2283_v40 }
 0x162   : > { %v558_v48 = vmul.f32 %v2285_v43, %v549_v28  ;;  %2286 = vrsqrt.f32 %v2779_v41  ;;  %vm564_vm4 = vweird.f32 %v2285_v43  ;;  %vm613_vm5 = vweird.f32 %v2779_v41  ;;  %vm585_vm8 = vmor %vm583_vm1, %vm584_vm2 }
 0x163   : > { %v579_v49 = vmul.f32 %v2283_v40, %v578_v44  ;;  %2288 = vrsqrt.f32 %v2781_v42  ;;  %vm593_vm7 = vweird.f32 %v2781_v42  ;;  %vm565_vm9 = vmor %vm563_vm3, %vm564_vm4  ;;  %vm573_vm11 = vweird.f32 %v2783_v45 }
 0x164   : > { %v559_v50 = vmul.f32 %v2285_v43, %v558_v48  ;;  %2290 = vrsqrt.f32 %v2783_v45 }
 0x165   : > { %v580_v60 = vmul.f32 0.5, %v579_v49 }
 0x166   : > { %v537_v61 = vpop.xlane.xlu2 %536  ;;  %v560_v63 = vmul.f32 0.5, %v559_v50  ;;  %v531_v5 = vpop.xlane.xlu0 %530 }
 0x167   : > { %v547_v2 = vmul.f32 %v537_v61, %v2694_v30  ;;  %v581_v6 = vsub.f32 1.5, %v580_v60  ;;  %v545_v7 = vmul.f32 %v531_v5, %v2694_v30 }
 0x168   : > { %v2287_v8 = vpop.eup %2286  ;;  %v561_v9 = vsub.f32 1.5, %v560_v63 }
 0x169   : > { %v2805_v10 = vadd.f32 1e-05, %v547_v2  ;;  %v2289_v11 = vpop.eup %2288  ;;  %v582_v12 = vmul.f32 %v2283_v40, %v581_v6  ;;  %v608_v0 = vmul.f32 %v2287_v8, %v2779_v41  ;;  %vm614_vm6 = vweird.f32 %v2287_v8 }
 0x16a   : > { %v2291_v14 = vpop.eup %2290  ;;  %v562_v15 = vmul.f32 %v2285_v43, %v561_v9  ;;  %v588_v22 = vmul.f32 %v2289_v11, %v2781_v42  ;;  %v2812_v23 = vadd.f32 1e-05, %v545_v7  ;;  %vm594_vm10 = vweird.f32 %v2289_v11  ;;  %vm615_vm13 = vmor %vm613_vm5, %vm614_vm6 }
 0x16b   : > { %2292 = vrsqrt.f32 %v2805_v10  ;;  %v586_v18 = vsel %vm585_vm8, %v2283_v40, %v582_v12  ;;  %v609_v19 = vmul.f32 %v2287_v8, %v608_v0  ;;  %v568_v24 = vmul.f32 %v2291_v14, %v2783_v45  ;;  %vm595_vm15 = vmor %vm593_vm7, %vm594_vm10 }
 0x16c   : > { %v641_v25 = vmul.f32 %v586_v18, %v2698_v36  ;;  %v642_v26 = vmul.f32 %v586_v18, %v2700_v37  ;;  %v566_v20 = vsel %vm565_vm9, %v2285_v43, %v562_v15  ;;  %v589_v27 = vmul.f32 %v2289_v11, %v588_v22 }
 0x16d   : > { %v637_v21 = vmul.f32 %v566_v20, %v2702_v38  ;;  %v638_v29 = vmul.f32 %v566_v20, %v2704_v39  ;;  %v610_v31 = vmul.f32 0.5, %v609_v19  ;;  %v569_v32 = vmul.f32 %v2291_v14, %v568_v24 }
 0x16e   : > { %v663_v28 = vmul.f32 %v2794_v51, %v641_v25  ;;  %v664_v33 = vmul.f32 %v2796_v52, %v642_v26  ;;  %v590_v34 = vmul.f32 0.5, %v589_v27  ;;  %vm574_vm12 = vweird.f32 %v2291_v14  ;;  %v540_v63 = vpop.xlane.xlu0 %539 }
 0x16f   : > { %v659_v35 = vmul.f32 %v2794_v51, %v637_v21  ;;  %v660_v36 = vmul.f32 %v2796_v52, %v638_v29  ;;  %v611_v40 = vsub.f32 1.5, %v610_v31  ;;  %v570_v37 = vmul.f32 0.5, %v569_v32  ;;  %vm575_vm1 = vmor %vm573_vm11, %vm574_vm12 }
 0x170   : > { %v685_v44 = vadd.f32 %v2798_v59, %v663_v28  ;;  %v686_v38 = vadd.f32 %v2800_v62, %v664_v33  ;;  %v591_v39 = vsub.f32 1.5, %v590_v34  ;;  %2294 = vrsqrt.f32 %v2812_v23 }
 0x171   : > { %v2293_v43 = vpop.eup %2292  ;;  %v681_v46 = vadd.f32 %v2798_v59, %v659_v35  ;;  %v682_v47 = vadd.f32 %v2800_v62, %v660_v36  ;;  %v612_v48 = vmul.f32 %v2287_v8, %v611_v40  ;;  %v571_v49 = vsub.f32 1.5, %v570_v37 }
 0x172   : > { %v699_v50 = vpack.c.bf16 %v686_v38, %v685_v44  ;;  %v592_v60 = vmul.f32 %v2289_v11, %v591_v39  ;;  %v618_v61 = vmul.f32 %v2293_v43, %v2805_v10  ;;  %vm623_vm14 = vweird.f32 %v2805_v10 }
 0x173   : > { %v697_v2 = vpack.c.bf16 %v682_v47, %v681_v46  ;;  %v616_v5 = vsel %vm615_vm13, %v2287_v8, %v612_v48  ;;  %v572_v41 = vmul.f32 %v2291_v14, %v571_v49  ;;  %vm624_vm0 = vweird.f32 %v2293_v43 }
 0x174   : > { %707 = vst [vmem:[#allocation2 + $0x10] sm:$0xff] %v699_v50  ;;  %v647_v6 = vmul.f32 %v616_v5, %v2718_v53  ;;  %v648_v7 = vmul.f32 %v616_v5, %v2720_v54  ;;  %v596_v9 = vsel %vm595_vm15, %v2289_v11, %v592_v60  ;;  %v619_v12 = vmul.f32 %v2293_v43, %v618_v61  ;;  %vm625_vm2 = vmor %vm623_vm14, %vm624_vm0 }
 0x175   : > { %705 = vst [vmem:[#allocation2] sm:$0xff] %v697_v2  ;;  %v643_v8 = vmul.f32 %v596_v9, %v2722_v55  ;;  %v644_v0 = vmul.f32 %v596_v9, %v2724_v56  ;;  %v576_v42 = vsel %vm575_vm1, %v2291_v14, %v572_v41  ;;  %v548_v15 = vmul.f32 %v540_v63, %v2694_v30 }
 0x176   : > { %v2295_v22 = vpop.eup %2294  ;;  %v669_v18 = vmul.f32 %v2794_v51, %v647_v6  ;;  %v670_v53 = vmul.f32 %v2796_v52, %v648_v7  ;;  %v639_v54 = vmul.f32 %v576_v42, %v2726_v57  ;;  %v640_v11 = vmul.f32 %v576_v42, %v2728_v58 }
 0x177   : > { %v665_v45 = vmul.f32 %v2794_v51, %v643_v8  ;;  %v666_v19 = vmul.f32 %v2796_v52, %v644_v0  ;;  %v620_v24 = vmul.f32 0.5, %v619_v12  ;;  %v598_v55 = vmul.f32 %v2295_v22, %v2812_v23 }
 0x178   : > { %v691_v56 = vadd.f32 %v2798_v59, %v669_v18  ;;  %v692_v30 = vadd.f32 %v2800_v62, %v670_v53  ;;  %v661_v14 = vmul.f32 %v2794_v51, %v639_v54  ;;  %v662_v25 = vmul.f32 %v2796_v52, %v640_v11 }
 0x179   : > { %v687_v26 = vadd.f32 %v2798_v59, %v665_v45  ;;  %v688_v57 = vadd.f32 %v2800_v62, %v666_v19  ;;  %v621_v58 = vsub.f32 1.5, %v620_v24  ;;  %v599_v20 = vmul.f32 %v2295_v22, %v598_v55 }
 0x17a   : > { %v702_v27 = vpack.c.bf16 %v692_v30, %v691_v56  ;;  %v683_v21 = vadd.f32 %v2798_v59, %v661_v14  ;;  %v684_v29 = vadd.f32 %v2800_v62, %v662_v25  ;;  %v556_v33 = vadd.f32 1e-05, %v548_v15 }
 0x17b   : > { %v700_v31 = vpack.c.bf16 %v688_v57, %v687_v26  ;;  %v622_v32 = vmul.f32 %v2293_v43, %v621_v58  ;;  %v600_v28 = vmul.f32 0.5, %v599_v20  ;;  %vm604_vm3 = vweird.f32 %v2295_v22 }
 0x17c   : > { %710 = vst [vmem:[#allocation2 + $0x28] sm:$0xff] %v702_v27  ;;  %v698_v34 = vpack.c.bf16 %v684_v29, %v683_v21  ;;  %2296 = vrsqrt.f32 %v556_v33  ;;  %vm603_vm4 = vweird.f32 %v2812_v23  ;;  %vm633_vm7 = vweird.f32 %v556_v33 }
 0x17d   : > { %708 = vst [vmem:[#allocation2 + $0x18] sm:$0xff] %v700_v31  ;;  %v626_v35 = vsel %vm625_vm2, %v2293_v43, %v622_v32  ;;  %v601_v36 = vsub.f32 1.5, %v600_v28  ;;  %vm605_vm5 = vmor %vm603_vm4, %vm604_vm3 }
 0x17e   : > { %706 = vst [vmem:[#allocation2 + $0x8] sm:$0xff] %v698_v34  ;;  %v649_v40 = vmul.f32 %v626_v35, %v2755_v1  ;;  %v650_v37 = vmul.f32 %v626_v35, %v2758_v13 }
 0x17f   : > { %v602_v44 = vmul.f32 %v2295_v22, %v601_v36 }
 0x180   : > { %v671_v38 = vmul.f32 %v2794_v51, %v649_v40  ;;  %v672_v39 = vmul.f32 %v2796_v52, %v650_v37 }
 0x181   : > { %v606_v10 = vsel %vm605_vm5, %v2295_v22, %v602_v44 }
 0x182   : > { %v693_v46 = vadd.f32 %v2798_v59, %v671_v38  ;;  %v694_v43 = vadd.f32 %v2800_v62, %v672_v39  ;;  %v645_v47 = vmul.f32 %v606_v10, %v2743_v3  ;;  %v646_v48 = vmul.f32 %v606_v10, %v2746_v4  ;;  %v2297_v1 = vpop.eup %2296 }
 0x183   : > { %v628_v50 = vmul.f32 %v2297_v1, %v556_v33  ;;  %vm634_vm6 = vweird.f32 %v2297_v1 }
 0x184   : > { %v703_v49 = vpack.c.bf16 %v694_v43, %v693_v46  ;;  %v667_v13 = vmul.f32 %v2794_v51, %v645_v47  ;;  %v668_v23 = vmul.f32 %v2796_v52, %v646_v48  ;;  %vm635_vm8 = vmor %vm633_vm7, %vm634_vm6 }
 0x185   : > { %v629_v63 = vmul.f32 %v2297_v1, %v628_v50 }
 0x186   : > { %711 = vst [vmem:[#allocation2 + $0x30] sm:$0xff] %v703_v49  ;;  %v689_v60 = vadd.f32 %v2798_v59, %v667_v13  ;;  %v690_v61 = vadd.f32 %v2800_v62, %v668_v23 }
 0x187   : > { %v630_v5 = vmul.f32 0.5, %v629_v63 }
 0x188   : > { %v701_v2 = vpack.c.bf16 %v690_v61, %v689_v60 }
 0x189   : > { %v631_v41 = vsub.f32 1.5, %v630_v5 }
 0x18a   : > { %709 = vst [vmem:[#allocation2 + $0x20] sm:$0xff] %v701_v2 }
 0x18b   : > { %v632_v3 = vmul.f32 %v2297_v1, %v631_v41 }
 0x18d   : > { %v636_v4 = vsel %vm635_vm8, %v2297_v1, %v632_v3 }
 0x18e   : > { %v651_v6 = vmul.f32 %v636_v4, %v2765_v16  ;;  %v652_v7 = vmul.f32 %v636_v4, %v2768_v17 }
 0x190   : > { %v673_v9 = vmul.f32 %v2794_v51, %v651_v6  ;;  %v674_v12 = vmul.f32 %v2796_v52, %v652_v7 }
 0x192   : > { %v695_v8 = vadd.f32 %v2798_v59, %v673_v9  ;;  %v696_v0 = vadd.f32 %v2800_v62, %v674_v12 }
 0x194   : > { %v704_v42 = vpack.c.bf16 %v696_v0, %v695_v8 }
 0x196   : > { %712 = vst [vmem:[#allocation2 + $0x38] sm:$0xff] %v704_v42 }
 0x197 PF: > { %v2018_v16 = vld [vmem:[%s2623_s24 + $0xe0] sm:$0xf]  ;;  %v2204_v17 = vld [vmem:[%s2623_s24 + $0xec] sm:$0xf0]  ;;  %v2202_v62 = vld [vmem:[%s2623_s24 + $0xe4] sm:$0xf] }
 0x198   : > { %v2146_v51 = vld [vmem:[%s2623_s24 + $0x1e0] sm:$0xf]  ;;  %v2019_v52 = vor.u32 %v2204_v17, %v2018_v16  ;;  %v2236_v59 = vld [vmem:[%s2623_s24 + $0x1ec] sm:$0xf0]  ;;  %v2020_v15 = vld [vmem:[%s2623_s24 + $0xf0] sm:$0xf0] }
 0x199   : > { %v2147_v22 = vor.u32 %v2236_v59, %v2146_v51  ;;  %v2023_v18 = vor.u32 %v2202_v62, %v2020_v15  ;;  %v2234_v53 = vld [vmem:[%s2623_s24 + $0x1e4] sm:$0xf]  ;;  %v2148_v54 = vld [vmem:[%s2623_s24 + $0x1f0] sm:$0xf0]  ;;  %v2002_v11 = vld [vmem:[%s2623_s24 + $0xc0] sm:$0xf] }
 0x19a   : > { %1155 = vmatpush.bf16.msra.mxu0 %v2019_v52  ;;  %v2151_v45 = vor.u32 %v2234_v53, %v2148_v54  ;;  %v2200_v19 = vld [vmem:[%s2623_s24 + $0xcc] sm:$0xf0]  ;;  %v2130_v24 = vld [vmem:[%s2623_s24 + $0x1c0] sm:$0xf]  ;;  %v2198_v14 = vld [vmem:[%s2623_s24 + $0xc4] sm:$0xf] }
 0x19b   : > { %v2232_v55 = vld [vmem:[%s2623_s24 + $0x1cc] sm:$0xf0]  ;;  %1184 = vmatpush.bf16.msra.mxu1 %v2147_v22  ;;  %1213 = vmatpush.bf16.msra.mxu2 %v2023_v18  ;;  %v2003_v56 = vor.u32 %v2200_v19, %v2002_v11  ;;  %v2004_v25 = vld [vmem:[%s2623_s24 + $0xd0] sm:$0xf0]  ;;  %v2230_v26 = vld [vmem:[%s2623_s24 + $0x1c4] sm:$0xf] }
 0x19c   : > { %v2131_v30 = vor.u32 %v2232_v55, %v2130_v24  ;;  %1242 = vmatpush.bf16.msra.mxu3 %v2151_v45  ;;  %v2007_v57 = vor.u32 %v2198_v14, %v2004_v25  ;;  %v2132_v58 = vld [vmem:[%s2623_s24 + $0x1d0] sm:$0xf0]  ;;  %v1986_v20 = vld [vmem:[%s2623_s24 + $0xa0] sm:$0xf]  ;;  %v2196_v27 = vld [vmem:[%s2623_s24 + $0xac] sm:$0xf0] }
 0x19d   : > { %v2135_v21 = vor.u32 %v2230_v26, %v2132_v58  ;;  %v2114_v29 = vld [vmem:[%s2623_s24 + $0x1a0] sm:$0xf]  ;;  %v2228_v31 = vld [vmem:[%s2623_s24 + $0x1ac] sm:$0xf0]  ;;  %v2194_v32 = vld [vmem:[%s2623_s24 + $0xa4] sm:$0xf]  ;;  %v1987_v28 = vor.u32 %v2196_v27, %v1986_v20 }
 0x19e   : > { %1156 = vmatpush.bf16.msra.mxu0 %v2003_v56  ;;  %v1988_v33 = vld [vmem:[%s2623_s24 + $0xb0] sm:$0xf0]  ;;  %v2226_v34 = vld [vmem:[%s2623_s24 + $0x1a4] sm:$0xf]  ;;  %v2115_v36 = vor.u32 %v2228_v31, %v2114_v29  ;;  %v1970_v37 = vld [vmem:[%s2623_s24 + $0x80] sm:$0xf] }
 0x19f   : > { %v2116_v35 = vld [vmem:[%s2623_s24 + $0x1b0] sm:$0xf0]  ;;  %1185 = vmatpush.bf16.msra.mxu1 %v2131_v30  ;;  %1214 = vmatpush.bf16.msra.mxu2 %v2007_v57  ;;  %v1991_v40 = vor.u32 %v2194_v32, %v1988_v33  ;;  %v2192_v44 = vld [vmem:[%s2623_s24 + $0x8c] sm:$0xf0]  ;;  %v2098_v38 = vld [vmem:[%s2623_s24 + $0x180] sm:$0xf] }
 0x1a0   : > { %1243 = vmatpush.bf16.msra.mxu3 %v2135_v21  ;;  %v2119_v39 = vor.u32 %v2226_v34, %v2116_v35  ;;  %v2224_v10 = vld [vmem:[%s2623_s24 + $0x18c] sm:$0xf0]  ;;  %v2190_v46 = vld [vmem:[%s2623_s24 + $0x84] sm:$0xf]  ;;  %v1972_v43 = vld [vmem:[%s2623_s24 + $0x90] sm:$0xf0]  ;;  %v1971_v1 = vor.u32 %v2192_v44, %v1970_v37 }
 0x1a1   : > { %v2222_v47 = vld [vmem:[%s2623_s24 + $0x184] sm:$0xf]  ;;  %v2100_v48 = vld [vmem:[%s2623_s24 + $0x190] sm:$0xf0]  ;;  %v2099_v49 = vor.u32 %v2224_v10, %v2098_v38  ;;  %v1975_v13 = vor.u32 %v2190_v46, %v1972_v43  ;;  %v1954_v23 = vld [vmem:[%s2623_s24 + $0x60] sm:$0xf] }
 0x1a2   : > { %1157 = vmatpush.bf16.msra.mxu0 %v1987_v28  ;;  %v2188_v50 = vld [vmem:[%s2623_s24 + $0x6c] sm:$0xf0]  ;;  %v2082_v60 = vld [vmem:[%s2623_s24 + $0x160] sm:$0xf]  ;;  %v2103_v61 = vor.u32 %v2222_v47, %v2100_v48  ;;  %v2186_v2 = vld [vmem:[%s2623_s24 + $0x64] sm:$0xf] }
 0x1a3   : > { %1186 = vmatpush.bf16.msra.mxu1 %v2115_v36  ;;  %1215 = vmatpush.bf16.msra.mxu2 %v1991_v40  ;;  %v2220_v63 = vld [vmem:[%s2623_s24 + $0x16c] sm:$0xf0]  ;;  %v1956_v5 = vld [vmem:[%s2623_s24 + $0x70] sm:$0xf0]  ;;  %v2218_v41 = vld [vmem:[%s2623_s24 + $0x164] sm:$0xf]  ;;  %v1955_v4 = vor.u32 %v2188_v50, %v1954_v23 }
 0x1a4   : > { %1244 = vmatpush.bf16.msra.mxu3 %v2119_v39  ;;  %v2084_v3 = vld [vmem:[%s2623_s24 + $0x170] sm:$0xf0]  ;;  %v2083_v6 = vor.u32 %v2220_v63, %v2082_v60  ;;  %v1959_v7 = vor.u32 %v2186_v2, %v1956_v5  ;;  %v1938_v9 = vld [vmem:[%s2623_s24 + $0x40] sm:$0xf]  ;;  %v2184_v12 = vld [vmem:[%s2623_s24 + $0x4c] sm:$0xf0] }
 0x1a5   : > { %v2066_v8 = vld [vmem:[%s2623_s24 + $0x140] sm:$0xf]  ;;  %v2087_v0 = vor.u32 %v2218_v41, %v2084_v3  ;;  %v2216_v42 = vld [vmem:[%s2623_s24 + $0x14c] sm:$0xf0]  ;;  %v2182_v16 = vld [vmem:[%s2623_s24 + $0x44] sm:$0xf]  ;;  %v1939_v59 = vor.u32 %v2184_v12, %v1938_v9 }
 0x1a6   : > { %1158 = vmatpush.bf16.msra.mxu0 %v1971_v1  ;;  %v1940_v17 = vld [vmem:[%s2623_s24 + $0x50] sm:$0xf0]  ;;  %v2214_v51 = vld [vmem:[%s2623_s24 + $0x144] sm:$0xf]  ;;  %v2067_v62 = vor.u32 %v2216_v42, %v2066_v8  ;;  %v1922_v22 = vld [vmem:[%s2623_s24 + $0x20] sm:$0xf] }
 0x1a7   : > { %1187 = vmatpush.bf16.msra.mxu1 %v2099_v49  ;;  %1216 = vmatpush.bf16.msra.mxu2 %v1975_v13  ;;  %v2068_v52 = vld [vmem:[%s2623_s24 + $0x150] sm:$0xf0]  ;;  %v1943_v15 = vor.u32 %v2182_v16, %v1940_v17  ;;  %v2180_v18 = vld [vmem:[%s2623_s24 + $0x2c] sm:$0xf0]  ;;  %v2050_v53 = vld [vmem:[%s2623_s24 + $0x120] sm:$0xf] }
 0x1a8   : > { %1245 = vmatpush.bf16.msra.mxu3 %v2103_v61  ;;  %v2071_v54 = vor.u32 %v2214_v51, %v2068_v52  ;;  %v2212_v11 = vld [vmem:[%s2623_s24 + $0x12c] sm:$0xf0]  ;;  %v2178_v45 = vld [vmem:[%s2623_s24 + $0x24] sm:$0xf]  ;;  %v1924_v19 = vld [vmem:[%s2623_s24 + $0x30] sm:$0xf0]  ;;  %v1923_v56 = vor.u32 %v2180_v18, %v1922_v22 }
 0x1a9   : > { %v2210_v24 = vld [vmem:[%s2623_s24 + $0x124] sm:$0xf]  ;;  %v2052_v55 = vld [vmem:[%s2623_s24 + $0x130] sm:$0xf0]  ;;  %v1906_v30 = vld [vmem:[%s2623_s24] sm:$0xf]  ;;  %v2051_v25 = vor.u32 %v2212_v11, %v2050_v53  ;;  %v1927_v26 = vor.u32 %v2178_v45, %v1924_v19 }
 0x1aa   : > { %1159 = vmatpush.bf16.msra.mxu0 %v1955_v4  ;;  %v2176_v14 = vld [vmem:[%s2623_s24 + $0xc] sm:$0xf0]  ;;  %v2034_v57 = vld [vmem:[%s2623_s24 + $0x100] sm:$0xf]  ;;  %v2174_v20 = vld [vmem:[%s2623_s24 + $0x4] sm:$0xf]  ;;  %v2055_v27 = vor.u32 %v2210_v24, %v2052_v55 }
 0x1ab   : > { %1188 = vmatpush.bf16.msra.mxu1 %v2083_v6  ;;  %1217 = vmatpush.bf16.msra.mxu2 %v1959_v7  ;;  %v2208_v58 = vld [vmem:[%s2623_s24 + $0x10c] sm:$0xf0]  ;;  %v1908_v21 = vld [vmem:[%s2623_s24 + $0x10] sm:$0xf0]  ;;  %v2206_v29 = vld [vmem:[%s2623_s24 + $0x104] sm:$0xf]  ;;  %v1907_v34 = vor.u32 %v2176_v14, %v1906_v30 }
 0x1ac   : > { %1246 = vmatpush.bf16.msra.mxu3 %v2087_v0  ;;  %v2036_v31 = vld [vmem:[%s2623_s24 + $0x110] sm:$0xf0]  ;;  %v1874_v32 = vld [vmem:[#allocation2] sm:$0xf]  ;;  %v2203_v28 = vld [vmem:[%s2623_s24 + $0xec] sm:$0xf]  ;;  %v2035_v37 = vor.u32 %v2208_v58, %v2034_v57  ;;  %v1911_v44 = vor.u32 %v2174_v20, %v1908_v21 }
 0x1ad   : > { %v2028_v33 = vld [vmem:[%s2623_s24 + $0xf8] sm:$0xf0]  ;;  %v2167_v35 = vld [vmem:[#allocation2 + $0x4] sm:$0xf0]  ;;  %v2235_v36 = vld [vmem:[%s2623_s24 + $0x1ec] sm:$0xf]  ;;  %v2039_v10 = vor.u32 %v2206_v29, %v2036_v31 }
 0x1ae   : > { %1160 = vmatpush.bf16.msra.mxu0 %v1939_v59  ;;  %v2156_v40 = vld [vmem:[%s2623_s24 + $0x1f8] sm:$0xf0]  ;;  %v2166_v38 = vld [vmem:[#allocation2 + $0x4] sm:$0xf]  ;;  %v1876_v39 = vld [vmem:[#allocation2 + $0x8] sm:$0xf0]  ;;  %v2031_v46 = vor.u32 %v2203_v28, %v2028_v33  ;;  %v2955_v1 = vor.u32 %v2167_v35, %v1874_v32 }
 0x1af   : > { %1189 = vmatpush.bf16.msra.mxu1 %v2067_v62  ;;  %1218 = vmatpush.bf16.msra.mxu2 %v1943_v15  ;;  %v2026_v43 = vld [vmem:[%s2623_s24 + $0xe8] sm:$0xf]  ;;  %v2205_v47 = vld [vmem:[%s2623_s24 + $0xf4] sm:$0xf0]  ;;  %v2159_v49 = vor.u32 %v2235_v36, %v2156_v40  ;;  %v2199_v23 = vld [vmem:[%s2623_s24 + $0xcc] sm:$0xf]  ;;  %v2960_v60 = vor.u32 %v2166_v38, %v1876_v39 }
 0x1b0   : > { %1247 = vmatpush.bf16.msra.mxu3 %v2071_v54  ;;  %v2154_v48 = vld [vmem:[%s2623_s24 + $0x1e8] sm:$0xf]  ;;  %v2237_v13 = vld [vmem:[%s2623_s24 + $0x1f4] sm:$0xf0]  ;;  %v2012_v50 = vld [vmem:[%s2623_s24 + $0xd8] sm:$0xf0]  ;;  %v2027_v2 = vor.u32 %v2205_v47, %v2026_v43 }
 0x1b1   : > { %v2231_v61 = vld [vmem:[%s2623_s24 + $0x1cc] sm:$0xf]  ;;  %v2140_v63 = vld [vmem:[%s2623_s24 + $0x1d8] sm:$0xf0]  ;;  %v2155_v5 = vor.u32 %v2237_v13, %v2154_v48  ;;  %v2015_v41 = vor.u32 %v2199_v23, %v2012_v50  ;;  %v2010_v3 = vld [vmem:[%s2623_s24 + $0xc8] sm:$0xf] }
 0x1b2   : > { %1161 = vmatpush.bf16.msra.mxu0 %v1923_v56  ;;  %v2201_v4 = vld [vmem:[%s2623_s24 + $0xd4] sm:$0xf0]  ;;  %v2138_v6 = vld [vmem:[%s2623_s24 + $0x1c8] sm:$0xf]  ;;  %v2143_v7 = vor.u32 %v2231_v61, %v2140_v63  ;;  %v2195_v12 = vld [vmem:[%s2623_s24 + $0xac] sm:$0xf] }
 0x1b3   : > { %1190 = vmatpush.bf16.msra.mxu1 %v2051_v25  ;;  %1219 = vmatpush.bf16.msra.mxu2 %v1927_v26  ;;  %v2233_v9 = vld [vmem:[%s2623_s24 + $0x1d4] sm:$0xf0]  ;;  %v1996_v8 = vld [vmem:[%s2623_s24 + $0xb8] sm:$0xf0]  ;;  %v2227_v0 = vld [vmem:[%s2623_s24 + $0x1ac] sm:$0xf]  ;;  %v2011_v16 = vor.u32 %v2201_v4, %v2010_v3 }
 0x1b4   : > { %1248 = vmatpush.bf16.msra.mxu3 %v2055_v27  ;;  %v2124_v42 = vld [vmem:[%s2623_s24 + $0x1b8] sm:$0xf0]  ;;  %v2139_v17 = vor.u32 %v2233_v9, %v2138_v6  ;;  %v1999_v51 = vor.u32 %v2195_v12, %v1996_v8  ;;  %v1994_v52 = vld [vmem:[%s2623_s24 + $0xa8] sm:$0xf]  ;;  %v2197_v59 = vld [vmem:[%s2623_s24 + $0xb4] sm:$0xf0] }
 0x1b5   : > { %v2122_v62 = vld [vmem:[%s2623_s24 + $0x1a8] sm:$0xf]  ;;  %v2127_v15 = vor.u32 %v2227_v0, %v2124_v42  ;;  %v2229_v22 = vld [vmem:[%s2623_s24 + $0x1b4] sm:$0xf0]  ;;  %v2191_v18 = vld [vmem:[%s2623_s24 + $0x8c] sm:$0xf]  ;;  %v1995_v45 = vor.u32 %v2197_v59, %v1994_v52 }
 0x1b6   : > { %1162 = vmatpush.bf16.msra.mxu0 %v1907_v34  ;;  %v1980_v53 = vld [vmem:[%s2623_s24 + $0x98] sm:$0xf0]  ;;  %v2223_v54 = vld [vmem:[%s2623_s24 + $0x18c] sm:$0xf]  ;;  %v1882_v19 = vld [vmem:[#allocation2 + $0x10] sm:$0xf]  ;;  %v2123_v24 = vor.u32 %v2229_v22, %v2122_v62 }
 0x1b7   : > { %1191 = vmatpush.bf16.msra.mxu1 %v2035_v37  ;;  %1220 = vmatpush.bf16.msra.mxu2 %v1911_v44  ;;  %v2108_v11 = vld [vmem:[%s2623_s24 + $0x198] sm:$0xf0]  ;;  %v1983_v55 = vor.u32 %v2191_v18, %v1980_v53  ;;  %v1978_v56 = vld [vmem:[%s2623_s24 + $0x88] sm:$0xf]  ;;  %v2193_v30 = vld [vmem:[%s2623_s24 + $0x94] sm:$0xf0] }
 0x1b8   : > { %1249 = vmatpush.bf16.msra.mxu3 %v2039_v10  ;;  %v2106_v14 = vld [vmem:[%s2623_s24 + $0x188] sm:$0xf]  ;;  %v2111_v25 = vor.u32 %v2223_v54, %v2108_v11  ;;  %v2225_v26 = vld [vmem:[%s2623_s24 + $0x194] sm:$0xf0]  ;;  %v2187_v57 = vld [vmem:[%s2623_s24 + $0x6c] sm:$0xf]  ;;  %v1979_v32 = vor.u32 %v2193_v30, %v1978_v56 }
 0x1b9   : > { %1163 = vmatmul.bf16.vlgmr.msra.gmra.mxu0 %v2955_v1  ;;  %v1964_v58 = vld [vmem:[%s2623_s24 + $0x78] sm:$0xf0]  ;;  %v2169_v20 = vld [vmem:[#allocation2 + $0x14] sm:$0xf0]  ;;  %v2219_v27 = vld [vmem:[%s2623_s24 + $0x16c] sm:$0xf]  ;;  %v2107_v28 = vor.u32 %v2225_v26, %v2106_v14 }
 0x1ba   : > { %1192 = vmatmul.bf16.vlgmr.msra.gmra.mxu1 %v2960_v60  ;;  %1221 = vmatmul.bf16.vlgmr.msra.gmra.mxu2 %v2955_v1  ;;  %v2092_v21 = vld [vmem:[%s2623_s24 + $0x178] sm:$0xf0]  ;;  %v2168_v29 = vld [vmem:[#allocation2 + $0x14] sm:$0xf]  ;;  %v1967_v33 = vor.u32 %v2187_v57, %v1964_v58  ;;  %v1962_v34 = vld [vmem:[%s2623_s24 + $0x68] sm:$0xf]  ;;  %v2995_v40 = vor.u32 %v2169_v20, %v1882_v19 }
 0x1bb   : > { %1329 = vmatpush.bf16.msrb.mxu2 %v2031_v46  ;;  %1250 = vmatmul.bf16.vlgmr.msra.gmra.mxu3 %v2960_v60  ;;  %v1884_v31 = vld [vmem:[#allocation2 + $0x18] sm:$0xf0]  ;;  %v2189_v35 = vld [vmem:[%s2623_s24 + $0x74] sm:$0xf0]  ;;  %v2090_v36 = vld [vmem:[%s2623_s24 + $0x168] sm:$0xf]  ;;  %v2095_v37 = vor.u32 %v2219_v27, %v2092_v21 }
 0x1bc   : > { %1358 = vmatpush.bf16.msrb.mxu3 %v2159_v49  ;;  %1271 = vmatpush.bf16.msrb.mxu0 %v2027_v2  ;;  %v2221_v44 = vld [vmem:[%s2623_s24 + $0x174] sm:$0xf0]  ;;  %v2183_v38 = vld [vmem:[%s2623_s24 + $0x4c] sm:$0xf]  ;;  %v1948_v39 = vld [vmem:[%s2623_s24 + $0x58] sm:$0xf0]  ;;  %v3000_v10 = vor.u32 %v2168_v29, %v1884_v31  ;;  %v1963_v47 = vor.u32 %v2189_v35, %v1962_v34 }
 0x1bd   : > { %1300 = vmatpush.bf16.msrb.mxu1 %v2155_v5  ;;  %v2215_v46 = vld [vmem:[%s2623_s24 + $0x14c] sm:$0xf]  ;;  %v2076_v43 = vld [vmem:[%s2623_s24 + $0x158] sm:$0xf0]  ;;  %v2091_v48 = vor.u32 %v2221_v44, %v2090_v36  ;;  %v1951_v49 = vor.u32 %v2183_v38, %v1948_v39  ;;  %v1946_v13 = vld [vmem:[%s2623_s24 + $0x48] sm:$0xf] }
 0x1be   : > { %v2185_v23 = vld [vmem:[%s2623_s24 + $0x54] sm:$0xf0]  ;;  %v2079_v50 = vor.u32 %v2215_v46, %v2076_v43  ;;  %v2074_v63 = vld [vmem:[%s2623_s24 + $0x148] sm:$0xf]  ;;  %v2179_v5 = vld [vmem:[%s2623_s24 + $0x2c] sm:$0xf] }
 0x1bf   : > { %1330 = vmatpush.bf16.msrb.mxu2 %v2015_v41  ;;  %v1947_v61 = vor.u32 %v2185_v23, %v1946_v13  ;;  %v2217_v2 = vld [vmem:[%s2623_s24 + $0x154] sm:$0xf0]  ;;  %v1932_v3 = vld [vmem:[%s2623_s24 + $0x38] sm:$0xf0]  ;;  %v2211_v4 = vld [vmem:[%s2623_s24 + $0x12c] sm:$0xf] }
 0x1c0   : > { %1359 = vmatpush.bf16.msrb.mxu3 %v2143_v7  ;;  %1272 = vmatpush.bf16.msrb.mxu0 %v2011_v16  ;;  %v2075_v41 = vor.u32 %v2217_v2, %v2074_v63  ;;  %v2060_v6 = vld [vmem:[%s2623_s24 + $0x138] sm:$0xf0]  ;;  %v1935_v7 = vor.u32 %v2179_v5, %v1932_v3  ;;  %v1930_v12 = vld [vmem:[%s2623_s24 + $0x28] sm:$0xf]  ;;  %v2181_v8 = vld [vmem:[%s2623_s24 + $0x34] sm:$0xf0] }
 0x1c1   : > { %1301 = vmatpush.bf16.msrb.mxu1 %v2139_v17  ;;  %v2063_v9 = vor.u32 %v2211_v4, %v2060_v6  ;;  %v2058_v0 = vld [vmem:[%s2623_s24 + $0x128] sm:$0xf]  ;;  %v2213_v42 = vld [vmem:[%s2623_s24 + $0x134] sm:$0xf0]  ;;  %v2175_v16 = vld [vmem:[%s2623_s24 + $0xc] sm:$0xf] }
 0x1c2   : > { %v1916_v17 = vld [vmem:[%s2623_s24 + $0x18] sm:$0xf0]  ;;  %v2207_v52 = vld [vmem:[%s2623_s24 + $0x10c] sm:$0xf]  ;;  %v2059_v62 = vor.u32 %v2213_v42, %v2058_v0  ;;  %v1914_v22 = vld [vmem:[%s2623_s24 + $0x8] sm:$0xf] }
 0x1c3   : > { %1331 = vmatpush.bf16.msrb.mxu2 %v1999_v51  ;;  %v1931_v51 = vor.u32 %v2181_v8, %v1930_v12  ;;  %v2044_v59 = vld [vmem:[%s2623_s24 + $0x118] sm:$0xf0]  ;;  %v2177_v18 = vld [vmem:[%s2623_s24 + $0x14] sm:$0xf0]  ;;  %v2042_v54 = vld [vmem:[%s2623_s24 + $0x108] sm:$0xf] }
 0x1c4   : > { %1360 = vmatpush.bf16.msrb.mxu3 %v2127_v15  ;;  %1273 = vmatpush.bf16.msrb.mxu0 %v1995_v45  ;;  %v1919_v15 = vor.u32 %v2175_v16, %v1916_v17  ;;  %v2047_v53 = vor.u32 %v2207_v52, %v2044_v59  ;;  %v2209_v11 = vld [vmem:[%s2623_s24 + $0x114] sm:$0xf0]  ;;  %v1890_v45 = vld [vmem:[#allocation2 + $0x20] sm:$0xf]  ;;  %v2171_v19 = vld [vmem:[#allocation2 + $0x24] sm:$0xf0]  ;;  %v1915_v56 = vor.u32 %v2177_v18, %v1914_v22 }
 0x1c5   : > { %1302 = vmatpush.bf16.msrb.mxu1 %v2123_v24  ;;  %v2170_v24 = vld [vmem:[#allocation2 + $0x24] sm:$0xf]  ;;  %v2043_v30 = vor.u32 %v2209_v11, %v2042_v54  ;;  %v1891_v14 = vor.u32 %v2171_v19, %v1890_v45  ;;  %v1898_v26 = vld [vmem:[#allocation2 + $0x30] sm:$0xf]  ;;  %v2173_v57 = vld [vmem:[#allocation2 + $0x34] sm:$0xf0] }
 0x1c6   : > { %v2172_v58 = vld [vmem:[#allocation2 + $0x34] sm:$0xf]  ;;  %v1900_v20 = vld [vmem:[#allocation2 + $0x38] sm:$0xf0]  ;;  %v1899_v27 = vor.u32 %v2173_v57, %v1898_v26  ;;  %s2238_s12 = sshll.u32 (%p2468_p6), %s2392_s20, 4 }
 0x1c7   : > { %1332 = vmatpush.bf16.msrb.mxu2 %v1983_v55  ;;  %v1892_v55 = vld [vmem:[#allocation2 + $0x28] sm:$0xf0]  ;;  %v1903_v21 = vor.u32 %v2172_v58, %v1900_v20  ;;  %s1719_s13 = scalar_lea.vmem (%p2468_p6), %s3327_s5, %s2238_s12 }
 0x1c8   : > { %1361 = vmatpush.bf16.msrb.mxu3 %v2111_v25  ;;  %1274 = vmatpush.bf16.msrb.mxu0 %v1979_v32  ;;  %v1895_v25 = vor.u32 %v2170_v24, %v1892_v55 }
 0x1c9   : > { %1303 = vmatpush.bf16.msrb.mxu1 %v2107_v28  ;;  %1168 = vmatmul.bf16.gmra.mxu0 %v2995_v40 }
 0x1ca   : > { %1197 = vmatmul.bf16.gmra.mxu1 %v3000_v10  ;;  %1226 = vmatmul.bf16.gmra.mxu2 %v2995_v40 }
 0x1cb   : > { %1333 = vmatpush.bf16.msrb.mxu2 %v1967_v33  ;;  %1255 = vmatmul.bf16.gmra.mxu3 %v3000_v10 }
 0x1cc   : > { %1362 = vmatpush.bf16.msrb.mxu3 %v2095_v37  ;;  %1275 = vmatpush.bf16.msrb.mxu0 %v1963_v47 }
 0x1cd   : > { %1304 = vmatpush.bf16.msrb.mxu1 %v2091_v48 }
 0x1cf   : > { %1334 = vmatpush.bf16.msrb.mxu2 %v1951_v49 }
 0x1d0   : > { %1363 = vmatpush.bf16.msrb.mxu3 %v2079_v50  ;;  %1276 = vmatpush.bf16.msrb.mxu0 %v1947_v61 }
 0x1d1   : > { %1305 = vmatpush.bf16.msrb.mxu1 %v2075_v41 }
 0x1d3   : > { %1335 = vmatpush.bf16.msrb.mxu2 %v1935_v7 }
 0x1d4   : > { %1364 = vmatpush.bf16.msrb.mxu3 %v2063_v9  ;;  %1277 = vmatpush.bf16.msrb.mxu0 %v1931_v51 }
 0x1d5   : > { %1306 = vmatpush.bf16.msrb.mxu1 %v2059_v62 }
 0x1d7   : > { %1336 = vmatpush.bf16.msrb.mxu2 %v1919_v15 }
 0x1d8   : > { %1365 = vmatpush.bf16.msrb.mxu3 %v2047_v53  ;;  %1278 = vmatpush.bf16.msrb.mxu0 %v1915_v56 }
 0x1d9   : > { %1307 = vmatpush.bf16.msrb.mxu1 %v2043_v30  ;;  %1173 = vmatmul.bf16.gmra.mxu0 %v1891_v14 }
 0x1da   : > { %1202 = vmatmul.bf16.gmra.mxu1 %v1895_v25  ;;  %1231 = vmatmul.bf16.gmra.mxu2 %v1891_v14 }
 0x1db   : > { %1260 = vmatmul.bf16.gmra.mxu3 %v1895_v25 }
 0x1e9   : > { %1178 = vmatmul.bf16.gmra.mxu0 %v1899_v27 }
 0x1ea   : > { %1207 = vmatmul.bf16.gmra.mxu1 %v1903_v21  ;;  %1236 = vmatmul.bf16.gmra.mxu2 %v1899_v27 }
 0x1eb   : > { %1265 = vmatmul.bf16.gmra.mxu3 %v1903_v21 }
 0x1f9   : > { %1279 = vmatmul.bf16.vlgmr.msrb.gmra.mxu0 %v2955_v1 }
 0x1fa   : > { %1308 = vmatmul.bf16.vlgmr.msrb.gmra.mxu1 %v2960_v60  ;;  %1337 = vmatmul.bf16.vlgmr.msrb.gmra.mxu2 %v2955_v1  ;;  %v3041_v1 = vld [vmem:[%s422_s17] sm:$0xf] }
 0x1fb   : > { %1366 = vmatmul.bf16.vlgmr.msrb.gmra.mxu3 %v2960_v60  ;;  %v3044_v60 = vperm.slane %v3041_v1, 0  ;;  %v3048_v33 = vperm.slane %v3041_v1, 1 }
 0x209   : > { %1284 = vmatmul.bf16.gmra.mxu0 %v2995_v40 }
 0x20a   : > { %1313 = vmatmul.bf16.gmra.mxu1 %v3000_v10  ;;  %1342 = vmatmul.bf16.gmra.mxu2 %v2995_v40 }
 0x20b   : > { %1371 = vmatmul.bf16.gmra.mxu3 %v3000_v10 }
 0x219   : > { %1289 = vmatmul.bf16.gmra.mxu0 %v1891_v14 }
 0x21a   : > { %1318 = vmatmul.bf16.gmra.mxu1 %v1895_v25  ;;  %1347 = vmatmul.bf16.gmra.mxu2 %v1891_v14 }
 0x21b   : > { %1376 = vmatmul.bf16.gmra.mxu3 %v1895_v25 }
 0x229   : > { %1294 = vmatmul.bf16.gmra.mxu0 %v1899_v27 }
 0x22a   : > { %1323 = vmatmul.bf16.gmra.mxu1 %v1903_v21  ;;  %1352 = vmatmul.bf16.gmra.mxu2 %v1899_v27 }
 0x22b   : > { %1381 = vmatmul.bf16.gmra.mxu3 %v1903_v21 }
 0x236   : > { %v1164_v29 = vpop.f32.mrf.mxu0 }
 0x237   : > { %v1165_v31 = vadd.f32 %v1164_v29, %v3044_v60  ;;  %v1193_v32 = vpop.f32.mrf.mxu1 }
 0x239   : > { %v1194_v28 = vadd.f32 %v1193_v32, %v1165_v31 }
 0x23b   : > { %v1419_v34 = vmul.f32 0.044715, %v1194_v28  ;;  %v1387_v57 = vmul.f32 0.5, %v1194_v28 }
 0x23d   : > { %v1451_v35 = vmul.f32 %v1419_v34, %v1194_v28  ;;  %v1222_v36 = vpop.f32.mrf.mxu2 }
 0x23e   : > { %v1223_v40 = vadd.f32 %v1222_v36, %v3048_v33  ;;  %v1251_v37 = vpop.f32.mrf.mxu3  ;;  %v1166_v44 = vpop.f32.mrf.mxu0 }
 0x23f   : > { %v1483_v38 = vmul.f32 %v1451_v35, %v1194_v28  ;;  %v1167_v39 = vadd.f32 %v1166_v44, %v3044_v60  ;;  %v1195_v10 = vpop.f32.mrf.mxu1 }
 0x240   : > { %v1252_v46 = vadd.f32 %v1251_v37, %v1223_v40 }
 0x241   : > { %v1515_v43 = vadd.f32 %v1483_v38, %v1194_v28  ;;  %v3052_v47 = vadd.f32 %v1195_v10, %v1167_v39 }
 0x242   : > { %v1420_v48 = vmul.f32 0.044715, %v1252_v46  ;;  %v1388_v58 = vmul.f32 0.5, %v1252_v46 }
 0x243   : > { %v1423_v49 = vmul.f32 0.044715, %v3052_v47  ;;  %v1547_v13 = vmul.f32 0.7978846, %v1515_v43 }
 0x244   : > { %v1452_v23 = vmul.f32 %v1420_v48, %v1252_v46 }
 0x245   : > { %v1455_v50 = vmul.f32 %v1423_v49, %v3052_v47  ;;  %v1224_v61 = vpop.f32.mrf.mxu2  ;;  %2298 = vtanh.f32 %v1547_v13 }
 0x246   : > { %v1484_v63 = vmul.f32 %v1452_v23, %v1252_v46  ;;  %v1225_v2 = vadd.f32 %v1224_v61, %v3048_v33  ;;  %v1253_v5 = vpop.f32.mrf.mxu3  ;;  %v1169_v41 = vpop.f32.mrf.mxu0 }
 0x247   : > { %v1487_v3 = vmul.f32 %v1455_v50, %v3052_v47  ;;  %v1170_v4 = vadd.f32 %v1169_v41, %v3044_v60  ;;  %v1198_v6 = vpop.f32.mrf.mxu1 }
 0x248   : > { %v1516_v7 = vadd.f32 %v1484_v63, %v1252_v46  ;;  %v1254_v9 = vadd.f32 %v1253_v5, %v1225_v2  ;;  %v1391_v2 = vmul.f32 0.5, %v3052_v47 }
 0x249   : > { %v1519_v12 = vadd.f32 %v1487_v3, %v3052_v47  ;;  %v3060_v8 = vadd.f32 %v1198_v6, %v1170_v4 }
 0x24a   : > { %v1548_v0 = vmul.f32 0.7978846, %v1516_v7  ;;  %v1424_v42 = vmul.f32 0.044715, %v1254_v9  ;;  %v1392_v5 = vmul.f32 0.5, %v1254_v9 }
 0x24b   : > { %v1427_v16 = vmul.f32 0.044715, %v3060_v8  ;;  %v1551_v17 = vmul.f32 0.7978846, %v1519_v12  ;;  %v2299_v62 = vpop.eup %2298 }
 0x24c   : > { %2300 = vtanh.f32 %v1548_v0  ;;  %v1456_v51 = vmul.f32 %v1424_v42, %v1254_v9  ;;  %v1611_v55 = vadd.f32 1.0, %v2299_v62 }
 0x24d   : > { %v1459_v52 = vmul.f32 %v1427_v16, %v3060_v8  ;;  %v1227_v59 = vpop.f32.mrf.mxu2  ;;  %2302 = vtanh.f32 %v1551_v17 }
 0x24e   : > { %v1488_v15 = vmul.f32 %v1456_v51, %v1254_v9  ;;  %v1228_v22 = vadd.f32 %v1227_v59, %v3048_v33  ;;  %v1256_v18 = vpop.f32.mrf.mxu3  ;;  %v1171_v53 = vpop.f32.mrf.mxu0  ;;  %v1643_v31 = vmul.f32 %v1611_v55, %v1387_v57 }
 0x24f   : > { %v1491_v54 = vmul.f32 %v1459_v52, %v3060_v8  ;;  %v1172_v11 = vadd.f32 %v1171_v53, %v3044_v60  ;;  %v1200_v45 = vpop.f32.mrf.mxu1 }
 0x250   : > { %v1520_v19 = vadd.f32 %v1488_v15, %v1254_v9  ;;  %v3067_v24 = vadd.f32 %v1256_v18, %v1228_v22 }
 0x251   : > { %v1523_v56 = vadd.f32 %v1491_v54, %v3060_v8  ;;  %v3070_v30 = vadd.f32 %v1200_v45, %v1172_v11 }
 0x252   : > { %v2301_v14 = vpop.eup %2300  ;;  %v1552_v25 = vmul.f32 0.7978846, %v1520_v19  ;;  %v1428_v26 = vmul.f32 0.044715, %v3067_v24 }
 0x253   : > { %v1612_v20 = vadd.f32 1.0, %v2301_v14  ;;  %v1431_v27 = vmul.f32 0.044715, %v3070_v30  ;;  %v1555_v21 = vmul.f32 0.7978846, %v1523_v56  ;;  %v2303_v36 = vpop.eup %2302  ;;  %v1395_v56 = vmul.f32 0.5, %v3060_v8 }
 0x254   : > { %2304 = vtanh.f32 %v1552_v25  ;;  %v1460_v29 = vmul.f32 %v1428_v26, %v3067_v24  ;;  %v1615_v49 = vadd.f32 1.0, %v2303_v36  ;;  %v1396_v14 = vmul.f32 0.5, %v3067_v24 }
 0x255   : > { %v1644_v32 = vmul.f32 %v1612_v20, %v1388_v58  ;;  %v1463_v34 = vmul.f32 %v1431_v27, %v3070_v30  ;;  %v1229_v35 = vpop.f32.mrf.mxu2  ;;  %2306 = vtanh.f32 %v1555_v21 }
 0x256   : > { %v1492_v40 = vmul.f32 %v1460_v29, %v3067_v24  ;;  %v1230_v37 = vadd.f32 %v1229_v35, %v3048_v33  ;;  %v1258_v28 = vpop.f32.mrf.mxu3  ;;  %v1174_v44 = vpop.f32.mrf.mxu0  ;;  %v1647_v7 = vmul.f32 %v1615_v49, %v1391_v2 }
 0x257   : > { %v1675_v38 = vpack.c.bf16 %v1644_v32, %v1643_v31  ;;  %v1495_v39 = vmul.f32 %v1463_v34, %v3070_v30  ;;  %v1175_v10 = vadd.f32 %v1174_v44, %v3044_v60  ;;  %v1203_v46 = vpop.f32.mrf.mxu1 }
 0x258   : > { %v1524_v43 = vadd.f32 %v1492_v40, %v3067_v24  ;;  %v3081_v48 = vadd.f32 %v1258_v28, %v1230_v37 }
 0x259   : > { %1691 = vst [vmem:[%s2625_s25] sm:$0xff] %v1675_v38  ;;  %v1527_v13 = vadd.f32 %v1495_v39, %v3070_v30  ;;  %v3085_v23 = vadd.f32 %v1203_v46, %v1175_v10 }
 0x25a   : > { %v2305_v50 = vpop.eup %2304  ;;  %v1556_v61 = vmul.f32 0.7978846, %v1524_v43  ;;  %v1432_v63 = vmul.f32 0.044715, %v3081_v48 }
 0x25b   : > { %v1616_v41 = vadd.f32 1.0, %v2305_v50  ;;  %v1435_v3 = vmul.f32 0.044715, %v3085_v23  ;;  %v1559_v4 = vmul.f32 0.7978846, %v1527_v13  ;;  %v2307_v16 = vpop.eup %2306  ;;  %v1399_v13 = vmul.f32 0.5, %v3070_v30 }
 0x25c   : > { %2308 = vtanh.f32 %v1556_v61  ;;  %v1464_v6 = vmul.f32 %v1432_v63, %v3081_v48  ;;  %v1619_v53 = vadd.f32 1.0, %v2307_v16  ;;  %v1400_v50 = vmul.f32 0.5, %v3081_v48 }
 0x25d   : > { %v1648_v12 = vmul.f32 %v1616_v41, %v1392_v5  ;;  %v1467_v0 = vmul.f32 %v1435_v3, %v3085_v23  ;;  %v1232_v42 = vpop.f32.mrf.mxu2  ;;  %2310 = vtanh.f32 %v1559_v4 }
 0x25e   : > { %v1496_v17 = vmul.f32 %v1464_v6, %v3081_v48  ;;  %v1233_v51 = vadd.f32 %v1232_v42, %v3048_v33  ;;  %v1261_v47 = vpop.f32.mrf.mxu3  ;;  %v1176_v9 = vpop.f32.mrf.mxu0  ;;  %v1651_v20 = vmul.f32 %v1619_v53, %v1395_v56 }
 0x25f   : > { %v1677_v52 = vpack.c.bf16 %v1648_v12, %v1647_v7  ;;  %v1499_v59 = vmul.f32 %v1467_v0, %v3085_v23  ;;  %v1177_v62 = vadd.f32 %v1176_v9, %v3044_v60  ;;  %v1205_v15 = vpop.f32.mrf.mxu1 }
 0x260   : > { %v1528_v22 = vadd.f32 %v1496_v17, %v3081_v48  ;;  %v3097_v18 = vadd.f32 %v1261_v47, %v1233_v51 }
 0x261   : > { %1693 = vst [vmem:[%s2625_s25 + $0x10] sm:$0xff] %v1677_v52  ;;  %v1531_v54 = vadd.f32 %v1499_v59, %v3085_v23  ;;  %v3101_v11 = vadd.f32 %v1205_v15, %v1177_v62 }
 0x262   : > { %v2309_v45 = vpop.eup %2308  ;;  %v1560_v19 = vmul.f32 0.7978846, %v1528_v22  ;;  %v1436_v55 = vmul.f32 0.044715, %v3097_v18 }
 0x263   : > { %v1620_v25 = vadd.f32 1.0, %v2309_v45  ;;  %v1439_v26 = vmul.f32 0.044715, %v3101_v11  ;;  %v1563_v57 = vmul.f32 0.7978846, %v1531_v54  ;;  %v2311_v31 = vpop.eup %2310  ;;  %v3139_v54 = vperm.slane %v3041_v1, 2 }
 0x264   : > { %2312 = vtanh.f32 %v1560_v19  ;;  %v1468_v58 = vmul.f32 %v1436_v55, %v3097_v18  ;;  %v1623_v38 = vadd.f32 1.0, %v2311_v31  ;;  %v1404_v45 = vmul.f32 0.5, %v3097_v18 }
 0x265   : > { %v1652_v27 = vmul.f32 %v1620_v25, %v1396_v14  ;;  %v1471_v21 = vmul.f32 %v1439_v26, %v3101_v11  ;;  %v1234_v29 = vpop.f32.mrf.mxu2  ;;  %2314 = vtanh.f32 %v1563_v57 }
 0x266   : > { %v1500_v32 = vmul.f32 %v1468_v58, %v3097_v18  ;;  %v1235_v8 = vadd.f32 %v1234_v29, %v3048_v33  ;;  %v1263_v34 = vpop.f32.mrf.mxu3  ;;  %v1179_v24 = vpop.f32.mrf.mxu0  ;;  %v1655_v41 = vmul.f32 %v1623_v38, %v1399_v13  ;;  %v3159_v38 = vperm.slane %v3041_v1, 3 }
 0x267   : > { %v1679_v35 = vpack.c.bf16 %v1652_v27, %v1651_v20  ;;  %v1503_v36 = vmul.f32 %v1471_v21, %v3101_v11  ;;  %v1180_v40 = vadd.f32 %v1179_v24, %v3044_v60  ;;  %v1208_v37 = vpop.f32.mrf.mxu1 }
 0x268   : > { %v1532_v28 = vadd.f32 %v1500_v32, %v3097_v18  ;;  %v3114_v44 = vadd.f32 %v1263_v34, %v1235_v8 }
 0x269   : > { %1695 = vst [vmem:[%s2625_s25 + $0x20] sm:$0xff] %v1679_v35  ;;  %v1535_v39 = vadd.f32 %v1503_v36, %v3101_v11  ;;  %v3118_v10 = vadd.f32 %v1208_v37, %v1180_v40 }
 0x26a   : > { %v2313_v46 = vpop.eup %2312  ;;  %v1564_v43 = vmul.f32 0.7978846, %v1532_v28  ;;  %v1440_v49 = vmul.f32 0.044715, %v3114_v44 }
 0x26b   : > { %v1624_v61 = vadd.f32 1.0, %v2313_v46  ;;  %v1443_v63 = vmul.f32 0.044715, %v3118_v10  ;;  %v1567_v2 = vmul.f32 0.7978846, %v1535_v39  ;;  %v2315_v7 = vpop.eup %2314  ;;  %v1407_v39 = vmul.f32 0.5, %v3101_v11 }
 0x26c   : > { %2316 = vtanh.f32 %v1564_v43  ;;  %v1472_v5 = vmul.f32 %v1440_v49, %v3114_v44  ;;  %v1627_v52 = vadd.f32 1.0, %v2315_v7  ;;  %v1408_v46 = vmul.f32 0.5, %v3114_v44 }
 0x26d   : > { %v1656_v3 = vmul.f32 %v1624_v61, %v1400_v50  ;;  %v1475_v4 = vmul.f32 %v1443_v63, %v3118_v10  ;;  %v1237_v6 = vpop.f32.mrf.mxu2  ;;  %2318 = vtanh.f32 %v1567_v2 }
 0x26e   : > { %v1504_v12 = vmul.f32 %v1472_v5, %v3114_v44  ;;  %v1238_v30 = vadd.f32 %v1237_v6, %v3048_v33  ;;  %v1266_v0 = vpop.f32.mrf.mxu3  ;;  %v1181_v48 = vpop.f32.mrf.mxu0 }
 0x26f   : > { %v1681_v42 = vpack.c.bf16 %v1656_v3, %v1655_v41  ;;  %v1507_v16 = vmul.f32 %v1475_v4, %v3118_v10  ;;  %v1182_v17 = vadd.f32 %v1181_v48, %v3044_v60  ;;  %v1210_v51 = vpop.f32.mrf.mxu1  ;;  %v1403_v60 = vmul.f32 0.5, %v3085_v23 }
 0x270   : > { %v1536_v47 = vadd.f32 %v1504_v12, %v3114_v44  ;;  %v3131_v9 = vadd.f32 %v1266_v0, %v1238_v30 }
 0x271   : > { %1697 = vst [vmem:[%s2625_s25 + $0x30] sm:$0xff] %v1681_v42  ;;  %v1539_v59 = vadd.f32 %v1507_v16, %v3118_v10  ;;  %v3135_v62 = vadd.f32 %v1210_v51, %v1182_v17  ;;  %v1659_v25 = vmul.f32 %v1627_v52, %v1403_v60  ;;  %v1411_v52 = vmul.f32 0.5, %v3118_v10 }
 0x272   : > { %v2317_v15 = vpop.eup %2316  ;;  %v1568_v22 = vmul.f32 0.7978846, %v1536_v47  ;;  %v1444_v53 = vmul.f32 0.044715, %v3131_v9 }
 0x273   : > { %v1628_v19 = vadd.f32 1.0, %v2317_v15  ;;  %v1447_v55 = vmul.f32 0.044715, %v3135_v62  ;;  %v1571_v56 = vmul.f32 0.7978846, %v1539_v59  ;;  %v2319_v20 = vpop.eup %2318  ;;  %v1412_v59 = vmul.f32 0.5, %v3131_v9 }
 0x274   : > { %2320 = vtanh.f32 %v1568_v22  ;;  %v1476_v14 = vmul.f32 %v1444_v53, %v3131_v9  ;;  %v1631_v35 = vadd.f32 1.0, %v2319_v20 }
 0x275   : > { %v1660_v26 = vmul.f32 %v1628_v19, %v1404_v45  ;;  %v1479_v57 = vmul.f32 %v1447_v55, %v3135_v62  ;;  %v1239_v58 = vpop.f32.mrf.mxu2  ;;  %2322 = vtanh.f32 %v1571_v56 }
 0x276   : > { %v1508_v27 = vmul.f32 %v1476_v14, %v3131_v9  ;;  %v1240_v23 = vadd.f32 %v1239_v58, %v3048_v33  ;;  %v1268_v21 = vpop.f32.mrf.mxu3  ;;  %v1280_v18 = vpop.f32.mrf.mxu0  ;;  %v1663_v61 = vmul.f32 %v1631_v35, %v1407_v39  ;;  %v1415_v35 = vmul.f32 0.5, %v3135_v62 }
 0x277   : > { %v1683_v29 = vpack.c.bf16 %v1660_v26, %v1659_v25  ;;  %v1511_v31 = vmul.f32 %v1479_v57, %v3135_v62  ;;  %v1281_v32 = vadd.f32 %v1280_v18, %v3139_v54  ;;  %v1309_v8 = vpop.f32.mrf.mxu1 }
 0x278   : > { %v1540_v34 = vadd.f32 %v1508_v27, %v3131_v9  ;;  %v3151_v24 = vadd.f32 %v1268_v21, %v1240_v23 }
 0x279   : > { %1699 = vst [vmem:[%s2625_s25 + $0x40] sm:$0xff] %v1683_v29  ;;  %v1543_v36 = vadd.f32 %v1511_v31, %v3135_v62  ;;  %v3155_v40 = vadd.f32 %v1309_v8, %v1281_v32 }
 0x27a   : > { %v2321_v33 = vpop.eup %2320  ;;  %v1572_v37 = vmul.f32 0.7978846, %v1540_v34  ;;  %v1448_v28 = vmul.f32 0.044715, %v3151_v24 }
 0x27b   : > { %v1632_v43 = vadd.f32 1.0, %v2321_v33  ;;  %v1421_v49 = vmul.f32 0.044715, %v3155_v40  ;;  %v1575_v13 = vmul.f32 0.7978846, %v1543_v36  ;;  %v2323_v41 = vpop.eup %2322  ;;  %v1416_v36 = vmul.f32 0.5, %v3151_v24 }
 0x27c   : > { %2324 = vtanh.f32 %v1572_v37  ;;  %v1480_v50 = vmul.f32 %v1448_v28, %v3151_v24  ;;  %v1635_v48 = vadd.f32 1.0, %v2323_v41 }
 0x27d   : > { %v1664_v63 = vmul.f32 %v1632_v43, %v1408_v46  ;;  %v1453_v2 = vmul.f32 %v1421_v49, %v3155_v40  ;;  %v1338_v5 = vpop.f32.mrf.mxu2  ;;  %2326 = vtanh.f32 %v1575_v13 }
 0x27e   : > { %v1512_v1 = vmul.f32 %v1480_v50, %v3151_v24  ;;  %v1339_v11 = vadd.f32 %v1338_v5, %v3159_v38  ;;  %v1367_v3 = vpop.f32.mrf.mxu3  ;;  %v1282_v44 = vpop.f32.mrf.mxu0  ;;  %v1667_v45 = vmul.f32 %v1635_v48, %v1411_v52  ;;  %v1389_v48 = vmul.f32 0.5, %v3155_v40 }
 0x27f   : > { %v1685_v4 = vpack.c.bf16 %v1664_v63, %v1663_v61  ;;  %v1485_v6 = vmul.f32 %v1453_v2, %v3155_v40  ;;  %v1283_v7 = vadd.f32 %v1282_v44, %v3139_v54  ;;  %v1311_v12 = vpop.f32.mrf.mxu1 }
 0x280   : > { %v1544_v30 = vadd.f32 %v1512_v1, %v3151_v24  ;;  %v3171_v0 = vadd.f32 %v1367_v3, %v1339_v11 }
 0x281   : > { %1701 = vst [vmem:[%s2625_s25 + $0x50] sm:$0xff] %v1685_v4  ;;  %v1517_v42 = vadd.f32 %v1485_v6, %v3155_v40  ;;  %v3175_v16 = vadd.f32 %v1311_v12, %v1283_v7 }
 0x282   : > { %v2325_v17 = vpop.eup %2324  ;;  %v1576_v51 = vmul.f32 0.7978846, %v1544_v30  ;;  %v1422_v47 = vmul.f32 0.044715, %v3171_v0 }
 0x283   : > { %v1636_v15 = vadd.f32 1.0, %v2325_v17  ;;  %v1425_v22 = vmul.f32 0.044715, %v3175_v16  ;;  %v1549_v53 = vmul.f32 0.7978846, %v1517_v42  ;;  %v2327_v14 = vpop.eup %2326  ;;  %v1390_v42 = vmul.f32 0.5, %v3171_v0 }
 0x284   : > { %2328 = vtanh.f32 %v1576_v51  ;;  %v1454_v60 = vmul.f32 %v1422_v47, %v3171_v0  ;;  %v1639_v18 = vadd.f32 1.0, %v2327_v14 }
 0x285   : > { %v1668_v19 = vmul.f32 %v1636_v15, %v1412_v59  ;;  %v1457_v55 = vmul.f32 %v1425_v22, %v3175_v16  ;;  %v1340_v56 = vpop.f32.mrf.mxu2  ;;  %2330 = vtanh.f32 %v1549_v53 }
 0x286   : > { %v1486_v25 = vmul.f32 %v1454_v60, %v3171_v0  ;;  %v1341_v10 = vadd.f32 %v1340_v56, %v3159_v38  ;;  %v1369_v26 = vpop.f32.mrf.mxu3  ;;  %v1285_v9 = vpop.f32.mrf.mxu0  ;;  %v1671_v46 = vmul.f32 %v1639_v18, %v1415_v35  ;;  %v1393_v18 = vmul.f32 0.5, %v3175_v16 }
 0x287   : > { %v1687_v57 = vpack.c.bf16 %v1668_v19, %v1667_v45  ;;  %v1489_v58 = vmul.f32 %v1457_v55, %v3175_v16  ;;  %v1286_v20 = vadd.f32 %v1285_v9, %v3139_v54  ;;  %v1314_v27 = vpop.f32.mrf.mxu1 }
 0x288   : > { %v1518_v23 = vadd.f32 %v1486_v25, %v3171_v0  ;;  %v3188_v21 = vadd.f32 %v1369_v26, %v1341_v10 }
 0x289   : > { %1703 = vst [vmem:[%s2625_s25 + $0x60] sm:$0xff] %v1687_v57  ;;  %v1521_v29 = vadd.f32 %v1489_v58, %v3175_v16  ;;  %v3192_v31 = vadd.f32 %v1314_v27, %v1286_v20 }
 0x28a   : > { %v2329_v32 = vpop.eup %2328  ;;  %v1550_v8 = vmul.f32 0.7978846, %v1518_v23  ;;  %v1426_v34 = vmul.f32 0.044715, %v3188_v21 }
 0x28b   : > { %v1640_v33 = vadd.f32 1.0, %v2329_v32  ;;  %v1429_v37 = vmul.f32 0.044715, %v3192_v31  ;;  %v1553_v28 = vmul.f32 0.7978846, %v1521_v29  ;;  %v2331_v50 = vpop.eup %2330  ;;  %v1394_v29 = vmul.f32 0.5, %v3188_v21 }
 0x28c   : > { %2332 = vtanh.f32 %v1550_v8  ;;  %v1458_v39 = vmul.f32 %v1426_v34, %v3188_v21  ;;  %v1613_v44 = vadd.f32 1.0, %v2331_v50 }
 0x28d   : > { %v1672_v43 = vmul.f32 %v1640_v33, %v1416_v36  ;;  %v1461_v49 = vmul.f32 %v1429_v37, %v3192_v31  ;;  %v1343_v13 = vpop.f32.mrf.mxu2  ;;  %2334 = vtanh.f32 %v1553_v28 }
 0x28e   : > { %v1490_v61 = vmul.f32 %v1458_v39, %v3188_v21  ;;  %v1344_v62 = vadd.f32 %v1343_v13, %v3159_v38  ;;  %v1372_v63 = vpop.f32.mrf.mxu3  ;;  %v1287_v24 = vpop.f32.mrf.mxu0  ;;  %v1645_v59 = vmul.f32 %v1613_v44, %v1389_v48  ;;  %v1397_v44 = vmul.f32 0.5, %v3192_v31 }
 0x28f   : > { %v1689_v2 = vpack.c.bf16 %v1672_v43, %v1671_v46  ;;  %v1493_v5 = vmul.f32 %v1461_v49, %v3192_v31  ;;  %v1288_v41 = vadd.f32 %v1287_v24, %v3139_v54  ;;  %v1316_v1 = vpop.f32.mrf.mxu1 }
 0x290   : > { %v1522_v11 = vadd.f32 %v1490_v61, %v3188_v21  ;;  %v3205_v3 = vadd.f32 %v1372_v63, %v1344_v62 }
 0x291   : > { %1705 = vst [vmem:[%s2625_s25 + $0x70] sm:$0xff] %v1689_v2  ;;  %v1525_v4 = vadd.f32 %v1493_v5, %v3192_v31  ;;  %v3209_v6 = vadd.f32 %v1316_v1, %v1288_v41 }
 0x292   : > { %v2333_v7 = vpop.eup %2332  ;;  %v1554_v12 = vmul.f32 0.7978846, %v1522_v11  ;;  %v1430_v30 = vmul.f32 0.044715, %v3205_v3 }
 0x293   : > { %v1614_v17 = vadd.f32 1.0, %v2333_v7  ;;  %v1433_v51 = vmul.f32 0.044715, %v3209_v6  ;;  %v1557_v47 = vmul.f32 0.7978846, %v1525_v4  ;;  %v2335_v60 = vpop.eup %2334  ;;  %v1398_v4 = vmul.f32 0.5, %v3205_v3 }
 0x294   : > { %2336 = vtanh.f32 %v1554_v12  ;;  %v1462_v52 = vmul.f32 %v1430_v30, %v3205_v3  ;;  %v1617_v9 = vadd.f32 1.0, %v2335_v60 }
 0x295   : > { %v1646_v15 = vmul.f32 %v1614_v17, %v1390_v42  ;;  %v1465_v22 = vmul.f32 %v1433_v51, %v3209_v6  ;;  %v1345_v53 = vpop.f32.mrf.mxu2  ;;  %2338 = vtanh.f32 %v1557_v47 }
 0x296   : > { %v1494_v45 = vmul.f32 %v1462_v52, %v3205_v3  ;;  %v1346_v40 = vadd.f32 %v1345_v53, %v3159_v38  ;;  %v1374_v19 = vpop.f32.mrf.mxu3  ;;  %v1290_v0 = vpop.f32.mrf.mxu0  ;;  %v1649_v36 = vmul.f32 %v1617_v9, %v1393_v18  ;;  %v1401_v9 = vmul.f32 0.5, %v3209_v6 }
 0x297   : > { %v1676_v55 = vpack.c.bf16 %v1646_v15, %v1645_v59  ;;  %v1497_v56 = vmul.f32 %v1465_v22, %v3209_v6  ;;  %v1291_v14 = vadd.f32 %v1290_v0, %v3139_v54  ;;  %v1319_v25 = vpop.f32.mrf.mxu1 }
 0x298   : > { %v1526_v10 = vadd.f32 %v1494_v45, %v3205_v3  ;;  %v3222_v26 = vadd.f32 %v1374_v19, %v1346_v40 }
 0x299   : > { %1692 = vst [vmem:[%s2625_s25 + $0x8] sm:$0xff] %v1676_v55  ;;  %v1529_v57 = vadd.f32 %v1497_v56, %v3209_v6  ;;  %v3226_v58 = vadd.f32 %v1319_v25, %v1291_v14 }
 0x29a   : > { %v2337_v20 = vpop.eup %2336  ;;  %v1558_v27 = vmul.f32 0.7978846, %v1526_v10  ;;  %v1434_v23 = vmul.f32 0.044715, %v3222_v26 }
 0x29b   : > { %v1618_v32 = vadd.f32 1.0, %v2337_v20  ;;  %v1437_v8 = vmul.f32 0.044715, %v3226_v58  ;;  %v1561_v34 = vmul.f32 0.7978846, %v1529_v57  ;;  %v2339_v39 = vpop.eup %2338  ;;  %v1402_v57 = vmul.f32 0.5, %v3222_v26 }
 0x29c   : > { %2340 = vtanh.f32 %v1558_v27  ;;  %v1466_v35 = vmul.f32 %v1434_v23, %v3222_v26  ;;  %v1621_v24 = vadd.f32 1.0, %v2339_v39 }
 0x29d   : > { %v1650_v33 = vmul.f32 %v1618_v32, %v1394_v29  ;;  %v1469_v37 = vmul.f32 %v1437_v8, %v3226_v58  ;;  %v1348_v28 = vpop.f32.mrf.mxu2  ;;  %2342 = vtanh.f32 %v1561_v34 }
 0x29e   : > { %v1498_v46 = vmul.f32 %v1466_v35, %v3222_v26  ;;  %v1349_v16 = vadd.f32 %v1348_v28, %v3159_v38  ;;  %v1377_v43 = vpop.f32.mrf.mxu3  ;;  %v1292_v21 = vpop.f32.mrf.mxu0  ;;  %v1653_v42 = vmul.f32 %v1621_v24, %v1397_v44  ;;  %v1405_v24 = vmul.f32 0.5, %v3226_v58 }
 0x29f   : > { %v1678_v49 = vpack.c.bf16 %v1650_v33, %v1649_v36  ;;  %v1501_v13 = vmul.f32 %v1469_v37, %v3226_v58  ;;  %v1293_v50 = vadd.f32 %v1292_v21, %v3139_v54  ;;  %v1321_v61 = vpop.f32.mrf.mxu1 }
 0x2a0   : > { %v1530_v62 = vadd.f32 %v1498_v46, %v3222_v26  ;;  %v3239_v63 = vadd.f32 %v1377_v43, %v1349_v16 }
 0x2a1   : > { %1694 = vst [vmem:[%s2625_s25 + $0x18] sm:$0xff] %v1678_v49  ;;  %v1533_v2 = vadd.f32 %v1501_v13, %v3226_v58  ;;  %v3243_v5 = vadd.f32 %v1321_v61, %v1293_v50 }
 0x2a2   : > { %v2341_v41 = vpop.eup %2340  ;;  %v1562_v1 = vmul.f32 0.7978846, %v1530_v62  ;;  %v1438_v11 = vmul.f32 0.044715, %v3239_v63 }
 0x2a3   : > { %v1622_v7 = vadd.f32 1.0, %v2341_v41  ;;  %v1441_v12 = vmul.f32 0.044715, %v3243_v5  ;;  %v1565_v30 = vmul.f32 0.7978846, %v1533_v2  ;;  %v2343_v52 = vpop.eup %2342  ;;  %v1406_v2 = vmul.f32 0.5, %v3239_v63 }
 0x2a4   : > { %2344 = vtanh.f32 %v1562_v1  ;;  %v1470_v48 = vmul.f32 %v1438_v11, %v3239_v63  ;;  %v1625_v0 = vadd.f32 1.0, %v2343_v52 }
 0x2a5   : > { %v1654_v17 = vmul.f32 %v1622_v7, %v1398_v4  ;;  %v1473_v51 = vmul.f32 %v1441_v12, %v3243_v5  ;;  %v1350_v47 = vpop.f32.mrf.mxu2  ;;  %2346 = vtanh.f32 %v1565_v30 }
 0x2a6   : > { %v1502_v59 = vmul.f32 %v1470_v48, %v3239_v63  ;;  %v1351_v31 = vadd.f32 %v1350_v47, %v3159_v38  ;;  %v1379_v15 = vpop.f32.mrf.mxu3  ;;  %v1295_v3 = vpop.f32.mrf.mxu0  ;;  %v1657_v29 = vmul.f32 %v1625_v0, %v1401_v9 }
 0x2a7   : > { %v1680_v22 = vpack.c.bf16 %v1654_v17, %v1653_v42  ;;  %v1505_v53 = vmul.f32 %v1473_v51, %v3243_v5  ;;  %v1296_v60 = vadd.f32 %v1295_v3, %v3139_v54  ;;  %v1324_v45 = vpop.f32.mrf.mxu1 }
 0x2a8   : > { %v1534_v40 = vadd.f32 %v1502_v59, %v3239_v63  ;;  %v3256_v19 = vadd.f32 %v1379_v15, %v1351_v31 }
 0x2a9   : > { %1696 = vst [vmem:[%s2625_s25 + $0x28] sm:$0xff] %v1680_v22  ;;  %v1537_v55 = vadd.f32 %v1505_v53, %v3243_v5  ;;  %v3260_v56 = vadd.f32 %v1324_v45, %v1296_v60  ;;  %v1409_v22 = vmul.f32 0.5, %v3243_v5 }
 0x2aa   : > { %v2345_v14 = vpop.eup %2344  ;;  %v1566_v25 = vmul.f32 0.7978846, %v1534_v40  ;;  %v1442_v10 = vmul.f32 0.044715, %v3256_v19  ;;  %v1410_v53 = vmul.f32 0.5, %v3256_v19 }
 0x2ab   : > { %v1626_v20 = vadd.f32 1.0, %v2345_v14  ;;  %v1445_v27 = vmul.f32 0.044715, %v3260_v56  ;;  %v1569_v23 = vmul.f32 0.7978846, %v1537_v55  ;;  %v2347_v35 = vpop.eup %2346  ;;  %v1413_v5 = vmul.f32 0.5, %v3260_v56 }
 0x2ac   : > { %2348 = vtanh.f32 %v1566_v25  ;;  %v1474_v18 = vmul.f32 %v1442_v10, %v3256_v19  ;;  %v1629_v21 = vadd.f32 1.0, %v2347_v35 }
 0x2ad   : > { %v1658_v32 = vmul.f32 %v1626_v20, %v1402_v57  ;;  %v1477_v8 = vmul.f32 %v1445_v27, %v3260_v56  ;;  %v1353_v34 = vpop.f32.mrf.mxu2  ;;  %2350 = vtanh.f32 %v1569_v23 }
 0x2ae   : > { %v1506_v36 = vmul.f32 %v1474_v18, %v3256_v19  ;;  %v1354_v6 = vadd.f32 %v1353_v34, %v3159_v38  ;;  %v1382_v33 = vpop.f32.mrf.mxu3  ;;  %v1297_v26 = vpop.f32.mrf.mxu0  ;;  %v1661_v44 = vmul.f32 %v1629_v21, %v1405_v24  ;;  %v1744_v21 = vld [vmem:[%s2625_s25 + $0x30] sm:$0xff] (%p2468_p6)  ;;  %v1756_v24 = vld [vmem:[%s2625_s25 + $0x60] sm:$0xff] (%p2468_p6) }
 0x2af   : > { %v1682_v37 = vpack.c.bf16 %v1658_v32, %v1657_v29  ;;  %v1509_v28 = vmul.f32 %v1477_v8, %v3260_v56  ;;  %v1298_v39 = vadd.f32 %v1297_v26, %v3139_v54  ;;  %v1326_v43 = vpop.f32.mrf.mxu1  ;;  %1745 = vst [vmem:[%s1719_s13 + $0x60] sm:$0xff] (%p2468_p6), %v1744_v21 }
 0x2b0   : > { %v1538_v46 = vadd.f32 %v1506_v36, %v3256_v19  ;;  %v1383_v16 = vadd.f32 %v1382_v33, %v1354_v6  ;;  %1757 = vst [vmem:[%s1719_s13 + $0xc0] sm:$0xff] (%p2468_p6), %v1756_v24 }
 0x2b1   : > { %1698 = vst [vmem:[%s2625_s25 + $0x38] sm:$0xff] %v1682_v37  ;;  %v1541_v49 = vadd.f32 %v1509_v28, %v3260_v56  ;;  %v1327_v13 = vadd.f32 %v1326_v43, %v1298_v39  ;;  %v1732_v56 = vld [vmem:[%s2625_s25] sm:$0xff] (%p2468_p6)  ;;  %v1734_v28 = vld [vmem:[%s2625_s25 + $0x8] sm:$0xff] (%p2468_p6)  ;;  %v1736_v39 = vld [vmem:[%s2625_s25 + $0x10] sm:$0xff] (%p2468_p6) }
 0x2b2   : > { %v2349_v50 = vpop.eup %2348  ;;  %v1570_v61 = vmul.f32 0.7978846, %v1538_v46  ;;  %v1446_v62 = vmul.f32 0.044715, %v1383_v16  ;;  %v1414_v27 = vmul.f32 0.5, %v1383_v16  ;;  %1733 = vst [vmem:[%s1719_s13] sm:$0xff] (%p2468_p6), %v1732_v56  ;;  %v1738_v46 = vld [vmem:[%s2625_s25 + $0x18] sm:$0xff] (%p2468_p6) }
 0x2b3   : > { %v1630_v41 = vadd.f32 1.0, %v2349_v50  ;;  %v1449_v1 = vmul.f32 0.044715, %v1327_v13  ;;  %v1573_v54 = vmul.f32 0.7978846, %v1541_v49  ;;  %v2351_v30 = vpop.eup %2350  ;;  %v1417_v35 = vmul.f32 0.5, %v1327_v13 }
 0x2b4   : > { %2352 = vtanh.f32 %v1570_v61  ;;  %v1478_v11 = vmul.f32 %v1446_v62, %v1383_v16  ;;  %v1633_v52 = vadd.f32 1.0, %v2351_v30  ;;  %1735 = vst [vmem:[%s1719_s13 + $0x8] sm:$0xff] (%p2468_p6), %v1734_v28  ;;  %v1742_v43 = vld [vmem:[%s2625_s25 + $0x28] sm:$0xff] (%p2468_p6)  ;;  %v1752_v61 = vld [vmem:[%s2625_s25 + $0x50] sm:$0xff] (%p2468_p6) }
 0x2b5   : > { %v1662_v4 = vmul.f32 %v1630_v41, %v1406_v2  ;;  %v1481_v7 = vmul.f32 %v1449_v1, %v1327_v13  ;;  %v1355_v12 = vpop.f32.mrf.mxu2  ;;  %2354 = vtanh.f32 %v1573_v54  ;;  %1737 = vst [vmem:[%s1719_s13 + $0x20] sm:$0xff] (%p2468_p6), %v1736_v39  ;;  %v1760_v41 = vld [vmem:[%s2625_s25 + $0x70] sm:$0xff] (%p2468_p6) }
 0x2b6   : > { %v1510_v48 = vmul.f32 %v1478_v11, %v1383_v16  ;;  %v1356_v42 = vadd.f32 %v1355_v12, %v3159_v38  ;;  %v1384_v47 = vpop.f32.mrf.mxu3  ;;  %v1665_v40 = vmul.f32 %v1633_v52, %v1409_v22  ;;  %1739 = vst [vmem:[%s1719_s13 + $0x28] sm:$0xff] (%p2468_p6), %v1738_v46 }
 0x2b7   : > { %v1684_v17 = vpack.c.bf16 %v1662_v4, %v1661_v44  ;;  %v1513_v51 = vmul.f32 %v1481_v7, %v1327_v13  ;;  %1743 = vst [vmem:[%s1719_s13 + $0x48] sm:$0xff] (%p2468_p6), %v1742_v43 }
 0x2b8   : > { %v1542_v58 = vadd.f32 %v1510_v48, %v1383_v16  ;;  %v1385_v63 = vadd.f32 %v1384_v47, %v1356_v42  ;;  %v1740_v16 = vld [vmem:[%s2625_s25 + $0x20] sm:$0xff] (%p2468_p6)  ;;  %v1746_v49 = vld [vmem:[%s2625_s25 + $0x38] sm:$0xff] (%p2468_p6)  ;;  %1753 = vst [vmem:[%s1719_s13 + $0xa0] sm:$0xff] (%p2468_p6), %v1752_v61 }
 0x2b9   : > { %1700 = vst [vmem:[%s2625_s25 + $0x48] sm:$0xff] %v1684_v17  ;;  %v1545_v59 = vadd.f32 %v1513_v51, %v1327_v13  ;;  %v1748_v13 = vld [vmem:[%s2625_s25 + $0x40] sm:$0xff] (%p2468_p6) }
 0x2ba   : > { %v2353_v31 = vpop.eup %2352  ;;  %v1574_v15 = vmul.f32 0.7978846, %v1542_v58  ;;  %v1450_v3 = vmul.f32 0.044715, %v1385_v63  ;;  %v1418_v36 = vmul.f32 0.5, %v1385_v63  ;;  %1741 = vst [vmem:[%s1719_s13 + $0x40] sm:$0xff] (%p2468_p6), %v1740_v16 }
 0x2bb   : > { %v1634_v60 = vadd.f32 1.0, %v2353_v31  ;;  %v1577_v38 = vmul.f32 0.7978846, %v1545_v59  ;;  %v2355_v55 = vpop.eup %2354  ;;  %1747 = vst [vmem:[%s1719_s13 + $0x68] sm:$0xff] (%p2468_p6), %v1746_v49 }
 0x2bc   : > { %2356 = vtanh.f32 %v1574_v15  ;;  %v1482_v45 = vmul.f32 %v1450_v3, %v1385_v63  ;;  %v1637_v9 = vadd.f32 1.0, %v2355_v55  ;;  %1749 = vst [vmem:[%s1719_s13 + $0x80] sm:$0xff] (%p2468_p6), %v1748_v13 }
 0x2bd   : > { %v1666_v0 = vmul.f32 %v1634_v60, %v1410_v53  ;;  %2358 = vtanh.f32 %v1577_v38  ;;  %1761 = vst [vmem:[%s1719_s13 + $0xe0] sm:$0xff] (%p2468_p6), %v1760_v41 }
 0x2be   : > { %v1514_v14 = vmul.f32 %v1482_v45, %v1385_v63  ;;  %v1669_v23 = vmul.f32 %v1637_v9, %v1413_v5 }
 0x2bf   : > { %v1686_v25 = vpack.c.bf16 %v1666_v0, %v1665_v40 }
 0x2c0   : > { %v1546_v10 = vadd.f32 %v1514_v14, %v1385_v63  ;;  %v1750_v50 = vld [vmem:[%s2625_s25 + $0x48] sm:$0xff] (%p2468_p6) }
 0x2c1   : > { %1702 = vst [vmem:[%s2625_s25 + $0x58] sm:$0xff] %v1686_v25 }
 0x2c2   : > { %v2357_v57 = vpop.eup %2356  ;;  %v1578_v20 = vmul.f32 0.7978846, %v1546_v10  ;;  %1751 = vst [vmem:[%s1719_s13 + $0x88] sm:$0xff] (%p2468_p6), %v1750_v50 }
 0x2c3   : > { %v1638_v19 = vadd.f32 1.0, %v2357_v57  ;;  %v2359_v29 = vpop.eup %2358 }
 0x2c4   : > { %2360 = vtanh.f32 %v1578_v20  ;;  %v1641_v8 = vadd.f32 1.0, %v2359_v29 }
 0x2c5   : > { %v1670_v18 = vmul.f32 %v1638_v19, %v1414_v27 }
 0x2c6   : > { %v1673_v33 = vmul.f32 %v1641_v8, %v1417_v35 }
 0x2c7   : > { %v1688_v32 = vpack.c.bf16 %v1670_v18, %v1669_v23 }
 0x2c8   : > { %v1754_v62 = vld [vmem:[%s2625_s25 + $0x58] sm:$0xff] (%p2468_p6) }
 0x2c9   : > { %1704 = vst [vmem:[%s2625_s25 + $0x68] sm:$0xff] %v1688_v32 }
 0x2ca   : > { %v2361_v34 = vpop.eup %2360  ;;  %1755 = vst [vmem:[%s1719_s13 + $0xa8] sm:$0xff] (%p2468_p6), %v1754_v62 }
 0x2cb   : > { %v1642_v6 = vadd.f32 1.0, %v2361_v34 }
 0x2cd   : > { %v1674_v26 = vmul.f32 %v1642_v6, %v1418_v36  ;;  %1713 = sbr.rel (!%p2468_p6) target bundleno = 730 (0x2da), region = 71 }
 0x2cf   : > { %v1690_v37 = vpack.c.bf16 %v1674_v26, %v1673_v33 }
 0x2d0   : > { %v1758_v2 = vld [vmem:[%s2625_s25 + $0x68] sm:$0xff] (%p2468_p6) }
 0x2d1   : > { %1706 = vst [vmem:[%s2625_s25 + $0x78] sm:$0xff] %v1690_v37 }
 0x2d2   : > { %1759 = vst [vmem:[%s1719_s13 + $0xc8] sm:$0xff] %v1758_v2 }
 0x2d8   : > { %v1762_v1 = vld [vmem:[%s2625_s25 + $0x78] sm:$0xff] }
 0x2d9   : > { %1763 = vst [vmem:[%s1719_s13 + $0xe8] sm:$0xff] %v1762_v1 }
 0x2da PF: > { %s15_s22 = sadd.s32 1, %s2400_s22   ;;  %s3329_s18 = smov %s2388_s19 }
 0x2db   : > { %p12_p13 = scmp.ge.s32.totalorder %s15_s22, 4   ;;  %s3330_s19 = smov %s2473_s28 }
 0x2dc   : > { %s3331_s20 = smov %s2396_s21  ;;  %s3332_s21 = smov %s3334_s23 }
 0x2dd   :  { %14 = sbr.rel (!%p12_p13) target bundleno = 3 (0x3), region = 131 }

// kernel: vit_encoder_forward.17
= control target key start
LH: loop header
LB: loop body
LE: loop exit
PB: predicated region body
PF: predicated region fallthrough
CT: control target
= control target key end

     0   :  { %s1931_s15 = smov 0   ;;  %s1933_s16 = smov 0   ;;  %s2331_s0 = inlined_call_operand.vmem [shape: bf16[64,1024], index: 0, kind: input, shape index: {}]   ;;  %s2332_s1 = inlined_call_operand.vmem [shape: bf16[1024,256], index: 1, kind: input, shape index: {}]   ;;  %s2333_s2 = inlined_call_operand.vmem [shape: f32[1,256], index: 2, kind: input, shape index: {}]   ;;  %s2334_s3 = inlined_call_operand.vmem [shape: f32[64,256], index: 3, kind: input, shape index: {}]   ;;  %s2335_s4 = inlined_call_operand.vmem [shape: f32[64,256], index: 4, kind: output, shape index: {}]  }
   0x1   :  { %s1935_s17 = smov 0   ;;  %s1937_s18 = smov 0  }
   0x2   :  { %s1939_s19 = smov 0  }
   0x3 LB: > { %s26_s20 = sadd.s32 1, %s1899_s18  ;;  %p49_p1 = scmp.ne.s32.totalorder %s1891_s16, %s1887_s15  ;;  %s1903_s19 = sphi %s1939_s19, %s14_s19   ;;  %s1899_s18 = sphi %s1937_s18, %s2339_s18   ;;  %s1895_s17 = sphi %s1935_s17, %s2338_s17   ;;  %s1891_s16 = sphi %s1933_s16, %s2337_s16   ;;  %s1887_s15 = sphi %s1931_s15, %s2336_s15  }
   0x4   : > { %p27_p0 = scmp.ge.s32.totalorder %s26_s20, 2  ;;  %p50_p2 = scmp.eq.s32.totalorder %s1903_s19, 0 }
   0x5   : > { %s42_s22 = sadd.s32 1, %s1891_s16  ;;  %p1407_p5 = scmp.ge.s32.totalorder %s1903_s19, 2 }
   0x6   : > { %s2341_s20 = smov (%p27_p0, %s26_s20), 0  ;;  %p51_p3 = por %p50_p2, %p49_p1 }
   0x7   : > { %s38_s21 = ssub.s32 %s1899_s18, %s2341_s20  ;;  %208 = sbr.rel (%p1407_p5) target bundleno = 32 (0x20), region = 24 }
   0x8   : > { %p40_p4 = scmp.eq.s32.totalorder %s38_s21, 0 }
   0xa   : > { %s1966_s23 = scalar_select %p40_p4, %s1891_s16, %s42_s22  }
   0xc   : > { %211 = sbr.rel (!%p51_p3) target bundleno = 32 (0x20), region = 28  ;;  %s213_s24 = sand.u32 (%p51_p3), 1, %s1891_s16  }
   0xd   : > { %s1742_s25 = sshll.u32 (%p51_p3), %s1899_s18, 4  ;;  %s1408_s26 = sshll.u32 (%p51_p3), %s213_s24, 7 }
   0xe   : > { %s1974_s29 = scalar_lea.vmem (%p51_p3), %s2331_s0, %s1742_s25  ;;  %s215_s30 = scalar_lea.vmem (%p51_p3), [#allocation3], %s1408_s26 }
   0xf   : > { %v234_v0 = vld [vmem:[%s1974_s29] sm:$0xff] (%p51_p3)  ;;  %v236_v1 = vld [vmem:[%s1974_s29 + $0x8] sm:$0xff] (%p51_p3) }
  0x10   : > { %v238_v2 = vld [vmem:[%s1974_s29 + $0x20] sm:$0xff] (%p51_p3)  ;;  %235 = vst [vmem:[%s215_s30] sm:$0xff] (%p51_p3), %v234_v0  ;;  %v240_v3 = vld [vmem:[%s1974_s29 + $0x28] sm:$0xff] (%p51_p3) }
  0x11   : > { %237 = vst [vmem:[%s215_s30 + $0x8] sm:$0xff] %v236_v1  ;;  %v242_v4 = vld [vmem:[%s1974_s29 + $0x40] sm:$0xff]  ;;  %v244_v5 = vld [vmem:[%s1974_s29 + $0x48] sm:$0xff] }
  0x12   : > { %239 = vst [vmem:[%s215_s30 + $0x10] sm:$0xff] %v238_v2  ;;  %v246_v6 = vld [vmem:[%s1974_s29 + $0x60] sm:$0xff]  ;;  %v248_v7 = vld [vmem:[%s1974_s29 + $0x68] sm:$0xff] }
  0x13   : > { %241 = vst [vmem:[%s215_s30 + $0x18] sm:$0xff] %v240_v3  ;;  %v250_v8 = vld [vmem:[%s1974_s29 + $0x80] sm:$0xff]  ;;  %v252_v9 = vld [vmem:[%s1974_s29 + $0x88] sm:$0xff] }
  0x14   : > { %243 = vst [vmem:[%s215_s30 + $0x20] sm:$0xff] %v242_v4  ;;  %v254_v10 = vld [vmem:[%s1974_s29 + $0xa0] sm:$0xff]  ;;  %v256_v11 = vld [vmem:[%s1974_s29 + $0xa8] sm:$0xff] }
  0x15   : > { %245 = vst [vmem:[%s215_s30 + $0x28] sm:$0xff] %v244_v5  ;;  %v258_v12 = vld [vmem:[%s1974_s29 + $0xc0] sm:$0xff]  ;;  %v260_v13 = vld [vmem:[%s1974_s29 + $0xc8] sm:$0xff] }
  0x16   : > { %247 = vst [vmem:[%s215_s30 + $0x30] sm:$0xff] %v246_v6  ;;  %v262_v14 = vld [vmem:[%s1974_s29 + $0xe0] sm:$0xff]  ;;  %v264_v15 = vld [vmem:[%s1974_s29 + $0xe8] sm:$0xff] }
  0x17   : > { %249 = vst [vmem:[%s215_s30 + $0x38] sm:$0xff] %v248_v7 }
  0x18   : > { %251 = vst [vmem:[%s215_s30 + $0x40] sm:$0xff] %v250_v8 }
  0x19   : > { %253 = vst [vmem:[%s215_s30 + $0x48] sm:$0xff] %v252_v9 }
  0x1a   : > { %255 = vst [vmem:[%s215_s30 + $0x50] sm:$0xff] %v254_v10 }
  0x1b   : > { %257 = vst [vmem:[%s215_s30 + $0x58] sm:$0xff] %v256_v11 }
  0x1c   : > { %259 = vst [vmem:[%s215_s30 + $0x60] sm:$0xff] %v258_v12 }
  0x1d   : > { %261 = vst [vmem:[%s215_s30 + $0x68] sm:$0xff] %v260_v13 }
  0x1e   : > { %263 = vst [vmem:[%s215_s30 + $0x70] sm:$0xff] %v262_v14 }
  0x1f   : > { %265 = vst [vmem:[%s215_s30 + $0x78] sm:$0xff] %v264_v15 }
  0x20 PF: > { %p1411_p6 = scmp.ge.s32.totalorder %s1903_s19, 1  ;;  %p285_p7 = scmp.lt.s32.totalorder %s1903_s19, 3 }
  0x22   : > { %p286_p8 = pnand %p1411_p6, %p285_p7 }
  0x23   : > { %s292_s5 = sand.u32 (!%p286_p8), 1, %s1887_s15   ;;  %s1413_s6 = sshll.u32 (!%p286_p8), %s1895_s17, 6 }
  0x24   : > { %289 = sbr.rel (%p286_p8) target bundleno = 381 (0x17d), region = 55  ;;  %s1412_s7 = sshll.u32 (!%p286_p8), %s292_s5, 7 }
  0x25   : > { %p350_p9 = scmp.lt.s32.totalorder (!%p286_p8), %s1413_s6, 127  ;;  %s2001_s12 = scalar_lea.vmem (!%p286_p8), [#allocation3], %s1412_s7 }
  0x26   : > { %p1416_p10 = scmp.ne.s32.totalorder (!%p286_p8), %s1895_s17, 0 }
  0x29   : > { %s2343_s6 = smov (!%p350_p9, %s1413_s6), 127  ;;  %392 = sbr.rel (%p1416_p10) target bundleno = 63 (0x3f), region = 63 }
  0x2a   : > { %s1743_s8 = sshll.u32 %s2343_s6, 3 }
  0x2b   : > { %s1999_s11 = scalar_lea.vmem %s2332_s1, %s1743_s8 }
  0x2e   : > { %v1905_v16 = vmov 0.0  }
  0x2f   : > { %393 = vst [vmem:[#allocation2 + $0x30] sm:$0xff] %v1905_v16 }
  0x30   : > { %394 = vst [vmem:[#allocation2] sm:$0xff] %v1905_v16 }
  0x31   : > { %395 = vst [vmem:[#allocation2 + $0x58] sm:$0xff] %v1905_v16 }
  0x32   : > { %396 = vst [vmem:[#allocation2 + $0x18] sm:$0xff] %v1905_v16 }
  0x33   : > { %397 = vst [vmem:[#allocation2 + $0x50] sm:$0xff] %v1905_v16 }
  0x34   : > { %398 = vst [vmem:[#allocation2 + $0x68] sm:$0xff] %v1905_v16 }
  0x35   : > { %399 = vst [vmem:[#allocation2 + $0x8] sm:$0xff] %v1905_v16 }
  0x36   : > { %400 = vst [vmem:[#allocation2 + $0x48] sm:$0xff] %v1905_v16 }
  0x37   : > { %401 = vst [vmem:[#allocation2 + $0x40] sm:$0xff] %v1905_v16 }
  0x38   : > { %402 = vst [vmem:[#allocation2 + $0x20] sm:$0xff] %v1905_v16 }
  0x39   : > { %403 = vst [vmem:[#allocation2 + $0x10] sm:$0xff] %v1905_v16 }
  0x3a   : > { %404 = vst [vmem:[#allocation2 + $0x38] sm:$0xff] %v1905_v16 }
  0x3b   : > { %405 = vst [vmem:[#allocation2 + $0x60] sm:$0xff] %v1905_v16 }
  0x3c   : > { %406 = vst [vmem:[#allocation2 + $0x70] sm:$0xff] %v1905_v16 }
  0x3d   : > { %407 = vst [vmem:[#allocation2 + $0x78] sm:$0xff] %v1905_v16 }
  0x3e   : > { %408 = vst [vmem:[#allocation2 + $0x28] sm:$0xff] %v1905_v16 }
  0x3f PF: > { %v1539_v17 = vld [vmem:[%s1999_s11 + $0x70] sm:$0xf]  ;;  %v1775_v18 = vld [vmem:[%s1999_s11 + $0x74] sm:$0xf0]  ;;  %v1531_v28 = vld [vmem:[%s1999_s11 + $0x60] sm:$0xf] }
  0x40   : > { %v1603_v19 = vld [vmem:[%s1999_s11 + $0xf0] sm:$0xf]  ;;  %v1540_v20 = vor.u32 %v1775_v18, %v1539_v17  ;;  %v1791_v21 = vld [vmem:[%s1999_s11 + $0xf4] sm:$0xf0]  ;;  %v1773_v30 = vld [vmem:[%s1999_s11 + $0x64] sm:$0xf0] }
  0x41   : > { %v1667_v22 = vld [vmem:[%s1999_s11 + $0x170] sm:$0xf]  ;;  %v1807_v23 = vld [vmem:[%s1999_s11 + $0x174] sm:$0xf0]  ;;  %v1604_v24 = vor.u32 %v1791_v21, %v1603_v19  ;;  %v1595_v31 = vld [vmem:[%s1999_s11 + $0xe0] sm:$0xf]  ;;  %v1532_v33 = vor.u32 %v1773_v30, %v1531_v28 }
  0x42   : > { %v1668_v25 = vor.u32 %v1807_v23, %v1667_v22  ;;  %v1731_v26 = vld [vmem:[%s1999_s11 + $0x1f0] sm:$0xf]  ;;  %v1823_v27 = vld [vmem:[%s1999_s11 + $0x1f4] sm:$0xf0]  ;;  %905 = vmatpush.bf16.msra.mxu0 %v1540_v20  ;;  %v1789_v32 = vld [vmem:[%s1999_s11 + $0xe4] sm:$0xf0] }
  0x43   : > { %v1732_v29 = vor.u32 %v1823_v27, %v1731_v26  ;;  %934 = vmatpush.bf16.msra.mxu1 %v1604_v24  ;;  %v1596_v34 = vor.u32 %v1789_v32, %v1595_v31  ;;  %v1659_v35 = vld [vmem:[%s1999_s11 + $0x160] sm:$0xf]  ;;  %v1805_v36 = vld [vmem:[%s1999_s11 + $0x164] sm:$0xf0]  ;;  %v1523_v40 = vld [vmem:[%s1999_s11 + $0x50] sm:$0xf] }
  0x44   : > { %963 = vmatpush.bf16.msra.mxu2 %v1668_v25  ;;  %v1723_v37 = vld [vmem:[%s1999_s11 + $0x1e0] sm:$0xf]  ;;  %v1660_v38 = vor.u32 %v1805_v36, %v1659_v35  ;;  %v1821_v39 = vld [vmem:[%s1999_s11 + $0x1e4] sm:$0xf0]  ;;  %v1771_v41 = vld [vmem:[%s1999_s11 + $0x54] sm:$0xf0] }
  0x45   : > { %992 = vmatpush.bf16.msra.mxu3 %v1732_v29  ;;  %v1724_v42 = vor.u32 %v1821_v39, %v1723_v37  ;;  %v1587_v43 = vld [vmem:[%s1999_s11 + $0xd0] sm:$0xf]  ;;  %v1787_v44 = vld [vmem:[%s1999_s11 + $0xd4] sm:$0xf0]  ;;  %v1524_v46 = vor.u32 %v1771_v41, %v1523_v40  ;;  %v1515_v52 = vld [vmem:[%s1999_s11 + $0x40] sm:$0xf] }
  0x46   : > { %v1651_v45 = vld [vmem:[%s1999_s11 + $0x150] sm:$0xf]  ;;  %906 = vmatpush.bf16.msra.mxu0 %v1532_v33  ;;  %v1803_v47 = vld [vmem:[%s1999_s11 + $0x154] sm:$0xf0]  ;;  %v1588_v50 = vor.u32 %v1787_v44, %v1587_v43  ;;  %v1769_v53 = vld [vmem:[%s1999_s11 + $0x44] sm:$0xf0] }
  0x47   : > { %v1715_v48 = vld [vmem:[%s1999_s11 + $0x1d0] sm:$0xf]  ;;  %v1819_v49 = vld [vmem:[%s1999_s11 + $0x1d4] sm:$0xf0]  ;;  %935 = vmatpush.bf16.msra.mxu1 %v1596_v34  ;;  %v1652_v51 = vor.u32 %v1803_v47, %v1651_v45  ;;  %v1579_v54 = vld [vmem:[%s1999_s11 + $0xc0] sm:$0xf]  ;;  %v1516_v61 = vor.u32 %v1769_v53, %v1515_v52 }
  0x48   : > { %964 = vmatpush.bf16.msra.mxu2 %v1660_v38  ;;  %v1716_v55 = vor.u32 %v1819_v49, %v1715_v48  ;;  %v1785_v56 = vld [vmem:[%s1999_s11 + $0xc4] sm:$0xf0]  ;;  %v1643_v57 = vld [vmem:[%s1999_s11 + $0x140] sm:$0xf]  ;;  %v1507_v0 = vld [vmem:[%s1999_s11 + $0x30] sm:$0xf] }
  0x49   : > { %993 = vmatpush.bf16.msra.mxu3 %v1724_v42  ;;  %v1801_v58 = vld [vmem:[%s1999_s11 + $0x144] sm:$0xf0]  ;;  %v1707_v59 = vld [vmem:[%s1999_s11 + $0x1c0] sm:$0xf]  ;;  %v1580_v62 = vor.u32 %v1785_v56, %v1579_v54  ;;  %v1767_v1 = vld [vmem:[%s1999_s11 + $0x34] sm:$0xf0] }
  0x4a   : > { %v1817_v60 = vld [vmem:[%s1999_s11 + $0x1c4] sm:$0xf0]  ;;  %907 = vmatpush.bf16.msra.mxu0 %v1524_v46  ;;  %v1644_v63 = vor.u32 %v1801_v58, %v1643_v57  ;;  %v1571_v2 = vld [vmem:[%s1999_s11 + $0xb0] sm:$0xf]  ;;  %v1783_v4 = vld [vmem:[%s1999_s11 + $0xb4] sm:$0xf0]  ;;  %v1508_v9 = vor.u32 %v1767_v1, %v1507_v0 }
  0x4b   : > { %936 = vmatpush.bf16.msra.mxu1 %v1588_v50  ;;  %v1708_v3 = vor.u32 %v1817_v60, %v1707_v59  ;;  %v1635_v5 = vld [vmem:[%s1999_s11 + $0x130] sm:$0xf]  ;;  %v1799_v6 = vld [vmem:[%s1999_s11 + $0x134] sm:$0xf0]  ;;  %v1572_v10 = vor.u32 %v1783_v4, %v1571_v2  ;;  %v1499_v12 = vld [vmem:[%s1999_s11 + $0x20] sm:$0xf] }
  0x4c   : > { %965 = vmatpush.bf16.msra.mxu2 %v1652_v51  ;;  %v1699_v7 = vld [vmem:[%s1999_s11 + $0x1b0] sm:$0xf]  ;;  %v1815_v8 = vld [vmem:[%s1999_s11 + $0x1b4] sm:$0xf0]  ;;  %v1636_v11 = vor.u32 %v1799_v6, %v1635_v5  ;;  %v1765_v13 = vld [vmem:[%s1999_s11 + $0x24] sm:$0xf0] }
  0x4d   : > { %994 = vmatpush.bf16.msra.mxu3 %v1716_v55  ;;  %v1563_v14 = vld [vmem:[%s1999_s11 + $0xa0] sm:$0xf]  ;;  %v1700_v15 = vor.u32 %v1815_v8, %v1699_v7  ;;  %v1781_v16 = vld [vmem:[%s1999_s11 + $0xa4] sm:$0xf0]  ;;  %v1500_v21 = vor.u32 %v1765_v13, %v1499_v12  ;;  %v1491_v24 = vld [vmem:[%s1999_s11 + $0x10] sm:$0xf] }
  0x4e   : > { %908 = vmatpush.bf16.msra.mxu0 %v1516_v61  ;;  %v1627_v17 = vld [vmem:[%s1999_s11 + $0x120] sm:$0xf]  ;;  %v1797_v18 = vld [vmem:[%s1999_s11 + $0x124] sm:$0xf0]  ;;  %v1564_v22 = vor.u32 %v1781_v16, %v1563_v14  ;;  %v1763_v25 = vld [vmem:[%s1999_s11 + $0x14] sm:$0xf0] }
  0x4f   : > { %937 = vmatpush.bf16.msra.mxu1 %v1580_v62  ;;  %v1691_v19 = vld [vmem:[%s1999_s11 + $0x1a0] sm:$0xf]  ;;  %v1813_v20 = vld [vmem:[%s1999_s11 + $0x1a4] sm:$0xf0]  ;;  %v1628_v23 = vor.u32 %v1797_v18, %v1627_v17  ;;  %v1555_v26 = vld [vmem:[%s1999_s11 + $0x90] sm:$0xf]  ;;  %v1492_v34 = vor.u32 %v1763_v25, %v1491_v24 }
  0x50   : > { %966 = vmatpush.bf16.msra.mxu2 %v1644_v63  ;;  %v1692_v27 = vor.u32 %v1813_v20, %v1691_v19  ;;  %v1779_v28 = vld [vmem:[%s1999_s11 + $0x94] sm:$0xf0]  ;;  %v1619_v29 = vld [vmem:[%s1999_s11 + $0x110] sm:$0xf]  ;;  %v1483_v33 = vld [vmem:[%s1999_s11] sm:$0xf] }
  0x51   : > { %995 = vmatpush.bf16.msra.mxu3 %v1708_v3  ;;  %v1795_v30 = vld [vmem:[%s1999_s11 + $0x114] sm:$0xf0]  ;;  %v1683_v31 = vld [vmem:[%s1999_s11 + $0x190] sm:$0xf]  ;;  %v1761_v35 = vld [vmem:[%s1999_s11 + $0x4] sm:$0xf0]  ;;  %v1556_v38 = vor.u32 %v1779_v28, %v1555_v26 }
  0x52   : > { %909 = vmatpush.bf16.msra.mxu0 %v1508_v9  ;;  %v1811_v32 = vld [vmem:[%s1999_s11 + $0x194] sm:$0xf0]  ;;  %v1547_v36 = vld [vmem:[%s1999_s11 + $0x80] sm:$0xf]  ;;  %v1777_v37 = vld [vmem:[%s1999_s11 + $0x84] sm:$0xf0]  ;;  %v1620_v39 = vor.u32 %v1795_v30, %v1619_v29  ;;  %v1484_v51 = vor.u32 %v1761_v35, %v1483_v33 }
  0x53   : > { %938 = vmatpush.bf16.msra.mxu1 %v1572_v10  ;;  %v1611_v40 = vld [vmem:[%s1999_s11 + $0x100] sm:$0xf]  ;;  %v1793_v41 = vld [vmem:[%s1999_s11 + $0x104] sm:$0xf0]  ;;  %v1684_v43 = vor.u32 %v1811_v32, %v1683_v31  ;;  %v1746_v46 = vld [vmem:[%s2001_s12 + $0xc] sm:$0xf0]  ;;  %v1548_v55 = vor.u32 %v1777_v37, %v1547_v36 }
  0x54   : > { %967 = vmatpush.bf16.msra.mxu2 %v1636_v11  ;;  %v1675_v42 = vld [vmem:[%s1999_s11 + $0x180] sm:$0xf]  ;;  %v1809_v44 = vld [vmem:[%s1999_s11 + $0x184] sm:$0xf0]  ;;  %v1744_v47 = vld [vmem:[%s2001_s12 + $0x4] sm:$0xf]  ;;  %v1612_v56 = vor.u32 %v1793_v41, %v1611_v40 }
  0x55   : > { %996 = vmatpush.bf16.msra.mxu3 %v1700_v15  ;;  %v1419_v45 = vld [vmem:[%s2001_s12] sm:$0xf]  ;;  %v1421_v48 = vld [vmem:[%s2001_s12 + $0x10] sm:$0xf0]  ;;  %v1669_v50 = vld [vmem:[%s1999_s11 + $0x178] sm:$0xf0]  ;;  %v1676_v60 = vor.u32 %v1809_v44, %v1675_v42 }
  0x56   : > { %910 = vmatpush.bf16.msra.mxu0 %v1500_v21  ;;  %v1806_v49 = vld [vmem:[%s1999_s11 + $0x174] sm:$0xf]  ;;  %v1427_v52 = vld [vmem:[%s2001_s12 + $0x8] sm:$0xf]  ;;  %v1733_v54 = vld [vmem:[%s1999_s11 + $0x1f8] sm:$0xf0]  ;;  %v2083_v1 = vor.u32 %v1746_v46, %v1419_v45  ;;  %v2088_v6 = vor.u32 %v1744_v47, %v1421_v48 }
  0x57   : > { %939 = vmatpush.bf16.msra.mxu1 %v1564_v22  ;;  %v1822_v53 = vld [vmem:[%s1999_s11 + $0x1f4] sm:$0xf]  ;;  %v1747_v57 = vld [vmem:[%s2001_s12 + $0x14] sm:$0xf0]  ;;  %v1745_v58 = vld [vmem:[%s2001_s12 + $0xc] sm:$0xf]  ;;  %v1672_v61 = vor.u32 %v1806_v49, %v1669_v50 }
  0x58   : > { %968 = vmatpush.bf16.msra.mxu2 %v1628_v23  ;;  %v1429_v59 = vld [vmem:[%s2001_s12 + $0x18] sm:$0xf0]  ;;  %v1774_v62 = vld [vmem:[%s1999_s11 + $0x74] sm:$0xf]  ;;  %v1736_v2 = vor.u32 %v1822_v53, %v1733_v54  ;;  %v1804_v4 = vld [vmem:[%s1999_s11 + $0x164] sm:$0xf]  ;;  %v2090_v7 = vor.u32 %v1747_v57, %v1427_v52 }
  0x59   : > { %997 = vmatpush.bf16.msra.mxu3 %v1692_v27  ;;  %v1541_v63 = vld [vmem:[%s1999_s11 + $0x78] sm:$0xf0]  ;;  %v1790_v0 = vld [vmem:[%s1999_s11 + $0xf4] sm:$0xf]  ;;  %v1661_v5 = vld [vmem:[%s1999_s11 + $0x168] sm:$0xf0]  ;;  %v2094_v10 = vor.u32 %v1745_v58, %v1429_v59 }
  0x5a   : > { %911 = vmatpush.bf16.msra.mxu0 %v1492_v34  ;;  %v1605_v3 = vld [vmem:[%s1999_s11 + $0xf8] sm:$0xf0]  ;;  %v1820_v8 = vld [vmem:[%s1999_s11 + $0x1e4] sm:$0xf]  ;;  %v1725_v9 = vld [vmem:[%s1999_s11 + $0x1e8] sm:$0xf0]  ;;  %v1544_v11 = vor.u32 %v1774_v62, %v1541_v63  ;;  %v1664_v13 = vor.u32 %v1804_v4, %v1661_v5 }
  0x5b   : > { %940 = vmatpush.bf16.msra.mxu1 %v1556_v38  ;;  %v1608_v12 = vor.u32 %v1790_v0, %v1605_v3  ;;  %v1772_v14 = vld [vmem:[%s1999_s11 + $0x64] sm:$0xf]  ;;  %v1533_v15 = vld [vmem:[%s1999_s11 + $0x68] sm:$0xf0]  ;;  %v1728_v17 = vor.u32 %v1820_v8, %v1725_v9  ;;  %v1802_v19 = vld [vmem:[%s1999_s11 + $0x154] sm:$0xf] }
  0x5c   : > { %969 = vmatpush.bf16.msra.mxu2 %v1620_v39  ;;  %v1788_v16 = vld [vmem:[%s1999_s11 + $0xe4] sm:$0xf]  ;;  %v1597_v18 = vld [vmem:[%s1999_s11 + $0xe8] sm:$0xf0]  ;;  %v1653_v20 = vld [vmem:[%s1999_s11 + $0x158] sm:$0xf0]  ;;  %v1536_v23 = vor.u32 %v1772_v14, %v1533_v15 }
  0x5d   : > { %998 = vmatpush.bf16.msra.mxu3 %v1684_v43  ;;  %v1818_v21 = vld [vmem:[%s1999_s11 + $0x1d4] sm:$0xf]  ;;  %v1717_v22 = vld [vmem:[%s1999_s11 + $0x1d8] sm:$0xf0]  ;;  %v1600_v24 = vor.u32 %v1788_v16, %v1597_v18  ;;  %v1656_v25 = vor.u32 %v1802_v19, %v1653_v20  ;;  %v1800_v31 = vld [vmem:[%s1999_s11 + $0x144] sm:$0xf] }
  0x5e   : > { %912 = vmatpush.bf16.msra.mxu0 %v1484_v51  ;;  %v1770_v26 = vld [vmem:[%s1999_s11 + $0x54] sm:$0xf]  ;;  %v1525_v27 = vld [vmem:[%s1999_s11 + $0x58] sm:$0xf0]  ;;  %v1720_v29 = vor.u32 %v1818_v21, %v1717_v22  ;;  %v1645_v32 = vld [vmem:[%s1999_s11 + $0x148] sm:$0xf0] }
  0x5f   : > { %941 = vmatpush.bf16.msra.mxu1 %v1548_v55  ;;  %v1786_v28 = vld [vmem:[%s1999_s11 + $0xd4] sm:$0xf]  ;;  %v1589_v30 = vld [vmem:[%s1999_s11 + $0xd8] sm:$0xf0]  ;;  %v1816_v33 = vld [vmem:[%s1999_s11 + $0x1c4] sm:$0xf]  ;;  %v1528_v35 = vor.u32 %v1770_v26, %v1525_v27  ;;  %v1648_v39 = vor.u32 %v1800_v31, %v1645_v32 }
  0x60   : > { %970 = vmatpush.bf16.msra.mxu2 %v1612_v56  ;;  %v1709_v34 = vld [vmem:[%s1999_s11 + $0x1c8] sm:$0xf0]  ;;  %v1435_v36 = vld [vmem:[%s2001_s12 + $0x20] sm:$0xf]  ;;  %v1750_v37 = vld [vmem:[%s2001_s12 + $0x2c] sm:$0xf0]  ;;  %v1592_v38 = vor.u32 %v1786_v28, %v1589_v30 }
  0x61   : > { %999 = vmatpush.bf16.msra.mxu3 %v1676_v60  ;;  %913 = vmatmul.bf16.vlgmr.msra.gmra.mxu0 %v2083_v1  ;;  %v1768_v40 = vld [vmem:[%s1999_s11 + $0x44] sm:$0xf]  ;;  %v1517_v41 = vld [vmem:[%s1999_s11 + $0x48] sm:$0xf0]  ;;  %v1437_v44 = vld [vmem:[%s2001_s12 + $0x30] sm:$0xf0]  ;;  %v1712_v45 = vor.u32 %v1816_v33, %v1709_v34 }
  0x62   : > { %942 = vmatmul.bf16.vlgmr.msra.gmra.mxu1 %v2088_v6  ;;  %1021 = vmatpush.bf16.msrb.mxu0 %v1544_v11  ;;  %v1784_v42 = vld [vmem:[%s1999_s11 + $0xc4] sm:$0xf]  ;;  %v1581_v46 = vld [vmem:[%s1999_s11 + $0xc8] sm:$0xf0]  ;;  %v1798_v47 = vld [vmem:[%s1999_s11 + $0x134] sm:$0xf]  ;;  %v1520_v55 = vor.u32 %v1768_v40, %v1517_v41 }
  0x63   : > { %971 = vmatmul.bf16.vlgmr.msra.gmra.mxu2 %v2090_v7  ;;  %1050 = vmatpush.bf16.msrb.mxu1 %v1608_v12  ;;  %v1748_v43 = vld [vmem:[%s2001_s12 + $0x24] sm:$0xf]  ;;  %v1637_v48 = vld [vmem:[%s1999_s11 + $0x138] sm:$0xf0]  ;;  %v1443_v49 = vld [vmem:[%s2001_s12 + $0x28] sm:$0xf]  ;;  %v1584_v56 = vor.u32 %v1784_v42, %v1581_v46 }
  0x64   : > { %1079 = vmatpush.bf16.msrb.mxu2 %v1672_v61  ;;  %1000 = vmatmul.bf16.vlgmr.msra.gmra.mxu3 %v2094_v10  ;;  %v1814_v50 = vld [vmem:[%s1999_s11 + $0x1b4] sm:$0xf]  ;;  %v1701_v51 = vld [vmem:[%s1999_s11 + $0x1b8] sm:$0xf0]  ;;  %v1751_v52 = vld [vmem:[%s2001_s12 + $0x34] sm:$0xf0]  ;;  %v1640_v57 = vor.u32 %v1798_v47, %v1637_v48  ;;  %v2135_v61 = vor.u32 %v1750_v37, %v1435_v36  ;;  %v2140_v3 = vor.u32 %v1748_v43, %v1437_v44 }
  0x65   : > { %1108 = vmatpush.bf16.msrb.mxu3 %v1736_v2  ;;  %v1749_v53 = vld [vmem:[%s2001_s12 + $0x2c] sm:$0xf]  ;;  %v1445_v54 = vld [vmem:[%s2001_s12 + $0x38] sm:$0xf0]  ;;  %v1766_v58 = vld [vmem:[%s1999_s11 + $0x34] sm:$0xf]  ;;  %v1704_v62 = vor.u32 %v1814_v50, %v1701_v51  ;;  %v2142_v4 = vor.u32 %v1751_v52, %v1443_v49 }
  0x66   : > { %1022 = vmatpush.bf16.msrb.mxu0 %v1536_v23  ;;  %v1509_v59 = vld [vmem:[%s1999_s11 + $0x38] sm:$0xf0]  ;;  %v1782_v60 = vld [vmem:[%s1999_s11 + $0xb4] sm:$0xf]  ;;  %v1796_v0 = vld [vmem:[%s1999_s11 + $0x124] sm:$0xf]  ;;  %v2146_v9 = vor.u32 %v1749_v53, %v1445_v54 }
  0x67   : > { %1051 = vmatpush.bf16.msrb.mxu1 %v1600_v24  ;;  %v1573_v63 = vld [vmem:[%s1999_s11 + $0xb8] sm:$0xf0]  ;;  %v1629_v2 = vld [vmem:[%s1999_s11 + $0x128] sm:$0xf0]  ;;  %v1812_v5 = vld [vmem:[%s1999_s11 + $0x1a4] sm:$0xf]  ;;  %v1512_v11 = vor.u32 %v1766_v58, %v1509_v59 }
  0x68   : > { %1080 = vmatpush.bf16.msrb.mxu2 %v1664_v13  ;;  %v1693_v8 = vld [vmem:[%s1999_s11 + $0x1a8] sm:$0xf0]  ;;  %v1576_v12 = vor.u32 %v1782_v60, %v1573_v63  ;;  %v1632_v13 = vor.u32 %v1796_v0, %v1629_v2  ;;  %v1764_v14 = vld [vmem:[%s1999_s11 + $0x24] sm:$0xf]  ;;  %v1794_v20 = vld [vmem:[%s1999_s11 + $0x114] sm:$0xf] }
  0x69   : > { %1109 = vmatpush.bf16.msrb.mxu3 %v1728_v17  ;;  %v1501_v15 = vld [vmem:[%s1999_s11 + $0x28] sm:$0xf0]  ;;  %v1696_v16 = vor.u32 %v1812_v5, %v1693_v8  ;;  %v1780_v17 = vld [vmem:[%s1999_s11 + $0xa4] sm:$0xf]  ;;  %v1621_v21 = vld [vmem:[%s1999_s11 + $0x118] sm:$0xf0] }
  0x6a   : > { %1023 = vmatpush.bf16.msrb.mxu0 %v1528_v35  ;;  %v1565_v18 = vld [vmem:[%s1999_s11 + $0xa8] sm:$0xf0]  ;;  %v1504_v19 = vor.u32 %v1764_v14, %v1501_v15  ;;  %v1810_v22 = vld [vmem:[%s1999_s11 + $0x194] sm:$0xf]  ;;  %v1624_v24 = vor.u32 %v1794_v20, %v1621_v21  ;;  %v1493_v27 = vld [vmem:[%s1999_s11 + $0x18] sm:$0xf0] }
  0x6b   : > { %1052 = vmatpush.bf16.msrb.mxu1 %v1592_v38  ;;  %v1568_v23 = vor.u32 %v1780_v17, %v1565_v18  ;;  %v1762_v26 = vld [vmem:[%s1999_s11 + $0x14] sm:$0xf]  ;;  %v1557_v30 = vld [vmem:[%s1999_s11 + $0x98] sm:$0xf0]  ;;  %v1792_v31 = vld [vmem:[%s1999_s11 + $0x104] sm:$0xf] }
  0x6c   : > { %1081 = vmatpush.bf16.msrb.mxu2 %v1656_v25  ;;  %v1685_v25 = vld [vmem:[%s1999_s11 + $0x198] sm:$0xf0]  ;;  %v1613_v32 = vld [vmem:[%s1999_s11 + $0x108] sm:$0xf0]  ;;  %v1808_v33 = vld [vmem:[%s1999_s11 + $0x184] sm:$0xf]  ;;  %v1496_v35 = vor.u32 %v1762_v26, %v1493_v27 }
  0x6d   : > { %1110 = vmatpush.bf16.msrb.mxu3 %v1720_v29  ;;  %v1688_v28 = vor.u32 %v1810_v22, %v1685_v25  ;;  %v1778_v29 = vld [vmem:[%s1999_s11 + $0x94] sm:$0xf]  ;;  %v1677_v34 = vld [vmem:[%s1999_s11 + $0x188] sm:$0xf0]  ;;  %v1616_v37 = vor.u32 %v1792_v31, %v1613_v32  ;;  %v1760_v38 = vld [vmem:[%s1999_s11 + $0x4] sm:$0xf] }
  0x6e   : > { %1024 = vmatpush.bf16.msrb.mxu0 %v1520_v55  ;;  %v1560_v36 = vor.u32 %v1778_v29, %v1557_v30  ;;  %v1680_v40 = vor.u32 %v1808_v33, %v1677_v34  ;;  %v1776_v41 = vld [vmem:[%s1999_s11 + $0x84] sm:$0xf]  ;;  %v1549_v42 = vld [vmem:[%s1999_s11 + $0x88] sm:$0xf0]  ;;  %v1451_v43 = vld [vmem:[%s2001_s12 + $0x40] sm:$0xf] }
  0x6f   : > { %1053 = vmatpush.bf16.msrb.mxu1 %v1584_v56  ;;  %v1754_v44 = vld [vmem:[%s2001_s12 + $0x4c] sm:$0xf0]  ;;  %v1453_v46 = vld [vmem:[%s2001_s12 + $0x50] sm:$0xf0]  ;;  %v1459_v47 = vld [vmem:[%s2001_s12 + $0x48] sm:$0xf]  ;;  %v1552_v52 = vor.u32 %v1776_v41, %v1549_v42 }
  0x70   : > { %1082 = vmatpush.bf16.msrb.mxu2 %v1648_v39  ;;  %v1485_v39 = vld [vmem:[%s1999_s11 + $0x8] sm:$0xf0]  ;;  %v1755_v48 = vld [vmem:[%s2001_s12 + $0x54] sm:$0xf0]  ;;  %v1461_v51 = vld [vmem:[%s2001_s12 + $0x58] sm:$0xf0]  ;;  %v1452_v53 = vor.u32 %v1754_v44, %v1451_v43 }
  0x71   : > { %1111 = vmatpush.bf16.msrb.mxu3 %v1712_v45  ;;  %918 = vmatmul.bf16.gmra.mxu0 %v2135_v61  ;;  %v1752_v45 = vld [vmem:[%s2001_s12 + $0x44] sm:$0xf]  ;;  %v1488_v49 = vor.u32 %v1760_v38, %v1485_v39  ;;  %v1753_v50 = vld [vmem:[%s2001_s12 + $0x4c] sm:$0xf]  ;;  %v1460_v55 = vor.u32 %v1755_v48, %v1459_v47  ;;  %v1758_v58 = vld [vmem:[%s2001_s12 + $0x6c] sm:$0xf0] }
  0x72   : > { %947 = vmatmul.bf16.gmra.mxu1 %v2140_v3  ;;  %1025 = vmatpush.bf16.msrb.mxu0 %v1512_v11  ;;  %v1456_v54 = vor.u32 %v1752_v45, %v1453_v46  ;;  %v1464_v56 = vor.u32 %v1753_v50, %v1461_v51  ;;  %v1756_v59 = vld [vmem:[%s2001_s12 + $0x64] sm:$0xf]  ;;  %v1469_v60 = vld [vmem:[%s2001_s12 + $0x70] sm:$0xf0]  ;;  %v1759_v63 = vld [vmem:[%s2001_s12 + $0x74] sm:$0xf0] }
  0x73   : > { %976 = vmatmul.bf16.gmra.mxu2 %v2142_v4  ;;  %1054 = vmatpush.bf16.msrb.mxu1 %v1576_v12  ;;  %v1757_v0 = vld [vmem:[%s2001_s12 + $0x6c] sm:$0xf]  ;;  %v1477_v2 = vld [vmem:[%s2001_s12 + $0x78] sm:$0xf0]  ;;  %v1472_v8 = vor.u32 %v1756_v59, %v1469_v60  ;;  %v413_v30 = vld [vmem:[#allocation2 + $0x50] sm:$0xff]  ;;  %p1737_p11 = scmp.ne.s32.totalorder %s1895_s17, 1 }
  0x74   : > { %1083 = vmatpush.bf16.msrb.mxu2 %v1640_v57  ;;  %1005 = vmatmul.bf16.gmra.mxu3 %v2146_v9  ;;  %v1467_v57 = vld [vmem:[%s2001_s12 + $0x60] sm:$0xf]  ;;  %v1480_v12 = vor.u32 %v1757_v0, %v1477_v2  ;;  %v411_v21 = vld [vmem:[#allocation2 + $0x58] sm:$0xff]  ;;  %v415_v39 = vld [vmem:[#allocation2 + $0x8] sm:$0xff] }
  0x75   : > { %1112 = vmatpush.bf16.msrb.mxu3 %v1704_v62  ;;  %v1475_v62 = vld [vmem:[%s2001_s12 + $0x68] sm:$0xf]  ;;  %v1468_v5 = vor.u32 %v1758_v58, %v1467_v57  ;;  %v417_v48 = vld [vmem:[#allocation2 + $0x40] sm:$0xff]  ;;  %v419_v57 = vld [vmem:[#allocation2 + $0x10] sm:$0xff] }
  0x76   : > { %1026 = vmatpush.bf16.msrb.mxu0 %v1504_v19  ;;  %v1476_v11 = vor.u32 %v1759_v63, %v1475_v62 }
  0x77   : > { %1055 = vmatpush.bf16.msrb.mxu1 %v1568_v23 }
  0x78   : > { %1084 = vmatpush.bf16.msrb.mxu2 %v1632_v13 }
  0x79   : > { %1113 = vmatpush.bf16.msrb.mxu3 %v1696_v16 }
  0x7a   : > { %1027 = vmatpush.bf16.msrb.mxu0 %v1496_v35 }
  0x7b   : > { %1056 = vmatpush.bf16.msrb.mxu1 %v1560_v36 }
  0x7c   : > { %1085 = vmatpush.bf16.msrb.mxu2 %v1624_v24 }
  0x7d   : > { %1114 = vmatpush.bf16.msrb.mxu3 %v1688_v28 }
  0x7e   : > { %1028 = vmatpush.bf16.msrb.mxu0 %v1488_v49 }
  0x7f   : > { %1057 = vmatpush.bf16.msrb.mxu1 %v1552_v52 }
  0x80   : > { %1086 = vmatpush.bf16.msrb.mxu2 %v1616_v37 }
  0x81   : > { %1115 = vmatpush.bf16.msrb.mxu3 %v1680_v40  ;;  %923 = vmatmul.bf16.gmra.mxu0 %v1452_v53 }
  0x82   : > { %952 = vmatmul.bf16.gmra.mxu1 %v1456_v54 }
  0x83   : > { %981 = vmatmul.bf16.gmra.mxu2 %v1460_v55 }
  0x84   : > { %1010 = vmatmul.bf16.gmra.mxu3 %v1464_v56 }
  0x91   : > { %928 = vmatmul.bf16.gmra.mxu0 %v1468_v5 }
  0x92   : > { %957 = vmatmul.bf16.gmra.mxu1 %v1472_v8 }
  0x93   : > { %986 = vmatmul.bf16.gmra.mxu2 %v1476_v11 }
  0x94   : > { %1015 = vmatmul.bf16.gmra.mxu3 %v1480_v12 }
  0xa1   : > { %1029 = vmatmul.bf16.vlgmr.msrb.gmra.mxu0 %v2083_v1 }
  0xa2   : > { %1058 = vmatmul.bf16.vlgmr.msrb.gmra.mxu1 %v2088_v6 }
  0xa3   : > { %1087 = vmatmul.bf16.vlgmr.msrb.gmra.mxu2 %v2090_v7 }
  0xa4   : > { %1116 = vmatmul.bf16.vlgmr.msrb.gmra.mxu3 %v2094_v10 }
  0xb1   : > { %1034 = vmatmul.bf16.gmra.mxu0 %v2135_v61 }
  0xb2   : > { %1063 = vmatmul.bf16.gmra.mxu1 %v2140_v3  ;;  %v409_v3 = vld [vmem:[#allocation2 + $0x30] sm:$0xff] }
  0xb3   : > { %1092 = vmatmul.bf16.gmra.mxu2 %v2142_v4 }
  0xb4   : > { %1121 = vmatmul.bf16.gmra.mxu3 %v2146_v9 }
  0xc1   : > { %1039 = vmatmul.bf16.gmra.mxu0 %v1452_v53 }
  0xc2   : > { %1068 = vmatmul.bf16.gmra.mxu1 %v1456_v54 }
  0xc3   : > { %1097 = vmatmul.bf16.gmra.mxu2 %v1460_v55 }
  0xc4   : > { %1126 = vmatmul.bf16.gmra.mxu3 %v1464_v56 }
  0xd1   : > { %1044 = vmatmul.bf16.gmra.mxu0 %v1468_v5 }
  0xd2   : > { %1073 = vmatmul.bf16.gmra.mxu1 %v1472_v8  ;;  %v421_v8 = vld [vmem:[#allocation2 + $0x60] sm:$0xff] }
  0xd3   : > { %1102 = vmatmul.bf16.gmra.mxu2 %v1476_v11 }
  0xd4   : > { %1131 = vmatmul.bf16.gmra.mxu3 %v1480_v12 }
  0xde   : > { %v914_v1 = vpop.f32.mrf.mxu0 }
  0xdf   : > { %v943_v6 = vpop.f32.mrf.mxu1 }
  0xe0   : > { %v944_v7 = vadd.f32 %v943_v6, %v914_v1 }
  0xe6   : > { %v972_v10 = vpop.f32.mrf.mxu2  ;;  %v916_v14 = vpop.f32.mrf.mxu0 }
  0xe7   : > { %v973_v13 = vadd.f32 %v972_v10, %v944_v7  ;;  %v1001_v61 = vpop.f32.mrf.mxu3  ;;  %v945_v15 = vpop.f32.mrf.mxu1 }
  0xe8   : > { %v946_v9 = vadd.f32 %v945_v15, %v916_v14  ;;  %v423_v14 = vld [vmem:[#allocation2 + $0x78] sm:$0xff] }
  0xe9   : > { %v1002_v4 = vadd.f32 %v1001_v61, %v973_v13 }
  0xeb   : > { %v1137_v16 = vadd.f32 %v1002_v4, %v409_v3 }
  0xed   : > { %1153 = vst [vmem:[#allocation2 + $0x30] sm:$0xff] %v1137_v16 }
  0xee   : > { %v974_v17 = vpop.f32.mrf.mxu2  ;;  %v919_v20 = vpop.f32.mrf.mxu0 }
  0xef   : > { %v975_v18 = vadd.f32 %v974_v17, %v946_v9  ;;  %v1003_v19 = vpop.f32.mrf.mxu3  ;;  %v948_v22 = vpop.f32.mrf.mxu1 }
  0xf0   : > { %v949_v25 = vadd.f32 %v948_v22, %v919_v20  ;;  %v410_v20 = vld [vmem:[#allocation2] sm:$0xff] }
  0xf1   : > { %v1004_v23 = vadd.f32 %v1003_v19, %v975_v18 }
  0xf3   : > { %v1139_v24 = vadd.f32 %v1004_v23, %v411_v21 }
  0xf5   : > { %1155 = vst [vmem:[#allocation2 + $0x58] sm:$0xff] %v1139_v24 }
  0xf6   : > { %v977_v26 = vpop.f32.mrf.mxu2  ;;  %v921_v29 = vpop.f32.mrf.mxu0 }
  0xf7   : > { %v978_v27 = vadd.f32 %v977_v26, %v949_v25  ;;  %v1006_v28 = vpop.f32.mrf.mxu3  ;;  %v950_v31 = vpop.f32.mrf.mxu1 }
  0xf8   : > { %v951_v34 = vadd.f32 %v950_v31, %v921_v29  ;;  %v412_v29 = vld [vmem:[#allocation2 + $0x18] sm:$0xff] }
  0xf9   : > { %v1007_v32 = vadd.f32 %v1006_v28, %v978_v27 }
  0xfb   : > { %v1141_v33 = vadd.f32 %v1007_v32, %v413_v30 }
  0xfd   : > { %1157 = vst [vmem:[#allocation2 + $0x50] sm:$0xff] %v1141_v33 }
  0xfe   : > { %v979_v35 = vpop.f32.mrf.mxu2  ;;  %v924_v38 = vpop.f32.mrf.mxu0 }
  0xff   : > { %v980_v36 = vadd.f32 %v979_v35, %v951_v34  ;;  %v1008_v37 = vpop.f32.mrf.mxu3  ;;  %v953_v40 = vpop.f32.mrf.mxu1 }
 0x100   : > { %v954_v43 = vadd.f32 %v953_v40, %v924_v38  ;;  %v414_v38 = vld [vmem:[#allocation2 + $0x68] sm:$0xff] }
 0x101   : > { %v1009_v41 = vadd.f32 %v1008_v37, %v980_v36 }
 0x103   : > { %v1143_v42 = vadd.f32 %v1009_v41, %v415_v39 }
 0x105   : > { %1159 = vst [vmem:[#allocation2 + $0x8] sm:$0xff] %v1143_v42 }
 0x106   : > { %v982_v44 = vpop.f32.mrf.mxu2  ;;  %v926_v47 = vpop.f32.mrf.mxu0 }
 0x107   : > { %v983_v45 = vadd.f32 %v982_v44, %v954_v43  ;;  %v1011_v46 = vpop.f32.mrf.mxu3  ;;  %v955_v49 = vpop.f32.mrf.mxu1 }
 0x108   : > { %v956_v52 = vadd.f32 %v955_v49, %v926_v47  ;;  %v416_v47 = vld [vmem:[#allocation2 + $0x48] sm:$0xff] }
 0x109   : > { %v1012_v50 = vadd.f32 %v1011_v46, %v983_v45 }
 0x10b   : > { %v1145_v51 = vadd.f32 %v1012_v50, %v417_v48 }
 0x10d   : > { %1161 = vst [vmem:[#allocation2 + $0x40] sm:$0xff] %v1145_v51 }
 0x10e   : > { %v984_v53 = vpop.f32.mrf.mxu2  ;;  %v929_v56 = vpop.f32.mrf.mxu0 }
 0x10f   : > { %v985_v54 = vadd.f32 %v984_v53, %v956_v52  ;;  %v1013_v55 = vpop.f32.mrf.mxu3  ;;  %v958_v58 = vpop.f32.mrf.mxu1 }
 0x110   : > { %v959_v62 = vadd.f32 %v958_v58, %v929_v56  ;;  %v418_v56 = vld [vmem:[#allocation2 + $0x20] sm:$0xff] }
 0x111   : > { %v1014_v59 = vadd.f32 %v1013_v55, %v985_v54 }
 0x113   : > { %v1147_v60 = vadd.f32 %v1014_v59, %v419_v57 }
 0x115   : > { %1163 = vst [vmem:[#allocation2 + $0x10] sm:$0xff] %v1147_v60 }
 0x116   : > { %v987_v63 = vpop.f32.mrf.mxu2  ;;  %v931_v5 = vpop.f32.mrf.mxu0 }
 0x117   : > { %v988_v0 = vadd.f32 %v987_v63, %v959_v62  ;;  %v1016_v2 = vpop.f32.mrf.mxu3  ;;  %v960_v11 = vpop.f32.mrf.mxu1 }
 0x118   : > { %v961_v6 = vadd.f32 %v960_v11, %v931_v5 }
 0x119   : > { %v1017_v12 = vadd.f32 %v1016_v2, %v988_v0  ;;  %v420_v2 = vld [vmem:[#allocation2 + $0x38] sm:$0xff] }
 0x11b   : > { %v1149_v1 = vadd.f32 %v1017_v12, %v421_v8 }
 0x11d   : > { %1165 = vst [vmem:[#allocation2 + $0x60] sm:$0xff] %v1149_v1 }
 0x11e   : > { %v989_v7 = vpop.f32.mrf.mxu2  ;;  %v1030_v61 = vpop.f32.mrf.mxu0 }
 0x11f   : > { %v990_v10 = vadd.f32 %v989_v7, %v961_v6  ;;  %v1018_v13 = vpop.f32.mrf.mxu3  ;;  %v1059_v3 = vpop.f32.mrf.mxu1 }
 0x120   : > { %v1060_v16 = vadd.f32 %v1059_v3, %v1030_v61 }
 0x121   : > { %v1019_v15 = vadd.f32 %v1018_v13, %v990_v10  ;;  %v422_v13 = vld [vmem:[#allocation2 + $0x70] sm:$0xff] }
 0x123   : > { %v1151_v4 = vadd.f32 %v1019_v15, %v423_v14 }
 0x125   : > { %1167 = vst [vmem:[#allocation2 + $0x78] sm:$0xff] %v1151_v4 }
 0x126   : > { %v1088_v9 = vpop.f32.mrf.mxu2  ;;  %v1032_v19 = vpop.f32.mrf.mxu0 }
 0x127   : > { %v1089_v17 = vadd.f32 %v1088_v9, %v1060_v16  ;;  %v1117_v18 = vpop.f32.mrf.mxu3  ;;  %v1061_v21 = vpop.f32.mrf.mxu1 }
 0x128   : > { %v1062_v24 = vadd.f32 %v1061_v21, %v1032_v19 }
 0x129   : > { %v1118_v22 = vadd.f32 %v1117_v18, %v1089_v17  ;;  %v424_v17 = vld [vmem:[#allocation2 + $0x28] sm:$0xff] }
 0x12b   : > { %v1138_v23 = vadd.f32 %v1118_v22, %v410_v20 }
 0x12d   : > { %1154 = vst [vmem:[#allocation2] sm:$0xff] %v1138_v23 }
 0x12e   : > { %v1090_v25 = vpop.f32.mrf.mxu2  ;;  %v1035_v28 = vpop.f32.mrf.mxu0 }
 0x12f   : > { %v1091_v26 = vadd.f32 %v1090_v25, %v1062_v24  ;;  %v1119_v27 = vpop.f32.mrf.mxu3  ;;  %v1064_v30 = vpop.f32.mrf.mxu1 }
 0x130   : > { %v1065_v33 = vadd.f32 %v1064_v30, %v1035_v28 }
 0x131   : > { %v1120_v31 = vadd.f32 %v1119_v27, %v1091_v26 }
 0x133   : > { %v1140_v32 = vadd.f32 %v1120_v31, %v412_v29 }
 0x135   : > { %1156 = vst [vmem:[#allocation2 + $0x18] sm:$0xff] %v1140_v32 }
 0x136   : > { %v1093_v34 = vpop.f32.mrf.mxu2  ;;  %v1037_v37 = vpop.f32.mrf.mxu0 }
 0x137   : > { %v1094_v35 = vadd.f32 %v1093_v34, %v1065_v33  ;;  %v1122_v36 = vpop.f32.mrf.mxu3  ;;  %v1066_v39 = vpop.f32.mrf.mxu1 }
 0x138   : > { %v1067_v42 = vadd.f32 %v1066_v39, %v1037_v37 }
 0x139   : > { %v1123_v40 = vadd.f32 %v1122_v36, %v1094_v35 }
 0x13b   : > { %v1142_v41 = vadd.f32 %v1123_v40, %v414_v38 }
 0x13d   : > { %1158 = vst [vmem:[#allocation2 + $0x68] sm:$0xff] %v1142_v41 }
 0x13e   : > { %v1095_v43 = vpop.f32.mrf.mxu2  ;;  %v1040_v46 = vpop.f32.mrf.mxu0 }
 0x13f   : > { %v1096_v44 = vadd.f32 %v1095_v43, %v1067_v42  ;;  %v1124_v45 = vpop.f32.mrf.mxu3  ;;  %v1069_v48 = vpop.f32.mrf.mxu1 }
 0x140   : > { %v1070_v51 = vadd.f32 %v1069_v48, %v1040_v46 }
 0x141   : > { %v1125_v49 = vadd.f32 %v1124_v45, %v1096_v44 }
 0x143   : > { %v1144_v50 = vadd.f32 %v1125_v49, %v416_v47 }
 0x145   : > { %1160 = vst [vmem:[#allocation2 + $0x48] sm:$0xff] %v1144_v50 }
 0x146   : > { %v1098_v52 = vpop.f32.mrf.mxu2  ;;  %v1042_v55 = vpop.f32.mrf.mxu0 }
 0x147   : > { %v1099_v53 = vadd.f32 %v1098_v52, %v1070_v51  ;;  %v1127_v54 = vpop.f32.mrf.mxu3  ;;  %v1071_v57 = vpop.f32.mrf.mxu1 }
 0x148   : > { %v1072_v60 = vadd.f32 %v1071_v57, %v1042_v55 }
 0x149   : > { %v1128_v58 = vadd.f32 %v1127_v54, %v1099_v53 }
 0x14b   : > { %v1146_v59 = vadd.f32 %v1128_v58, %v418_v56 }
 0x14d   : > { %1162 = vst [vmem:[#allocation2 + $0x20] sm:$0xff] %v1146_v59 }
 0x14e   : > { %v1100_v62 = vpop.f32.mrf.mxu2  ;;  %v1045_v5 = vpop.f32.mrf.mxu0 }
 0x14f   : > { %v1101_v63 = vadd.f32 %v1100_v62, %v1072_v60  ;;  %v1129_v0 = vpop.f32.mrf.mxu3  ;;  %v1074_v8 = vpop.f32.mrf.mxu1 }
 0x150   : > { %v1075_v1 = vadd.f32 %v1074_v8, %v1045_v5 }
 0x151   : > { %v1130_v11 = vadd.f32 %v1129_v0, %v1101_v63 }
 0x153   : > { %v1148_v12 = vadd.f32 %v1130_v11, %v420_v2 }
 0x155   : > { %1164 = vst [vmem:[#allocation2 + $0x38] sm:$0xff] %v1148_v12 }
 0x156   : > { %v1103_v6 = vpop.f32.mrf.mxu2  ;;  %v1047_v14 = vpop.f32.mrf.mxu0 }
 0x157   : > { %v1104_v7 = vadd.f32 %v1103_v6, %v1075_v1  ;;  %v1132_v10 = vpop.f32.mrf.mxu3  ;;  %v1076_v3 = vpop.f32.mrf.mxu1 }
 0x158   : > { %v1077_v4 = vadd.f32 %v1076_v3, %v1047_v14 }
 0x159   : > { %v1133_v61 = vadd.f32 %v1132_v10, %v1104_v7 }
 0x15b   : > { %v1150_v15 = vadd.f32 %v1133_v61, %v422_v13 }
 0x15d   : > { %1166 = vst [vmem:[#allocation2 + $0x70] sm:$0xff] %v1150_v15 }
 0x15e   : > { %v1105_v16 = vpop.f32.mrf.mxu2 }
 0x15f   : > { %v1106_v9 = vadd.f32 %v1105_v16, %v1077_v4  ;;  %v1134_v18 = vpop.f32.mrf.mxu3 }
 0x161   : > { %v1135_v19 = vadd.f32 %v1134_v18, %v1106_v9  ;;  %1172 = sbr.rel (%p1737_p11) target bundleno = 381 (0x17d), region = 67 }
 0x163   : > { %v1152_v20 = vadd.f32 %v1135_v19, %v424_v17 }
 0x165   : > { %1168 = vst [vmem:[#allocation2 + $0x28] sm:$0xff] %v1152_v20 }
 0x166   : > { %v1173_v21 = vld [vmem:[#allocation2 + $0x30] sm:$0xff]  ;;  %v1189_v22 = vld [vmem:[%s2333_s2] sm:$0x3]  ;;  %v1175_v27 = vld [vmem:[#allocation2 + $0x58] sm:$0xff] }
 0x167   : > { %v2200_v23 = vperm.slane %v1189_v22, 0  ;;  %v1211_v24 = vld [vmem:[%s2334_s3] sm:$0xff]  ;;  %v2205_v26 = vperm.slane %v1189_v22, 1  ;;  %v1212_v28 = vld [vmem:[%s2334_s3 + $0x8] sm:$0xff]  ;;  %v1213_v29 = vld [vmem:[%s2334_s3 + $0x10] sm:$0xff] }
 0x168   : > { %v1174_v25 = vld [vmem:[#allocation2] sm:$0xff]  ;;  %v1176_v30 = vld [vmem:[#allocation2 + $0x18] sm:$0xff]  ;;  %v1177_v36 = vld [vmem:[#allocation2 + $0x50] sm:$0xff] }
 0x169   : > { %v1195_v31 = vadd.f32 %v2200_v23, %v1173_v21  ;;  %v1196_v32 = vadd.f32 %v2205_v26, %v1174_v25  ;;  %v1197_v33 = vadd.f32 %v2200_v23, %v1175_v27  ;;  %v1198_v34 = vadd.f32 %v2205_v26, %v1176_v30  ;;  %v1214_v35 = vld [vmem:[%s2334_s3 + $0x18] sm:$0xff]  ;;  %v1178_v37 = vld [vmem:[#allocation2 + $0x68] sm:$0xff]  ;;  %v1215_v39 = vld [vmem:[%s2334_s3 + $0x20] sm:$0xff] }
 0x16a   : > { %v1199_v38 = vadd.f32 %v2200_v23, %v1177_v36  ;;  %v1200_v40 = vadd.f32 %v2205_v26, %v1178_v37  ;;  %v1179_v41 = vld [vmem:[#allocation2 + $0x8] sm:$0xff]  ;;  %v1181_v47 = vld [vmem:[#allocation2 + $0x40] sm:$0xff]  ;;  %v1217_v50 = vld [vmem:[%s2334_s3 + $0x30] sm:$0xff] }
 0x16b   : > { %v1227_v42 = vadd.f32 %v1211_v24, %v1195_v31  ;;  %v1228_v43 = vadd.f32 %v1212_v28, %v1196_v32  ;;  %v1229_v44 = vadd.f32 %v1213_v29, %v1197_v33  ;;  %v1216_v45 = vld [vmem:[%s2334_s3 + $0x28] sm:$0xff]  ;;  %v1230_v48 = vadd.f32 %v1214_v35, %v1198_v34  ;;  %v1182_v52 = vld [vmem:[#allocation2 + $0x20] sm:$0xff]  ;;  %v1218_v54 = vld [vmem:[%s2334_s3 + $0x38] sm:$0xff] }
 0x16c   : > { %v1180_v46 = vld [vmem:[#allocation2 + $0x48] sm:$0xff]  ;;  %v1201_v49 = vadd.f32 %v2200_v23, %v1179_v41  ;;  %v1231_v53 = vadd.f32 %v1215_v39, %v1199_v38  ;;  %v1203_v55 = vadd.f32 %v2200_v23, %v1181_v47  ;;  %v1183_v56 = vld [vmem:[#allocation2 + $0x10] sm:$0xff]  ;;  %v1184_v57 = vld [vmem:[#allocation2 + $0x38] sm:$0xff]  ;;  %v1232_v58 = vadd.f32 %v1216_v45, %v1200_v40 }
 0x16d   : > { %v1202_v51 = vadd.f32 %v2205_v26, %v1180_v46  ;;  %1243 = vst [vmem:[%s2335_s4] sm:$0xff] %v1227_v42  ;;  %v1219_v59 = vld [vmem:[%s2334_s3 + $0x40] sm:$0xff]  ;;  %v1204_v60 = vadd.f32 %v2205_v26, %v1182_v52  ;;  %v1220_v0 = vld [vmem:[%s2334_s3 + $0x48] sm:$0xff]  ;;  %v1205_v2 = vadd.f32 %v2200_v23, %v1183_v56  ;;  %v1186_v5 = vld [vmem:[#allocation2 + $0x70] sm:$0xff]  ;;  %v1206_v12 = vadd.f32 %v2205_v26, %v1184_v57 }
 0x16e   : > { %1244 = vst [vmem:[%s2335_s4 + $0x8] sm:$0xff] %v1228_v43  ;;  %v1185_v62 = vld [vmem:[#allocation2 + $0x60] sm:$0xff]  ;;  %v1233_v63 = vadd.f32 %v1217_v50, %v1201_v49  ;;  %v1221_v11 = vld [vmem:[%s2334_s3 + $0x50] sm:$0xff]  ;;  %v1187_v1 = vld [vmem:[#allocation2 + $0x78] sm:$0xff]  ;;  %v1235_v6 = vadd.f32 %v1219_v59, %v1203_v55  ;;  %v1208_v3 = vadd.f32 %v2205_v26, %v1186_v5 }
 0x16f   : > { %1245 = vst [vmem:[%s2335_s4 + $0x10] sm:$0xff] %v1229_v44  ;;  %v1234_v8 = vadd.f32 %v1218_v54, %v1202_v51  ;;  %v1222_v7 = vld [vmem:[%s2334_s3 + $0x58] sm:$0xff]  ;;  %v1207_v10 = vadd.f32 %v2200_v23, %v1185_v62  ;;  %v1188_v13 = vld [vmem:[#allocation2 + $0x28] sm:$0xff]  ;;  %v1236_v61 = vadd.f32 %v1220_v0, %v1204_v60  ;;  %v1223_v14 = vld [vmem:[%s2334_s3 + $0x60] sm:$0xff]  ;;  %v1237_v15 = vadd.f32 %v1221_v11, %v1205_v2 }
 0x170   : > { %1246 = vst [vmem:[%s2335_s4 + $0x18] sm:$0xff] %v1230_v48  ;;  %v1224_v4 = vld [vmem:[%s2334_s3 + $0x68] sm:$0xff]  ;;  %v1209_v16 = vadd.f32 %v2200_v23, %v1187_v1  ;;  %v1238_v9 = vadd.f32 %v1222_v7, %v1206_v12  ;;  %v1225_v17 = vld [vmem:[%s2334_s3 + $0x70] sm:$0xff]  ;;  %v1210_v18 = vadd.f32 %v2205_v26, %v1188_v13  ;;  %v1226_v20 = vld [vmem:[%s2334_s3 + $0x78] sm:$0xff] }
 0x171   : > { %1247 = vst [vmem:[%s2335_s4 + $0x20] sm:$0xff] %v1231_v53  ;;  %v1239_v19 = vadd.f32 %v1223_v14, %v1207_v10  ;;  %v1240_v21 = vadd.f32 %v1224_v4, %v1208_v3 }
 0x172   : > { %1248 = vst [vmem:[%s2335_s4 + $0x28] sm:$0xff] %v1232_v58  ;;  %v1241_v22 = vadd.f32 %v1225_v17, %v1209_v16  ;;  %v1242_v23 = vadd.f32 %v1226_v20, %v1210_v18 }
 0x173   : > { %1249 = vst [vmem:[%s2335_s4 + $0x30] sm:$0xff] %v1233_v63 }
 0x174   : > { %1250 = vst [vmem:[%s2335_s4 + $0x38] sm:$0xff] %v1234_v8 }
 0x175   : > { %1251 = vst [vmem:[%s2335_s4 + $0x40] sm:$0xff] %v1235_v6 }
 0x176   : > { %1252 = vst [vmem:[%s2335_s4 + $0x48] sm:$0xff] %v1236_v61 }
 0x177   : > { %1253 = vst [vmem:[%s2335_s4 + $0x50] sm:$0xff] %v1237_v15 }
 0x178   : > { %1254 = vst [vmem:[%s2335_s4 + $0x58] sm:$0xff] %v1238_v9 }
 0x179   : > { %1255 = vst [vmem:[%s2335_s4 + $0x60] sm:$0xff] %v1239_v19 }
 0x17a   : > { %1256 = vst [vmem:[%s2335_s4 + $0x68] sm:$0xff] %v1240_v21 }
 0x17b   : > { %1257 = vst [vmem:[%s2335_s4 + $0x70] sm:$0xff] %v1241_v22 }
 0x17c   : > { %1258 = vst [vmem:[%s2335_s4 + $0x78] sm:$0xff] %v1242_v23 }
 0x17d PF: > { %s14_s19 = sadd.s32 1, %s1903_s19   ;;  %s2336_s15 = smov %s1891_s16 }
 0x17e   : > { %p11_p12 = scmp.ge.s32.totalorder %s14_s19, 4   ;;  %s2337_s16 = smov %s1966_s23 }
 0x17f   : > { %s2338_s17 = smov %s1899_s18  ;;  %s2339_s18 = smov %s2341_s20 }
 0x180   :  { %13 = sbr.rel (!%p11_p12) target bundleno = 3 (0x3), region = 111 }

</bundles_post_ra>
